<compile_context>
chip_gen: v6e
topology: v6e:2x2x1
jax: 0.10.0
libtpu: 0.0.40
codegen_flags: <defaults>
</compile_context>

<pallas_src>
import math

import jax
import jax.numpy as jnp
from jax import lax
from jax.experimental import pallas as pl
from jax.experimental.pallas import tpu as pltpu


EMBED_DIM = 128                      # fixed by the module (nn.Embedding(embed_size, 128))


def _vmem_limit_bytes():
    # Per-chip limit (~75% of physical VMEM): ~96 MiB on v5e/v6e, ~48 MiB on v7x.
    try:
        cap = int(getattr(pltpu.get_tpu_info(), "vmem_capacity_bytes", 0))
        if cap >= (64 << 20):
            return int(0.75 * cap)
    except Exception:
        pass
    return 48 * 1024 * 1024


VMEM_LIMIT = _vmem_limit_bytes()


# --------------------------------------------------------------------------
# Fused bidirectional LSTM layer kernel (both directions in one call).
#   x_ref   : (T, B, Din)   bf16, time-major
#   wih_ref : (2, Din, 4H)  bf16   (dir 0 = fwd, dir 1 = bwd)
#   whh_ref : (2H, 4H)      bf16   ([W_hh_f ; W_hh_b] stacked along rows)
#   b_ref   : (2, 1,  4H)   f32    (b_ih + b_hh, pre-combined)
#   out_ref : (T, B, 2H)    bf16   ([.., :H] = fwd, [.., H:] = bwd, PyTorch order)
# Gate order matches PyTorch: i, f, g, o.
# --------------------------------------------------------------------------
def _bilstm_layer_kernel(x_ref, wih_ref, whh_ref, b_ref, out_ref, xg_f, xg_b):
    T, B, _ = x_ref.shape
    H = out_ref.shape[2] // 2
    cd = (((2,), (0,)), ((), ()))          # contract last dim of x with dim 0 of W

    # --- hoisted input projections (one big MXU matmul per direction) ------
    # Stored bf16 (halves the dominant VMEM consumer at scale); bias folded in.
    x = x_ref[...]
    xg_f[...] = (lax.dot_general(x, wih_ref[0], cd, preferred_element_type=jnp.float32)
                 + b_ref[0]).astype(xg_f.dtype)
    xg_b[...] = (lax.dot_general(x, wih_ref[1], cd, preferred_element_type=jnp.float32)
                 + b_ref[1]).astype(xg_b.dtype)

    # --- loop invariants, hoisted so they stay vreg-resident ---------------
    whh = whh_ref[...]                                          # (2H, 4H) bf16
    lane = lax.broadcasted_iota(jnp.int32, (1, 4 * H), 1)
    is_g = (lane >= 2 * H) & (lane < 3 * H)
    g_scale = jnp.where(is_g, 1.0, 0.5)       # sigmoid(x) = 0.5*tanh(0.5x)+0.5
    g_shift = jnp.where(is_g, 0.0, 0.5)
    rows = lax.broadcasted_iota(jnp.int32, (2 * B, H), 0)
    is_fwd_row = rows < B

    def step(t, carry):
        h, c = carry                       # (2B, H) f32; rows 0:B fwd, B:2B bwd
        rt = T - 1 - t

        # One fused recurrent matmul for both directions (block-masked lhs):
        #   hp rows 0:B = [h_f | 0], rows B:2B = [0 | h_b]
        hp = jnp.concatenate([jnp.where(is_fwd_row, h, 0.0),
                              jnp.where(is_fwd_row, 0.0, h)], axis=1)   # (2B, 2H)
        hh = jnp.dot(hp.astype(whh.dtype), whh,
                     preferred_element_type=jnp.float32)                # (2B, 4H)

        # Hoisted input gates: fwd at time t, bwd at time T-1-t (off the
        # h/c dependency chain, so the scheduler prefetches them freely).
        xg = jnp.concatenate([xg_f[t], xg_b[rt]], axis=0)               # (2B, 4H)
        g = hh + xg.astype(jnp.float32)

        # All gate nonlinearities with ONE full-width tanh + per-lane affine.
        a = g_scale * jnp.tanh(g_scale * g) + g_shift                   # (2B, 4H)
        i = a[:, 0 * H:1 * H]
        f = a[:, 1 * H:2 * H]
        gg = a[:, 2 * H:3 * H]
        o = a[:, 3 * H:4 * H]

        c_new = f * c + i * gg
        h_new = o * jnp.tanh(c_new)

        # TODO(synk): on v5e, batch these masked 64-lane stores into one
        # lane-dense store after the loop (per-direction (T,B,H) scratch).
        out_ref[t, :, 0:H] = h_new[0:B].astype(out_ref.dtype)
        out_ref[rt, :, H:2 * H] = h_new[B:2 * B].astype(out_ref.dtype)
        return h_new, c_new

    h0 = jnp.zeros((2 * B, H), jnp.float32)
    c0 = jnp.zeros((2 * B, H), jnp.float32)
    # Full unroll: state stays in vregs, fwd/bwd chains interleave.
    # TODO(synk): for large T use unroll=2..4 to bound code size / live ranges.
    lax.fori_loop(0, T, step, (h0, c0), unroll=True)


def bilstm_layer(x_tbd, wih, whh, b):
    """One fused bidirectional LSTM layer. x_tbd: (T,B,Din) bf16 -> (T,B,2H) bf16."""
    T, B, _ = x_tbd.shape
    H = whh.shape[1] // 4
    # TODO(synk): at production B, give this a batch grid (parallel) so v7x's
    # two TensorCores split the batch and the DMA pipelines; at B=2 the grid
    # would be a single block, so the kernel keeps whole-array VMEM residency.
    return pl.pallas_call(
        _bilstm_layer_kernel,
        out_shape=jax.ShapeDtypeStruct((T, B, 2 * H), jnp.bfloat16),
        in_specs=[pl.BlockSpec(memory_space=pltpu.MemorySpace.VMEM)] * 4,
        out_specs=pl.BlockSpec(memory_space=pltpu.MemorySpace.VMEM),
        scratch_shapes=[
            pltpu.VMEM((T, B, 4 * H), jnp.bfloat16),   # hoisted gates, fwd
            pltpu.VMEM((T, B, 4 * H), jnp.bfloat16),   # hoisted gates, bwd
        ],
        compiler_params=pltpu.CompilerParams(vmem_limit_bytes=VMEM_LIMIT),
    )(x_tbd, wih, whh, b)


def bilstm(x_tbd, layer_params):
    """Stacked bidirectional LSTM (eval-mode PyTorch semantics)."""
    # TODO(synk): at scale, fuse both layers of the stack into one pallas_call
    # (layer-1 consumes layer-0 output from VMEM), gated on the v7x VMEM budget.
    out = x_tbd
    for lp in layer_params:
        out = bilstm_layer(out, lp["wih"], lp["whh"], lp["b"])
    return out


# --------------------------------------------------------------------------
# Conv1d (kernel_size=5, stride=1, padding=2) on (T*B, Cin)-flattened rows:
# a shift of k time steps is a shift of k*B rows, so every tap is a static
# row-slice and every matmul has full sublane / MXU-row occupancy.
# Only the halo rows of the padded scratch are zeroed.
# --------------------------------------------------------------------------
def conv1d_same(x_flat, w_kio, b_1o, batch):
    M, Cin = x_flat.shape                 # M = T * B
    K, _, Cout = w_kio.shape
    pad = (K - 1) // 2
    halo = pad * batch

    def kernel(x_ref, w_ref, b_ref, out_ref, xp_sc):
        # xp_sc: (M + 2*halo, Cin) bf16
        xp_sc[0:halo] = jnp.zeros((halo, Cin), xp_sc.dtype)
        xp_sc[halo + M:halo + M + halo] = jnp.zeros((halo, Cin), xp_sc.dtype)
        xp_sc[halo:halo + M] = x_ref[...]

        acc = jnp.zeros((M, Cout), jnp.float32)
        for k in range(K):                # static unrolled, K = 5
            acc = acc + jnp.dot(xp_sc[k * batch:k * batch + M], w_ref[k],
                                preferred_element_type=jnp.float32)
        out_ref[...] = (acc + b_ref[...]).astype(out_ref.dtype)

    # TODO(synk): Conv1d could be folded algebraically into lstm2 layer 0's
    # input projection (no nonlinearity in between); kept separate for clarity.
    return pl.pallas_call(
        kernel,
        out_shape=jax.ShapeDtypeStruct((M, Cout), jnp.bfloat16),
        in_specs=[pl.BlockSpec(memory_space=pltpu.MemorySpace.VMEM)] * 3,
        out_specs=pl.BlockSpec(memory_space=pltpu.MemorySpace.VMEM),
        scratch_shapes=[pltpu.VMEM((M + 2 * halo, Cin), x_flat.dtype)],
        compiler_params=pltpu.CompilerParams(vmem_limit_bytes=VMEM_LIMIT),
    )(x_flat, w_kio, b_1o)


# --------------------------------------------------------------------------
# Fused concat + final Linear on flattened rows:  y = x1 @ W1 + x2 @ W2 + b
# (no (T,B,4H) concat materialized in HBM; full sublane occupancy).
# Row-tiled grid marked "parallel" so megacore can shard it.
# --------------------------------------------------------------------------
def _concat_linear_kernel(x1_ref, x2_ref, w1_ref, w2_ref, b_ref, out_ref):
    out_ref[...] = (
        jnp.dot(x1_ref[...], w1_ref[...], preferred_element_type=jnp.float32)
        + jnp.dot(x2_ref[...], w2_ref[...], preferred_element_type=jnp.float32)
        + b_ref[...])


def _row_tile(M):
    for cand in (1024, 512, 256, 128, 64, 32, 16, 8):
        if M % cand == 0:
            return cand
    return M


def fused_concat_linear(x1_flat, x2_flat, w1, w2, b):
    M, F = x1_flat.shape
    C = w1.shape[1]
    tm = _row_tile(M)
    return pl.pallas_call(
        _concat_linear_kernel,
        out_shape=jax.ShapeDtypeStruct((M, C), jnp.float32),
        grid=(M // tm,),
        in_specs=[
            pl.BlockSpec((tm, F), lambda i: (i, 0)),
            pl.BlockSpec((tm, F), lambda i: (i, 0)),
            pl.BlockSpec((F, C), lambda i: (0, 0)),
            pl.BlockSpec((F, C), lambda i: (0, 0)),
            pl.BlockSpec((1, C), lambda i: (0, 0)),
        ],
        out_specs=pl.BlockSpec((tm, C), lambda i: (i, 0)),
        compiler_params=pltpu.CompilerParams(
            dimension_semantics=("parallel",),
            vmem_limit_bytes=VMEM_LIMIT),
    )(x1_flat, x2_flat, w1, w2, b)


# --------------------------------------------------------------------------
# Parameter init: PyTorch-like shapes/ranges, but stored kernel-ready:
# pre-transposed, biases pre-combined, W_hh of both directions pre-stacked,
# matmul operands cast to bf16.
# --------------------------------------------------------------------------
def init_params(key, embed_size, class_num, layer_n, hidden_dim):
    keys = iter(jax.random.split(key, 128))

    def unif(shape, bound):
        return jax.random.uniform(next(keys), shape, jnp.float32, -bound, bound)

    params = {}
    params["embedding"] = jax.random.normal(
        next(keys), (embed_size, EMBED_DIM), jnp.float32).astype(jnp.bfloat16)

    def lstm_stack():
        k = 1.0 / math.sqrt(hidden_dim)
        layers = []
        for layer in range(layer_n):
            din = EMBED_DIM if layer == 0 else 2 * hidden_dim
            wih, whh, bias = [], [], []
            for _ in range(2):  # fwd, bwd
                w_ih = unif((4 * hidden_dim, din), k)
                w_hh = unif((4 * hidden_dim, hidden_dim), k)
                b_ih = unif((4 * hidden_dim,), k)
                b_hh = unif((4 * hidden_dim,), k)
                wih.append(jnp.transpose(w_ih).astype(jnp.bfloat16))   # (Din, 4H)
                whh.append(jnp.transpose(w_hh).astype(jnp.bfloat16))   # (H, 4H)
                bias.append((b_ih + b_hh).reshape(1, 4 * hidden_dim))  # f32
            layers.append({
                "wih": jnp.stack(wih),                    # (2, Din, 4H) bf16
                "whh": jnp.concatenate(whh, axis=0),      # (2H, 4H)    bf16
                "b":   jnp.stack(bias),                   # (2, 1, 4H)  f32
            })
        return layers

    params["lstm1"] = lstm_stack()

    kc = 1.0 / math.sqrt(EMBED_DIM * 5)
    conv_w = unif((EMBED_DIM, EMBED_DIM, 5), kc)                       # (Cout, Cin, K)
    params["conv2_w"] = jnp.transpose(conv_w, (2, 1, 0)).astype(jnp.bfloat16)  # (K, Cin, Cout)
    params["conv2_b"] = unif((EMBED_DIM,), kc).reshape(1, EMBED_DIM)   # f32

    params["lstm2"] = lstm_stack()

    kf = 1.0 / math.sqrt(hidden_dim * 2 * 2)
    fc_w = unif((class_num, hidden_dim * 4), kf)                       # (C, 4H)
    params["fc_w1"] = jnp.transpose(fc_w[:, :2 * hidden_dim]).astype(jnp.bfloat16)  # (2H, C)
    params["fc_w2"] = jnp.transpose(fc_w[:, 2 * hidden_dim:]).astype(jnp.bfloat16)  # (2H, C)
    params["fc_b"] = unif((class_num,), kf).reshape(1, class_num)      # f32
    return params


# --------------------------------------------------------------------------
# Full forward pass (time-major end to end; flat (T*B) rows for the
# throughput kernels via free reshapes; single permute at the output).
# --------------------------------------------------------------------------
def lstm_net_forward(params, x_ids):
    B, T = x_ids.shape
    # TODO(synk): embedding gather stays in plain JAX (jnp.take); a DMA-gather
    # Pallas kernel adds no value at these sizes.
    x = jnp.take(params["embedding"], jnp.transpose(x_ids), axis=0)    # (T, B, 128) bf16

    # TODO(synk): on v7x the two independent branches (lstm1 vs conv+lstm2)
    # could run on the two TensorCores via pl.core_map; serialized here.
    x1 = bilstm(x, params["lstm1"])                                    # (T, B, 2H) bf16

    x2_flat = conv1d_same(x.reshape(T * B, EMBED_DIM),
                          params["conv2_w"], params["conv2_b"], B)     # (T*B, 128) bf16
    x2 = bilstm(x2_flat.reshape(T, B, EMBED_DIM), params["lstm2"])     # (T, B, 2H) bf16

    F = x1.shape[2]
    y_flat = fused_concat_linear(x1.reshape(T * B, F), x2.reshape(T * B, F),
                                 params["fc_w1"], params["fc_w2"],
                                 params["fc_b"])                       # (T*B, C) f32
    C = y_flat.shape[1]
    return jnp.transpose(y_flat.reshape(T, B, C), (1, 2, 0))           # (B, C, T)


if __name__ == "__main__":
    embed_size, class_num, layer_n, hidden_dim = 20, 5, 2, 32
    B, T = 2, 8

    key = jax.random.PRNGKey(0)
    pkey, xkey = jax.random.split(key)
    params = init_params(pkey, embed_size, class_num, layer_n, hidden_dim)
    x_ids = jax.random.randint(xkey, (B, T), 0, embed_size, dtype=jnp.int32)

    fwd = jax.jit(lstm_net_forward)
    out = jax.block_until_ready(fwd(params, x_ids))

    assert out.shape == (B, class_num, T), out.shape
    assert out.dtype == jnp.float32
    assert bool(jnp.all(jnp.isfinite(out)))
    print("KERNEL_OK")
</pallas_src>

<mosaic_0001>
module attributes {stable_mosaic.version = 11 : i64} {
  func.func @_bilstm_layer_kernel(%arg0: memref<8x2x128xbf16, #tpu.memory_space<vmem>>, %arg1: memref<2x128x128xbf16, #tpu.memory_space<vmem>>, %arg2: memref<64x128xbf16, #tpu.memory_space<vmem>>, %arg3: memref<2x1x128xf32, #tpu.memory_space<vmem>>, %arg4: memref<8x2x64xbf16, #tpu.memory_space<vmem>>, %arg5: memref<8x2x128xbf16, #tpu.memory_space<vmem>>, %arg6: memref<8x2x128xbf16, #tpu.memory_space<vmem>>) attributes {dimension_semantics = [], scalar_prefetch = 0 : i64, scratch_operands = 2 : i64, tpu.core_type = #tpu.core_type<tc>} {
    %c0 = arith.constant 0 : index
    %c0_0 = arith.constant 0 : index
    %c0_1 = arith.constant 0 : index
    %0 = vector.load %arg0[%c0, %c0_0, %c0_1] : memref<8x2x128xbf16, #tpu.memory_space<vmem>>, vector<8x2x128xbf16>
    %c0_2 = arith.constant 0 : index
    %c0_3 = arith.constant 0 : index
    %c0_4 = arith.constant 0 : index
    %1 = vector.load %arg1[%c0_2, %c0_3, %c0_4] : memref<2x128x128xbf16, #tpu.memory_space<vmem>>, vector<1x128x128xbf16>
    %2 = vector.shape_cast %1 : vector<1x128x128xbf16> to vector<128x128xbf16>
    %cst = arith.constant dense<0.000000e+00> : vector<8x2x128xf32>
    %3 = tpu.matmul %0, %2, %cst {dimension_numbers = #tpu.dot_dimension_numbers<[2], [0], [0, 1], [1], [0, 0, 0, 1, 1, 1], [], []>} : vector<8x2x128xbf16>, vector<128x128xbf16>, vector<8x2x128xf32> -> vector<8x2x128xf32>
    %c0_5 = arith.constant 0 : index
    %c0_6 = arith.constant 0 : index
    %c0_7 = arith.constant 0 : index
    %4 = vector.load %arg3[%c0_5, %c0_6, %c0_7] : memref<2x1x128xf32, #tpu.memory_space<vmem>>, vector<1x1x128xf32>
    %5 = vector.shape_cast %4 : vector<1x1x128xf32> to vector<1x128xf32>
    %6 = vector.shape_cast %5 : vector<1x128xf32> to vector<1x1x128xf32>
    %7 = vector.broadcast %6 : vector<1x1x128xf32> to vector<8x2x128xf32>
    %8 = arith.addf %3, %7 : vector<8x2x128xf32>
    %9 = arith.truncf %8 : vector<8x2x128xf32> to vector<8x2x128xbf16>
    %c0_8 = arith.constant 0 : index
    %c0_9 = arith.constant 0 : index
    %c0_10 = arith.constant 0 : index
    %10 = vector.load %arg5[%c0_8, %c0_9, %c0_10] : memref<8x2x128xbf16, #tpu.memory_space<vmem>>, vector<8x2x128xbf16>
    tpu.vector_store %arg5[%c0_8, %c0_9, %c0_10], %9 {strides = array<i32>} : memref<8x2x128xbf16, #tpu.memory_space<vmem>>, vector<8x2x128xbf16>,
    %c1 = arith.constant 1 : index
    %c0_11 = arith.constant 0 : index
    %c0_12 = arith.constant 0 : index
    %11 = vector.load %arg1[%c1, %c0_11, %c0_12] : memref<2x128x128xbf16, #tpu.memory_space<vmem>>, vector<1x128x128xbf16>
    %12 = vector.shape_cast %11 : vector<1x128x128xbf16> to vector<128x128xbf16>
    %cst_13 = arith.constant dense<0.000000e+00> : vector<8x2x128xf32>
    %13 = tpu.matmul %0, %12, %cst_13 {dimension_numbers = #tpu.dot_dimension_numbers<[2], [0], [0, 1], [1], [0, 0, 0, 1, 1, 1], [], []>} : vector<8x2x128xbf16>, vector<128x128xbf16>, vector<8x2x128xf32> -> vector<8x2x128xf32>
    %c1_14 = arith.constant 1 : index
    %c0_15 = arith.constant 0 : index
    %c0_16 = arith.constant 0 : index
    %14 = vector.load %arg3[%c1_14, %c0_15, %c0_16] : memref<2x1x128xf32, #tpu.memory_space<vmem>>, vector<1x1x128xf32>
    %15 = vector.shape_cast %14 : vector<1x1x128xf32> to vector<1x128xf32>
    %16 = vector.shape_cast %15 : vector<1x128xf32> to vector<1x1x128xf32>
    %17 = vector.broadcast %16 : vector<1x1x128xf32> to vector<8x2x128xf32>
    %18 = arith.addf %13, %17 : vector<8x2x128xf32>
    %19 = arith.truncf %18 : vector<8x2x128xf32> to vector<8x2x128xbf16>
    %c0_17 = arith.constant 0 : index
    %c0_18 = arith.constant 0 : index
    %c0_19 = arith.constant 0 : index
    %20 = vector.load %arg6[%c0_17, %c0_18, %c0_19] : memref<8x2x128xbf16, #tpu.memory_space<vmem>>, vector<8x2x128xbf16>
    tpu.vector_store %arg6[%c0_17, %c0_18, %c0_19], %19 {strides = array<i32>} : memref<8x2x128xbf16, #tpu.memory_space<vmem>>, vector<8x2x128xbf16>,
    %c0_20 = arith.constant 0 : index
    %c0_21 = arith.constant 0 : index
    %21 = vector.load %arg2[%c0_20, %c0_21] : memref<64x128xbf16, #tpu.memory_space<vmem>>, vector<64x128xbf16>
    %22 = tpu.iota {dimensions = array<i32: 1>} : vector<1x128xi32>
    %c64_i32 = arith.constant 64 : i32
    %23 = vector.broadcast %c64_i32 : i32 to vector<1x128xi32>
    %24 = arith.cmpi sge, %22, %23 : vector<1x128xi32>
    %c96_i32 = arith.constant 96 : i32
    %25 = vector.broadcast %c96_i32 : i32 to vector<1x128xi32>
    %26 = arith.cmpi slt, %22, %25 : vector<1x128xi32>
    %27 = arith.andi %24, %26 : vector<1x128xi1>
    %cst_22 = arith.constant 1.000000e+00 : f32
    %cst_23 = arith.constant 5.000000e-01 : f32
    %28 = vector.broadcast %cst_22 : f32 to vector<1x128xf32>
    %29 = vector.broadcast %cst_23 : f32 to vector<1x128xf32>
    %30 = arith.select %27, %28, %29 : vector<1x128xi1>, vector<1x128xf32>
    %cst_24 = arith.constant 0.000000e+00 : f32
    %cst_25 = arith.constant 5.000000e-01 : f32
    %31 = vector.broadcast %cst_24 : f32 to vector<1x128xf32>
    %32 = vector.broadcast %cst_25 : f32 to vector<1x128xf32>
    %33 = arith.select %27, %31, %32 : vector<1x128xi1>, vector<1x128xf32>
    %34 = tpu.iota {dimensions = array<i32: 0>} : vector<4x32xi32>
    %c2_i32 = arith.constant 2 : i32
    %35 = vector.broadcast %c2_i32 : i32 to vector<4x32xi32>
    %36 = arith.cmpi slt, %34, %35 : vector<4x32xi32>
    %cst_26 = arith.constant 0.000000e+00 : f32
    %37 = vector.broadcast %cst_26 : f32 to vector<4x32xf32>
    %cst_27 = arith.constant 0.000000e+00 : f32
    %38 = vector.broadcast %cst_27 : f32 to vector<4x32xf32>
    %c0_i32 = arith.constant 0 : i32
    %c7_i32 = arith.constant 7 : i32
    %39 = arith.subi %c7_i32, %c0_i32 : i32
    %cst_28 = arith.constant 0.000000e+00 : f32
    %40 = vector.broadcast %cst_28 : f32 to vector<4x32xf32>
    %41 = arith.select %36, %37, %40 : vector<4x32xi1>, vector<4x32xf32>
    %cst_29 = arith.constant 0.000000e+00 : f32
    %42 = vector.broadcast %cst_29 : f32 to vector<4x32xf32>
    %43 = arith.select %36, %42, %37 : vector<4x32xi1>, vector<4x32xf32>
    %44 = tpu.concatenate %41, %43 in 1 : vector<4x32xf32>, vector<4x32xf32> -> vector<4x64xf32>
    %45 = arith.truncf %44 : vector<4x64xf32> to vector<4x64xbf16>
    %cst_30 = arith.constant dense<0.000000e+00> : vector<4x128xf32>
    %46 = tpu.matmul %45, %21, %cst_30 {dimension_numbers = #tpu.dot_dimension_numbers<[1], [0], [0], [1], [0, 0, 1, 1], [], []>} : vector<4x64xbf16>, vector<64x128xbf16>, vector<4x128xf32> -> vector<4x128xf32>
    %47 = arith.index_cast %c0_i32 : i32 to index
    %c0_31 = arith.constant 0 : index
    %c0_32 = arith.constant 0 : index
    %48 = vector.load %arg5[%47, %c0_31, %c0_32] : memref<8x2x128xbf16, #tpu.memory_space<vmem>>, vector<1x2x128xbf16>
    %49 = vector.shape_cast %48 : vector<1x2x128xbf16> to vector<2x128xbf16>
    %50 = arith.index_cast %39 : i32 to index
    %c0_33 = arith.constant 0 : index
    %c0_34 = arith.constant 0 : index
    %51 = vector.load %arg6[%50, %c0_33, %c0_34] : memref<8x2x128xbf16, #tpu.memory_space<vmem>>, vector<1x2x128xbf16>
    %52 = vector.shape_cast %51 : vector<1x2x128xbf16> to vector<2x128xbf16>
    %53 = tpu.concatenate %49, %52 in 0 : vector<2x128xbf16>, vector<2x128xbf16> -> vector<4x128xbf16>
    %54 = arith.extf %53 : vector<4x128xbf16> to vector<4x128xf32>
    %55 = arith.addf %46, %54 : vector<4x128xf32>
    %56 = vector.broadcast %30 : vector<1x128xf32> to vector<4x128xf32>
    %57 = arith.mulf %56, %55 : vector<4x128xf32>
    %58 = math.tanh %57 : vector<4x128xf32>
    %59 = vector.broadcast %30 : vector<1x128xf32> to vector<4x128xf32>
    %60 = arith.mulf %59, %58 : vector<4x128xf32>
    %61 = vector.broadcast %33 : vector<1x128xf32> to vector<4x128xf32>
    %62 = arith.addf %60, %61 : vector<4x128xf32>
    %63 = vector.extract_strided_slice %62 {offsets = [0, 0], sizes = [4, 32], strides = [1, 1]} : vector<4x128xf32> to vector<4x32xf32>
    %64 = vector.extract_strided_slice %62 {offsets = [0, 32], sizes = [4, 32], strides = [1, 1]} : vector<4x128xf32> to vector<4x32xf32>
    %65 = vector.extract_strided_slice %62 {offsets = [0, 64], sizes = [4, 32], strides = [1, 1]} : vector<4x128xf32> to vector<4x32xf32>
    %66 = vector.extract_strided_slice %62 {offsets = [0, 96], sizes = [4, 32], strides = [1, 1]} : vector<4x128xf32> to vector<4x32xf32>
    %67 = arith.mulf %64, %38 : vector<4x32xf32>
    %68 = arith.mulf %63, %65 : vector<4x32xf32>
    %69 = arith.addf %67, %68 : vector<4x32xf32>
    %70 = math.tanh %69 : vector<4x32xf32>
    %71 = arith.mulf %66, %70 : vector<4x32xf32>
    %72 = vector.extract_strided_slice %71 {offsets = [0, 0], sizes = [2, 32], strides = [1, 1]} : vector<4x32xf32> to vector<2x32xf32>
    %73 = arith.truncf %72 : vector<2x32xf32> to vector<2x32xbf16>
    %74 = arith.index_cast %c0_i32 : i32 to index
    %c0_35 = arith.constant 0 : index
    %c0_36 = arith.constant 0 : index
    %75 = vector.load %arg4[%74, %c0_35, %c0_36] : memref<8x2x64xbf16, #tpu.memory_space<vmem>>, vector<1x2x32xbf16>
    %76 = vector.shape_cast %75 : vector<1x2x32xbf16> to vector<2x32xbf16>
    %77 = vector.shape_cast %73 : vector<2x32xbf16> to vector<1x2x32xbf16>
    tpu.vector_store %arg4[%74, %c0_35, %c0_36], %77 {strides = array<i32>} : memref<8x2x64xbf16, #tpu.memory_space<vmem>>, vector<1x2x32xbf16>,
    %78 = vector.extract_strided_slice %71 {offsets = [2, 0], sizes = [2, 32], strides = [1, 1]} : vector<4x32xf32> to vector<2x32xf32>
    %79 = arith.truncf %78 : vector<2x32xf32> to vector<2x32xbf16>
    %80 = arith.index_cast %39 : i32 to index
    %c0_37 = arith.constant 0 : index
    %c32 = arith.constant 32 : index
    %81 = vector.load %arg4[%80, %c0_37, %c32] : memref<8x2x64xbf16, #tpu.memory_space<vmem>>, vector<1x2x32xbf16>
    %82 = vector.shape_cast %81 : vector<1x2x32xbf16> to vector<2x32xbf16>
    %83 = vector.shape_cast %79 : vector<2x32xbf16> to vector<1x2x32xbf16>
    tpu.vector_store %arg4[%80, %c0_37, %c32], %83 {strides = array<i32>} : memref<8x2x64xbf16, #tpu.memory_space<vmem>>, vector<1x2x32xbf16>,
    %c1_i32 = arith.constant 1 : i32
    %c7_i32_38 = arith.constant 7 : i32
    %84 = arith.subi %c7_i32_38, %c1_i32 : i32
    %cst_39 = arith.constant 0.000000e+00 : f32
    %85 = vector.broadcast %cst_39 : f32 to vector<4x32xf32>
    %86 = arith.select %36, %71, %85 : vector<4x32xi1>, vector<4x32xf32>
    %cst_40 = arith.constant 0.000000e+00 : f32
    %87 = vector.broadcast %cst_40 : f32 to vector<4x32xf32>
    %88 = arith.select %36, %87, %71 : vector<4x32xi1>, vector<4x32xf32>
    %89 = tpu.concatenate %86, %88 in 1 : vector<4x32xf32>, vector<4x32xf32> -> vector<4x64xf32>
    %90 = arith.truncf %89 : vector<4x64xf32> to vector<4x64xbf16>
    %cst_41 = arith.constant dense<0.000000e+00> : vector<4x128xf32>
    %91 = tpu.matmul %90, %21, %cst_41 {dimension_numbers = #tpu.dot_dimension_numbers<[1], [0], [0], [1], [0, 0, 1, 1], [], []>} : vector<4x64xbf16>, vector<64x128xbf16>, vector<4x128xf32> -> vector<4x128xf32>
    %92 = arith.index_cast %c1_i32 : i32 to index
    %c0_42 = arith.constant 0 : index
    %c0_43 = arith.constant 0 : index
    %93 = vector.load %arg5[%92, %c0_42, %c0_43] : memref<8x2x128xbf16, #tpu.memory_space<vmem>>, vector<1x2x128xbf16>
    %94 = vector.shape_cast %93 : vector<1x2x128xbf16> to vector<2x128xbf16>
    %95 = arith.index_cast %84 : i32 to index
    %c0_44 = arith.constant 0 : index
    %c0_45 = arith.constant 0 : index
    %96 = vector.load %arg6[%95, %c0_44, %c0_45] : memref<8x2x128xbf16, #tpu.memory_space<vmem>>, vector<1x2x128xbf16>
    %97 = vector.shape_cast %96 : vector<1x2x128xbf16> to vector<2x128xbf16>
    %98 = tpu.concatenate %94, %97 in 0 : vector<2x128xbf16>, vector<2x128xbf16> -> vector<4x128xbf16>
    %99 = arith.extf %98 : vector<4x128xbf16> to vector<4x128xf32>
    %100 = arith.addf %91, %99 : vector<4x128xf32>
    %101 = vector.broadcast %30 : vector<1x128xf32> to vector<4x128xf32>
    %102 = arith.mulf %101, %100 : vector<4x128xf32>
    %103 = math.tanh %102 : vector<4x128xf32>
    %104 = vector.broadcast %30 : vector<1x128xf32> to vector<4x128xf32>
    %105 = arith.mulf %104, %103 : vector<4x128xf32>
    %106 = vector.broadcast %33 : vector<1x128xf32> to vector<4x128xf32>
    %107 = arith.addf %105, %106 : vector<4x128xf32>
    %108 = vector.extract_strided_slice %107 {offsets = [0, 0], sizes = [4, 32], strides = [1, 1]} : vector<4x128xf32> to vector<4x32xf32>
    %109 = vector.extract_strided_slice %107 {offsets = [0, 32], sizes = [4, 32], strides = [1, 1]} : vector<4x128xf32> to vector<4x32xf32>
    %110 = vector.extract_strided_slice %107 {offsets = [0, 64], sizes = [4, 32], strides = [1, 1]} : vector<4x128xf32> to vector<4x32xf32>
    %111 = vector.extract_strided_slice %107 {offsets = [0, 96], sizes = [4, 32], strides = [1, 1]} : vector<4x128xf32> to vector<4x32xf32>
    %112 = arith.mulf %109, %69 : vector<4x32xf32>
    %113 = arith.mulf %108, %110 : vector<4x32xf32>
    %114 = arith.addf %112, %113 : vector<4x32xf32>
    %115 = math.tanh %114 : vector<4x32xf32>
    %116 = arith.mulf %111, %115 : vector<4x32xf32>
    %117 = vector.extract_strided_slice %116 {offsets = [0, 0], sizes = [2, 32], strides = [1, 1]} : vector<4x32xf32> to vector<2x32xf32>
    %118 = arith.truncf %117 : vector<2x32xf32> to vector<2x32xbf16>
    %119 = arith.index_cast %c1_i32 : i32 to index
    %c0_46 = arith.constant 0 : index
    %c0_47 = arith.constant 0 : index
    %120 = vector.load %arg4[%119, %c0_46, %c0_47] : memref<8x2x64xbf16, #tpu.memory_space<vmem>>, vector<1x2x32xbf16>
    %121 = vector.shape_cast %120 : vector<1x2x32xbf16> to vector<2x32xbf16>
    %122 = vector.shape_cast %118 : vector<2x32xbf16> to vector<1x2x32xbf16>
    tpu.vector_store %arg4[%119, %c0_46, %c0_47], %122 {strides = array<i32>} : memref<8x2x64xbf16, #tpu.memory_space<vmem>>, vector<1x2x32xbf16>,
    %123 = vector.extract_strided_slice %116 {offsets = [2, 0], sizes = [2, 32], strides = [1, 1]} : vector<4x32xf32> to vector<2x32xf32>
    %124 = arith.truncf %123 : vector<2x32xf32> to vector<2x32xbf16>
    %125 = arith.index_cast %84 : i32 to index
    %c0_48 = arith.constant 0 : index
    %c32_49 = arith.constant 32 : index
    %126 = vector.load %arg4[%125, %c0_48, %c32_49] : memref<8x2x64xbf16, #tpu.memory_space<vmem>>, vector<1x2x32xbf16>
    %127 = vector.shape_cast %126 : vector<1x2x32xbf16> to vector<2x32xbf16>
    %128 = vector.shape_cast %124 : vector<2x32xbf16> to vector<1x2x32xbf16>
    tpu.vector_store %arg4[%125, %c0_48, %c32_49], %128 {strides = array<i32>} : memref<8x2x64xbf16, #tpu.memory_space<vmem>>, vector<1x2x32xbf16>,
    %c2_i32_50 = arith.constant 2 : i32
    %c7_i32_51 = arith.constant 7 : i32
    %129 = arith.subi %c7_i32_51, %c2_i32_50 : i32
    %cst_52 = arith.constant 0.000000e+00 : f32
    %130 = vector.broadcast %cst_52 : f32 to vector<4x32xf32>
    %131 = arith.select %36, %116, %130 : vector<4x32xi1>, vector<4x32xf32>
    %cst_53 = arith.constant 0.000000e+00 : f32
    %132 = vector.broadcast %cst_53 : f32 to vector<4x32xf32>
    %133 = arith.select %36, %132, %116 : vector<4x32xi1>, vector<4x32xf32>
    %134 = tpu.concatenate %131, %133 in 1 : vector<4x32xf32>, vector<4x32xf32> -> vector<4x64xf32>
    %135 = arith.truncf %134 : vector<4x64xf32> to vector<4x64xbf16>
    %cst_54 = arith.constant dense<0.000000e+00> : vector<4x128xf32>
    %136 = tpu.matmul %135, %21, %cst_54 {dimension_numbers = #tpu.dot_dimension_numbers<[1], [0], [0], [1], [0, 0, 1, 1], [], []>} : vector<4x64xbf16>, vector<64x128xbf16>, vector<4x128xf32> -> vector<4x128xf32>
    %137 = arith.index_cast %c2_i32_50 : i32 to index
    %c0_55 = arith.constant 0 : index
    %c0_56 = arith.constant 0 : index
    %138 = vector.load %arg5[%137, %c0_55, %c0_56] : memref<8x2x128xbf16, #tpu.memory_space<vmem>>, vector<1x2x128xbf16>
    %139 = vector.shape_cast %138 : vector<1x2x128xbf16> to vector<2x128xbf16>
    %140 = arith.index_cast %129 : i32 to index
    %c0_57 = arith.constant 0 : index
    %c0_58 = arith.constant 0 : index
    %141 = vector.load %arg6[%140, %c0_57, %c0_58] : memref<8x2x128xbf16, #tpu.memory_space<vmem>>, vector<1x2x128xbf16>
    %142 = vector.shape_cast %141 : vector<1x2x128xbf16> to vector<2x128xbf16>
    %143 = tpu.concatenate %139, %142 in 0 : vector<2x128xbf16>, vector<2x128xbf16> -> vector<4x128xbf16>
    %144 = arith.extf %143 : vector<4x128xbf16> to vector<4x128xf32>
    %145 = arith.addf %136, %144 : vector<4x128xf32>
    %146 = vector.broadcast %30 : vector<1x128xf32> to vector<4x128xf32>
    %147 = arith.mulf %146, %145 : vector<4x128xf32>
    %148 = math.tanh %147 : vector<4x128xf32>
    %149 = vector.broadcast %30 : vector<1x128xf32> to vector<4x128xf32>
    %150 = arith.mulf %149, %148 : vector<4x128xf32>
    %151 = vector.broadcast %33 : vector<1x128xf32> to vector<4x128xf32>
    %152 = arith.addf %150, %151 : vector<4x128xf32>
    %153 = vector.extract_strided_slice %152 {offsets = [0, 0], sizes = [4, 32], strides = [1, 1]} : vector<4x128xf32> to vector<4x32xf32>
    %154 = vector.extract_strided_slice %152 {offsets = [0, 32], sizes = [4, 32], strides = [1, 1]} : vector<4x128xf32> to vector<4x32xf32>
    %155 = vector.extract_strided_slice %152 {offsets = [0, 64], sizes = [4, 32], strides = [1, 1]} : vector<4x128xf32> to vector<4x32xf32>
    %156 = vector.extract_strided_slice %152 {offsets = [0, 96], sizes = [4, 32], strides = [1, 1]} : vector<4x128xf32> to vector<4x32xf32>
    %157 = arith.mulf %154, %114 : vector<4x32xf32>
    %158 = arith.mulf %153, %155 : vector<4x32xf32>
    %159 = arith.addf %157, %158 : vector<4x32xf32>
    %160 = math.tanh %159 : vector<4x32xf32>
    %161 = arith.mulf %156, %160 : vector<4x32xf32>
    %162 = vector.extract_strided_slice %161 {offsets = [0, 0], sizes = [2, 32], strides = [1, 1]} : vector<4x32xf32> to vector<2x32xf32>
    %163 = arith.truncf %162 : vector<2x32xf32> to vector<2x32xbf16>
    %164 = arith.index_cast %c2_i32_50 : i32 to index
    %c0_59 = arith.constant 0 : index
    %c0_60 = arith.constant 0 : index
    %165 = vector.load %arg4[%164, %c0_59, %c0_60] : memref<8x2x64xbf16, #tpu.memory_space<vmem>>, vector<1x2x32xbf16>
    %166 = vector.shape_cast %165 : vector<1x2x32xbf16> to vector<2x32xbf16>
    %167 = vector.shape_cast %163 : vector<2x32xbf16> to vector<1x2x32xbf16>
    tpu.vector_store %arg4[%164, %c0_59, %c0_60], %167 {strides = array<i32>} : memref<8x2x64xbf16, #tpu.memory_space<vmem>>, vector<1x2x32xbf16>,
    %168 = vector.extract_strided_slice %161 {offsets = [2, 0], sizes = [2, 32], strides = [1, 1]} : vector<4x32xf32> to vector<2x32xf32>
    %169 = arith.truncf %168 : vector<2x32xf32> to vector<2x32xbf16>
    %170 = arith.index_cast %129 : i32 to index
    %c0_61 = arith.constant 0 : index
    %c32_62 = arith.constant 32 : index
    %171 = vector.load %arg4[%170, %c0_61, %c32_62] : memref<8x2x64xbf16, #tpu.memory_space<vmem>>, vector<1x2x32xbf16>
    %172 = vector.shape_cast %171 : vector<1x2x32xbf16> to vector<2x32xbf16>
    %173 = vector.shape_cast %169 : vector<2x32xbf16> to vector<1x2x32xbf16>
    tpu.vector_store %arg4[%170, %c0_61, %c32_62], %173 {strides = array<i32>} : memref<8x2x64xbf16, #tpu.memory_space<vmem>>, vector<1x2x32xbf16>,
    %c3_i32 = arith.constant 3 : i32
    %c7_i32_63 = arith.constant 7 : i32
    %174 = arith.subi %c7_i32_63, %c3_i32 : i32
    %cst_64 = arith.constant 0.000000e+00 : f32
    %175 = vector.broadcast %cst_64 : f32 to vector<4x32xf32>
    %176 = arith.select %36, %161, %175 : vector<4x32xi1>, vector<4x32xf32>
    %cst_65 = arith.constant 0.000000e+00 : f32
    %177 = vector.broadcast %cst_65 : f32 to vector<4x32xf32>
    %178 = arith.select %36, %177, %161 : vector<4x32xi1>, vector<4x32xf32>
    %179 = tpu.concatenate %176, %178 in 1 : vector<4x32xf32>, vector<4x32xf32> -> vector<4x64xf32>
    %180 = arith.truncf %179 : vector<4x64xf32> to vector<4x64xbf16>
    %cst_66 = arith.constant dense<0.000000e+00> : vector<4x128xf32>
    %181 = tpu.matmul %180, %21, %cst_66 {dimension_numbers = #tpu.dot_dimension_numbers<[1], [0], [0], [1], [0, 0, 1, 1], [], []>} : vector<4x64xbf16>, vector<64x128xbf16>, vector<4x128xf32> -> vector<4x128xf32>
    %182 = arith.index_cast %c3_i32 : i32 to index
    %c0_67 = arith.constant 0 : index
    %c0_68 = arith.constant 0 : index
    %183 = vector.load %arg5[%182, %c0_67, %c0_68] : memref<8x2x128xbf16, #tpu.memory_space<vmem>>, vector<1x2x128xbf16>
    %184 = vector.shape_cast %183 : vector<1x2x128xbf16> to vector<2x128xbf16>
    %185 = arith.index_cast %174 : i32 to index
    %c0_69 = arith.constant 0 : index
    %c0_70 = arith.constant 0 : index
    %186 = vector.load %arg6[%185, %c0_69, %c0_70] : memref<8x2x128xbf16, #tpu.memory_space<vmem>>, vector<1x2x128xbf16>
    %187 = vector.shape_cast %186 : vector<1x2x128xbf16> to vector<2x128xbf16>
    %188 = tpu.concatenate %184, %187 in 0 : vector<2x128xbf16>, vector<2x128xbf16> -> vector<4x128xbf16>
    %189 = arith.extf %188 : vector<4x128xbf16> to vector<4x128xf32>
    %190 = arith.addf %181, %189 : vector<4x128xf32>
    %191 = vector.broadcast %30 : vector<1x128xf32> to vector<4x128xf32>
    %192 = arith.mulf %191, %190 : vector<4x128xf32>
    %193 = math.tanh %192 : vector<4x128xf32>
    %194 = vector.broadcast %30 : vector<1x128xf32> to vector<4x128xf32>
    %195 = arith.mulf %194, %193 : vector<4x128xf32>
    %196 = vector.broadcast %33 : vector<1x128xf32> to vector<4x128xf32>
    %197 = arith.addf %195, %196 : vector<4x128xf32>
    %198 = vector.extract_strided_slice %197 {offsets = [0, 0], sizes = [4, 32], strides = [1, 1]} : vector<4x128xf32> to vector<4x32xf32>
    %199 = vector.extract_strided_slice %197 {offsets = [0, 32], sizes = [4, 32], strides = [1, 1]} : vector<4x128xf32> to vector<4x32xf32>
    %200 = vector.extract_strided_slice %197 {offsets = [0, 64], sizes = [4, 32], strides = [1, 1]} : vector<4x128xf32> to vector<4x32xf32>
    %201 = vector.extract_strided_slice %197 {offsets = [0, 96], sizes = [4, 32], strides = [1, 1]} : vector<4x128xf32> to vector<4x32xf32>
    %202 = arith.mulf %199, %159 : vector<4x32xf32>
    %203 = arith.mulf %198, %200 : vector<4x32xf32>
    %204 = arith.addf %202, %203 : vector<4x32xf32>
    %205 = math.tanh %204 : vector<4x32xf32>
    %206 = arith.mulf %201, %205 : vector<4x32xf32>
    %207 = vector.extract_strided_slice %206 {offsets = [0, 0], sizes = [2, 32], strides = [1, 1]} : vector<4x32xf32> to vector<2x32xf32>
    %208 = arith.truncf %207 : vector<2x32xf32> to vector<2x32xbf16>
    %209 = arith.index_cast %c3_i32 : i32 to index
    %c0_71 = arith.constant 0 : index
    %c0_72 = arith.constant 0 : index
    %210 = vector.load %arg4[%209, %c0_71, %c0_72] : memref<8x2x64xbf16, #tpu.memory_space<vmem>>, vector<1x2x32xbf16>
    %211 = vector.shape_cast %210 : vector<1x2x32xbf16> to vector<2x32xbf16>
    %212 = vector.shape_cast %208 : vector<2x32xbf16> to vector<1x2x32xbf16>
    tpu.vector_store %arg4[%209, %c0_71, %c0_72], %212 {strides = array<i32>} : memref<8x2x64xbf16, #tpu.memory_space<vmem>>, vector<1x2x32xbf16>,
    %213 = vector.extract_strided_slice %206 {offsets = [2, 0], sizes = [2, 32], strides = [1, 1]} : vector<4x32xf32> to vector<2x32xf32>
    %214 = arith.truncf %213 : vector<2x32xf32> to vector<2x32xbf16>
    %215 = arith.index_cast %174 : i32 to index
    %c0_73 = arith.constant 0 : index
    %c32_74 = arith.constant 32 : index
    %216 = vector.load %arg4[%215, %c0_73, %c32_74] : memref<8x2x64xbf16, #tpu.memory_space<vmem>>, vector<1x2x32xbf16>
    %217 = vector.shape_cast %216 : vector<1x2x32xbf16> to vector<2x32xbf16>
    %218 = vector.shape_cast %214 : vector<2x32xbf16> to vector<1x2x32xbf16>
    tpu.vector_store %arg4[%215, %c0_73, %c32_74], %218 {strides = array<i32>} : memref<8x2x64xbf16, #tpu.memory_space<vmem>>, vector<1x2x32xbf16>,
    %c4_i32 = arith.constant 4 : i32
    %c7_i32_75 = arith.constant 7 : i32
    %219 = arith.subi %c7_i32_75, %c4_i32 : i32
    %cst_76 = arith.constant 0.000000e+00 : f32
    %220 = vector.broadcast %cst_76 : f32 to vector<4x32xf32>
    %221 = arith.select %36, %206, %220 : vector<4x32xi1>, vector<4x32xf32>
    %cst_77 = arith.constant 0.000000e+00 : f32
    %222 = vector.broadcast %cst_77 : f32 to vector<4x32xf32>
    %223 = arith.select %36, %222, %206 : vector<4x32xi1>, vector<4x32xf32>
    %224 = tpu.concatenate %221, %223 in 1 : vector<4x32xf32>, vector<4x32xf32> -> vector<4x64xf32>
    %225 = arith.truncf %224 : vector<4x64xf32> to vector<4x64xbf16>
    %cst_78 = arith.constant dense<0.000000e+00> : vector<4x128xf32>
    %226 = tpu.matmul %225, %21, %cst_78 {dimension_numbers = #tpu.dot_dimension_numbers<[1], [0], [0], [1], [0, 0, 1, 1], [], []>} : vector<4x64xbf16>, vector<64x128xbf16>, vector<4x128xf32> -> vector<4x128xf32>
    %227 = arith.index_cast %c4_i32 : i32 to index
    %c0_79 = arith.constant 0 : index
    %c0_80 = arith.constant 0 : index
    %228 = vector.load %arg5[%227, %c0_79, %c0_80] : memref<8x2x128xbf16, #tpu.memory_space<vmem>>, vector<1x2x128xbf16>
    %229 = vector.shape_cast %228 : vector<1x2x128xbf16> to vector<2x128xbf16>
    %230 = arith.index_cast %219 : i32 to index
    %c0_81 = arith.constant 0 : index
    %c0_82 = arith.constant 0 : index
    %231 = vector.load %arg6[%230, %c0_81, %c0_82] : memref<8x2x128xbf16, #tpu.memory_space<vmem>>, vector<1x2x128xbf16>
    %232 = vector.shape_cast %231 : vector<1x2x128xbf16> to vector<2x128xbf16>
    %233 = tpu.concatenate %229, %232 in 0 : vector<2x128xbf16>, vector<2x128xbf16> -> vector<4x128xbf16>
    %234 = arith.extf %233 : vector<4x128xbf16> to vector<4x128xf32>
    %235 = arith.addf %226, %234 : vector<4x128xf32>
    %236 = vector.broadcast %30 : vector<1x128xf32> to vector<4x128xf32>
    %237 = arith.mulf %236, %235 : vector<4x128xf32>
    %238 = math.tanh %237 : vector<4x128xf32>
    %239 = vector.broadcast %30 : vector<1x128xf32> to vector<4x128xf32>
    %240 = arith.mulf %239, %238 : vector<4x128xf32>
    %241 = vector.broadcast %33 : vector<1x128xf32> to vector<4x128xf32>
    %242 = arith.addf %240, %241 : vector<4x128xf32>
    %243 = vector.extract_strided_slice %242 {offsets = [0, 0], sizes = [4, 32], strides = [1, 1]} : vector<4x128xf32> to vector<4x32xf32>
    %244 = vector.extract_strided_slice %242 {offsets = [0, 32], sizes = [4, 32], strides = [1, 1]} : vector<4x128xf32> to vector<4x32xf32>
    %245 = vector.extract_strided_slice %242 {offsets = [0, 64], sizes = [4, 32], strides = [1, 1]} : vector<4x128xf32> to vector<4x32xf32>
    %246 = vector.extract_strided_slice %242 {offsets = [0, 96], sizes = [4, 32], strides = [1, 1]} : vector<4x128xf32> to vector<4x32xf32>
    %247 = arith.mulf %244, %204 : vector<4x32xf32>
    %248 = arith.mulf %243, %245 : vector<4x32xf32>
    %249 = arith.addf %247, %248 : vector<4x32xf32>
    %250 = math.tanh %249 : vector<4x32xf32>
    %251 = arith.mulf %246, %250 : vector<4x32xf32>
    %252 = vector.extract_strided_slice %251 {offsets = [0, 0], sizes = [2, 32], strides = [1, 1]} : vector<4x32xf32> to vector<2x32xf32>
    %253 = arith.truncf %252 : vector<2x32xf32> to vector<2x32xbf16>
    %254 = arith.index_cast %c4_i32 : i32 to index
    %c0_83 = arith.constant 0 : index
    %c0_84 = arith.constant 0 : index
    %255 = vector.load %arg4[%254, %c0_83, %c0_84] : memref<8x2x64xbf16, #tpu.memory_space<vmem>>, vector<1x2x32xbf16>
    %256 = vector.shape_cast %255 : vector<1x2x32xbf16> to vector<2x32xbf16>
    %257 = vector.shape_cast %253 : vector<2x32xbf16> to vector<1x2x32xbf16>
    tpu.vector_store %arg4[%254, %c0_83, %c0_84], %257 {strides = array<i32>} : memref<8x2x64xbf16, #tpu.memory_space<vmem>>, vector<1x2x32xbf16>,
    %258 = vector.extract_strided_slice %251 {offsets = [2, 0], sizes = [2, 32], strides = [1, 1]} : vector<4x32xf32> to vector<2x32xf32>
    %259 = arith.truncf %258 : vector<2x32xf32> to vector<2x32xbf16>
    %260 = arith.index_cast %219 : i32 to index
    %c0_85 = arith.constant 0 : index
    %c32_86 = arith.constant 32 : index
    %261 = vector.load %arg4[%260, %c0_85, %c32_86] : memref<8x2x64xbf16, #tpu.memory_space<vmem>>, vector<1x2x32xbf16>
    %262 = vector.shape_cast %261 : vector<1x2x32xbf16> to vector<2x32xbf16>
    %263 = vector.shape_cast %259 : vector<2x32xbf16> to vector<1x2x32xbf16>
    tpu.vector_store %arg4[%260, %c0_85, %c32_86], %263 {strides = array<i32>} : memref<8x2x64xbf16, #tpu.memory_space<vmem>>, vector<1x2x32xbf16>,
    %c5_i32 = arith.constant 5 : i32
    %c7_i32_87 = arith.constant 7 : i32
    %264 = arith.subi %c7_i32_87, %c5_i32 : i32
    %cst_88 = arith.constant 0.000000e+00 : f32
    %265 = vector.broadcast %cst_88 : f32 to vector<4x32xf32>
    %266 = arith.select %36, %251, %265 : vector<4x32xi1>, vector<4x32xf32>
    %cst_89 = arith.constant 0.000000e+00 : f32
    %267 = vector.broadcast %cst_89 : f32 to vector<4x32xf32>
    %268 = arith.select %36, %267, %251 : vector<4x32xi1>, vector<4x32xf32>
    %269 = tpu.concatenate %266, %268 in 1 : vector<4x32xf32>, vector<4x32xf32> -> vector<4x64xf32>
    %270 = arith.truncf %269 : vector<4x64xf32> to vector<4x64xbf16>
    %cst_90 = arith.constant dense<0.000000e+00> : vector<4x128xf32>
    %271 = tpu.matmul %270, %21, %cst_90 {dimension_numbers = #tpu.dot_dimension_numbers<[1], [0], [0], [1], [0, 0, 1, 1], [], []>} : vector<4x64xbf16>, vector<64x128xbf16>, vector<4x128xf32> -> vector<4x128xf32>
    %272 = arith.index_cast %c5_i32 : i32 to index
    %c0_91 = arith.constant 0 : index
    %c0_92 = arith.constant 0 : index
    %273 = vector.load %arg5[%272, %c0_91, %c0_92] : memref<8x2x128xbf16, #tpu.memory_space<vmem>>, vector<1x2x128xbf16>
    %274 = vector.shape_cast %273 : vector<1x2x128xbf16> to vector<2x128xbf16>
    %275 = arith.index_cast %264 : i32 to index
    %c0_93 = arith.constant 0 : index
    %c0_94 = arith.constant 0 : index
    %276 = vector.load %arg6[%275, %c0_93, %c0_94] : memref<8x2x128xbf16, #tpu.memory_space<vmem>>, vector<1x2x128xbf16>
    %277 = vector.shape_cast %276 : vector<1x2x128xbf16> to vector<2x128xbf16>
    %278 = tpu.concatenate %274, %277 in 0 : vector<2x128xbf16>, vector<2x128xbf16> -> vector<4x128xbf16>
    %279 = arith.extf %278 : vector<4x128xbf16> to vector<4x128xf32>
    %280 = arith.addf %271, %279 : vector<4x128xf32>
    %281 = vector.broadcast %30 : vector<1x128xf32> to vector<4x128xf32>
    %282 = arith.mulf %281, %280 : vector<4x128xf32>
    %283 = math.tanh %282 : vector<4x128xf32>
    %284 = vector.broadcast %30 : vector<1x128xf32> to vector<4x128xf32>
    %285 = arith.mulf %284, %283 : vector<4x128xf32>
    %286 = vector.broadcast %33 : vector<1x128xf32> to vector<4x128xf32>
    %287 = arith.addf %285, %286 : vector<4x128xf32>
    %288 = vector.extract_strided_slice %287 {offsets = [0, 0], sizes = [4, 32], strides = [1, 1]} : vector<4x128xf32> to vector<4x32xf32>
    %289 = vector.extract_strided_slice %287 {offsets = [0, 32], sizes = [4, 32], strides = [1, 1]} : vector<4x128xf32> to vector<4x32xf32>
    %290 = vector.extract_strided_slice %287 {offsets = [0, 64], sizes = [4, 32], strides = [1, 1]} : vector<4x128xf32> to vector<4x32xf32>
    %291 = vector.extract_strided_slice %287 {offsets = [0, 96], sizes = [4, 32], strides = [1, 1]} : vector<4x128xf32> to vector<4x32xf32>
    %292 = arith.mulf %289, %249 : vector<4x32xf32>
    %293 = arith.mulf %288, %290 : vector<4x32xf32>
    %294 = arith.addf %292, %293 : vector<4x32xf32>
    %295 = math.tanh %294 : vector<4x32xf32>
    %296 = arith.mulf %291, %295 : vector<4x32xf32>
    %297 = vector.extract_strided_slice %296 {offsets = [0, 0], sizes = [2, 32], strides = [1, 1]} : vector<4x32xf32> to vector<2x32xf32>
    %298 = arith.truncf %297 : vector<2x32xf32> to vector<2x32xbf16>
    %299 = arith.index_cast %c5_i32 : i32 to index
    %c0_95 = arith.constant 0 : index
    %c0_96 = arith.constant 0 : index
    %300 = vector.load %arg4[%299, %c0_95, %c0_96] : memref<8x2x64xbf16, #tpu.memory_space<vmem>>, vector<1x2x32xbf16>
    %301 = vector.shape_cast %300 : vector<1x2x32xbf16> to vector<2x32xbf16>
    %302 = vector.shape_cast %298 : vector<2x32xbf16> to vector<1x2x32xbf16>
    tpu.vector_store %arg4[%299, %c0_95, %c0_96], %302 {strides = array<i32>} : memref<8x2x64xbf16, #tpu.memory_space<vmem>>, vector<1x2x32xbf16>,
    %303 = vector.extract_strided_slice %296 {offsets = [2, 0], sizes = [2, 32], strides = [1, 1]} : vector<4x32xf32> to vector<2x32xf32>
    %304 = arith.truncf %303 : vector<2x32xf32> to vector<2x32xbf16>
    %305 = arith.index_cast %264 : i32 to index
    %c0_97 = arith.constant 0 : index
    %c32_98 = arith.constant 32 : index
    %306 = vector.load %arg4[%305, %c0_97, %c32_98] : memref<8x2x64xbf16, #tpu.memory_space<vmem>>, vector<1x2x32xbf16>
    %307 = vector.shape_cast %306 : vector<1x2x32xbf16> to vector<2x32xbf16>
    %308 = vector.shape_cast %304 : vector<2x32xbf16> to vector<1x2x32xbf16>
    tpu.vector_store %arg4[%305, %c0_97, %c32_98], %308 {strides = array<i32>} : memref<8x2x64xbf16, #tpu.memory_space<vmem>>, vector<1x2x32xbf16>,
    %c6_i32 = arith.constant 6 : i32
    %c7_i32_99 = arith.constant 7 : i32
    %309 = arith.subi %c7_i32_99, %c6_i32 : i32
    %cst_100 = arith.constant 0.000000e+00 : f32
    %310 = vector.broadcast %cst_100 : f32 to vector<4x32xf32>
    %311 = arith.select %36, %296, %310 : vector<4x32xi1>, vector<4x32xf32>
    %cst_101 = arith.constant 0.000000e+00 : f32
    %312 = vector.broadcast %cst_101 : f32 to vector<4x32xf32>
    %313 = arith.select %36, %312, %296 : vector<4x32xi1>, vector<4x32xf32>
    %314 = tpu.concatenate %311, %313 in 1 : vector<4x32xf32>, vector<4x32xf32> -> vector<4x64xf32>
    %315 = arith.truncf %314 : vector<4x64xf32> to vector<4x64xbf16>
    %cst_102 = arith.constant dense<0.000000e+00> : vector<4x128xf32>
    %316 = tpu.matmul %315, %21, %cst_102 {dimension_numbers = #tpu.dot_dimension_numbers<[1], [0], [0], [1], [0, 0, 1, 1], [], []>} : vector<4x64xbf16>, vector<64x128xbf16>, vector<4x128xf32> -> vector<4x128xf32>
    %317 = arith.index_cast %c6_i32 : i32 to index
    %c0_103 = arith.constant 0 : index
    %c0_104 = arith.constant 0 : index
    %318 = vector.load %arg5[%317, %c0_103, %c0_104] : memref<8x2x128xbf16, #tpu.memory_space<vmem>>, vector<1x2x128xbf16>
    %319 = vector.shape_cast %318 : vector<1x2x128xbf16> to vector<2x128xbf16>
    %320 = arith.index_cast %309 : i32 to index
    %c0_105 = arith.constant 0 : index
    %c0_106 = arith.constant 0 : index
    %321 = vector.load %arg6[%320, %c0_105, %c0_106] : memref<8x2x128xbf16, #tpu.memory_space<vmem>>, vector<1x2x128xbf16>
    %322 = vector.shape_cast %321 : vector<1x2x128xbf16> to vector<2x128xbf16>
    %323 = tpu.concatenate %319, %322 in 0 : vector<2x128xbf16>, vector<2x128xbf16> -> vector<4x128xbf16>
    %324 = arith.extf %323 : vector<4x128xbf16> to vector<4x128xf32>
    %325 = arith.addf %316, %324 : vector<4x128xf32>
    %326 = vector.broadcast %30 : vector<1x128xf32> to vector<4x128xf32>
    %327 = arith.mulf %326, %325 : vector<4x128xf32>
    %328 = math.tanh %327 : vector<4x128xf32>
    %329 = vector.broadcast %30 : vector<1x128xf32> to vector<4x128xf32>
    %330 = arith.mulf %329, %328 : vector<4x128xf32>
    %331 = vector.broadcast %33 : vector<1x128xf32> to vector<4x128xf32>
    %332 = arith.addf %330, %331 : vector<4x128xf32>
    %333 = vector.extract_strided_slice %332 {offsets = [0, 0], sizes = [4, 32], strides = [1, 1]} : vector<4x128xf32> to vector<4x32xf32>
    %334 = vector.extract_strided_slice %332 {offsets = [0, 32], sizes = [4, 32], strides = [1, 1]} : vector<4x128xf32> to vector<4x32xf32>
    %335 = vector.extract_strided_slice %332 {offsets = [0, 64], sizes = [4, 32], strides = [1, 1]} : vector<4x128xf32> to vector<4x32xf32>
    %336 = vector.extract_strided_slice %332 {offsets = [0, 96], sizes = [4, 32], strides = [1, 1]} : vector<4x128xf32> to vector<4x32xf32>
    %337 = arith.mulf %334, %294 : vector<4x32xf32>
    %338 = arith.mulf %333, %335 : vector<4x32xf32>
    %339 = arith.addf %337, %338 : vector<4x32xf32>
    %340 = math.tanh %339 : vector<4x32xf32>
    %341 = arith.mulf %336, %340 : vector<4x32xf32>
    %342 = vector.extract_strided_slice %341 {offsets = [0, 0], sizes = [2, 32], strides = [1, 1]} : vector<4x32xf32> to vector<2x32xf32>
    %343 = arith.truncf %342 : vector<2x32xf32> to vector<2x32xbf16>
    %344 = arith.index_cast %c6_i32 : i32 to index
    %c0_107 = arith.constant 0 : index
    %c0_108 = arith.constant 0 : index
    %345 = vector.load %arg4[%344, %c0_107, %c0_108] : memref<8x2x64xbf16, #tpu.memory_space<vmem>>, vector<1x2x32xbf16>
    %346 = vector.shape_cast %345 : vector<1x2x32xbf16> to vector<2x32xbf16>
    %347 = vector.shape_cast %343 : vector<2x32xbf16> to vector<1x2x32xbf16>
    tpu.vector_store %arg4[%344, %c0_107, %c0_108], %347 {strides = array<i32>} : memref<8x2x64xbf16, #tpu.memory_space<vmem>>, vector<1x2x32xbf16>,
    %348 = vector.extract_strided_slice %341 {offsets = [2, 0], sizes = [2, 32], strides = [1, 1]} : vector<4x32xf32> to vector<2x32xf32>
    %349 = arith.truncf %348 : vector<2x32xf32> to vector<2x32xbf16>
    %350 = arith.index_cast %309 : i32 to index
    %c0_109 = arith.constant 0 : index
    %c32_110 = arith.constant 32 : index
    %351 = vector.load %arg4[%350, %c0_109, %c32_110] : memref<8x2x64xbf16, #tpu.memory_space<vmem>>, vector<1x2x32xbf16>
    %352 = vector.shape_cast %351 : vector<1x2x32xbf16> to vector<2x32xbf16>
    %353 = vector.shape_cast %349 : vector<2x32xbf16> to vector<1x2x32xbf16>
    tpu.vector_store %arg4[%350, %c0_109, %c32_110], %353 {strides = array<i32>} : memref<8x2x64xbf16, #tpu.memory_space<vmem>>, vector<1x2x32xbf16>,
    %c7_i32_111 = arith.constant 7 : i32
    %c7_i32_112 = arith.constant 7 : i32
    %354 = arith.subi %c7_i32_112, %c7_i32_111 : i32
    %cst_113 = arith.constant 0.000000e+00 : f32
    %355 = vector.broadcast %cst_113 : f32 to vector<4x32xf32>
    %356 = arith.select %36, %341, %355 : vector<4x32xi1>, vector<4x32xf32>
    %cst_114 = arith.constant 0.000000e+00 : f32
    %357 = vector.broadcast %cst_114 : f32 to vector<4x32xf32>
    %358 = arith.select %36, %357, %341 : vector<4x32xi1>, vector<4x32xf32>
    %359 = tpu.concatenate %356, %358 in 1 : vector<4x32xf32>, vector<4x32xf32> -> vector<4x64xf32>
    %360 = arith.truncf %359 : vector<4x64xf32> to vector<4x64xbf16>
    %cst_115 = arith.constant dense<0.000000e+00> : vector<4x128xf32>
    %361 = tpu.matmul %360, %21, %cst_115 {dimension_numbers = #tpu.dot_dimension_numbers<[1], [0], [0], [1], [0, 0, 1, 1], [], []>} : vector<4x64xbf16>, vector<64x128xbf16>, vector<4x128xf32> -> vector<4x128xf32>
    %362 = arith.index_cast %c7_i32_111 : i32 to index
    %c0_116 = arith.constant 0 : index
    %c0_117 = arith.constant 0 : index
    %363 = vector.load %arg5[%362, %c0_116, %c0_117] : memref<8x2x128xbf16, #tpu.memory_space<vmem>>, vector<1x2x128xbf16>
    %364 = vector.shape_cast %363 : vector<1x2x128xbf16> to vector<2x128xbf16>
    %365 = arith.index_cast %354 : i32 to index
    %c0_118 = arith.constant 0 : index
    %c0_119 = arith.constant 0 : index
    %366 = vector.load %arg6[%365, %c0_118, %c0_119] : memref<8x2x128xbf16, #tpu.memory_space<vmem>>, vector<1x2x128xbf16>
    %367 = vector.shape_cast %366 : vector<1x2x128xbf16> to vector<2x128xbf16>
    %368 = tpu.concatenate %364, %367 in 0 : vector<2x128xbf16>, vector<2x128xbf16> -> vector<4x128xbf16>
    %369 = arith.extf %368 : vector<4x128xbf16> to vector<4x128xf32>
    %370 = arith.addf %361, %369 : vector<4x128xf32>
    %371 = vector.broadcast %30 : vector<1x128xf32> to vector<4x128xf32>
    %372 = arith.mulf %371, %370 : vector<4x128xf32>
    %373 = math.tanh %372 : vector<4x128xf32>
    %374 = vector.broadcast %30 : vector<1x128xf32> to vector<4x128xf32>
    %375 = arith.mulf %374, %373 : vector<4x128xf32>
    %376 = vector.broadcast %33 : vector<1x128xf32> to vector<4x128xf32>
    %377 = arith.addf %375, %376 : vector<4x128xf32>
    %378 = vector.extract_strided_slice %377 {offsets = [0, 0], sizes = [4, 32], strides = [1, 1]} : vector<4x128xf32> to vector<4x32xf32>
    %379 = vector.extract_strided_slice %377 {offsets = [0, 32], sizes = [4, 32], strides = [1, 1]} : vector<4x128xf32> to vector<4x32xf32>
    %380 = vector.extract_strided_slice %377 {offsets = [0, 64], sizes = [4, 32], strides = [1, 1]} : vector<4x128xf32> to vector<4x32xf32>
    %381 = vector.extract_strided_slice %377 {offsets = [0, 96], sizes = [4, 32], strides = [1, 1]} : vector<4x128xf32> to vector<4x32xf32>
    %382 = arith.mulf %379, %339 : vector<4x32xf32>
    %383 = arith.mulf %378, %380 : vector<4x32xf32>
    %384 = arith.addf %382, %383 : vector<4x32xf32>
    %385 = math.tanh %384 : vector<4x32xf32>
    %386 = arith.mulf %381, %385 : vector<4x32xf32>
    %387 = vector.extract_strided_slice %386 {offsets = [0, 0], sizes = [2, 32], strides = [1, 1]} : vector<4x32xf32> to vector<2x32xf32>
    %388 = arith.truncf %387 : vector<2x32xf32> to vector<2x32xbf16>
    %389 = arith.index_cast %c7_i32_111 : i32 to index
    %c0_120 = arith.constant 0 : index
    %c0_121 = arith.constant 0 : index
    %390 = vector.load %arg4[%389, %c0_120, %c0_121] : memref<8x2x64xbf16, #tpu.memory_space<vmem>>, vector<1x2x32xbf16>
    %391 = vector.shape_cast %390 : vector<1x2x32xbf16> to vector<2x32xbf16>
    %392 = vector.shape_cast %388 : vector<2x32xbf16> to vector<1x2x32xbf16>
    tpu.vector_store %arg4[%389, %c0_120, %c0_121], %392 {strides = array<i32>} : memref<8x2x64xbf16, #tpu.memory_space<vmem>>, vector<1x2x32xbf16>,
    %393 = vector.extract_strided_slice %386 {offsets = [2, 0], sizes = [2, 32], strides = [1, 1]} : vector<4x32xf32> to vector<2x32xf32>
    %394 = arith.truncf %393 : vector<2x32xf32> to vector<2x32xbf16>
    %395 = arith.index_cast %354 : i32 to index
    %c0_122 = arith.constant 0 : index
    %c32_123 = arith.constant 32 : index
    %396 = vector.load %arg4[%395, %c0_122, %c32_123] : memref<8x2x64xbf16, #tpu.memory_space<vmem>>, vector<1x2x32xbf16>
    %397 = vector.shape_cast %396 : vector<1x2x32xbf16> to vector<2x32xbf16>
    %398 = vector.shape_cast %394 : vector<2x32xbf16> to vector<1x2x32xbf16>
    tpu.vector_store %arg4[%395, %c0_122, %c32_123], %398 {strides = array<i32>} : memref<8x2x64xbf16, #tpu.memory_space<vmem>>, vector<1x2x32xbf16>,
    %c8_i32 = arith.constant 8 : i32
    return
  }
}

module attributes {stable_mosaic.version = 11 : i64} {
  func.func @kernel(%arg0: memref<16x128xbf16, #tpu.memory_space<vmem>>, %arg1: memref<5x128x128xbf16, #tpu.memory_space<vmem>>, %arg2: memref<1x128xf32, #tpu.memory_space<vmem>>, %arg3: memref<16x128xbf16, #tpu.memory_space<vmem>>, %arg4: memref<24x128xbf16, #tpu.memory_space<vmem>>) attributes {dimension_semantics = [], scalar_prefetch = 0 : i64, scratch_operands = 1 : i64, tpu.core_type = #tpu.core_type<tc>} {
    %cst = arith.constant 0.000000e+00 : bf16
    %0 = vector.broadcast %cst : bf16 to vector<4x128xbf16>
    %c0 = arith.constant 0 : index
    %c0_0 = arith.constant 0 : index
    %1 = vector.load %arg4[%c0, %c0_0] : memref<24x128xbf16, #tpu.memory_space<vmem>>, vector<4x128xbf16>
    tpu.vector_store %arg4[%c0, %c0_0], %0 {strides = array<i32>} : memref<24x128xbf16, #tpu.memory_space<vmem>>, vector<4x128xbf16>,
    %cst_1 = arith.constant 0.000000e+00 : bf16
    %2 = vector.broadcast %cst_1 : bf16 to vector<4x128xbf16>
    %c20 = arith.constant 20 : index
    %c0_2 = arith.constant 0 : index
    %3 = vector.load %arg4[%c20, %c0_2] : memref<24x128xbf16, #tpu.memory_space<vmem>>, vector<4x128xbf16>
    tpu.vector_store %arg4[%c20, %c0_2], %2 {strides = array<i32>} : memref<24x128xbf16, #tpu.memory_space<vmem>>, vector<4x128xbf16>,
    %c0_3 = arith.constant 0 : index
    %c0_4 = arith.constant 0 : index
    %4 = vector.load %arg0[%c0_3, %c0_4] : memref<16x128xbf16, #tpu.memory_space<vmem>>, vector<16x128xbf16>
    %c4 = arith.constant 4 : index
    %c0_5 = arith.constant 0 : index
    %5 = vector.load %arg4[%c4, %c0_5] : memref<24x128xbf16, #tpu.memory_space<vmem>>, vector<16x128xbf16>
    tpu.vector_store %arg4[%c4, %c0_5], %4 {strides = array<i32>} : memref<24x128xbf16, #tpu.memory_space<vmem>>, vector<16x128xbf16>,
    %cst_6 = arith.constant 0.000000e+00 : f32
    %6 = vector.broadcast %cst_6 : f32 to vector<16x128xf32>
    %c0_7 = arith.constant 0 : index
    %c0_8 = arith.constant 0 : index
    %7 = vector.load %arg4[%c0_7, %c0_8] : memref<24x128xbf16, #tpu.memory_space<vmem>>, vector<16x128xbf16>
    %c0_9 = arith.constant 0 : index
    %c0_10 = arith.constant 0 : index
    %c0_11 = arith.constant 0 : index
    %8 = vector.load %arg1[%c0_9, %c0_10, %c0_11] : memref<5x128x128xbf16, #tpu.memory_space<vmem>>, vector<1x128x128xbf16>
    %9 = vector.shape_cast %8 : vector<1x128x128xbf16> to vector<128x128xbf16>
    %cst_12 = arith.constant dense<0.000000e+00> : vector<16x128xf32>
    %10 = tpu.matmul %7, %9, %cst_12 {dimension_numbers = #tpu.dot_dimension_numbers<[1], [0], [0], [1], [0, 0, 1, 1], [], []>} : vector<16x128xbf16>, vector<128x128xbf16>, vector<16x128xf32> -> vector<16x128xf32>
    %11 = arith.addf %6, %10 : vector<16x128xf32>
    %c2 = arith.constant 2 : index
    %c0_13 = arith.constant 0 : index
    %12 = vector.load %arg4[%c2, %c0_13] : memref<24x128xbf16, #tpu.memory_space<vmem>>, vector<16x128xbf16>
    %c1 = arith.constant 1 : index
    %c0_14 = arith.constant 0 : index
    %c0_15 = arith.constant 0 : index
    %13 = vector.load %arg1[%c1, %c0_14, %c0_15] : memref<5x128x128xbf16, #tpu.memory_space<vmem>>, vector<1x128x128xbf16>
    %14 = vector.shape_cast %13 : vector<1x128x128xbf16> to vector<128x128xbf16>
    %cst_16 = arith.constant dense<0.000000e+00> : vector<16x128xf32>
    %15 = tpu.matmul %12, %14, %cst_16 {dimension_numbers = #tpu.dot_dimension_numbers<[1], [0], [0], [1], [0, 0, 1, 1], [], []>} : vector<16x128xbf16>, vector<128x128xbf16>, vector<16x128xf32> -> vector<16x128xf32>
    %16 = arith.addf %11, %15 : vector<16x128xf32>
    %c4_17 = arith.constant 4 : index
    %c0_18 = arith.constant 0 : index
    %17 = vector.load %arg4[%c4_17, %c0_18] : memref<24x128xbf16, #tpu.memory_space<vmem>>, vector<16x128xbf16>
    %c2_19 = arith.constant 2 : index
    %c0_20 = arith.constant 0 : index
    %c0_21 = arith.constant 0 : index
    %18 = vector.load %arg1[%c2_19, %c0_20, %c0_21] : memref<5x128x128xbf16, #tpu.memory_space<vmem>>, vector<1x128x128xbf16>
    %19 = vector.shape_cast %18 : vector<1x128x128xbf16> to vector<128x128xbf16>
    %cst_22 = arith.constant dense<0.000000e+00> : vector<16x128xf32>
    %20 = tpu.matmul %17, %19, %cst_22 {dimension_numbers = #tpu.dot_dimension_numbers<[1], [0], [0], [1], [0, 0, 1, 1], [], []>} : vector<16x128xbf16>, vector<128x128xbf16>, vector<16x128xf32> -> vector<16x128xf32>
    %21 = arith.addf %16, %20 : vector<16x128xf32>
    %c6 = arith.constant 6 : index
    %c0_23 = arith.constant 0 : index
    %22 = vector.load %arg4[%c6, %c0_23] : memref<24x128xbf16, #tpu.memory_space<vmem>>, vector<16x128xbf16>
    %c3 = arith.constant 3 : index
    %c0_24 = arith.constant 0 : index
    %c0_25 = arith.constant 0 : index
    %23 = vector.load %arg1[%c3, %c0_24, %c0_25] : memref<5x128x128xbf16, #tpu.memory_space<vmem>>, vector<1x128x128xbf16>
    %24 = vector.shape_cast %23 : vector<1x128x128xbf16> to vector<128x128xbf16>
    %cst_26 = arith.constant dense<0.000000e+00> : vector<16x128xf32>
    %25 = tpu.matmul %22, %24, %cst_26 {dimension_numbers = #tpu.dot_dimension_numbers<[1], [0], [0], [1], [0, 0, 1, 1], [], []>} : vector<16x128xbf16>, vector<128x128xbf16>, vector<16x128xf32> -> vector<16x128xf32>
    %26 = arith.addf %21, %25 : vector<16x128xf32>
    %c8 = arith.constant 8 : index
    %c0_27 = arith.constant 0 : index
    %27 = vector.load %arg4[%c8, %c0_27] : memref<24x128xbf16, #tpu.memory_space<vmem>>, vector<16x128xbf16>
    %c4_28 = arith.constant 4 : index
    %c0_29 = arith.constant 0 : index
    %c0_30 = arith.constant 0 : index
    %28 = vector.load %arg1[%c4_28, %c0_29, %c0_30] : memref<5x128x128xbf16, #tpu.memory_space<vmem>>, vector<1x128x128xbf16>
    %29 = vector.shape_cast %28 : vector<1x128x128xbf16> to vector<128x128xbf16>
    %cst_31 = arith.constant dense<0.000000e+00> : vector<16x128xf32>
    %30 = tpu.matmul %27, %29, %cst_31 {dimension_numbers = #tpu.dot_dimension_numbers<[1], [0], [0], [1], [0, 0, 1, 1], [], []>} : vector<16x128xbf16>, vector<128x128xbf16>, vector<16x128xf32> -> vector<16x128xf32>
    %31 = arith.addf %26, %30 : vector<16x128xf32>
    %c0_32 = arith.constant 0 : index
    %c0_33 = arith.constant 0 : index
    %32 = vector.load %arg2[%c0_32, %c0_33] : memref<1x128xf32, #tpu.memory_space<vmem>>, vector<1x128xf32>
    %33 = vector.broadcast %32 : vector<1x128xf32> to vector<16x128xf32>
    %34 = arith.addf %31, %33 : vector<16x128xf32>
    %35 = arith.truncf %34 : vector<16x128xf32> to vector<16x128xbf16>
    %c0_34 = arith.constant 0 : index
    %c0_35 = arith.constant 0 : index
    %36 = vector.load %arg3[%c0_34, %c0_35] : memref<16x128xbf16, #tpu.memory_space<vmem>>, vector<16x128xbf16>
    tpu.vector_store %arg3[%c0_34, %c0_35], %35 {strides = array<i32>} : memref<16x128xbf16, #tpu.memory_space<vmem>>, vector<16x128xbf16>,
    return
  }
}

module attributes {stable_mosaic.version = 11 : i64} {
  func.func @_bilstm_layer_kernel(%arg0: memref<8x2x64xbf16, #tpu.memory_space<vmem>>, %arg1: memref<2x64x128xbf16, #tpu.memory_space<vmem>>, %arg2: memref<64x128xbf16, #tpu.memory_space<vmem>>, %arg3: memref<2x1x128xf32, #tpu.memory_space<vmem>>, %arg4: memref<8x2x64xbf16, #tpu.memory_space<vmem>>, %arg5: memref<8x2x128xbf16, #tpu.memory_space<vmem>>, %arg6: memref<8x2x128xbf16, #tpu.memory_space<vmem>>) attributes {dimension_semantics = [], scalar_prefetch = 0 : i64, scratch_operands = 2 : i64, tpu.core_type = #tpu.core_type<tc>} {
    %c0 = arith.constant 0 : index
    %c0_0 = arith.constant 0 : index
    %c0_1 = arith.constant 0 : index
    %0 = vector.load %arg0[%c0, %c0_0, %c0_1] : memref<8x2x64xbf16, #tpu.memory_space<vmem>>, vector<8x2x64xbf16>
    %c0_2 = arith.constant 0 : index
    %c0_3 = arith.constant 0 : index
    %c0_4 = arith.constant 0 : index
    %1 = vector.load %arg1[%c0_2, %c0_3, %c0_4] : memref<2x64x128xbf16, #tpu.memory_space<vmem>>, vector<1x64x128xbf16>
    %2 = vector.shape_cast %1 : vector<1x64x128xbf16> to vector<64x128xbf16>
    %cst = arith.constant dense<0.000000e+00> : vector<8x2x128xf32>
    %3 = tpu.matmul %0, %2, %cst {dimension_numbers = #tpu.dot_dimension_numbers<[2], [0], [0, 1], [1], [0, 0, 0, 1, 1, 1], [], []>} : vector<8x2x64xbf16>, vector<64x128xbf16>, vector<8x2x128xf32> -> vector<8x2x128xf32>
    %c0_5 = arith.constant 0 : index
    %c0_6 = arith.constant 0 : index
    %c0_7 = arith.constant 0 : index
    %4 = vector.load %arg3[%c0_5, %c0_6, %c0_7] : memref<2x1x128xf32, #tpu.memory_space<vmem>>, vector<1x1x128xf32>
    %5 = vector.shape_cast %4 : vector<1x1x128xf32> to vector<1x128xf32>
    %6 = vector.shape_cast %5 : vector<1x128xf32> to vector<1x1x128xf32>
    %7 = vector.broadcast %6 : vector<1x1x128xf32> to vector<8x2x128xf32>
    %8 = arith.addf %3, %7 : vector<8x2x128xf32>
    %9 = arith.truncf %8 : vector<8x2x128xf32> to vector<8x2x128xbf16>
    %c0_8 = arith.constant 0 : index
    %c0_9 = arith.constant 0 : index
    %c0_10 = arith.constant 0 : index
    %10 = vector.load %arg5[%c0_8, %c0_9, %c0_10] : memref<8x2x128xbf16, #tpu.memory_space<vmem>>, vector<8x2x128xbf16>
    tpu.vector_store %arg5[%c0_8, %c0_9, %c0_10], %9 {strides = array<i32>} : memref<8x2x128xbf16, #tpu.memory_space<vmem>>, vector<8x2x128xbf16>,
    %c1 = arith.constant 1 : index
    %c0_11 = arith.constant 0 : index
    %c0_12 = arith.constant 0 : index
    %11 = vector.load %arg1[%c1, %c0_11, %c0_12] : memref<2x64x128xbf16, #tpu.memory_space<vmem>>, vector<1x64x128xbf16>
    %12 = vector.shape_cast %11 : vector<1x64x128xbf16> to vector<64x128xbf16>
    %cst_13 = arith.constant dense<0.000000e+00> : vector<8x2x128xf32>
    %13 = tpu.matmul %0, %12, %cst_13 {dimension_numbers = #tpu.dot_dimension_numbers<[2], [0], [0, 1], [1], [0, 0, 0, 1, 1, 1], [], []>} : vector<8x2x64xbf16>, vector<64x128xbf16>, vector<8x2x128xf32> -> vector<8x2x128xf32>
    %c1_14 = arith.constant 1 : index
    %c0_15 = arith.constant 0 : index
    %c0_16 = arith.constant 0 : index
    %14 = vector.load %arg3[%c1_14, %c0_15, %c0_16] : memref<2x1x128xf32, #tpu.memory_space<vmem>>, vector<1x1x128xf32>
    %15 = vector.shape_cast %14 : vector<1x1x128xf32> to vector<1x128xf32>
    %16 = vector.shape_cast %15 : vector<1x128xf32> to vector<1x1x128xf32>
    %17 = vector.broadcast %16 : vector<1x1x128xf32> to vector<8x2x128xf32>
    %18 = arith.addf %13, %17 : vector<8x2x128xf32>
    %19 = arith.truncf %18 : vector<8x2x128xf32> to vector<8x2x128xbf16>
    %c0_17 = arith.constant 0 : index
    %c0_18 = arith.constant 0 : index
    %c0_19 = arith.constant 0 : index
    %20 = vector.load %arg6[%c0_17, %c0_18, %c0_19] : memref<8x2x128xbf16, #tpu.memory_space<vmem>>, vector<8x2x128xbf16>
    tpu.vector_store %arg6[%c0_17, %c0_18, %c0_19], %19 {strides = array<i32>} : memref<8x2x128xbf16, #tpu.memory_space<vmem>>, vector<8x2x128xbf16>,
    %c0_20 = arith.constant 0 : index
    %c0_21 = arith.constant 0 : index
    %21 = vector.load %arg2[%c0_20, %c0_21] : memref<64x128xbf16, #tpu.memory_space<vmem>>, vector<64x128xbf16>
    %22 = tpu.iota {dimensions = array<i32: 1>} : vector<1x128xi32>
    %c64_i32 = arith.constant 64 : i32
    %23 = vector.broadcast %c64_i32 : i32 to vector<1x128xi32>
    %24 = arith.cmpi sge, %22, %23 : vector<1x128xi32>
    %c96_i32 = arith.constant 96 : i32
    %25 = vector.broadcast %c96_i32 : i32 to vector<1x128xi32>
    %26 = arith.cmpi slt, %22, %25 : vector<1x128xi32>
    %27 = arith.andi %24, %26 : vector<1x128xi1>
    %cst_22 = arith.constant 1.000000e+00 : f32
    %cst_23 = arith.constant 5.000000e-01 : f32
    %28 = vector.broadcast %cst_22 : f32 to vector<1x128xf32>
    %29 = vector.broadcast %cst_23 : f32 to vector<1x128xf32>
    %30 = arith.select %27, %28, %29 : vector<1x128xi1>, vector<1x128xf32>
    %cst_24 = arith.constant 0.000000e+00 : f32
    %cst_25 = arith.constant 5.000000e-01 : f32
    %31 = vector.broadcast %cst_24 : f32 to vector<1x128xf32>
    %32 = vector.broadcast %cst_25 : f32 to vector<1x128xf32>
    %33 = arith.select %27, %31, %32 : vector<1x128xi1>, vector<1x128xf32>
    %34 = tpu.iota {dimensions = array<i32: 0>} : vector<4x32xi32>
    %c2_i32 = arith.constant 2 : i32
    %35 = vector.broadcast %c2_i32 : i32 to vector<4x32xi32>
    %36 = arith.cmpi slt, %34, %35 : vector<4x32xi32>
    %cst_26 = arith.constant 0.000000e+00 : f32
    %37 = vector.broadcast %cst_26 : f32 to vector<4x32xf32>
    %cst_27 = arith.constant 0.000000e+00 : f32
    %38 = vector.broadcast %cst_27 : f32 to vector<4x32xf32>
    %c0_i32 = arith.constant 0 : i32
    %c7_i32 = arith.constant 7 : i32
    %39 = arith.subi %c7_i32, %c0_i32 : i32
    %cst_28 = arith.constant 0.000000e+00 : f32
    %40 = vector.broadcast %cst_28 : f32 to vector<4x32xf32>
    %41 = arith.select %36, %37, %40 : vector<4x32xi1>, vector<4x32xf32>
    %cst_29 = arith.constant 0.000000e+00 : f32
    %42 = vector.broadcast %cst_29 : f32 to vector<4x32xf32>
    %43 = arith.select %36, %42, %37 : vector<4x32xi1>, vector<4x32xf32>
    %44 = tpu.concatenate %41, %43 in 1 : vector<4x32xf32>, vector<4x32xf32> -> vector<4x64xf32>
    %45 = arith.truncf %44 : vector<4x64xf32> to vector<4x64xbf16>
    %cst_30 = arith.constant dense<0.000000e+00> : vector<4x128xf32>
    %46 = tpu.matmul %45, %21, %cst_30 {dimension_numbers = #tpu.dot_dimension_numbers<[1], [0], [0], [1], [0, 0, 1, 1], [], []>} : vector<4x64xbf16>, vector<64x128xbf16>, vector<4x128xf32> -> vector<4x128xf32>
    %47 = arith.index_cast %c0_i32 : i32 to index
    %c0_31 = arith.constant 0 : index
    %c0_32 = arith.constant 0 : index
    %48 = vector.load %arg5[%47, %c0_31, %c0_32] : memref<8x2x128xbf16, #tpu.memory_space<vmem>>, vector<1x2x128xbf16>
    %49 = vector.shape_cast %48 : vector<1x2x128xbf16> to vector<2x128xbf16>
    %50 = arith.index_cast %39 : i32 to index
    %c0_33 = arith.constant 0 : index
    %c0_34 = arith.constant 0 : index
    %51 = vector.load %arg6[%50, %c0_33, %c0_34] : memref<8x2x128xbf16, #tpu.memory_space<vmem>>, vector<1x2x128xbf16>
    %52 = vector.shape_cast %51 : vector<1x2x128xbf16> to vector<2x128xbf16>
    %53 = tpu.concatenate %49, %52 in 0 : vector<2x128xbf16>, vector<2x128xbf16> -> vector<4x128xbf16>
    %54 = arith.extf %53 : vector<4x128xbf16> to vector<4x128xf32>
    %55 = arith.addf %46, %54 : vector<4x128xf32>
    %56 = vector.broadcast %30 : vector<1x128xf32> to vector<4x128xf32>
    %57 = arith.mulf %56, %55 : vector<4x128xf32>
    %58 = math.tanh %57 : vector<4x128xf32>
    %59 = vector.broadcast %30 : vector<1x128xf32> to vector<4x128xf32>
    %60 = arith.mulf %59, %58 : vector<4x128xf32>
    %61 = vector.broadcast %33 : vector<1x128xf32> to vector<4x128xf32>
    %62 = arith.addf %60, %61 : vector<4x128xf32>
    %63 = vector.extract_strided_slice %62 {offsets = [0, 0], sizes = [4, 32], strides = [1, 1]} : vector<4x128xf32> to vector<4x32xf32>
    %64 = vector.extract_strided_slice %62 {offsets = [0, 32], sizes = [4, 32], strides = [1, 1]} : vector<4x128xf32> to vector<4x32xf32>
    %65 = vector.extract_strided_slice %62 {offsets = [0, 64], sizes = [4, 32], strides = [1, 1]} : vector<4x128xf32> to vector<4x32xf32>
    %66 = vector.extract_strided_slice %62 {offsets = [0, 96], sizes = [4, 32], strides = [1, 1]} : vector<4x128xf32> to vector<4x32xf32>
    %67 = arith.mulf %64, %38 : vector<4x32xf32>
    %68 = arith.mulf %63, %65 : vector<4x32xf32>
    %69 = arith.addf %67, %68 : vector<4x32xf32>
    %70 = math.tanh %69 : vector<4x32xf32>
    %71 = arith.mulf %66, %70 : vector<4x32xf32>
    %72 = vector.extract_strided_slice %71 {offsets = [0, 0], sizes = [2, 32], strides = [1, 1]} : vector<4x32xf32> to vector<2x32xf32>
    %73 = arith.truncf %72 : vector<2x32xf32> to vector<2x32xbf16>
    %74 = arith.index_cast %c0_i32 : i32 to index
    %c0_35 = arith.constant 0 : index
    %c0_36 = arith.constant 0 : index
    %75 = vector.load %arg4[%74, %c0_35, %c0_36] : memref<8x2x64xbf16, #tpu.memory_space<vmem>>, vector<1x2x32xbf16>
    %76 = vector.shape_cast %75 : vector<1x2x32xbf16> to vector<2x32xbf16>
    %77 = vector.shape_cast %73 : vector<2x32xbf16> to vector<1x2x32xbf16>
    tpu.vector_store %arg4[%74, %c0_35, %c0_36], %77 {strides = array<i32>} : memref<8x2x64xbf16, #tpu.memory_space<vmem>>, vector<1x2x32xbf16>,
    %78 = vector.extract_strided_slice %71 {offsets = [2, 0], sizes = [2, 32], strides = [1, 1]} : vector<4x32xf32> to vector<2x32xf32>
    %79 = arith.truncf %78 : vector<2x32xf32> to vector<2x32xbf16>
    %80 = arith.index_cast %39 : i32 to index
    %c0_37 = arith.constant 0 : index
    %c32 = arith.constant 32 : index
    %81 = vector.load %arg4[%80, %c0_37, %c32] : memref<8x2x64xbf16, #tpu.memory_space<vmem>>, vector<1x2x32xbf16>
    %82 = vector.shape_cast %81 : vector<1x2x32xbf16> to vector<2x32xbf16>
    %83 = vector.shape_cast %79 : vector<2x32xbf16> to vector<1x2x32xbf16>
    tpu.vector_store %arg4[%80, %c0_37, %c32], %83 {strides = array<i32>} : memref<8x2x64xbf16, #tpu.memory_space<vmem>>, vector<1x2x32xbf16>,
    %c1_i32 = arith.constant 1 : i32
    %c7_i32_38 = arith.constant 7 : i32
    %84 = arith.subi %c7_i32_38, %c1_i32 : i32
    %cst_39 = arith.constant 0.000000e+00 : f32
    %85 = vector.broadcast %cst_39 : f32 to vector<4x32xf32>
    %86 = arith.select %36, %71, %85 : vector<4x32xi1>, vector<4x32xf32>
    %cst_40 = arith.constant 0.000000e+00 : f32
    %87 = vector.broadcast %cst_40 : f32 to vector<4x32xf32>
    %88 = arith.select %36, %87, %71 : vector<4x32xi1>, vector<4x32xf32>
    %89 = tpu.concatenate %86, %88 in 1 : vector<4x32xf32>, vector<4x32xf32> -> vector<4x64xf32>
    %90 = arith.truncf %89 : vector<4x64xf32> to vector<4x64xbf16>
    %cst_41 = arith.constant dense<0.000000e+00> : vector<4x128xf32>
    %91 = tpu.matmul %90, %21, %cst_41 {dimension_numbers = #tpu.dot_dimension_numbers<[1], [0], [0], [1], [0, 0, 1, 1], [], []>} : vector<4x64xbf16>, vector<64x128xbf16>, vector<4x128xf32> -> vector<4x128xf32>
    %92 = arith.index_cast %c1_i32 : i32 to index
    %c0_42 = arith.constant 0 : index
    %c0_43 = arith.constant 0 : index
    %93 = vector.load %arg5[%92, %c0_42, %c0_43] : memref<8x2x128xbf16, #tpu.memory_space<vmem>>, vector<1x2x128xbf16>
    %94 = vector.shape_cast %93 : vector<1x2x128xbf16> to vector<2x128xbf16>
    %95 = arith.index_cast %84 : i32 to index
    %c0_44 = arith.constant 0 : index
    %c0_45 = arith.constant 0 : index
    %96 = vector.load %arg6[%95, %c0_44, %c0_45] : memref<8x2x128xbf16, #tpu.memory_space<vmem>>, vector<1x2x128xbf16>
    %97 = vector.shape_cast %96 : vector<1x2x128xbf16> to vector<2x128xbf16>
    %98 = tpu.concatenate %94, %97 in 0 : vector<2x128xbf16>, vector<2x128xbf16> -> vector<4x128xbf16>
    %99 = arith.extf %98 : vector<4x128xbf16> to vector<4x128xf32>
    %100 = arith.addf %91, %99 : vector<4x128xf32>
    %101 = vector.broadcast %30 : vector<1x128xf32> to vector<4x128xf32>
    %102 = arith.mulf %101, %100 : vector<4x128xf32>
    %103 = math.tanh %102 : vector<4x128xf32>
    %104 = vector.broadcast %30 : vector<1x128xf32> to vector<4x128xf32>
    %105 = arith.mulf %104, %103 : vector<4x128xf32>
    %106 = vector.broadcast %33 : vector<1x128xf32> to vector<4x128xf32>
    %107 = arith.addf %105, %106 : vector<4x128xf32>
    %108 = vector.extract_strided_slice %107 {offsets = [0, 0], sizes = [4, 32], strides = [1, 1]} : vector<4x128xf32> to vector<4x32xf32>
    %109 = vector.extract_strided_slice %107 {offsets = [0, 32], sizes = [4, 32], strides = [1, 1]} : vector<4x128xf32> to vector<4x32xf32>
    %110 = vector.extract_strided_slice %107 {offsets = [0, 64], sizes = [4, 32], strides = [1, 1]} : vector<4x128xf32> to vector<4x32xf32>
    %111 = vector.extract_strided_slice %107 {offsets = [0, 96], sizes = [4, 32], strides = [1, 1]} : vector<4x128xf32> to vector<4x32xf32>
    %112 = arith.mulf %109, %69 : vector<4x32xf32>
    %113 = arith.mulf %108, %110 : vector<4x32xf32>
    %114 = arith.addf %112, %113 : vector<4x32xf32>
    %115 = math.tanh %114 : vector<4x32xf32>
    %116 = arith.mulf %111, %115 : vector<4x32xf32>
    %117 = vector.extract_strided_slice %116 {offsets = [0, 0], sizes = [2, 32], strides = [1, 1]} : vector<4x32xf32> to vector<2x32xf32>
    %118 = arith.truncf %117 : vector<2x32xf32> to vector<2x32xbf16>
    %119 = arith.index_cast %c1_i32 : i32 to index
    %c0_46 = arith.constant 0 : index
    %c0_47 = arith.constant 0 : index
    %120 = vector.load %arg4[%119, %c0_46, %c0_47] : memref<8x2x64xbf16, #tpu.memory_space<vmem>>, vector<1x2x32xbf16>
    %121 = vector.shape_cast %120 : vector<1x2x32xbf16> to vector<2x32xbf16>
    %122 = vector.shape_cast %118 : vector<2x32xbf16> to vector<1x2x32xbf16>
    tpu.vector_store %arg4[%119, %c0_46, %c0_47], %122 {strides = array<i32>} : memref<8x2x64xbf16, #tpu.memory_space<vmem>>, vector<1x2x32xbf16>,
    %123 = vector.extract_strided_slice %116 {offsets = [2, 0], sizes = [2, 32], strides = [1, 1]} : vector<4x32xf32> to vector<2x32xf32>
    %124 = arith.truncf %123 : vector<2x32xf32> to vector<2x32xbf16>
    %125 = arith.index_cast %84 : i32 to index
    %c0_48 = arith.constant 0 : index
    %c32_49 = arith.constant 32 : index
    %126 = vector.load %arg4[%125, %c0_48, %c32_49] : memref<8x2x64xbf16, #tpu.memory_space<vmem>>, vector<1x2x32xbf16>
    %127 = vector.shape_cast %126 : vector<1x2x32xbf16> to vector<2x32xbf16>
    %128 = vector.shape_cast %124 : vector<2x32xbf16> to vector<1x2x32xbf16>
    tpu.vector_store %arg4[%125, %c0_48, %c32_49], %128 {strides = array<i32>} : memref<8x2x64xbf16, #tpu.memory_space<vmem>>, vector<1x2x32xbf16>,
    %c2_i32_50 = arith.constant 2 : i32
    %c7_i32_51 = arith.constant 7 : i32
    %129 = arith.subi %c7_i32_51, %c2_i32_50 : i32
    %cst_52 = arith.constant 0.000000e+00 : f32
    %130 = vector.broadcast %cst_52 : f32 to vector<4x32xf32>
    %131 = arith.select %36, %116, %130 : vector<4x32xi1>, vector<4x32xf32>
    %cst_53 = arith.constant 0.000000e+00 : f32
    %132 = vector.broadcast %cst_53 : f32 to vector<4x32xf32>
    %133 = arith.select %36, %132, %116 : vector<4x32xi1>, vector<4x32xf32>
    %134 = tpu.concatenate %131, %133 in 1 : vector<4x32xf32>, vector<4x32xf32> -> vector<4x64xf32>
    %135 = arith.truncf %134 : vector<4x64xf32> to vector<4x64xbf16>
    %cst_54 = arith.constant dense<0.000000e+00> : vector<4x128xf32>
    %136 = tpu.matmul %135, %21, %cst_54 {dimension_numbers = #tpu.dot_dimension_numbers<[1], [0], [0], [1], [0, 0, 1, 1], [], []>} : vector<4x64xbf16>, vector<64x128xbf16>, vector<4x128xf32> -> vector<4x128xf32>
    %137 = arith.index_cast %c2_i32_50 : i32 to index
    %c0_55 = arith.constant 0 : index
    %c0_56 = arith.constant 0 : index
    %138 = vector.load %arg5[%137, %c0_55, %c0_56] : memref<8x2x128xbf16, #tpu.memory_space<vmem>>, vector<1x2x128xbf16>
    %139 = vector.shape_cast %138 : vector<1x2x128xbf16> to vector<2x128xbf16>
    %140 = arith.index_cast %129 : i32 to index
    %c0_57 = arith.constant 0 : index
    %c0_58 = arith.constant 0 : index
    %141 = vector.load %arg6[%140, %c0_57, %c0_58] : memref<8x2x128xbf16, #tpu.memory_space<vmem>>, vector<1x2x128xbf16>
    %142 = vector.shape_cast %141 : vector<1x2x128xbf16> to vector<2x128xbf16>
    %143 = tpu.concatenate %139, %142 in 0 : vector<2x128xbf16>, vector<2x128xbf16> -> vector<4x128xbf16>
    %144 = arith.extf %143 : vector<4x128xbf16> to vector<4x128xf32>
    %145 = arith.addf %136, %144 : vector<4x128xf32>
    %146 = vector.broadcast %30 : vector<1x128xf32> to vector<4x128xf32>
    %147 = arith.mulf %146, %145 : vector<4x128xf32>
    %148 = math.tanh %147 : vector<4x128xf32>
    %149 = vector.broadcast %30 : vector<1x128xf32> to vector<4x128xf32>
    %150 = arith.mulf %149, %148 : vector<4x128xf32>
    %151 = vector.broadcast %33 : vector<1x128xf32> to vector<4x128xf32>
    %152 = arith.addf %150, %151 : vector<4x128xf32>
    %153 = vector.extract_strided_slice %152 {offsets = [0, 0], sizes = [4, 32], strides = [1, 1]} : vector<4x128xf32> to vector<4x32xf32>
    %154 = vector.extract_strided_slice %152 {offsets = [0, 32], sizes = [4, 32], strides = [1, 1]} : vector<4x128xf32> to vector<4x32xf32>
    %155 = vector.extract_strided_slice %152 {offsets = [0, 64], sizes = [4, 32], strides = [1, 1]} : vector<4x128xf32> to vector<4x32xf32>
    %156 = vector.extract_strided_slice %152 {offsets = [0, 96], sizes = [4, 32], strides = [1, 1]} : vector<4x128xf32> to vector<4x32xf32>
    %157 = arith.mulf %154, %114 : vector<4x32xf32>
    %158 = arith.mulf %153, %155 : vector<4x32xf32>
    %159 = arith.addf %157, %158 : vector<4x32xf32>
    %160 = math.tanh %159 : vector<4x32xf32>
    %161 = arith.mulf %156, %160 : vector<4x32xf32>
    %162 = vector.extract_strided_slice %161 {offsets = [0, 0], sizes = [2, 32], strides = [1, 1]} : vector<4x32xf32> to vector<2x32xf32>
    %163 = arith.truncf %162 : vector<2x32xf32> to vector<2x32xbf16>
    %164 = arith.index_cast %c2_i32_50 : i32 to index
    %c0_59 = arith.constant 0 : index
    %c0_60 = arith.constant 0 : index
    %165 = vector.load %arg4[%164, %c0_59, %c0_60] : memref<8x2x64xbf16, #tpu.memory_space<vmem>>, vector<1x2x32xbf16>
    %166 = vector.shape_cast %165 : vector<1x2x32xbf16> to vector<2x32xbf16>
    %167 = vector.shape_cast %163 : vector<2x32xbf16> to vector<1x2x32xbf16>
    tpu.vector_store %arg4[%164, %c0_59, %c0_60], %167 {strides = array<i32>} : memref<8x2x64xbf16, #tpu.memory_space<vmem>>, vector<1x2x32xbf16>,
    %168 = vector.extract_strided_slice %161 {offsets = [2, 0], sizes = [2, 32], strides = [1, 1]} : vector<4x32xf32> to vector<2x32xf32>
    %169 = arith.truncf %168 : vector<2x32xf32> to vector<2x32xbf16>
    %170 = arith.index_cast %129 : i32 to index
    %c0_61 = arith.constant 0 : index
    %c32_62 = arith.constant 32 : index
    %171 = vector.load %arg4[%170, %c0_61, %c32_62] : memref<8x2x64xbf16, #tpu.memory_space<vmem>>, vector<1x2x32xbf16>
    %172 = vector.shape_cast %171 : vector<1x2x32xbf16> to vector<2x32xbf16>
    %173 = vector.shape_cast %169 : vector<2x32xbf16> to vector<1x2x32xbf16>
    tpu.vector_store %arg4[%170, %c0_61, %c32_62], %173 {strides = array<i32>} : memref<8x2x64xbf16, #tpu.memory_space<vmem>>, vector<1x2x32xbf16>,
    %c3_i32 = arith.constant 3 : i32
    %c7_i32_63 = arith.constant 7 : i32
    %174 = arith.subi %c7_i32_63, %c3_i32 : i32
    %cst_64 = arith.constant 0.000000e+00 : f32
    %175 = vector.broadcast %cst_64 : f32 to vector<4x32xf32>
    %176 = arith.select %36, %161, %175 : vector<4x32xi1>, vector<4x32xf32>
    %cst_65 = arith.constant 0.000000e+00 : f32
    %177 = vector.broadcast %cst_65 : f32 to vector<4x32xf32>
    %178 = arith.select %36, %177, %161 : vector<4x32xi1>, vector<4x32xf32>
    %179 = tpu.concatenate %176, %178 in 1 : vector<4x32xf32>, vector<4x32xf32> -> vector<4x64xf32>
    %180 = arith.truncf %179 : vector<4x64xf32> to vector<4x64xbf16>
    %cst_66 = arith.constant dense<0.000000e+00> : vector<4x128xf32>
    %181 = tpu.matmul %180, %21, %cst_66 {dimension_numbers = #tpu.dot_dimension_numbers<[1], [0], [0], [1], [0, 0, 1, 1], [], []>} : vector<4x64xbf16>, vector<64x128xbf16>, vector<4x128xf32> -> vector<4x128xf32>
    %182 = arith.index_cast %c3_i32 : i32 to index
    %c0_67 = arith.constant 0 : index
    %c0_68 = arith.constant 0 : index
    %183 = vector.load %arg5[%182, %c0_67, %c0_68] : memref<8x2x128xbf16, #tpu.memory_space<vmem>>, vector<1x2x128xbf16>
    %184 = vector.shape_cast %183 : vector<1x2x128xbf16> to vector<2x128xbf16>
    %185 = arith.index_cast %174 : i32 to index
    %c0_69 = arith.constant 0 : index
    %c0_70 = arith.constant 0 : index
    %186 = vector.load %arg6[%185, %c0_69, %c0_70] : memref<8x2x128xbf16, #tpu.memory_space<vmem>>, vector<1x2x128xbf16>
    %187 = vector.shape_cast %186 : vector<1x2x128xbf16> to vector<2x128xbf16>
    %188 = tpu.concatenate %184, %187 in 0 : vector<2x128xbf16>, vector<2x128xbf16> -> vector<4x128xbf16>
    %189 = arith.extf %188 : vector<4x128xbf16> to vector<4x128xf32>
    %190 = arith.addf %181, %189 : vector<4x128xf32>
    %191 = vector.broadcast %30 : vector<1x128xf32> to vector<4x128xf32>
    %192 = arith.mulf %191, %190 : vector<4x128xf32>
    %193 = math.tanh %192 : vector<4x128xf32>
    %194 = vector.broadcast %30 : vector<1x128xf32> to vector<4x128xf32>
    %195 = arith.mulf %194, %193 : vector<4x128xf32>
    %196 = vector.broadcast %33 : vector<1x128xf32> to vector<4x128xf32>
    %197 = arith.addf %195, %196 : vector<4x128xf32>
    %198 = vector.extract_strided_slice %197 {offsets = [0, 0], sizes = [4, 32], strides = [1, 1]} : vector<4x128xf32> to vector<4x32xf32>
    %199 = vector.extract_strided_slice %197 {offsets = [0, 32], sizes = [4, 32], strides = [1, 1]} : vector<4x128xf32> to vector<4x32xf32>
    %200 = vector.extract_strided_slice %197 {offsets = [0, 64], sizes = [4, 32], strides = [1, 1]} : vector<4x128xf32> to vector<4x32xf32>
    %201 = vector.extract_strided_slice %197 {offsets = [0, 96], sizes = [4, 32], strides = [1, 1]} : vector<4x128xf32> to vector<4x32xf32>
    %202 = arith.mulf %199, %159 : vector<4x32xf32>
    %203 = arith.mulf %198, %200 : vector<4x32xf32>
    %204 = arith.addf %202, %203 : vector<4x32xf32>
    %205 = math.tanh %204 : vector<4x32xf32>
    %206 = arith.mulf %201, %205 : vector<4x32xf32>
    %207 = vector.extract_strided_slice %206 {offsets = [0, 0], sizes = [2, 32], strides = [1, 1]} : vector<4x32xf32> to vector<2x32xf32>
    %208 = arith.truncf %207 : vector<2x32xf32> to vector<2x32xbf16>
    %209 = arith.index_cast %c3_i32 : i32 to index
    %c0_71 = arith.constant 0 : index
    %c0_72 = arith.constant 0 : index
    %210 = vector.load %arg4[%209, %c0_71, %c0_72] : memref<8x2x64xbf16, #tpu.memory_space<vmem>>, vector<1x2x32xbf16>
    %211 = vector.shape_cast %210 : vector<1x2x32xbf16> to vector<2x32xbf16>
    %212 = vector.shape_cast %208 : vector<2x32xbf16> to vector<1x2x32xbf16>
    tpu.vector_store %arg4[%209, %c0_71, %c0_72], %212 {strides = array<i32>} : memref<8x2x64xbf16, #tpu.memory_space<vmem>>, vector<1x2x32xbf16>,
    %213 = vector.extract_strided_slice %206 {offsets = [2, 0], sizes = [2, 32], strides = [1, 1]} : vector<4x32xf32> to vector<2x32xf32>
    %214 = arith.truncf %213 : vector<2x32xf32> to vector<2x32xbf16>
    %215 = arith.index_cast %174 : i32 to index
    %c0_73 = arith.constant 0 : index
    %c32_74 = arith.constant 32 : index
    %216 = vector.load %arg4[%215, %c0_73, %c32_74] : memref<8x2x64xbf16, #tpu.memory_space<vmem>>, vector<1x2x32xbf16>
    %217 = vector.shape_cast %216 : vector<1x2x32xbf16> to vector<2x32xbf16>
    %218 = vector.shape_cast %214 : vector<2x32xbf16> to vector<1x2x32xbf16>
    tpu.vector_store %arg4[%215, %c0_73, %c32_74], %218 {strides = array<i32>} : memref<8x2x64xbf16, #tpu.memory_space<vmem>>, vector<1x2x32xbf16>,
    %c4_i32 = arith.constant 4 : i32
    %c7_i32_75 = arith.constant 7 : i32
    %219 = arith.subi %c7_i32_75, %c4_i32 : i32
    %cst_76 = arith.constant 0.000000e+00 : f32
    %220 = vector.broadcast %cst_76 : f32 to vector<4x32xf32>
    %221 = arith.select %36, %206, %220 : vector<4x32xi1>, vector<4x32xf32>
    %cst_77 = arith.constant 0.000000e+00 : f32
    %222 = vector.broadcast %cst_77 : f32 to vector<4x32xf32>
    %223 = arith.select %36, %222, %206 : vector<4x32xi1>, vector<4x32xf32>
    %224 = tpu.concatenate %221, %223 in 1 : vector<4x32xf32>, vector<4x32xf32> -> vector<4x64xf32>
    %225 = arith.truncf %224 : vector<4x64xf32> to vector<4x64xbf16>
    %cst_78 = arith.constant dense<0.000000e+00> : vector<4x128xf32>
    %226 = tpu.matmul %225, %21, %cst_78 {dimension_numbers = #tpu.dot_dimension_numbers<[1], [0], [0], [1], [0, 0, 1, 1], [], []>} : vector<4x64xbf16>, vector<64x128xbf16>, vector<4x128xf32> -> vector<4x128xf32>
    %227 = arith.index_cast %c4_i32 : i32 to index
    %c0_79 = arith.constant 0 : index
    %c0_80 = arith.constant 0 : index
    %228 = vector.load %arg5[%227, %c0_79, %c0_80] : memref<8x2x128xbf16, #tpu.memory_space<vmem>>, vector<1x2x128xbf16>
    %229 = vector.shape_cast %228 : vector<1x2x128xbf16> to vector<2x128xbf16>
    %230 = arith.index_cast %219 : i32 to index
    %c0_81 = arith.constant 0 : index
    %c0_82 = arith.constant 0 : index
    %231 = vector.load %arg6[%230, %c0_81, %c0_82] : memref<8x2x128xbf16, #tpu.memory_space<vmem>>, vector<1x2x128xbf16>
    %232 = vector.shape_cast %231 : vector<1x2x128xbf16> to vector<2x128xbf16>
    %233 = tpu.concatenate %229, %232 in 0 : vector<2x128xbf16>, vector<2x128xbf16> -> vector<4x128xbf16>
    %234 = arith.extf %233 : vector<4x128xbf16> to vector<4x128xf32>
    %235 = arith.addf %226, %234 : vector<4x128xf32>
    %236 = vector.broadcast %30 : vector<1x128xf32> to vector<4x128xf32>
    %237 = arith.mulf %236, %235 : vector<4x128xf32>
    %238 = math.tanh %237 : vector<4x128xf32>
    %239 = vector.broadcast %30 : vector<1x128xf32> to vector<4x128xf32>
    %240 = arith.mulf %239, %238 : vector<4x128xf32>
    %241 = vector.broadcast %33 : vector<1x128xf32> to vector<4x128xf32>
    %242 = arith.addf %240, %241 : vector<4x128xf32>
    %243 = vector.extract_strided_slice %242 {offsets = [0, 0], sizes = [4, 32], strides = [1, 1]} : vector<4x128xf32> to vector<4x32xf32>
    %244 = vector.extract_strided_slice %242 {offsets = [0, 32], sizes = [4, 32], strides = [1, 1]} : vector<4x128xf32> to vector<4x32xf32>
    %245 = vector.extract_strided_slice %242 {offsets = [0, 64], sizes = [4, 32], strides = [1, 1]} : vector<4x128xf32> to vector<4x32xf32>
    %246 = vector.extract_strided_slice %242 {offsets = [0, 96], sizes = [4, 32], strides = [1, 1]} : vector<4x128xf32> to vector<4x32xf32>
    %247 = arith.mulf %244, %204 : vector<4x32xf32>
    %248 = arith.mulf %243, %245 : vector<4x32xf32>
    %249 = arith.addf %247, %248 : vector<4x32xf32>
    %250 = math.tanh %249 : vector<4x32xf32>
    %251 = arith.mulf %246, %250 : vector<4x32xf32>
    %252 = vector.extract_strided_slice %251 {offsets = [0, 0], sizes = [2, 32], strides = [1, 1]} : vector<4x32xf32> to vector<2x32xf32>
    %253 = arith.truncf %252 : vector<2x32xf32> to vector<2x32xbf16>
    %254 = arith.index_cast %c4_i32 : i32 to index
    %c0_83 = arith.constant 0 : index
    %c0_84 = arith.constant 0 : index
    %255 = vector.load %arg4[%254, %c0_83, %c0_84] : memref<8x2x64xbf16, #tpu.memory_space<vmem>>, vector<1x2x32xbf16>
    %256 = vector.shape_cast %255 : vector<1x2x32xbf16> to vector<2x32xbf16>
    %257 = vector.shape_cast %253 : vector<2x32xbf16> to vector<1x2x32xbf16>
    tpu.vector_store %arg4[%254, %c0_83, %c0_84], %257 {strides = array<i32>} : memref<8x2x64xbf16, #tpu.memory_space<vmem>>, vector<1x2x32xbf16>,
    %258 = vector.extract_strided_slice %251 {offsets = [2, 0], sizes = [2, 32], strides = [1, 1]} : vector<4x32xf32> to vector<2x32xf32>
    %259 = arith.truncf %258 : vector<2x32xf32> to vector<2x32xbf16>
    %260 = arith.index_cast %219 : i32 to index
    %c0_85 = arith.constant 0 : index
    %c32_86 = arith.constant 32 : index
    %261 = vector.load %arg4[%260, %c0_85, %c32_86] : memref<8x2x64xbf16, #tpu.memory_space<vmem>>, vector<1x2x32xbf16>
    %262 = vector.shape_cast %261 : vector<1x2x32xbf16> to vector<2x32xbf16>
    %263 = vector.shape_cast %259 : vector<2x32xbf16> to vector<1x2x32xbf16>
    tpu.vector_store %arg4[%260, %c0_85, %c32_86], %263 {strides = array<i32>} : memref<8x2x64xbf16, #tpu.memory_space<vmem>>, vector<1x2x32xbf16>,
    %c5_i32 = arith.constant 5 : i32
    %c7_i32_87 = arith.constant 7 : i32
    %264 = arith.subi %c7_i32_87, %c5_i32 : i32
    %cst_88 = arith.constant 0.000000e+00 : f32
    %265 = vector.broadcast %cst_88 : f32 to vector<4x32xf32>
    %266 = arith.select %36, %251, %265 : vector<4x32xi1>, vector<4x32xf32>
    %cst_89 = arith.constant 0.000000e+00 : f32
    %267 = vector.broadcast %cst_89 : f32 to vector<4x32xf32>
    %268 = arith.select %36, %267, %251 : vector<4x32xi1>, vector<4x32xf32>
    %269 = tpu.concatenate %266, %268 in 1 : vector<4x32xf32>, vector<4x32xf32> -> vector<4x64xf32>
    %270 = arith.truncf %269 : vector<4x64xf32> to vector<4x64xbf16>
    %cst_90 = arith.constant dense<0.000000e+00> : vector<4x128xf32>
    %271 = tpu.matmul %270, %21, %cst_90 {dimension_numbers = #tpu.dot_dimension_numbers<[1], [0], [0], [1], [0, 0, 1, 1], [], []>} : vector<4x64xbf16>, vector<64x128xbf16>, vector<4x128xf32> -> vector<4x128xf32>
    %272 = arith.index_cast %c5_i32 : i32 to index
    %c0_91 = arith.constant 0 : index
    %c0_92 = arith.constant 0 : index
    %273 = vector.load %arg5[%272, %c0_91, %c0_92] : memref<8x2x128xbf16, #tpu.memory_space<vmem>>, vector<1x2x128xbf16>
    %274 = vector.shape_cast %273 : vector<1x2x128xbf16> to vector<2x128xbf16>
    %275 = arith.index_cast %264 : i32 to index
    %c0_93 = arith.constant 0 : index
    %c0_94 = arith.constant 0 : index
    %276 = vector.load %arg6[%275, %c0_93, %c0_94] : memref<8x2x128xbf16, #tpu.memory_space<vmem>>, vector<1x2x128xbf16>
    %277 = vector.shape_cast %276 : vector<1x2x128xbf16> to vector<2x128xbf16>
    %278 = tpu.concatenate %274, %277 in 0 : vector<2x128xbf16>, vector<2x128xbf16> -> vector<4x128xbf16>
    %279 = arith.extf %278 : vector<4x128xbf16> to vector<4x128xf32>
    %280 = arith.addf %271, %279 : vector<4x128xf32>
    %281 = vector.broadcast %30 : vector<1x128xf32> to vector<4x128xf32>
    %282 = arith.mulf %281, %280 : vector<4x128xf32>
    %283 = math.tanh %282 : vector<4x128xf32>
    %284 = vector.broadcast %30 : vector<1x128xf32> to vector<4x128xf32>
    %285 = arith.mulf %284, %283 : vector<4x128xf32>
    %286 = vector.broadcast %33 : vector<1x128xf32> to vector<4x128xf32>
    %287 = arith.addf %285, %286 : vector<4x128xf32>
    %288 = vector.extract_strided_slice %287 {offsets = [0, 0], sizes = [4, 32], strides = [1, 1]} : vector<4x128xf32> to vector<4x32xf32>
    %289 = vector.extract_strided_slice %287 {offsets = [0, 32], sizes = [4, 32], strides = [1, 1]} : vector<4x128xf32> to vector<4x32xf32>
    %290 = vector.extract_strided_slice %287 {offsets = [0, 64], sizes = [4, 32], strides = [1, 1]} : vector<4x128xf32> to vector<4x32xf32>
    %291 = vector.extract_strided_slice %287 {offsets = [0, 96], sizes = [4, 32], strides = [1, 1]} : vector<4x128xf32> to vector<4x32xf32>
    %292 = arith.mulf %289, %249 : vector<4x32xf32>
    %293 = arith.mulf %288, %290 : vector<4x32xf32>
    %294 = arith.addf %292, %293 : vector<4x32xf32>
    %295 = math.tanh %294 : vector<4x32xf32>
    %296 = arith.mulf %291, %295 : vector<4x32xf32>
    %297 = vector.extract_strided_slice %296 {offsets = [0, 0], sizes = [2, 32], strides = [1, 1]} : vector<4x32xf32> to vector<2x32xf32>
    %298 = arith.truncf %297 : vector<2x32xf32> to vector<2x32xbf16>
    %299 = arith.index_cast %c5_i32 : i32 to index
    %c0_95 = arith.constant 0 : index
    %c0_96 = arith.constant 0 : index
    %300 = vector.load %arg4[%299, %c0_95, %c0_96] : memref<8x2x64xbf16, #tpu.memory_space<vmem>>, vector<1x2x32xbf16>
    %301 = vector.shape_cast %300 : vector<1x2x32xbf16> to vector<2x32xbf16>
    %302 = vector.shape_cast %298 : vector<2x32xbf16> to vector<1x2x32xbf16>
    tpu.vector_store %arg4[%299, %c0_95, %c0_96], %302 {strides = array<i32>} : memref<8x2x64xbf16, #tpu.memory_space<vmem>>, vector<1x2x32xbf16>,
    %303 = vector.extract_strided_slice %296 {offsets = [2, 0], sizes = [2, 32], strides = [1, 1]} : vector<4x32xf32> to vector<2x32xf32>
    %304 = arith.truncf %303 : vector<2x32xf32> to vector<2x32xbf16>
    %305 = arith.index_cast %264 : i32 to index
    %c0_97 = arith.constant 0 : index
    %c32_98 = arith.constant 32 : index
    %306 = vector.load %arg4[%305, %c0_97, %c32_98] : memref<8x2x64xbf16, #tpu.memory_space<vmem>>, vector<1x2x32xbf16>
    %307 = vector.shape_cast %306 : vector<1x2x32xbf16> to vector<2x32xbf16>
    %308 = vector.shape_cast %304 : vector<2x32xbf16> to vector<1x2x32xbf16>
    tpu.vector_store %arg4[%305, %c0_97, %c32_98], %308 {strides = array<i32>} : memref<8x2x64xbf16, #tpu.memory_space<vmem>>, vector<1x2x32xbf16>,
    %c6_i32 = arith.constant 6 : i32
    %c7_i32_99 = arith.constant 7 : i32
    %309 = arith.subi %c7_i32_99, %c6_i32 : i32
    %cst_100 = arith.constant 0.000000e+00 : f32
    %310 = vector.broadcast %cst_100 : f32 to vector<4x32xf32>
    %311 = arith.select %36, %296, %310 : vector<4x32xi1>, vector<4x32xf32>
    %cst_101 = arith.constant 0.000000e+00 : f32
    %312 = vector.broadcast %cst_101 : f32 to vector<4x32xf32>
    %313 = arith.select %36, %312, %296 : vector<4x32xi1>, vector<4x32xf32>
    %314 = tpu.concatenate %311, %313 in 1 : vector<4x32xf32>, vector<4x32xf32> -> vector<4x64xf32>
    %315 = arith.truncf %314 : vector<4x64xf32> to vector<4x64xbf16>
    %cst_102 = arith.constant dense<0.000000e+00> : vector<4x128xf32>
    %316 = tpu.matmul %315, %21, %cst_102 {dimension_numbers = #tpu.dot_dimension_numbers<[1], [0], [0], [1], [0, 0, 1, 1], [], []>} : vector<4x64xbf16>, vector<64x128xbf16>, vector<4x128xf32> -> vector<4x128xf32>
    %317 = arith.index_cast %c6_i32 : i32 to index
    %c0_103 = arith.constant 0 : index
    %c0_104 = arith.constant 0 : index
    %318 = vector.load %arg5[%317, %c0_103, %c0_104] : memref<8x2x128xbf16, #tpu.memory_space<vmem>>, vector<1x2x128xbf16>
    %319 = vector.shape_cast %318 : vector<1x2x128xbf16> to vector<2x128xbf16>
    %320 = arith.index_cast %309 : i32 to index
    %c0_105 = arith.constant 0 : index
    %c0_106 = arith.constant 0 : index
    %321 = vector.load %arg6[%320, %c0_105, %c0_106] : memref<8x2x128xbf16, #tpu.memory_space<vmem>>, vector<1x2x128xbf16>
    %322 = vector.shape_cast %321 : vector<1x2x128xbf16> to vector<2x128xbf16>
    %323 = tpu.concatenate %319, %322 in 0 : vector<2x128xbf16>, vector<2x128xbf16> -> vector<4x128xbf16>
    %324 = arith.extf %323 : vector<4x128xbf16> to vector<4x128xf32>
    %325 = arith.addf %316, %324 : vector<4x128xf32>
    %326 = vector.broadcast %30 : vector<1x128xf32> to vector<4x128xf32>
    %327 = arith.mulf %326, %325 : vector<4x128xf32>
    %328 = math.tanh %327 : vector<4x128xf32>
    %329 = vector.broadcast %30 : vector<1x128xf32> to vector<4x128xf32>
    %330 = arith.mulf %329, %328 : vector<4x128xf32>
    %331 = vector.broadcast %33 : vector<1x128xf32> to vector<4x128xf32>
    %332 = arith.addf %330, %331 : vector<4x128xf32>
    %333 = vector.extract_strided_slice %332 {offsets = [0, 0], sizes = [4, 32], strides = [1, 1]} : vector<4x128xf32> to vector<4x32xf32>
    %334 = vector.extract_strided_slice %332 {offsets = [0, 32], sizes = [4, 32], strides = [1, 1]} : vector<4x128xf32> to vector<4x32xf32>
    %335 = vector.extract_strided_slice %332 {offsets = [0, 64], sizes = [4, 32], strides = [1, 1]} : vector<4x128xf32> to vector<4x32xf32>
    %336 = vector.extract_strided_slice %332 {offsets = [0, 96], sizes = [4, 32], strides = [1, 1]} : vector<4x128xf32> to vector<4x32xf32>
    %337 = arith.mulf %334, %294 : vector<4x32xf32>
    %338 = arith.mulf %333, %335 : vector<4x32xf32>
    %339 = arith.addf %337, %338 : vector<4x32xf32>
    %340 = math.tanh %339 : vector<4x32xf32>
    %341 = arith.mulf %336, %340 : vector<4x32xf32>
    %342 = vector.extract_strided_slice %341 {offsets = [0, 0], sizes = [2, 32], strides = [1, 1]} : vector<4x32xf32> to vector<2x32xf32>
    %343 = arith.truncf %342 : vector<2x32xf32> to vector<2x32xbf16>
    %344 = arith.index_cast %c6_i32 : i32 to index
    %c0_107 = arith.constant 0 : index
    %c0_108 = arith.constant 0 : index
    %345 = vector.load %arg4[%344, %c0_107, %c0_108] : memref<8x2x64xbf16, #tpu.memory_space<vmem>>, vector<1x2x32xbf16>
    %346 = vector.shape_cast %345 : vector<1x2x32xbf16> to vector<2x32xbf16>
    %347 = vector.shape_cast %343 : vector<2x32xbf16> to vector<1x2x32xbf16>
    tpu.vector_store %arg4[%344, %c0_107, %c0_108], %347 {strides = array<i32>} : memref<8x2x64xbf16, #tpu.memory_space<vmem>>, vector<1x2x32xbf16>,
    %348 = vector.extract_strided_slice %341 {offsets = [2, 0], sizes = [2, 32], strides = [1, 1]} : vector<4x32xf32> to vector<2x32xf32>
    %349 = arith.truncf %348 : vector<2x32xf32> to vector<2x32xbf16>
    %350 = arith.index_cast %309 : i32 to index
    %c0_109 = arith.constant 0 : index
    %c32_110 = arith.constant 32 : index
    %351 = vector.load %arg4[%350, %c0_109, %c32_110] : memref<8x2x64xbf16, #tpu.memory_space<vmem>>, vector<1x2x32xbf16>
    %352 = vector.shape_cast %351 : vector<1x2x32xbf16> to vector<2x32xbf16>
    %353 = vector.shape_cast %349 : vector<2x32xbf16> to vector<1x2x32xbf16>
    tpu.vector_store %arg4[%350, %c0_109, %c32_110], %353 {strides = array<i32>} : memref<8x2x64xbf16, #tpu.memory_space<vmem>>, vector<1x2x32xbf16>,
    %c7_i32_111 = arith.constant 7 : i32
    %c7_i32_112 = arith.constant 7 : i32
    %354 = arith.subi %c7_i32_112, %c7_i32_111 : i32
    %cst_113 = arith.constant 0.000000e+00 : f32
    %355 = vector.broadcast %cst_113 : f32 to vector<4x32xf32>
    %356 = arith.select %36, %341, %355 : vector<4x32xi1>, vector<4x32xf32>
    %cst_114 = arith.constant 0.000000e+00 : f32
    %357 = vector.broadcast %cst_114 : f32 to vector<4x32xf32>
    %358 = arith.select %36, %357, %341 : vector<4x32xi1>, vector<4x32xf32>
    %359 = tpu.concatenate %356, %358 in 1 : vector<4x32xf32>, vector<4x32xf32> -> vector<4x64xf32>
    %360 = arith.truncf %359 : vector<4x64xf32> to vector<4x64xbf16>
    %cst_115 = arith.constant dense<0.000000e+00> : vector<4x128xf32>
    %361 = tpu.matmul %360, %21, %cst_115 {dimension_numbers = #tpu.dot_dimension_numbers<[1], [0], [0], [1], [0, 0, 1, 1], [], []>} : vector<4x64xbf16>, vector<64x128xbf16>, vector<4x128xf32> -> vector<4x128xf32>
    %362 = arith.index_cast %c7_i32_111 : i32 to index
    %c0_116 = arith.constant 0 : index
    %c0_117 = arith.constant 0 : index
    %363 = vector.load %arg5[%362, %c0_116, %c0_117] : memref<8x2x128xbf16, #tpu.memory_space<vmem>>, vector<1x2x128xbf16>
    %364 = vector.shape_cast %363 : vector<1x2x128xbf16> to vector<2x128xbf16>
    %365 = arith.index_cast %354 : i32 to index
    %c0_118 = arith.constant 0 : index
    %c0_119 = arith.constant 0 : index
    %366 = vector.load %arg6[%365, %c0_118, %c0_119] : memref<8x2x128xbf16, #tpu.memory_space<vmem>>, vector<1x2x128xbf16>
    %367 = vector.shape_cast %366 : vector<1x2x128xbf16> to vector<2x128xbf16>
    %368 = tpu.concatenate %364, %367 in 0 : vector<2x128xbf16>, vector<2x128xbf16> -> vector<4x128xbf16>
    %369 = arith.extf %368 : vector<4x128xbf16> to vector<4x128xf32>
    %370 = arith.addf %361, %369 : vector<4x128xf32>
    %371 = vector.broadcast %30 : vector<1x128xf32> to vector<4x128xf32>
    %372 = arith.mulf %371, %370 : vector<4x128xf32>
    %373 = math.tanh %372 : vector<4x128xf32>
    %374 = vector.broadcast %30 : vector<1x128xf32> to vector<4x128xf32>
    %375 = arith.mulf %374, %373 : vector<4x128xf32>
    %376 = vector.broadcast %33 : vector<1x128xf32> to vector<4x128xf32>
    %377 = arith.addf %375, %376 : vector<4x128xf32>
    %378 = vector.extract_strided_slice %377 {offsets = [0, 0], sizes = [4, 32], strides = [1, 1]} : vector<4x128xf32> to vector<4x32xf32>
    %379 = vector.extract_strided_slice %377 {offsets = [0, 32], sizes = [4, 32], strides = [1, 1]} : vector<4x128xf32> to vector<4x32xf32>
    %380 = vector.extract_strided_slice %377 {offsets = [0, 64], sizes = [4, 32], strides = [1, 1]} : vector<4x128xf32> to vector<4x32xf32>
    %381 = vector.extract_strided_slice %377 {offsets = [0, 96], sizes = [4, 32], strides = [1, 1]} : vector<4x128xf32> to vector<4x32xf32>
    %382 = arith.mulf %379, %339 : vector<4x32xf32>
    %383 = arith.mulf %378, %380 : vector<4x32xf32>
    %384 = arith.addf %382, %383 : vector<4x32xf32>
    %385 = math.tanh %384 : vector<4x32xf32>
    %386 = arith.mulf %381, %385 : vector<4x32xf32>
    %387 = vector.extract_strided_slice %386 {offsets = [0, 0], sizes = [2, 32], strides = [1, 1]} : vector<4x32xf32> to vector<2x32xf32>
    %388 = arith.truncf %387 : vector<2x32xf32> to vector<2x32xbf16>
    %389 = arith.index_cast %c7_i32_111 : i32 to index
    %c0_120 = arith.constant 0 : index
    %c0_121 = arith.constant 0 : index
    %390 = vector.load %arg4[%389, %c0_120, %c0_121] : memref<8x2x64xbf16, #tpu.memory_space<vmem>>, vector<1x2x32xbf16>
    %391 = vector.shape_cast %390 : vector<1x2x32xbf16> to vector<2x32xbf16>
    %392 = vector.shape_cast %388 : vector<2x32xbf16> to vector<1x2x32xbf16>
    tpu.vector_store %arg4[%389, %c0_120, %c0_121], %392 {strides = array<i32>} : memref<8x2x64xbf16, #tpu.memory_space<vmem>>, vector<1x2x32xbf16>,
    %393 = vector.extract_strided_slice %386 {offsets = [2, 0], sizes = [2, 32], strides = [1, 1]} : vector<4x32xf32> to vector<2x32xf32>
    %394 = arith.truncf %393 : vector<2x32xf32> to vector<2x32xbf16>
    %395 = arith.index_cast %354 : i32 to index
    %c0_122 = arith.constant 0 : index
    %c32_123 = arith.constant 32 : index
    %396 = vector.load %arg4[%395, %c0_122, %c32_123] : memref<8x2x64xbf16, #tpu.memory_space<vmem>>, vector<1x2x32xbf16>
    %397 = vector.shape_cast %396 : vector<1x2x32xbf16> to vector<2x32xbf16>
    %398 = vector.shape_cast %394 : vector<2x32xbf16> to vector<1x2x32xbf16>
    tpu.vector_store %arg4[%395, %c0_122, %c32_123], %398 {strides = array<i32>} : memref<8x2x64xbf16, #tpu.memory_space<vmem>>, vector<1x2x32xbf16>,
    %c8_i32 = arith.constant 8 : i32
    return
  }
}

module attributes {stable_mosaic.version = 11 : i64} {
  func.func @_bilstm_layer_kernel(%arg0: memref<8x2x128xbf16, #tpu.memory_space<vmem>>, %arg1: memref<2x128x128xbf16, #tpu.memory_space<vmem>>, %arg2: memref<64x128xbf16, #tpu.memory_space<vmem>>, %arg3: memref<2x1x128xf32, #tpu.memory_space<vmem>>, %arg4: memref<8x2x64xbf16, #tpu.memory_space<vmem>>, %arg5: memref<8x2x128xbf16, #tpu.memory_space<vmem>>, %arg6: memref<8x2x128xbf16, #tpu.memory_space<vmem>>) attributes {dimension_semantics = [], scalar_prefetch = 0 : i64, scratch_operands = 2 : i64, tpu.core_type = #tpu.core_type<tc>} {
    %c0 = arith.constant 0 : index
    %c0_0 = arith.constant 0 : index
    %c0_1 = arith.constant 0 : index
    %0 = vector.load %arg0[%c0, %c0_0, %c0_1] : memref<8x2x128xbf16, #tpu.memory_space<vmem>>, vector<8x2x128xbf16>
    %c0_2 = arith.constant 0 : index
    %c0_3 = arith.constant 0 : index
    %c0_4 = arith.constant 0 : index
    %1 = vector.load %arg1[%c0_2, %c0_3, %c0_4] : memref<2x128x128xbf16, #tpu.memory_space<vmem>>, vector<1x128x128xbf16>
    %2 = vector.shape_cast %1 : vector<1x128x128xbf16> to vector<128x128xbf16>
    %cst = arith.constant dense<0.000000e+00> : vector<8x2x128xf32>
    %3 = tpu.matmul %0, %2, %cst {dimension_numbers = #tpu.dot_dimension_numbers<[2], [0], [0, 1], [1], [0, 0, 0, 1, 1, 1], [], []>} : vector<8x2x128xbf16>, vector<128x128xbf16>, vector<8x2x128xf32> -> vector<8x2x128xf32>
    %c0_5 = arith.constant 0 : index
    %c0_6 = arith.constant 0 : index
    %c0_7 = arith.constant 0 : index
    %4 = vector.load %arg3[%c0_5, %c0_6, %c0_7] : memref<2x1x128xf32, #tpu.memory_space<vmem>>, vector<1x1x128xf32>
    %5 = vector.shape_cast %4 : vector<1x1x128xf32> to vector<1x128xf32>
    %6 = vector.shape_cast %5 : vector<1x128xf32> to vector<1x1x128xf32>
    %7 = vector.broadcast %6 : vector<1x1x128xf32> to vector<8x2x128xf32>
    %8 = arith.addf %3, %7 : vector<8x2x128xf32>
    %9 = arith.truncf %8 : vector<8x2x128xf32> to vector<8x2x128xbf16>
    %c0_8 = arith.constant 0 : index
    %c0_9 = arith.constant 0 : index
    %c0_10 = arith.constant 0 : index
    %10 = vector.load %arg5[%c0_8, %c0_9, %c0_10] : memref<8x2x128xbf16, #tpu.memory_space<vmem>>, vector<8x2x128xbf16>
    tpu.vector_store %arg5[%c0_8, %c0_9, %c0_10], %9 {strides = array<i32>} : memref<8x2x128xbf16, #tpu.memory_space<vmem>>, vector<8x2x128xbf16>,
    %c1 = arith.constant 1 : index
    %c0_11 = arith.constant 0 : index
    %c0_12 = arith.constant 0 : index
    %11 = vector.load %arg1[%c1, %c0_11, %c0_12] : memref<2x128x128xbf16, #tpu.memory_space<vmem>>, vector<1x128x128xbf16>
    %12 = vector.shape_cast %11 : vector<1x128x128xbf16> to vector<128x128xbf16>
    %cst_13 = arith.constant dense<0.000000e+00> : vector<8x2x128xf32>
    %13 = tpu.matmul %0, %12, %cst_13 {dimension_numbers = #tpu.dot_dimension_numbers<[2], [0], [0, 1], [1], [0, 0, 0, 1, 1, 1], [], []>} : vector<8x2x128xbf16>, vector<128x128xbf16>, vector<8x2x128xf32> -> vector<8x2x128xf32>
    %c1_14 = arith.constant 1 : index
    %c0_15 = arith.constant 0 : index
    %c0_16 = arith.constant 0 : index
    %14 = vector.load %arg3[%c1_14, %c0_15, %c0_16] : memref<2x1x128xf32, #tpu.memory_space<vmem>>, vector<1x1x128xf32>
    %15 = vector.shape_cast %14 : vector<1x1x128xf32> to vector<1x128xf32>
    %16 = vector.shape_cast %15 : vector<1x128xf32> to vector<1x1x128xf32>
    %17 = vector.broadcast %16 : vector<1x1x128xf32> to vector<8x2x128xf32>
    %18 = arith.addf %13, %17 : vector<8x2x128xf32>
    %19 = arith.truncf %18 : vector<8x2x128xf32> to vector<8x2x128xbf16>
    %c0_17 = arith.constant 0 : index
    %c0_18 = arith.constant 0 : index
    %c0_19 = arith.constant 0 : index
    %20 = vector.load %arg6[%c0_17, %c0_18, %c0_19] : memref<8x2x128xbf16, #tpu.memory_space<vmem>>, vector<8x2x128xbf16>
    tpu.vector_store %arg6[%c0_17, %c0_18, %c0_19], %19 {strides = array<i32>} : memref<8x2x128xbf16, #tpu.memory_space<vmem>>, vector<8x2x128xbf16>,
    %c0_20 = arith.constant 0 : index
    %c0_21 = arith.constant 0 : index
    %21 = vector.load %arg2[%c0_20, %c0_21] : memref<64x128xbf16, #tpu.memory_space<vmem>>, vector<64x128xbf16>
    %22 = tpu.iota {dimensions = array<i32: 1>} : vector<1x128xi32>
    %c64_i32 = arith.constant 64 : i32
    %23 = vector.broadcast %c64_i32 : i32 to vector<1x128xi32>
    %24 = arith.cmpi sge, %22, %23 : vector<1x128xi32>
    %c96_i32 = arith.constant 96 : i32
    %25 = vector.broadcast %c96_i32 : i32 to vector<1x128xi32>
    %26 = arith.cmpi slt, %22, %25 : vector<1x128xi32>
    %27 = arith.andi %24, %26 : vector<1x128xi1>
    %cst_22 = arith.constant 1.000000e+00 : f32
    %cst_23 = arith.constant 5.000000e-01 : f32
    %28 = vector.broadcast %cst_22 : f32 to vector<1x128xf32>
    %29 = vector.broadcast %cst_23 : f32 to vector<1x128xf32>
    %30 = arith.select %27, %28, %29 : vector<1x128xi1>, vector<1x128xf32>
    %cst_24 = arith.constant 0.000000e+00 : f32
    %cst_25 = arith.constant 5.000000e-01 : f32
    %31 = vector.broadcast %cst_24 : f32 to vector<1x128xf32>
    %32 = vector.broadcast %cst_25 : f32 to vector<1x128xf32>
    %33 = arith.select %27, %31, %32 : vector<1x128xi1>, vector<1x128xf32>
    %34 = tpu.iota {dimensions = array<i32: 0>} : vector<4x32xi32>
    %c2_i32 = arith.constant 2 : i32
    %35 = vector.broadcast %c2_i32 : i32 to vector<4x32xi32>
    %36 = arith.cmpi slt, %34, %35 : vector<4x32xi32>
    %cst_26 = arith.constant 0.000000e+00 : f32
    %37 = vector.broadcast %cst_26 : f32 to vector<4x32xf32>
    %cst_27 = arith.constant 0.000000e+00 : f32
    %38 = vector.broadcast %cst_27 : f32 to vector<4x32xf32>
    %c0_i32 = arith.constant 0 : i32
    %c7_i32 = arith.constant 7 : i32
    %39 = arith.subi %c7_i32, %c0_i32 : i32
    %cst_28 = arith.constant 0.000000e+00 : f32
    %40 = vector.broadcast %cst_28 : f32 to vector<4x32xf32>
    %41 = arith.select %36, %37, %40 : vector<4x32xi1>, vector<4x32xf32>
    %cst_29 = arith.constant 0.000000e+00 : f32
    %42 = vector.broadcast %cst_29 : f32 to vector<4x32xf32>
    %43 = arith.select %36, %42, %37 : vector<4x32xi1>, vector<4x32xf32>
    %44 = tpu.concatenate %41, %43 in 1 : vector<4x32xf32>, vector<4x32xf32> -> vector<4x64xf32>
    %45 = arith.truncf %44 : vector<4x64xf32> to vector<4x64xbf16>
    %cst_30 = arith.constant dense<0.000000e+00> : vector<4x128xf32>
    %46 = tpu.matmul %45, %21, %cst_30 {dimension_numbers = #tpu.dot_dimension_numbers<[1], [0], [0], [1], [0, 0, 1, 1], [], []>} : vector<4x64xbf16>, vector<64x128xbf16>, vector<4x128xf32> -> vector<4x128xf32>
    %47 = arith.index_cast %c0_i32 : i32 to index
    %c0_31 = arith.constant 0 : index
    %c0_32 = arith.constant 0 : index
    %48 = vector.load %arg5[%47, %c0_31, %c0_32] : memref<8x2x128xbf16, #tpu.memory_space<vmem>>, vector<1x2x128xbf16>
    %49 = vector.shape_cast %48 : vector<1x2x128xbf16> to vector<2x128xbf16>
    %50 = arith.index_cast %39 : i32 to index
    %c0_33 = arith.constant 0 : index
    %c0_34 = arith.constant 0 : index
    %51 = vector.load %arg6[%50, %c0_33, %c0_34] : memref<8x2x128xbf16, #tpu.memory_space<vmem>>, vector<1x2x128xbf16>
    %52 = vector.shape_cast %51 : vector<1x2x128xbf16> to vector<2x128xbf16>
    %53 = tpu.concatenate %49, %52 in 0 : vector<2x128xbf16>, vector<2x128xbf16> -> vector<4x128xbf16>
    %54 = arith.extf %53 : vector<4x128xbf16> to vector<4x128xf32>
    %55 = arith.addf %46, %54 : vector<4x128xf32>
    %56 = vector.broadcast %30 : vector<1x128xf32> to vector<4x128xf32>
    %57 = arith.mulf %56, %55 : vector<4x128xf32>
    %58 = math.tanh %57 : vector<4x128xf32>
    %59 = vector.broadcast %30 : vector<1x128xf32> to vector<4x128xf32>
    %60 = arith.mulf %59, %58 : vector<4x128xf32>
    %61 = vector.broadcast %33 : vector<1x128xf32> to vector<4x128xf32>
    %62 = arith.addf %60, %61 : vector<4x128xf32>
    %63 = vector.extract_strided_slice %62 {offsets = [0, 0], sizes = [4, 32], strides = [1, 1]} : vector<4x128xf32> to vector<4x32xf32>
    %64 = vector.extract_strided_slice %62 {offsets = [0, 32], sizes = [4, 32], strides = [1, 1]} : vector<4x128xf32> to vector<4x32xf32>
    %65 = vector.extract_strided_slice %62 {offsets = [0, 64], sizes = [4, 32], strides = [1, 1]} : vector<4x128xf32> to vector<4x32xf32>
    %66 = vector.extract_strided_slice %62 {offsets = [0, 96], sizes = [4, 32], strides = [1, 1]} : vector<4x128xf32> to vector<4x32xf32>
    %67 = arith.mulf %64, %38 : vector<4x32xf32>
    %68 = arith.mulf %63, %65 : vector<4x32xf32>
    %69 = arith.addf %67, %68 : vector<4x32xf32>
    %70 = math.tanh %69 : vector<4x32xf32>
    %71 = arith.mulf %66, %70 : vector<4x32xf32>
    %72 = vector.extract_strided_slice %71 {offsets = [0, 0], sizes = [2, 32], strides = [1, 1]} : vector<4x32xf32> to vector<2x32xf32>
    %73 = arith.truncf %72 : vector<2x32xf32> to vector<2x32xbf16>
    %74 = arith.index_cast %c0_i32 : i32 to index
    %c0_35 = arith.constant 0 : index
    %c0_36 = arith.constant 0 : index
    %75 = vector.load %arg4[%74, %c0_35, %c0_36] : memref<8x2x64xbf16, #tpu.memory_space<vmem>>, vector<1x2x32xbf16>
    %76 = vector.shape_cast %75 : vector<1x2x32xbf16> to vector<2x32xbf16>
    %77 = vector.shape_cast %73 : vector<2x32xbf16> to vector<1x2x32xbf16>
    tpu.vector_store %arg4[%74, %c0_35, %c0_36], %77 {strides = array<i32>} : memref<8x2x64xbf16, #tpu.memory_space<vmem>>, vector<1x2x32xbf16>,
    %78 = vector.extract_strided_slice %71 {offsets = [2, 0], sizes = [2, 32], strides = [1, 1]} : vector<4x32xf32> to vector<2x32xf32>
    %79 = arith.truncf %78 : vector<2x32xf32> to vector<2x32xbf16>
    %80 = arith.index_cast %39 : i32 to index
    %c0_37 = arith.constant 0 : index
    %c32 = arith.constant 32 : index
    %81 = vector.load %arg4[%80, %c0_37, %c32] : memref<8x2x64xbf16, #tpu.memory_space<vmem>>, vector<1x2x32xbf16>
    %82 = vector.shape_cast %81 : vector<1x2x32xbf16> to vector<2x32xbf16>
    %83 = vector.shape_cast %79 : vector<2x32xbf16> to vector<1x2x32xbf16>
    tpu.vector_store %arg4[%80, %c0_37, %c32], %83 {strides = array<i32>} : memref<8x2x64xbf16, #tpu.memory_space<vmem>>, vector<1x2x32xbf16>,
    %c1_i32 = arith.constant 1 : i32
    %c7_i32_38 = arith.constant 7 : i32
    %84 = arith.subi %c7_i32_38, %c1_i32 : i32
    %cst_39 = arith.constant 0.000000e+00 : f32
    %85 = vector.broadcast %cst_39 : f32 to vector<4x32xf32>
    %86 = arith.select %36, %71, %85 : vector<4x32xi1>, vector<4x32xf32>
    %cst_40 = arith.constant 0.000000e+00 : f32
    %87 = vector.broadcast %cst_40 : f32 to vector<4x32xf32>
    %88 = arith.select %36, %87, %71 : vector<4x32xi1>, vector<4x32xf32>
    %89 = tpu.concatenate %86, %88 in 1 : vector<4x32xf32>, vector<4x32xf32> -> vector<4x64xf32>
    %90 = arith.truncf %89 : vector<4x64xf32> to vector<4x64xbf16>
    %cst_41 = arith.constant dense<0.000000e+00> : vector<4x128xf32>
    %91 = tpu.matmul %90, %21, %cst_41 {dimension_numbers = #tpu.dot_dimension_numbers<[1], [0], [0], [1], [0, 0, 1, 1], [], []>} : vector<4x64xbf16>, vector<64x128xbf16>, vector<4x128xf32> -> vector<4x128xf32>
    %92 = arith.index_cast %c1_i32 : i32 to index
    %c0_42 = arith.constant 0 : index
    %c0_43 = arith.constant 0 : index
    %93 = vector.load %arg5[%92, %c0_42, %c0_43] : memref<8x2x128xbf16, #tpu.memory_space<vmem>>, vector<1x2x128xbf16>
    %94 = vector.shape_cast %93 : vector<1x2x128xbf16> to vector<2x128xbf16>
    %95 = arith.index_cast %84 : i32 to index
    %c0_44 = arith.constant 0 : index
    %c0_45 = arith.constant 0 : index
    %96 = vector.load %arg6[%95, %c0_44, %c0_45] : memref<8x2x128xbf16, #tpu.memory_space<vmem>>, vector<1x2x128xbf16>
    %97 = vector.shape_cast %96 : vector<1x2x128xbf16> to vector<2x128xbf16>
    %98 = tpu.concatenate %94, %97 in 0 : vector<2x128xbf16>, vector<2x128xbf16> -> vector<4x128xbf16>
    %99 = arith.extf %98 : vector<4x128xbf16> to vector<4x128xf32>
    %100 = arith.addf %91, %99 : vector<4x128xf32>
    %101 = vector.broadcast %30 : vector<1x128xf32> to vector<4x128xf32>
    %102 = arith.mulf %101, %100 : vector<4x128xf32>
    %103 = math.tanh %102 : vector<4x128xf32>
    %104 = vector.broadcast %30 : vector<1x128xf32> to vector<4x128xf32>
    %105 = arith.mulf %104, %103 : vector<4x128xf32>
    %106 = vector.broadcast %33 : vector<1x128xf32> to vector<4x128xf32>
    %107 = arith.addf %105, %106 : vector<4x128xf32>
    %108 = vector.extract_strided_slice %107 {offsets = [0, 0], sizes = [4, 32], strides = [1, 1]} : vector<4x128xf32> to vector<4x32xf32>
    %109 = vector.extract_strided_slice %107 {offsets = [0, 32], sizes = [4, 32], strides = [1, 1]} : vector<4x128xf32> to vector<4x32xf32>
    %110 = vector.extract_strided_slice %107 {offsets = [0, 64], sizes = [4, 32], strides = [1, 1]} : vector<4x128xf32> to vector<4x32xf32>
    %111 = vector.extract_strided_slice %107 {offsets = [0, 96], sizes = [4, 32], strides = [1, 1]} : vector<4x128xf32> to vector<4x32xf32>
    %112 = arith.mulf %109, %69 : vector<4x32xf32>
    %113 = arith.mulf %108, %110 : vector<4x32xf32>
    %114 = arith.addf %112, %113 : vector<4x32xf32>
    %115 = math.tanh %114 : vector<4x32xf32>
    %116 = arith.mulf %111, %115 : vector<4x32xf32>
    %117 = vector.extract_strided_slice %116 {offsets = [0, 0], sizes = [2, 32], strides = [1, 1]} : vector<4x32xf32> to vector<2x32xf32>
    %118 = arith.truncf %117 : vector<2x32xf32> to vector<2x32xbf16>
    %119 = arith.index_cast %c1_i32 : i32 to index
    %c0_46 = arith.constant 0 : index
    %c0_47 = arith.constant 0 : index
    %120 = vector.load %arg4[%119, %c0_46, %c0_47] : memref<8x2x64xbf16, #tpu.memory_space<vmem>>, vector<1x2x32xbf16>
    %121 = vector.shape_cast %120 : vector<1x2x32xbf16> to vector<2x32xbf16>
    %122 = vector.shape_cast %118 : vector<2x32xbf16> to vector<1x2x32xbf16>
    tpu.vector_store %arg4[%119, %c0_46, %c0_47], %122 {strides = array<i32>} : memref<8x2x64xbf16, #tpu.memory_space<vmem>>, vector<1x2x32xbf16>,
    %123 = vector.extract_strided_slice %116 {offsets = [2, 0], sizes = [2, 32], strides = [1, 1]} : vector<4x32xf32> to vector<2x32xf32>
    %124 = arith.truncf %123 : vector<2x32xf32> to vector<2x32xbf16>
    %125 = arith.index_cast %84 : i32 to index
    %c0_48 = arith.constant 0 : index
    %c32_49 = arith.constant 32 : index
    %126 = vector.load %arg4[%125, %c0_48, %c32_49] : memref<8x2x64xbf16, #tpu.memory_space<vmem>>, vector<1x2x32xbf16>
    %127 = vector.shape_cast %126 : vector<1x2x32xbf16> to vector<2x32xbf16>
    %128 = vector.shape_cast %124 : vector<2x32xbf16> to vector<1x2x32xbf16>
    tpu.vector_store %arg4[%125, %c0_48, %c32_49], %128 {strides = array<i32>} : memref<8x2x64xbf16, #tpu.memory_space<vmem>>, vector<1x2x32xbf16>,
    %c2_i32_50 = arith.constant 2 : i32
    %c7_i32_51 = arith.constant 7 : i32
    %129 = arith.subi %c7_i32_51, %c2_i32_50 : i32
    %cst_52 = arith.constant 0.000000e+00 : f32
    %130 = vector.broadcast %cst_52 : f32 to vector<4x32xf32>
    %131 = arith.select %36, %116, %130 : vector<4x32xi1>, vector<4x32xf32>
    %cst_53 = arith.constant 0.000000e+00 : f32
    %132 = vector.broadcast %cst_53 : f32 to vector<4x32xf32>
    %133 = arith.select %36, %132, %116 : vector<4x32xi1>, vector<4x32xf32>
    %134 = tpu.concatenate %131, %133 in 1 : vector<4x32xf32>, vector<4x32xf32> -> vector<4x64xf32>
    %135 = arith.truncf %134 : vector<4x64xf32> to vector<4x64xbf16>
    %cst_54 = arith.constant dense<0.000000e+00> : vector<4x128xf32>
    %136 = tpu.matmul %135, %21, %cst_54 {dimension_numbers = #tpu.dot_dimension_numbers<[1], [0], [0], [1], [0, 0, 1, 1], [], []>} : vector<4x64xbf16>, vector<64x128xbf16>, vector<4x128xf32> -> vector<4x128xf32>
    %137 = arith.index_cast %c2_i32_50 : i32 to index
    %c0_55 = arith.constant 0 : index
    %c0_56 = arith.constant 0 : index
    %138 = vector.load %arg5[%137, %c0_55, %c0_56] : memref<8x2x128xbf16, #tpu.memory_space<vmem>>, vector<1x2x128xbf16>
    %139 = vector.shape_cast %138 : vector<1x2x128xbf16> to vector<2x128xbf16>
    %140 = arith.index_cast %129 : i32 to index
    %c0_57 = arith.constant 0 : index
    %c0_58 = arith.constant 0 : index
    %141 = vector.load %arg6[%140, %c0_57, %c0_58] : memref<8x2x128xbf16, #tpu.memory_space<vmem>>, vector<1x2x128xbf16>
    %142 = vector.shape_cast %141 : vector<1x2x128xbf16> to vector<2x128xbf16>
    %143 = tpu.concatenate %139, %142 in 0 : vector<2x128xbf16>, vector<2x128xbf16> -> vector<4x128xbf16>
    %144 = arith.extf %143 : vector<4x128xbf16> to vector<4x128xf32>
    %145 = arith.addf %136, %144 : vector<4x128xf32>
    %146 = vector.broadcast %30 : vector<1x128xf32> to vector<4x128xf32>
    %147 = arith.mulf %146, %145 : vector<4x128xf32>
    %148 = math.tanh %147 : vector<4x128xf32>
    %149 = vector.broadcast %30 : vector<1x128xf32> to vector<4x128xf32>
    %150 = arith.mulf %149, %148 : vector<4x128xf32>
    %151 = vector.broadcast %33 : vector<1x128xf32> to vector<4x128xf32>
    %152 = arith.addf %150, %151 : vector<4x128xf32>
    %153 = vector.extract_strided_slice %152 {offsets = [0, 0], sizes = [4, 32], strides = [1, 1]} : vector<4x128xf32> to vector<4x32xf32>
    %154 = vector.extract_strided_slice %152 {offsets = [0, 32], sizes = [4, 32], strides = [1, 1]} : vector<4x128xf32> to vector<4x32xf32>
    %155 = vector.extract_strided_slice %152 {offsets = [0, 64], sizes = [4, 32], strides = [1, 1]} : vector<4x128xf32> to vector<4x32xf32>
    %156 = vector.extract_strided_slice %152 {offsets = [0, 96], sizes = [4, 32], strides = [1, 1]} : vector<4x128xf32> to vector<4x32xf32>
    %157 = arith.mulf %154, %114 : vector<4x32xf32>
    %158 = arith.mulf %153, %155 : vector<4x32xf32>
    %159 = arith.addf %157, %158 : vector<4x32xf32>
    %160 = math.tanh %159 : vector<4x32xf32>
    %161 = arith.mulf %156, %160 : vector<4x32xf32>
    %162 = vector.extract_strided_slice %161 {offsets = [0, 0], sizes = [2, 32], strides = [1, 1]} : vector<4x32xf32> to vector<2x32xf32>
    %163 = arith.truncf %162 : vector<2x32xf32> to vector<2x32xbf16>
    %164 = arith.index_cast %c2_i32_50 : i32 to index
    %c0_59 = arith.constant 0 : index
    %c0_60 = arith.constant 0 : index
    %165 = vector.load %arg4[%164, %c0_59, %c0_60] : memref<8x2x64xbf16, #tpu.memory_space<vmem>>, vector<1x2x32xbf16>
    %166 = vector.shape_cast %165 : vector<1x2x32xbf16> to vector<2x32xbf16>
    %167 = vector.shape_cast %163 : vector<2x32xbf16> to vector<1x2x32xbf16>
    tpu.vector_store %arg4[%164, %c0_59, %c0_60], %167 {strides = array<i32>} : memref<8x2x64xbf16, #tpu.memory_space<vmem>>, vector<1x2x32xbf16>,
    %168 = vector.extract_strided_slice %161 {offsets = [2, 0], sizes = [2, 32], strides = [1, 1]} : vector<4x32xf32> to vector<2x32xf32>
    %169 = arith.truncf %168 : vector<2x32xf32> to vector<2x32xbf16>
    %170 = arith.index_cast %129 : i32 to index
    %c0_61 = arith.constant 0 : index
    %c32_62 = arith.constant 32 : index
    %171 = vector.load %arg4[%170, %c0_61, %c32_62] : memref<8x2x64xbf16, #tpu.memory_space<vmem>>, vector<1x2x32xbf16>
    %172 = vector.shape_cast %171 : vector<1x2x32xbf16> to vector<2x32xbf16>
    %173 = vector.shape_cast %169 : vector<2x32xbf16> to vector<1x2x32xbf16>
    tpu.vector_store %arg4[%170, %c0_61, %c32_62], %173 {strides = array<i32>} : memref<8x2x64xbf16, #tpu.memory_space<vmem>>, vector<1x2x32xbf16>,
    %c3_i32 = arith.constant 3 : i32
    %c7_i32_63 = arith.constant 7 : i32
    %174 = arith.subi %c7_i32_63, %c3_i32 : i32
    %cst_64 = arith.constant 0.000000e+00 : f32
    %175 = vector.broadcast %cst_64 : f32 to vector<4x32xf32>
    %176 = arith.select %36, %161, %175 : vector<4x32xi1>, vector<4x32xf32>
    %cst_65 = arith.constant 0.000000e+00 : f32
    %177 = vector.broadcast %cst_65 : f32 to vector<4x32xf32>
    %178 = arith.select %36, %177, %161 : vector<4x32xi1>, vector<4x32xf32>
    %179 = tpu.concatenate %176, %178 in 1 : vector<4x32xf32>, vector<4x32xf32> -> vector<4x64xf32>
    %180 = arith.truncf %179 : vector<4x64xf32> to vector<4x64xbf16>
    %cst_66 = arith.constant dense<0.000000e+00> : vector<4x128xf32>
    %181 = tpu.matmul %180, %21, %cst_66 {dimension_numbers = #tpu.dot_dimension_numbers<[1], [0], [0], [1], [0, 0, 1, 1], [], []>} : vector<4x64xbf16>, vector<64x128xbf16>, vector<4x128xf32> -> vector<4x128xf32>
    %182 = arith.index_cast %c3_i32 : i32 to index
    %c0_67 = arith.constant 0 : index
    %c0_68 = arith.constant 0 : index
    %183 = vector.load %arg5[%182, %c0_67, %c0_68] : memref<8x2x128xbf16, #tpu.memory_space<vmem>>, vector<1x2x128xbf16>
    %184 = vector.shape_cast %183 : vector<1x2x128xbf16> to vector<2x128xbf16>
    %185 = arith.index_cast %174 : i32 to index
    %c0_69 = arith.constant 0 : index
    %c0_70 = arith.constant 0 : index
    %186 = vector.load %arg6[%185, %c0_69, %c0_70] : memref<8x2x128xbf16, #tpu.memory_space<vmem>>, vector<1x2x128xbf16>
    %187 = vector.shape_cast %186 : vector<1x2x128xbf16> to vector<2x128xbf16>
    %188 = tpu.concatenate %184, %187 in 0 : vector<2x128xbf16>, vector<2x128xbf16> -> vector<4x128xbf16>
    %189 = arith.extf %188 : vector<4x128xbf16> to vector<4x128xf32>
    %190 = arith.addf %181, %189 : vector<4x128xf32>
    %191 = vector.broadcast %30 : vector<1x128xf32> to vector<4x128xf32>
    %192 = arith.mulf %191, %190 : vector<4x128xf32>
    %193 = math.tanh %192 : vector<4x128xf32>
    %194 = vector.broadcast %30 : vector<1x128xf32> to vector<4x128xf32>
    %195 = arith.mulf %194, %193 : vector<4x128xf32>
    %196 = vector.broadcast %33 : vector<1x128xf32> to vector<4x128xf32>
    %197 = arith.addf %195, %196 : vector<4x128xf32>
    %198 = vector.extract_strided_slice %197 {offsets = [0, 0], sizes = [4, 32], strides = [1, 1]} : vector<4x128xf32> to vector<4x32xf32>
    %199 = vector.extract_strided_slice %197 {offsets = [0, 32], sizes = [4, 32], strides = [1, 1]} : vector<4x128xf32> to vector<4x32xf32>
    %200 = vector.extract_strided_slice %197 {offsets = [0, 64], sizes = [4, 32], strides = [1, 1]} : vector<4x128xf32> to vector<4x32xf32>
    %201 = vector.extract_strided_slice %197 {offsets = [0, 96], sizes = [4, 32], strides = [1, 1]} : vector<4x128xf32> to vector<4x32xf32>
    %202 = arith.mulf %199, %159 : vector<4x32xf32>
    %203 = arith.mulf %198, %200 : vector<4x32xf32>
    %204 = arith.addf %202, %203 : vector<4x32xf32>
    %205 = math.tanh %204 : vector<4x32xf32>
    %206 = arith.mulf %201, %205 : vector<4x32xf32>
    %207 = vector.extract_strided_slice %206 {offsets = [0, 0], sizes = [2, 32], strides = [1, 1]} : vector<4x32xf32> to vector<2x32xf32>
    %208 = arith.truncf %207 : vector<2x32xf32> to vector<2x32xbf16>
    %209 = arith.index_cast %c3_i32 : i32 to index
    %c0_71 = arith.constant 0 : index
    %c0_72 = arith.constant 0 : index
    %210 = vector.load %arg4[%209, %c0_71, %c0_72] : memref<8x2x64xbf16, #tpu.memory_space<vmem>>, vector<1x2x32xbf16>
    %211 = vector.shape_cast %210 : vector<1x2x32xbf16> to vector<2x32xbf16>
    %212 = vector.shape_cast %208 : vector<2x32xbf16> to vector<1x2x32xbf16>
    tpu.vector_store %arg4[%209, %c0_71, %c0_72], %212 {strides = array<i32>} : memref<8x2x64xbf16, #tpu.memory_space<vmem>>, vector<1x2x32xbf16>,
    %213 = vector.extract_strided_slice %206 {offsets = [2, 0], sizes = [2, 32], strides = [1, 1]} : vector<4x32xf32> to vector<2x32xf32>
    %214 = arith.truncf %213 : vector<2x32xf32> to vector<2x32xbf16>
    %215 = arith.index_cast %174 : i32 to index
    %c0_73 = arith.constant 0 : index
    %c32_74 = arith.constant 32 : index
    %216 = vector.load %arg4[%215, %c0_73, %c32_74] : memref<8x2x64xbf16, #tpu.memory_space<vmem>>, vector<1x2x32xbf16>
    %217 = vector.shape_cast %216 : vector<1x2x32xbf16> to vector<2x32xbf16>
    %218 = vector.shape_cast %214 : vector<2x32xbf16> to vector<1x2x32xbf16>
    tpu.vector_store %arg4[%215, %c0_73, %c32_74], %218 {strides = array<i32>} : memref<8x2x64xbf16, #tpu.memory_space<vmem>>, vector<1x2x32xbf16>,
    %c4_i32 = arith.constant 4 : i32
    %c7_i32_75 = arith.constant 7 : i32
    %219 = arith.subi %c7_i32_75, %c4_i32 : i32
    %cst_76 = arith.constant 0.000000e+00 : f32
    %220 = vector.broadcast %cst_76 : f32 to vector<4x32xf32>
    %221 = arith.select %36, %206, %220 : vector<4x32xi1>, vector<4x32xf32>
    %cst_77 = arith.constant 0.000000e+00 : f32
    %222 = vector.broadcast %cst_77 : f32 to vector<4x32xf32>
    %223 = arith.select %36, %222, %206 : vector<4x32xi1>, vector<4x32xf32>
    %224 = tpu.concatenate %221, %223 in 1 : vector<4x32xf32>, vector<4x32xf32> -> vector<4x64xf32>
    %225 = arith.truncf %224 : vector<4x64xf32> to vector<4x64xbf16>
    %cst_78 = arith.constant dense<0.000000e+00> : vector<4x128xf32>
    %226 = tpu.matmul %225, %21, %cst_78 {dimension_numbers = #tpu.dot_dimension_numbers<[1], [0], [0], [1], [0, 0, 1, 1], [], []>} : vector<4x64xbf16>, vector<64x128xbf16>, vector<4x128xf32> -> vector<4x128xf32>
    %227 = arith.index_cast %c4_i32 : i32 to index
    %c0_79 = arith.constant 0 : index
    %c0_80 = arith.constant 0 : index
    %228 = vector.load %arg5[%227, %c0_79, %c0_80] : memref<8x2x128xbf16, #tpu.memory_space<vmem>>, vector<1x2x128xbf16>
    %229 = vector.shape_cast %228 : vector<1x2x128xbf16> to vector<2x128xbf16>
    %230 = arith.index_cast %219 : i32 to index
    %c0_81 = arith.constant 0 : index
    %c0_82 = arith.constant 0 : index
    %231 = vector.load %arg6[%230, %c0_81, %c0_82] : memref<8x2x128xbf16, #tpu.memory_space<vmem>>, vector<1x2x128xbf16>
    %232 = vector.shape_cast %231 : vector<1x2x128xbf16> to vector<2x128xbf16>
    %233 = tpu.concatenate %229, %232 in 0 : vector<2x128xbf16>, vector<2x128xbf16> -> vector<4x128xbf16>
    %234 = arith.extf %233 : vector<4x128xbf16> to vector<4x128xf32>
    %235 = arith.addf %226, %234 : vector<4x128xf32>
    %236 = vector.broadcast %30 : vector<1x128xf32> to vector<4x128xf32>
    %237 = arith.mulf %236, %235 : vector<4x128xf32>
    %238 = math.tanh %237 : vector<4x128xf32>
    %239 = vector.broadcast %30 : vector<1x128xf32> to vector<4x128xf32>
    %240 = arith.mulf %239, %238 : vector<4x128xf32>
    %241 = vector.broadcast %33 : vector<1x128xf32> to vector<4x128xf32>
    %242 = arith.addf %240, %241 : vector<4x128xf32>
    %243 = vector.extract_strided_slice %242 {offsets = [0, 0], sizes = [4, 32], strides = [1, 1]} : vector<4x128xf32> to vector<4x32xf32>
    %244 = vector.extract_strided_slice %242 {offsets = [0, 32], sizes = [4, 32], strides = [1, 1]} : vector<4x128xf32> to vector<4x32xf32>
    %245 = vector.extract_strided_slice %242 {offsets = [0, 64], sizes = [4, 32], strides = [1, 1]} : vector<4x128xf32> to vector<4x32xf32>
    %246 = vector.extract_strided_slice %242 {offsets = [0, 96], sizes = [4, 32], strides = [1, 1]} : vector<4x128xf32> to vector<4x32xf32>
    %247 = arith.mulf %244, %204 : vector<4x32xf32>
    %248 = arith.mulf %243, %245 : vector<4x32xf32>
    %249 = arith.addf %247, %248 : vector<4x32xf32>
    %250 = math.tanh %249 : vector<4x32xf32>
    %251 = arith.mulf %246, %250 : vector<4x32xf32>
    %252 = vector.extract_strided_slice %251 {offsets = [0, 0], sizes = [2, 32], strides = [1, 1]} : vector<4x32xf32> to vector<2x32xf32>
    %253 = arith.truncf %252 : vector<2x32xf32> to vector<2x32xbf16>
    %254 = arith.index_cast %c4_i32 : i32 to index
    %c0_83 = arith.constant 0 : index
    %c0_84 = arith.constant 0 : index
    %255 = vector.load %arg4[%254, %c0_83, %c0_84] : memref<8x2x64xbf16, #tpu.memory_space<vmem>>, vector<1x2x32xbf16>
    %256 = vector.shape_cast %255 : vector<1x2x32xbf16> to vector<2x32xbf16>
    %257 = vector.shape_cast %253 : vector<2x32xbf16> to vector<1x2x32xbf16>
    tpu.vector_store %arg4[%254, %c0_83, %c0_84], %257 {strides = array<i32>} : memref<8x2x64xbf16, #tpu.memory_space<vmem>>, vector<1x2x32xbf16>,
    %258 = vector.extract_strided_slice %251 {offsets = [2, 0], sizes = [2, 32], strides = [1, 1]} : vector<4x32xf32> to vector<2x32xf32>
    %259 = arith.truncf %258 : vector<2x32xf32> to vector<2x32xbf16>
    %260 = arith.index_cast %219 : i32 to index
    %c0_85 = arith.constant 0 : index
    %c32_86 = arith.constant 32 : index
    %261 = vector.load %arg4[%260, %c0_85, %c32_86] : memref<8x2x64xbf16, #tpu.memory_space<vmem>>, vector<1x2x32xbf16>
    %262 = vector.shape_cast %261 : vector<1x2x32xbf16> to vector<2x32xbf16>
    %263 = vector.shape_cast %259 : vector<2x32xbf16> to vector<1x2x32xbf16>
    tpu.vector_store %arg4[%260, %c0_85, %c32_86], %263 {strides = array<i32>} : memref<8x2x64xbf16, #tpu.memory_space<vmem>>, vector<1x2x32xbf16>,
    %c5_i32 = arith.constant 5 : i32
    %c7_i32_87 = arith.constant 7 : i32
    %264 = arith.subi %c7_i32_87, %c5_i32 : i32
    %cst_88 = arith.constant 0.000000e+00 : f32
    %265 = vector.broadcast %cst_88 : f32 to vector<4x32xf32>
    %266 = arith.select %36, %251, %265 : vector<4x32xi1>, vector<4x32xf32>
    %cst_89 = arith.constant 0.000000e+00 : f32
    %267 = vector.broadcast %cst_89 : f32 to vector<4x32xf32>
    %268 = arith.select %36, %267, %251 : vector<4x32xi1>, vector<4x32xf32>
    %269 = tpu.concatenate %266, %268 in 1 : vector<4x32xf32>, vector<4x32xf32> -> vector<4x64xf32>
    %270 = arith.truncf %269 : vector<4x64xf32> to vector<4x64xbf16>
    %cst_90 = arith.constant dense<0.000000e+00> : vector<4x128xf32>
    %271 = tpu.matmul %270, %21, %cst_90 {dimension_numbers = #tpu.dot_dimension_numbers<[1], [0], [0], [1], [0, 0, 1, 1], [], []>} : vector<4x64xbf16>, vector<64x128xbf16>, vector<4x128xf32> -> vector<4x128xf32>
    %272 = arith.index_cast %c5_i32 : i32 to index
    %c0_91 = arith.constant 0 : index
    %c0_92 = arith.constant 0 : index
    %273 = vector.load %arg5[%272, %c0_91, %c0_92] : memref<8x2x128xbf16, #tpu.memory_space<vmem>>, vector<1x2x128xbf16>
    %274 = vector.shape_cast %273 : vector<1x2x128xbf16> to vector<2x128xbf16>
    %275 = arith.index_cast %264 : i32 to index
    %c0_93 = arith.constant 0 : index
    %c0_94 = arith.constant 0 : index
    %276 = vector.load %arg6[%275, %c0_93, %c0_94] : memref<8x2x128xbf16, #tpu.memory_space<vmem>>, vector<1x2x128xbf16>
    %277 = vector.shape_cast %276 : vector<1x2x128xbf16> to vector<2x128xbf16>
    %278 = tpu.concatenate %274, %277 in 0 : vector<2x128xbf16>, vector<2x128xbf16> -> vector<4x128xbf16>
    %279 = arith.extf %278 : vector<4x128xbf16> to vector<4x128xf32>
    %280 = arith.addf %271, %279 : vector<4x128xf32>
    %281 = vector.broadcast %30 : vector<1x128xf32> to vector<4x128xf32>
    %282 = arith.mulf %281, %280 : vector<4x128xf32>
    %283 = math.tanh %282 : vector<4x128xf32>
    %284 = vector.broadcast %30 : vector<1x128xf32> to vector<4x128xf32>
    %285 = arith.mulf %284, %283 : vector<4x128xf32>
    %286 = vector.broadcast %33 : vector<1x128xf32> to vector<4x128xf32>
    %287 = arith.addf %285, %286 : vector<4x128xf32>
    %288 = vector.extract_strided_slice %287 {offsets = [0, 0], sizes = [4, 32], strides = [1, 1]} : vector<4x128xf32> to vector<4x32xf32>
    %289 = vector.extract_strided_slice %287 {offsets = [0, 32], sizes = [4, 32], strides = [1, 1]} : vector<4x128xf32> to vector<4x32xf32>
    %290 = vector.extract_strided_slice %287 {offsets = [0, 64], sizes = [4, 32], strides = [1, 1]} : vector<4x128xf32> to vector<4x32xf32>
    %291 = vector.extract_strided_slice %287 {offsets = [0, 96], sizes = [4, 32], strides = [1, 1]} : vector<4x128xf32> to vector<4x32xf32>
    %292 = arith.mulf %289, %249 : vector<4x32xf32>
    %293 = arith.mulf %288, %290 : vector<4x32xf32>
    %294 = arith.addf %292, %293 : vector<4x32xf32>
    %295 = math.tanh %294 : vector<4x32xf32>
    %296 = arith.mulf %291, %295 : vector<4x32xf32>
    %297 = vector.extract_strided_slice %296 {offsets = [0, 0], sizes = [2, 32], strides = [1, 1]} : vector<4x32xf32> to vector<2x32xf32>
    %298 = arith.truncf %297 : vector<2x32xf32> to vector<2x32xbf16>
    %299 = arith.index_cast %c5_i32 : i32 to index
    %c0_95 = arith.constant 0 : index
    %c0_96 = arith.constant 0 : index
    %300 = vector.load %arg4[%299, %c0_95, %c0_96] : memref<8x2x64xbf16, #tpu.memory_space<vmem>>, vector<1x2x32xbf16>
    %301 = vector.shape_cast %300 : vector<1x2x32xbf16> to vector<2x32xbf16>
    %302 = vector.shape_cast %298 : vector<2x32xbf16> to vector<1x2x32xbf16>
    tpu.vector_store %arg4[%299, %c0_95, %c0_96], %302 {strides = array<i32>} : memref<8x2x64xbf16, #tpu.memory_space<vmem>>, vector<1x2x32xbf16>,
    %303 = vector.extract_strided_slice %296 {offsets = [2, 0], sizes = [2, 32], strides = [1, 1]} : vector<4x32xf32> to vector<2x32xf32>
    %304 = arith.truncf %303 : vector<2x32xf32> to vector<2x32xbf16>
    %305 = arith.index_cast %264 : i32 to index
    %c0_97 = arith.constant 0 : index
    %c32_98 = arith.constant 32 : index
    %306 = vector.load %arg4[%305, %c0_97, %c32_98] : memref<8x2x64xbf16, #tpu.memory_space<vmem>>, vector<1x2x32xbf16>
    %307 = vector.shape_cast %306 : vector<1x2x32xbf16> to vector<2x32xbf16>
    %308 = vector.shape_cast %304 : vector<2x32xbf16> to vector<1x2x32xbf16>
    tpu.vector_store %arg4[%305, %c0_97, %c32_98], %308 {strides = array<i32>} : memref<8x2x64xbf16, #tpu.memory_space<vmem>>, vector<1x2x32xbf16>,
    %c6_i32 = arith.constant 6 : i32
    %c7_i32_99 = arith.constant 7 : i32
    %309 = arith.subi %c7_i32_99, %c6_i32 : i32
    %cst_100 = arith.constant 0.000000e+00 : f32
    %310 = vector.broadcast %cst_100 : f32 to vector<4x32xf32>
    %311 = arith.select %36, %296, %310 : vector<4x32xi1>, vector<4x32xf32>
    %cst_101 = arith.constant 0.000000e+00 : f32
    %312 = vector.broadcast %cst_101 : f32 to vector<4x32xf32>
    %313 = arith.select %36, %312, %296 : vector<4x32xi1>, vector<4x32xf32>
    %314 = tpu.concatenate %311, %313 in 1 : vector<4x32xf32>, vector<4x32xf32> -> vector<4x64xf32>
    %315 = arith.truncf %314 : vector<4x64xf32> to vector<4x64xbf16>
    %cst_102 = arith.constant dense<0.000000e+00> : vector<4x128xf32>
    %316 = tpu.matmul %315, %21, %cst_102 {dimension_numbers = #tpu.dot_dimension_numbers<[1], [0], [0], [1], [0, 0, 1, 1], [], []>} : vector<4x64xbf16>, vector<64x128xbf16>, vector<4x128xf32> -> vector<4x128xf32>
    %317 = arith.index_cast %c6_i32 : i32 to index
    %c0_103 = arith.constant 0 : index
    %c0_104 = arith.constant 0 : index
    %318 = vector.load %arg5[%317, %c0_103, %c0_104] : memref<8x2x128xbf16, #tpu.memory_space<vmem>>, vector<1x2x128xbf16>
    %319 = vector.shape_cast %318 : vector<1x2x128xbf16> to vector<2x128xbf16>
    %320 = arith.index_cast %309 : i32 to index
    %c0_105 = arith.constant 0 : index
    %c0_106 = arith.constant 0 : index
    %321 = vector.load %arg6[%320, %c0_105, %c0_106] : memref<8x2x128xbf16, #tpu.memory_space<vmem>>, vector<1x2x128xbf16>
    %322 = vector.shape_cast %321 : vector<1x2x128xbf16> to vector<2x128xbf16>
    %323 = tpu.concatenate %319, %322 in 0 : vector<2x128xbf16>, vector<2x128xbf16> -> vector<4x128xbf16>
    %324 = arith.extf %323 : vector<4x128xbf16> to vector<4x128xf32>
    %325 = arith.addf %316, %324 : vector<4x128xf32>
    %326 = vector.broadcast %30 : vector<1x128xf32> to vector<4x128xf32>
    %327 = arith.mulf %326, %325 : vector<4x128xf32>
    %328 = math.tanh %327 : vector<4x128xf32>
    %329 = vector.broadcast %30 : vector<1x128xf32> to vector<4x128xf32>
    %330 = arith.mulf %329, %328 : vector<4x128xf32>
    %331 = vector.broadcast %33 : vector<1x128xf32> to vector<4x128xf32>
    %332 = arith.addf %330, %331 : vector<4x128xf32>
    %333 = vector.extract_strided_slice %332 {offsets = [0, 0], sizes = [4, 32], strides = [1, 1]} : vector<4x128xf32> to vector<4x32xf32>
    %334 = vector.extract_strided_slice %332 {offsets = [0, 32], sizes = [4, 32], strides = [1, 1]} : vector<4x128xf32> to vector<4x32xf32>
    %335 = vector.extract_strided_slice %332 {offsets = [0, 64], sizes = [4, 32], strides = [1, 1]} : vector<4x128xf32> to vector<4x32xf32>
    %336 = vector.extract_strided_slice %332 {offsets = [0, 96], sizes = [4, 32], strides = [1, 1]} : vector<4x128xf32> to vector<4x32xf32>
    %337 = arith.mulf %334, %294 : vector<4x32xf32>
    %338 = arith.mulf %333, %335 : vector<4x32xf32>
    %339 = arith.addf %337, %338 : vector<4x32xf32>
    %340 = math.tanh %339 : vector<4x32xf32>
    %341 = arith.mulf %336, %340 : vector<4x32xf32>
    %342 = vector.extract_strided_slice %341 {offsets = [0, 0], sizes = [2, 32], strides = [1, 1]} : vector<4x32xf32> to vector<2x32xf32>
    %343 = arith.truncf %342 : vector<2x32xf32> to vector<2x32xbf16>
    %344 = arith.index_cast %c6_i32 : i32 to index
    %c0_107 = arith.constant 0 : index
    %c0_108 = arith.constant 0 : index
    %345 = vector.load %arg4[%344, %c0_107, %c0_108] : memref<8x2x64xbf16, #tpu.memory_space<vmem>>, vector<1x2x32xbf16>
    %346 = vector.shape_cast %345 : vector<1x2x32xbf16> to vector<2x32xbf16>
    %347 = vector.shape_cast %343 : vector<2x32xbf16> to vector<1x2x32xbf16>
    tpu.vector_store %arg4[%344, %c0_107, %c0_108], %347 {strides = array<i32>} : memref<8x2x64xbf16, #tpu.memory_space<vmem>>, vector<1x2x32xbf16>,
    %348 = vector.extract_strided_slice %341 {offsets = [2, 0], sizes = [2, 32], strides = [1, 1]} : vector<4x32xf32> to vector<2x32xf32>
    %349 = arith.truncf %348 : vector<2x32xf32> to vector<2x32xbf16>
    %350 = arith.index_cast %309 : i32 to index
    %c0_109 = arith.constant 0 : index
    %c32_110 = arith.constant 32 : index
    %351 = vector.load %arg4[%350, %c0_109, %c32_110] : memref<8x2x64xbf16, #tpu.memory_space<vmem>>, vector<1x2x32xbf16>
    %352 = vector.shape_cast %351 : vector<1x2x32xbf16> to vector<2x32xbf16>
    %353 = vector.shape_cast %349 : vector<2x32xbf16> to vector<1x2x32xbf16>
    tpu.vector_store %arg4[%350, %c0_109, %c32_110], %353 {strides = array<i32>} : memref<8x2x64xbf16, #tpu.memory_space<vmem>>, vector<1x2x32xbf16>,
    %c7_i32_111 = arith.constant 7 : i32
    %c7_i32_112 = arith.constant 7 : i32
    %354 = arith.subi %c7_i32_112, %c7_i32_111 : i32
    %cst_113 = arith.constant 0.000000e+00 : f32
    %355 = vector.broadcast %cst_113 : f32 to vector<4x32xf32>
    %356 = arith.select %36, %341, %355 : vector<4x32xi1>, vector<4x32xf32>
    %cst_114 = arith.constant 0.000000e+00 : f32
    %357 = vector.broadcast %cst_114 : f32 to vector<4x32xf32>
    %358 = arith.select %36, %357, %341 : vector<4x32xi1>, vector<4x32xf32>
    %359 = tpu.concatenate %356, %358 in 1 : vector<4x32xf32>, vector<4x32xf32> -> vector<4x64xf32>
    %360 = arith.truncf %359 : vector<4x64xf32> to vector<4x64xbf16>
    %cst_115 = arith.constant dense<0.000000e+00> : vector<4x128xf32>
    %361 = tpu.matmul %360, %21, %cst_115 {dimension_numbers = #tpu.dot_dimension_numbers<[1], [0], [0], [1], [0, 0, 1, 1], [], []>} : vector<4x64xbf16>, vector<64x128xbf16>, vector<4x128xf32> -> vector<4x128xf32>
    %362 = arith.index_cast %c7_i32_111 : i32 to index
    %c0_116 = arith.constant 0 : index
    %c0_117 = arith.constant 0 : index
    %363 = vector.load %arg5[%362, %c0_116, %c0_117] : memref<8x2x128xbf16, #tpu.memory_space<vmem>>, vector<1x2x128xbf16>
    %364 = vector.shape_cast %363 : vector<1x2x128xbf16> to vector<2x128xbf16>
    %365 = arith.index_cast %354 : i32 to index
    %c0_118 = arith.constant 0 : index
    %c0_119 = arith.constant 0 : index
    %366 = vector.load %arg6[%365, %c0_118, %c0_119] : memref<8x2x128xbf16, #tpu.memory_space<vmem>>, vector<1x2x128xbf16>
    %367 = vector.shape_cast %366 : vector<1x2x128xbf16> to vector<2x128xbf16>
    %368 = tpu.concatenate %364, %367 in 0 : vector<2x128xbf16>, vector<2x128xbf16> -> vector<4x128xbf16>
    %369 = arith.extf %368 : vector<4x128xbf16> to vector<4x128xf32>
    %370 = arith.addf %361, %369 : vector<4x128xf32>
    %371 = vector.broadcast %30 : vector<1x128xf32> to vector<4x128xf32>
    %372 = arith.mulf %371, %370 : vector<4x128xf32>
    %373 = math.tanh %372 : vector<4x128xf32>
    %374 = vector.broadcast %30 : vector<1x128xf32> to vector<4x128xf32>
    %375 = arith.mulf %374, %373 : vector<4x128xf32>
    %376 = vector.broadcast %33 : vector<1x128xf32> to vector<4x128xf32>
    %377 = arith.addf %375, %376 : vector<4x128xf32>
    %378 = vector.extract_strided_slice %377 {offsets = [0, 0], sizes = [4, 32], strides = [1, 1]} : vector<4x128xf32> to vector<4x32xf32>
    %379 = vector.extract_strided_slice %377 {offsets = [0, 32], sizes = [4, 32], strides = [1, 1]} : vector<4x128xf32> to vector<4x32xf32>
    %380 = vector.extract_strided_slice %377 {offsets = [0, 64], sizes = [4, 32], strides = [1, 1]} : vector<4x128xf32> to vector<4x32xf32>
    %381 = vector.extract_strided_slice %377 {offsets = [0, 96], sizes = [4, 32], strides = [1, 1]} : vector<4x128xf32> to vector<4x32xf32>
    %382 = arith.mulf %379, %339 : vector<4x32xf32>
    %383 = arith.mulf %378, %380 : vector<4x32xf32>
    %384 = arith.addf %382, %383 : vector<4x32xf32>
    %385 = math.tanh %384 : vector<4x32xf32>
    %386 = arith.mulf %381, %385 : vector<4x32xf32>
    %387 = vector.extract_strided_slice %386 {offsets = [0, 0], sizes = [2, 32], strides = [1, 1]} : vector<4x32xf32> to vector<2x32xf32>
    %388 = arith.truncf %387 : vector<2x32xf32> to vector<2x32xbf16>
    %389 = arith.index_cast %c7_i32_111 : i32 to index
    %c0_120 = arith.constant 0 : index
    %c0_121 = arith.constant 0 : index
    %390 = vector.load %arg4[%389, %c0_120, %c0_121] : memref<8x2x64xbf16, #tpu.memory_space<vmem>>, vector<1x2x32xbf16>
    %391 = vector.shape_cast %390 : vector<1x2x32xbf16> to vector<2x32xbf16>
    %392 = vector.shape_cast %388 : vector<2x32xbf16> to vector<1x2x32xbf16>
    tpu.vector_store %arg4[%389, %c0_120, %c0_121], %392 {strides = array<i32>} : memref<8x2x64xbf16, #tpu.memory_space<vmem>>, vector<1x2x32xbf16>,
    %393 = vector.extract_strided_slice %386 {offsets = [2, 0], sizes = [2, 32], strides = [1, 1]} : vector<4x32xf32> to vector<2x32xf32>
    %394 = arith.truncf %393 : vector<2x32xf32> to vector<2x32xbf16>
    %395 = arith.index_cast %354 : i32 to index
    %c0_122 = arith.constant 0 : index
    %c32_123 = arith.constant 32 : index
    %396 = vector.load %arg4[%395, %c0_122, %c32_123] : memref<8x2x64xbf16, #tpu.memory_space<vmem>>, vector<1x2x32xbf16>
    %397 = vector.shape_cast %396 : vector<1x2x32xbf16> to vector<2x32xbf16>
    %398 = vector.shape_cast %394 : vector<2x32xbf16> to vector<1x2x32xbf16>
    tpu.vector_store %arg4[%395, %c0_122, %c32_123], %398 {strides = array<i32>} : memref<8x2x64xbf16, #tpu.memory_space<vmem>>, vector<1x2x32xbf16>,
    %c8_i32 = arith.constant 8 : i32
    return
  }
}

module attributes {stable_mosaic.version = 11 : i64} {
  func.func @_bilstm_layer_kernel(%arg0: memref<8x2x64xbf16, #tpu.memory_space<vmem>>, %arg1: memref<2x64x128xbf16, #tpu.memory_space<vmem>>, %arg2: memref<64x128xbf16, #tpu.memory_space<vmem>>, %arg3: memref<2x1x128xf32, #tpu.memory_space<vmem>>, %arg4: memref<8x2x64xbf16, #tpu.memory_space<vmem>>, %arg5: memref<8x2x128xbf16, #tpu.memory_space<vmem>>, %arg6: memref<8x2x128xbf16, #tpu.memory_space<vmem>>) attributes {dimension_semantics = [], scalar_prefetch = 0 : i64, scratch_operands = 2 : i64, tpu.core_type = #tpu.core_type<tc>} {
    %c0 = arith.constant 0 : index
    %c0_0 = arith.constant 0 : index
    %c0_1 = arith.constant 0 : index
    %0 = vector.load %arg0[%c0, %c0_0, %c0_1] : memref<8x2x64xbf16, #tpu.memory_space<vmem>>, vector<8x2x64xbf16>
    %c0_2 = arith.constant 0 : index
    %c0_3 = arith.constant 0 : index
    %c0_4 = arith.constant 0 : index
    %1 = vector.load %arg1[%c0_2, %c0_3, %c0_4] : memref<2x64x128xbf16, #tpu.memory_space<vmem>>, vector<1x64x128xbf16>
    %2 = vector.shape_cast %1 : vector<1x64x128xbf16> to vector<64x128xbf16>
    %cst = arith.constant dense<0.000000e+00> : vector<8x2x128xf32>
    %3 = tpu.matmul %0, %2, %cst {dimension_numbers = #tpu.dot_dimension_numbers<[2], [0], [0, 1], [1], [0, 0, 0, 1, 1, 1], [], []>} : vector<8x2x64xbf16>, vector<64x128xbf16>, vector<8x2x128xf32> -> vector<8x2x128xf32>
    %c0_5 = arith.constant 0 : index
    %c0_6 = arith.constant 0 : index
    %c0_7 = arith.constant 0 : index
    %4 = vector.load %arg3[%c0_5, %c0_6, %c0_7] : memref<2x1x128xf32, #tpu.memory_space<vmem>>, vector<1x1x128xf32>
    %5 = vector.shape_cast %4 : vector<1x1x128xf32> to vector<1x128xf32>
    %6 = vector.shape_cast %5 : vector<1x128xf32> to vector<1x1x128xf32>
    %7 = vector.broadcast %6 : vector<1x1x128xf32> to vector<8x2x128xf32>
    %8 = arith.addf %3, %7 : vector<8x2x128xf32>
    %9 = arith.truncf %8 : vector<8x2x128xf32> to vector<8x2x128xbf16>
    %c0_8 = arith.constant 0 : index
    %c0_9 = arith.constant 0 : index
    %c0_10 = arith.constant 0 : index
    %10 = vector.load %arg5[%c0_8, %c0_9, %c0_10] : memref<8x2x128xbf16, #tpu.memory_space<vmem>>, vector<8x2x128xbf16>
    tpu.vector_store %arg5[%c0_8, %c0_9, %c0_10], %9 {strides = array<i32>} : memref<8x2x128xbf16, #tpu.memory_space<vmem>>, vector<8x2x128xbf16>,
    %c1 = arith.constant 1 : index
    %c0_11 = arith.constant 0 : index
    %c0_12 = arith.constant 0 : index
    %11 = vector.load %arg1[%c1, %c0_11, %c0_12] : memref<2x64x128xbf16, #tpu.memory_space<vmem>>, vector<1x64x128xbf16>
    %12 = vector.shape_cast %11 : vector<1x64x128xbf16> to vector<64x128xbf16>
    %cst_13 = arith.constant dense<0.000000e+00> : vector<8x2x128xf32>
    %13 = tpu.matmul %0, %12, %cst_13 {dimension_numbers = #tpu.dot_dimension_numbers<[2], [0], [0, 1], [1], [0, 0, 0, 1, 1, 1], [], []>} : vector<8x2x64xbf16>, vector<64x128xbf16>, vector<8x2x128xf32> -> vector<8x2x128xf32>
    %c1_14 = arith.constant 1 : index
    %c0_15 = arith.constant 0 : index
    %c0_16 = arith.constant 0 : index
    %14 = vector.load %arg3[%c1_14, %c0_15, %c0_16] : memref<2x1x128xf32, #tpu.memory_space<vmem>>, vector<1x1x128xf32>
    %15 = vector.shape_cast %14 : vector<1x1x128xf32> to vector<1x128xf32>
    %16 = vector.shape_cast %15 : vector<1x128xf32> to vector<1x1x128xf32>
    %17 = vector.broadcast %16 : vector<1x1x128xf32> to vector<8x2x128xf32>
    %18 = arith.addf %13, %17 : vector<8x2x128xf32>
    %19 = arith.truncf %18 : vector<8x2x128xf32> to vector<8x2x128xbf16>
    %c0_17 = arith.constant 0 : index
    %c0_18 = arith.constant 0 : index
    %c0_19 = arith.constant 0 : index
    %20 = vector.load %arg6[%c0_17, %c0_18, %c0_19] : memref<8x2x128xbf16, #tpu.memory_space<vmem>>, vector<8x2x128xbf16>
    tpu.vector_store %arg6[%c0_17, %c0_18, %c0_19], %19 {strides = array<i32>} : memref<8x2x128xbf16, #tpu.memory_space<vmem>>, vector<8x2x128xbf16>,
    %c0_20 = arith.constant 0 : index
    %c0_21 = arith.constant 0 : index
    %21 = vector.load %arg2[%c0_20, %c0_21] : memref<64x128xbf16, #tpu.memory_space<vmem>>, vector<64x128xbf16>
    %22 = tpu.iota {dimensions = array<i32: 1>} : vector<1x128xi32>
    %c64_i32 = arith.constant 64 : i32
    %23 = vector.broadcast %c64_i32 : i32 to vector<1x128xi32>
    %24 = arith.cmpi sge, %22, %23 : vector<1x128xi32>
    %c96_i32 = arith.constant 96 : i32
    %25 = vector.broadcast %c96_i32 : i32 to vector<1x128xi32>
    %26 = arith.cmpi slt, %22, %25 : vector<1x128xi32>
    %27 = arith.andi %24, %26 : vector<1x128xi1>
    %cst_22 = arith.constant 1.000000e+00 : f32
    %cst_23 = arith.constant 5.000000e-01 : f32
    %28 = vector.broadcast %cst_22 : f32 to vector<1x128xf32>
    %29 = vector.broadcast %cst_23 : f32 to vector<1x128xf32>
    %30 = arith.select %27, %28, %29 : vector<1x128xi1>, vector<1x128xf32>
    %cst_24 = arith.constant 0.000000e+00 : f32
    %cst_25 = arith.constant 5.000000e-01 : f32
    %31 = vector.broadcast %cst_24 : f32 to vector<1x128xf32>
    %32 = vector.broadcast %cst_25 : f32 to vector<1x128xf32>
    %33 = arith.select %27, %31, %32 : vector<1x128xi1>, vector<1x128xf32>
    %34 = tpu.iota {dimensions = array<i32: 0>} : vector<4x32xi32>
    %c2_i32 = arith.constant 2 : i32
    %35 = vector.broadcast %c2_i32 : i32 to vector<4x32xi32>
    %36 = arith.cmpi slt, %34, %35 : vector<4x32xi32>
    %cst_26 = arith.constant 0.000000e+00 : f32
    %37 = vector.broadcast %cst_26 : f32 to vector<4x32xf32>
    %cst_27 = arith.constant 0.000000e+00 : f32
    %38 = vector.broadcast %cst_27 : f32 to vector<4x32xf32>
    %c0_i32 = arith.constant 0 : i32
    %c7_i32 = arith.constant 7 : i32
    %39 = arith.subi %c7_i32, %c0_i32 : i32
    %cst_28 = arith.constant 0.000000e+00 : f32
    %40 = vector.broadcast %cst_28 : f32 to vector<4x32xf32>
    %41 = arith.select %36, %37, %40 : vector<4x32xi1>, vector<4x32xf32>
    %cst_29 = arith.constant 0.000000e+00 : f32
    %42 = vector.broadcast %cst_29 : f32 to vector<4x32xf32>
    %43 = arith.select %36, %42, %37 : vector<4x32xi1>, vector<4x32xf32>
    %44 = tpu.concatenate %41, %43 in 1 : vector<4x32xf32>, vector<4x32xf32> -> vector<4x64xf32>
    %45 = arith.truncf %44 : vector<4x64xf32> to vector<4x64xbf16>
    %cst_30 = arith.constant dense<0.000000e+00> : vector<4x128xf32>
    %46 = tpu.matmul %45, %21, %cst_30 {dimension_numbers = #tpu.dot_dimension_numbers<[1], [0], [0], [1], [0, 0, 1, 1], [], []>} : vector<4x64xbf16>, vector<64x128xbf16>, vector<4x128xf32> -> vector<4x128xf32>
    %47 = arith.index_cast %c0_i32 : i32 to index
    %c0_31 = arith.constant 0 : index
    %c0_32 = arith.constant 0 : index
    %48 = vector.load %arg5[%47, %c0_31, %c0_32] : memref<8x2x128xbf16, #tpu.memory_space<vmem>>, vector<1x2x128xbf16>
    %49 = vector.shape_cast %48 : vector<1x2x128xbf16> to vector<2x128xbf16>
    %50 = arith.index_cast %39 : i32 to index
    %c0_33 = arith.constant 0 : index
    %c0_34 = arith.constant 0 : index
    %51 = vector.load %arg6[%50, %c0_33, %c0_34] : memref<8x2x128xbf16, #tpu.memory_space<vmem>>, vector<1x2x128xbf16>
    %52 = vector.shape_cast %51 : vector<1x2x128xbf16> to vector<2x128xbf16>
    %53 = tpu.concatenate %49, %52 in 0 : vector<2x128xbf16>, vector<2x128xbf16> -> vector<4x128xbf16>
    %54 = arith.extf %53 : vector<4x128xbf16> to vector<4x128xf32>
    %55 = arith.addf %46, %54 : vector<4x128xf32>
    %56 = vector.broadcast %30 : vector<1x128xf32> to vector<4x128xf32>
    %57 = arith.mulf %56, %55 : vector<4x128xf32>
    %58 = math.tanh %57 : vector<4x128xf32>
    %59 = vector.broadcast %30 : vector<1x128xf32> to vector<4x128xf32>
    %60 = arith.mulf %59, %58 : vector<4x128xf32>
    %61 = vector.broadcast %33 : vector<1x128xf32> to vector<4x128xf32>
    %62 = arith.addf %60, %61 : vector<4x128xf32>
    %63 = vector.extract_strided_slice %62 {offsets = [0, 0], sizes = [4, 32], strides = [1, 1]} : vector<4x128xf32> to vector<4x32xf32>
    %64 = vector.extract_strided_slice %62 {offsets = [0, 32], sizes = [4, 32], strides = [1, 1]} : vector<4x128xf32> to vector<4x32xf32>
    %65 = vector.extract_strided_slice %62 {offsets = [0, 64], sizes = [4, 32], strides = [1, 1]} : vector<4x128xf32> to vector<4x32xf32>
    %66 = vector.extract_strided_slice %62 {offsets = [0, 96], sizes = [4, 32], strides = [1, 1]} : vector<4x128xf32> to vector<4x32xf32>
    %67 = arith.mulf %64, %38 : vector<4x32xf32>
    %68 = arith.mulf %63, %65 : vector<4x32xf32>
    %69 = arith.addf %67, %68 : vector<4x32xf32>
    %70 = math.tanh %69 : vector<4x32xf32>
    %71 = arith.mulf %66, %70 : vector<4x32xf32>
    %72 = vector.extract_strided_slice %71 {offsets = [0, 0], sizes = [2, 32], strides = [1, 1]} : vector<4x32xf32> to vector<2x32xf32>
    %73 = arith.truncf %72 : vector<2x32xf32> to vector<2x32xbf16>
    %74 = arith.index_cast %c0_i32 : i32 to index
    %c0_35 = arith.constant 0 : index
    %c0_36 = arith.constant 0 : index
    %75 = vector.load %arg4[%74, %c0_35, %c0_36] : memref<8x2x64xbf16, #tpu.memory_space<vmem>>, vector<1x2x32xbf16>
    %76 = vector.shape_cast %75 : vector<1x2x32xbf16> to vector<2x32xbf16>
    %77 = vector.shape_cast %73 : vector<2x32xbf16> to vector<1x2x32xbf16>
    tpu.vector_store %arg4[%74, %c0_35, %c0_36], %77 {strides = array<i32>} : memref<8x2x64xbf16, #tpu.memory_space<vmem>>, vector<1x2x32xbf16>,
    %78 = vector.extract_strided_slice %71 {offsets = [2, 0], sizes = [2, 32], strides = [1, 1]} : vector<4x32xf32> to vector<2x32xf32>
    %79 = arith.truncf %78 : vector<2x32xf32> to vector<2x32xbf16>
    %80 = arith.index_cast %39 : i32 to index
    %c0_37 = arith.constant 0 : index
    %c32 = arith.constant 32 : index
    %81 = vector.load %arg4[%80, %c0_37, %c32] : memref<8x2x64xbf16, #tpu.memory_space<vmem>>, vector<1x2x32xbf16>
    %82 = vector.shape_cast %81 : vector<1x2x32xbf16> to vector<2x32xbf16>
    %83 = vector.shape_cast %79 : vector<2x32xbf16> to vector<1x2x32xbf16>
    tpu.vector_store %arg4[%80, %c0_37, %c32], %83 {strides = array<i32>} : memref<8x2x64xbf16, #tpu.memory_space<vmem>>, vector<1x2x32xbf16>,
    %c1_i32 = arith.constant 1 : i32
    %c7_i32_38 = arith.constant 7 : i32
    %84 = arith.subi %c7_i32_38, %c1_i32 : i32
    %cst_39 = arith.constant 0.000000e+00 : f32
    %85 = vector.broadcast %cst_39 : f32 to vector<4x32xf32>
    %86 = arith.select %36, %71, %85 : vector<4x32xi1>, vector<4x32xf32>
    %cst_40 = arith.constant 0.000000e+00 : f32
    %87 = vector.broadcast %cst_40 : f32 to vector<4x32xf32>
    %88 = arith.select %36, %87, %71 : vector<4x32xi1>, vector<4x32xf32>
    %89 = tpu.concatenate %86, %88 in 1 : vector<4x32xf32>, vector<4x32xf32> -> vector<4x64xf32>
    %90 = arith.truncf %89 : vector<4x64xf32> to vector<4x64xbf16>
    %cst_41 = arith.constant dense<0.000000e+00> : vector<4x128xf32>
    %91 = tpu.matmul %90, %21, %cst_41 {dimension_numbers = #tpu.dot_dimension_numbers<[1], [0], [0], [1], [0, 0, 1, 1], [], []>} : vector<4x64xbf16>, vector<64x128xbf16>, vector<4x128xf32> -> vector<4x128xf32>
    %92 = arith.index_cast %c1_i32 : i32 to index
    %c0_42 = arith.constant 0 : index
    %c0_43 = arith.constant 0 : index
    %93 = vector.load %arg5[%92, %c0_42, %c0_43] : memref<8x2x128xbf16, #tpu.memory_space<vmem>>, vector<1x2x128xbf16>
    %94 = vector.shape_cast %93 : vector<1x2x128xbf16> to vector<2x128xbf16>
    %95 = arith.index_cast %84 : i32 to index
    %c0_44 = arith.constant 0 : index
    %c0_45 = arith.constant 0 : index
    %96 = vector.load %arg6[%95, %c0_44, %c0_45] : memref<8x2x128xbf16, #tpu.memory_space<vmem>>, vector<1x2x128xbf16>
    %97 = vector.shape_cast %96 : vector<1x2x128xbf16> to vector<2x128xbf16>
    %98 = tpu.concatenate %94, %97 in 0 : vector<2x128xbf16>, vector<2x128xbf16> -> vector<4x128xbf16>
    %99 = arith.extf %98 : vector<4x128xbf16> to vector<4x128xf32>
    %100 = arith.addf %91, %99 : vector<4x128xf32>
    %101 = vector.broadcast %30 : vector<1x128xf32> to vector<4x128xf32>
    %102 = arith.mulf %101, %100 : vector<4x128xf32>
    %103 = math.tanh %102 : vector<4x128xf32>
    %104 = vector.broadcast %30 : vector<1x128xf32> to vector<4x128xf32>
    %105 = arith.mulf %104, %103 : vector<4x128xf32>
    %106 = vector.broadcast %33 : vector<1x128xf32> to vector<4x128xf32>
    %107 = arith.addf %105, %106 : vector<4x128xf32>
    %108 = vector.extract_strided_slice %107 {offsets = [0, 0], sizes = [4, 32], strides = [1, 1]} : vector<4x128xf32> to vector<4x32xf32>
    %109 = vector.extract_strided_slice %107 {offsets = [0, 32], sizes = [4, 32], strides = [1, 1]} : vector<4x128xf32> to vector<4x32xf32>
    %110 = vector.extract_strided_slice %107 {offsets = [0, 64], sizes = [4, 32], strides = [1, 1]} : vector<4x128xf32> to vector<4x32xf32>
    %111 = vector.extract_strided_slice %107 {offsets = [0, 96], sizes = [4, 32], strides = [1, 1]} : vector<4x128xf32> to vector<4x32xf32>
    %112 = arith.mulf %109, %69 : vector<4x32xf32>
    %113 = arith.mulf %108, %110 : vector<4x32xf32>
    %114 = arith.addf %112, %113 : vector<4x32xf32>
    %115 = math.tanh %114 : vector<4x32xf32>
    %116 = arith.mulf %111, %115 : vector<4x32xf32>
    %117 = vector.extract_strided_slice %116 {offsets = [0, 0], sizes = [2, 32], strides = [1, 1]} : vector<4x32xf32> to vector<2x32xf32>
    %118 = arith.truncf %117 : vector<2x32xf32> to vector<2x32xbf16>
    %119 = arith.index_cast %c1_i32 : i32 to index
    %c0_46 = arith.constant 0 : index
    %c0_47 = arith.constant 0 : index
    %120 = vector.load %arg4[%119, %c0_46, %c0_47] : memref<8x2x64xbf16, #tpu.memory_space<vmem>>, vector<1x2x32xbf16>
    %121 = vector.shape_cast %120 : vector<1x2x32xbf16> to vector<2x32xbf16>
    %122 = vector.shape_cast %118 : vector<2x32xbf16> to vector<1x2x32xbf16>
    tpu.vector_store %arg4[%119, %c0_46, %c0_47], %122 {strides = array<i32>} : memref<8x2x64xbf16, #tpu.memory_space<vmem>>, vector<1x2x32xbf16>,
    %123 = vector.extract_strided_slice %116 {offsets = [2, 0], sizes = [2, 32], strides = [1, 1]} : vector<4x32xf32> to vector<2x32xf32>
    %124 = arith.truncf %123 : vector<2x32xf32> to vector<2x32xbf16>
    %125 = arith.index_cast %84 : i32 to index
    %c0_48 = arith.constant 0 : index
    %c32_49 = arith.constant 32 : index
    %126 = vector.load %arg4[%125, %c0_48, %c32_49] : memref<8x2x64xbf16, #tpu.memory_space<vmem>>, vector<1x2x32xbf16>
    %127 = vector.shape_cast %126 : vector<1x2x32xbf16> to vector<2x32xbf16>
    %128 = vector.shape_cast %124 : vector<2x32xbf16> to vector<1x2x32xbf16>
    tpu.vector_store %arg4[%125, %c0_48, %c32_49], %128 {strides = array<i32>} : memref<8x2x64xbf16, #tpu.memory_space<vmem>>, vector<1x2x32xbf16>,
    %c2_i32_50 = arith.constant 2 : i32
    %c7_i32_51 = arith.constant 7 : i32
    %129 = arith.subi %c7_i32_51, %c2_i32_50 : i32
    %cst_52 = arith.constant 0.000000e+00 : f32
    %130 = vector.broadcast %cst_52 : f32 to vector<4x32xf32>
    %131 = arith.select %36, %116, %130 : vector<4x32xi1>, vector<4x32xf32>
    %cst_53 = arith.constant 0.000000e+00 : f32
    %132 = vector.broadcast %cst_53 : f32 to vector<4x32xf32>
    %133 = arith.select %36, %132, %116 : vector<4x32xi1>, vector<4x32xf32>
    %134 = tpu.concatenate %131, %133 in 1 : vector<4x32xf32>, vector<4x32xf32> -> vector<4x64xf32>
    %135 = arith.truncf %134 : vector<4x64xf32> to vector<4x64xbf16>
    %cst_54 = arith.constant dense<0.000000e+00> : vector<4x128xf32>
    %136 = tpu.matmul %135, %21, %cst_54 {dimension_numbers = #tpu.dot_dimension_numbers<[1], [0], [0], [1], [0, 0, 1, 1], [], []>} : vector<4x64xbf16>, vector<64x128xbf16>, vector<4x128xf32> -> vector<4x128xf32>
    %137 = arith.index_cast %c2_i32_50 : i32 to index
    %c0_55 = arith.constant 0 : index
    %c0_56 = arith.constant 0 : index
    %138 = vector.load %arg5[%137, %c0_55, %c0_56] : memref<8x2x128xbf16, #tpu.memory_space<vmem>>, vector<1x2x128xbf16>
    %139 = vector.shape_cast %138 : vector<1x2x128xbf16> to vector<2x128xbf16>
    %140 = arith.index_cast %129 : i32 to index
    %c0_57 = arith.constant 0 : index
    %c0_58 = arith.constant 0 : index
    %141 = vector.load %arg6[%140, %c0_57, %c0_58] : memref<8x2x128xbf16, #tpu.memory_space<vmem>>, vector<1x2x128xbf16>
    %142 = vector.shape_cast %141 : vector<1x2x128xbf16> to vector<2x128xbf16>
    %143 = tpu.concatenate %139, %142 in 0 : vector<2x128xbf16>, vector<2x128xbf16> -> vector<4x128xbf16>
    %144 = arith.extf %143 : vector<4x128xbf16> to vector<4x128xf32>
    %145 = arith.addf %136, %144 : vector<4x128xf32>
    %146 = vector.broadcast %30 : vector<1x128xf32> to vector<4x128xf32>
    %147 = arith.mulf %146, %145 : vector<4x128xf32>
    %148 = math.tanh %147 : vector<4x128xf32>
    %149 = vector.broadcast %30 : vector<1x128xf32> to vector<4x128xf32>
    %150 = arith.mulf %149, %148 : vector<4x128xf32>
    %151 = vector.broadcast %33 : vector<1x128xf32> to vector<4x128xf32>
    %152 = arith.addf %150, %151 : vector<4x128xf32>
    %153 = vector.extract_strided_slice %152 {offsets = [0, 0], sizes = [4, 32], strides = [1, 1]} : vector<4x128xf32> to vector<4x32xf32>
    %154 = vector.extract_strided_slice %152 {offsets = [0, 32], sizes = [4, 32], strides = [1, 1]} : vector<4x128xf32> to vector<4x32xf32>
    %155 = vector.extract_strided_slice %152 {offsets = [0, 64], sizes = [4, 32], strides = [1, 1]} : vector<4x128xf32> to vector<4x32xf32>
    %156 = vector.extract_strided_slice %152 {offsets = [0, 96], sizes = [4, 32], strides = [1, 1]} : vector<4x128xf32> to vector<4x32xf32>
    %157 = arith.mulf %154, %114 : vector<4x32xf32>
    %158 = arith.mulf %153, %155 : vector<4x32xf32>
    %159 = arith.addf %157, %158 : vector<4x32xf32>
    %160 = math.tanh %159 : vector<4x32xf32>
    %161 = arith.mulf %156, %160 : vector<4x32xf32>
    %162 = vector.extract_strided_slice %161 {offsets = [0, 0], sizes = [2, 32], strides = [1, 1]} : vector<4x32xf32> to vector<2x32xf32>
    %163 = arith.truncf %162 : vector<2x32xf32> to vector<2x32xbf16>
    %164 = arith.index_cast %c2_i32_50 : i32 to index
    %c0_59 = arith.constant 0 : index
    %c0_60 = arith.constant 0 : index
    %165 = vector.load %arg4[%164, %c0_59, %c0_60] : memref<8x2x64xbf16, #tpu.memory_space<vmem>>, vector<1x2x32xbf16>
    %166 = vector.shape_cast %165 : vector<1x2x32xbf16> to vector<2x32xbf16>
    %167 = vector.shape_cast %163 : vector<2x32xbf16> to vector<1x2x32xbf16>
    tpu.vector_store %arg4[%164, %c0_59, %c0_60], %167 {strides = array<i32>} : memref<8x2x64xbf16, #tpu.memory_space<vmem>>, vector<1x2x32xbf16>,
    %168 = vector.extract_strided_slice %161 {offsets = [2, 0], sizes = [2, 32], strides = [1, 1]} : vector<4x32xf32> to vector<2x32xf32>
    %169 = arith.truncf %168 : vector<2x32xf32> to vector<2x32xbf16>
    %170 = arith.index_cast %129 : i32 to index
    %c0_61 = arith.constant 0 : index
    %c32_62 = arith.constant 32 : index
    %171 = vector.load %arg4[%170, %c0_61, %c32_62] : memref<8x2x64xbf16, #tpu.memory_space<vmem>>, vector<1x2x32xbf16>
    %172 = vector.shape_cast %171 : vector<1x2x32xbf16> to vector<2x32xbf16>
    %173 = vector.shape_cast %169 : vector<2x32xbf16> to vector<1x2x32xbf16>
    tpu.vector_store %arg4[%170, %c0_61, %c32_62], %173 {strides = array<i32>} : memref<8x2x64xbf16, #tpu.memory_space<vmem>>, vector<1x2x32xbf16>,
    %c3_i32 = arith.constant 3 : i32
    %c7_i32_63 = arith.constant 7 : i32
    %174 = arith.subi %c7_i32_63, %c3_i32 : i32
    %cst_64 = arith.constant 0.000000e+00 : f32
    %175 = vector.broadcast %cst_64 : f32 to vector<4x32xf32>
    %176 = arith.select %36, %161, %175 : vector<4x32xi1>, vector<4x32xf32>
    %cst_65 = arith.constant 0.000000e+00 : f32
    %177 = vector.broadcast %cst_65 : f32 to vector<4x32xf32>
    %178 = arith.select %36, %177, %161 : vector<4x32xi1>, vector<4x32xf32>
    %179 = tpu.concatenate %176, %178 in 1 : vector<4x32xf32>, vector<4x32xf32> -> vector<4x64xf32>
    %180 = arith.truncf %179 : vector<4x64xf32> to vector<4x64xbf16>
    %cst_66 = arith.constant dense<0.000000e+00> : vector<4x128xf32>
    %181 = tpu.matmul %180, %21, %cst_66 {dimension_numbers = #tpu.dot_dimension_numbers<[1], [0], [0], [1], [0, 0, 1, 1], [], []>} : vector<4x64xbf16>, vector<64x128xbf16>, vector<4x128xf32> -> vector<4x128xf32>
    %182 = arith.index_cast %c3_i32 : i32 to index
    %c0_67 = arith.constant 0 : index
    %c0_68 = arith.constant 0 : index
    %183 = vector.load %arg5[%182, %c0_67, %c0_68] : memref<8x2x128xbf16, #tpu.memory_space<vmem>>, vector<1x2x128xbf16>
    %184 = vector.shape_cast %183 : vector<1x2x128xbf16> to vector<2x128xbf16>
    %185 = arith.index_cast %174 : i32 to index
    %c0_69 = arith.constant 0 : index
    %c0_70 = arith.constant 0 : index
    %186 = vector.load %arg6[%185, %c0_69, %c0_70] : memref<8x2x128xbf16, #tpu.memory_space<vmem>>, vector<1x2x128xbf16>
    %187 = vector.shape_cast %186 : vector<1x2x128xbf16> to vector<2x128xbf16>
    %188 = tpu.concatenate %184, %187 in 0 : vector<2x128xbf16>, vector<2x128xbf16> -> vector<4x128xbf16>
    %189 = arith.extf %188 : vector<4x128xbf16> to vector<4x128xf32>
    %190 = arith.addf %181, %189 : vector<4x128xf32>
    %191 = vector.broadcast %30 : vector<1x128xf32> to vector<4x128xf32>
    %192 = arith.mulf %191, %190 : vector<4x128xf32>
    %193 = math.tanh %192 : vector<4x128xf32>
    %194 = vector.broadcast %30 : vector<1x128xf32> to vector<4x128xf32>
    %195 = arith.mulf %194, %193 : vector<4x128xf32>
    %196 = vector.broadcast %33 : vector<1x128xf32> to vector<4x128xf32>
    %197 = arith.addf %195, %196 : vector<4x128xf32>
    %198 = vector.extract_strided_slice %197 {offsets = [0, 0], sizes = [4, 32], strides = [1, 1]} : vector<4x128xf32> to vector<4x32xf32>
    %199 = vector.extract_strided_slice %197 {offsets = [0, 32], sizes = [4, 32], strides = [1, 1]} : vector<4x128xf32> to vector<4x32xf32>
    %200 = vector.extract_strided_slice %197 {offsets = [0, 64], sizes = [4, 32], strides = [1, 1]} : vector<4x128xf32> to vector<4x32xf32>
    %201 = vector.extract_strided_slice %197 {offsets = [0, 96], sizes = [4, 32], strides = [1, 1]} : vector<4x128xf32> to vector<4x32xf32>
    %202 = arith.mulf %199, %159 : vector<4x32xf32>
    %203 = arith.mulf %198, %200 : vector<4x32xf32>
    %204 = arith.addf %202, %203 : vector<4x32xf32>
    %205 = math.tanh %204 : vector<4x32xf32>
    %206 = arith.mulf %201, %205 : vector<4x32xf32>
    %207 = vector.extract_strided_slice %206 {offsets = [0, 0], sizes = [2, 32], strides = [1, 1]} : vector<4x32xf32> to vector<2x32xf32>
    %208 = arith.truncf %207 : vector<2x32xf32> to vector<2x32xbf16>
    %209 = arith.index_cast %c3_i32 : i32 to index
    %c0_71 = arith.constant 0 : index
    %c0_72 = arith.constant 0 : index
    %210 = vector.load %arg4[%209, %c0_71, %c0_72] : memref<8x2x64xbf16, #tpu.memory_space<vmem>>, vector<1x2x32xbf16>
    %211 = vector.shape_cast %210 : vector<1x2x32xbf16> to vector<2x32xbf16>
    %212 = vector.shape_cast %208 : vector<2x32xbf16> to vector<1x2x32xbf16>
    tpu.vector_store %arg4[%209, %c0_71, %c0_72], %212 {strides = array<i32>} : memref<8x2x64xbf16, #tpu.memory_space<vmem>>, vector<1x2x32xbf16>,
    %213 = vector.extract_strided_slice %206 {offsets = [2, 0], sizes = [2, 32], strides = [1, 1]} : vector<4x32xf32> to vector<2x32xf32>
    %214 = arith.truncf %213 : vector<2x32xf32> to vector<2x32xbf16>
    %215 = arith.index_cast %174 : i32 to index
    %c0_73 = arith.constant 0 : index
    %c32_74 = arith.constant 32 : index
    %216 = vector.load %arg4[%215, %c0_73, %c32_74] : memref<8x2x64xbf16, #tpu.memory_space<vmem>>, vector<1x2x32xbf16>
    %217 = vector.shape_cast %216 : vector<1x2x32xbf16> to vector<2x32xbf16>
    %218 = vector.shape_cast %214 : vector<2x32xbf16> to vector<1x2x32xbf16>
    tpu.vector_store %arg4[%215, %c0_73, %c32_74], %218 {strides = array<i32>} : memref<8x2x64xbf16, #tpu.memory_space<vmem>>, vector<1x2x32xbf16>,
    %c4_i32 = arith.constant 4 : i32
    %c7_i32_75 = arith.constant 7 : i32
    %219 = arith.subi %c7_i32_75, %c4_i32 : i32
    %cst_76 = arith.constant 0.000000e+00 : f32
    %220 = vector.broadcast %cst_76 : f32 to vector<4x32xf32>
    %221 = arith.select %36, %206, %220 : vector<4x32xi1>, vector<4x32xf32>
    %cst_77 = arith.constant 0.000000e+00 : f32
    %222 = vector.broadcast %cst_77 : f32 to vector<4x32xf32>
    %223 = arith.select %36, %222, %206 : vector<4x32xi1>, vector<4x32xf32>
    %224 = tpu.concatenate %221, %223 in 1 : vector<4x32xf32>, vector<4x32xf32> -> vector<4x64xf32>
    %225 = arith.truncf %224 : vector<4x64xf32> to vector<4x64xbf16>
    %cst_78 = arith.constant dense<0.000000e+00> : vector<4x128xf32>
    %226 = tpu.matmul %225, %21, %cst_78 {dimension_numbers = #tpu.dot_dimension_numbers<[1], [0], [0], [1], [0, 0, 1, 1], [], []>} : vector<4x64xbf16>, vector<64x128xbf16>, vector<4x128xf32> -> vector<4x128xf32>
    %227 = arith.index_cast %c4_i32 : i32 to index
    %c0_79 = arith.constant 0 : index
    %c0_80 = arith.constant 0 : index
    %228 = vector.load %arg5[%227, %c0_79, %c0_80] : memref<8x2x128xbf16, #tpu.memory_space<vmem>>, vector<1x2x128xbf16>
    %229 = vector.shape_cast %228 : vector<1x2x128xbf16> to vector<2x128xbf16>
    %230 = arith.index_cast %219 : i32 to index
    %c0_81 = arith.constant 0 : index
    %c0_82 = arith.constant 0 : index
    %231 = vector.load %arg6[%230, %c0_81, %c0_82] : memref<8x2x128xbf16, #tpu.memory_space<vmem>>, vector<1x2x128xbf16>
    %232 = vector.shape_cast %231 : vector<1x2x128xbf16> to vector<2x128xbf16>
    %233 = tpu.concatenate %229, %232 in 0 : vector<2x128xbf16>, vector<2x128xbf16> -> vector<4x128xbf16>
    %234 = arith.extf %233 : vector<4x128xbf16> to vector<4x128xf32>
    %235 = arith.addf %226, %234 : vector<4x128xf32>
    %236 = vector.broadcast %30 : vector<1x128xf32> to vector<4x128xf32>
    %237 = arith.mulf %236, %235 : vector<4x128xf32>
    %238 = math.tanh %237 : vector<4x128xf32>
    %239 = vector.broadcast %30 : vector<1x128xf32> to vector<4x128xf32>
    %240 = arith.mulf %239, %238 : vector<4x128xf32>
    %241 = vector.broadcast %33 : vector<1x128xf32> to vector<4x128xf32>
    %242 = arith.addf %240, %241 : vector<4x128xf32>
    %243 = vector.extract_strided_slice %242 {offsets = [0, 0], sizes = [4, 32], strides = [1, 1]} : vector<4x128xf32> to vector<4x32xf32>
    %244 = vector.extract_strided_slice %242 {offsets = [0, 32], sizes = [4, 32], strides = [1, 1]} : vector<4x128xf32> to vector<4x32xf32>
    %245 = vector.extract_strided_slice %242 {offsets = [0, 64], sizes = [4, 32], strides = [1, 1]} : vector<4x128xf32> to vector<4x32xf32>
    %246 = vector.extract_strided_slice %242 {offsets = [0, 96], sizes = [4, 32], strides = [1, 1]} : vector<4x128xf32> to vector<4x32xf32>
    %247 = arith.mulf %244, %204 : vector<4x32xf32>
    %248 = arith.mulf %243, %245 : vector<4x32xf32>
    %249 = arith.addf %247, %248 : vector<4x32xf32>
    %250 = math.tanh %249 : vector<4x32xf32>
    %251 = arith.mulf %246, %250 : vector<4x32xf32>
    %252 = vector.extract_strided_slice %251 {offsets = [0, 0], sizes = [2, 32], strides = [1, 1]} : vector<4x32xf32> to vector<2x32xf32>
    %253 = arith.truncf %252 : vector<2x32xf32> to vector<2x32xbf16>
    %254 = arith.index_cast %c4_i32 : i32 to index
    %c0_83 = arith.constant 0 : index
    %c0_84 = arith.constant 0 : index
    %255 = vector.load %arg4[%254, %c0_83, %c0_84] : memref<8x2x64xbf16, #tpu.memory_space<vmem>>, vector<1x2x32xbf16>
    %256 = vector.shape_cast %255 : vector<1x2x32xbf16> to vector<2x32xbf16>
    %257 = vector.shape_cast %253 : vector<2x32xbf16> to vector<1x2x32xbf16>
    tpu.vector_store %arg4[%254, %c0_83, %c0_84], %257 {strides = array<i32>} : memref<8x2x64xbf16, #tpu.memory_space<vmem>>, vector<1x2x32xbf16>,
    %258 = vector.extract_strided_slice %251 {offsets = [2, 0], sizes = [2, 32], strides = [1, 1]} : vector<4x32xf32> to vector<2x32xf32>
    %259 = arith.truncf %258 : vector<2x32xf32> to vector<2x32xbf16>
    %260 = arith.index_cast %219 : i32 to index
    %c0_85 = arith.constant 0 : index
    %c32_86 = arith.constant 32 : index
    %261 = vector.load %arg4[%260, %c0_85, %c32_86] : memref<8x2x64xbf16, #tpu.memory_space<vmem>>, vector<1x2x32xbf16>
    %262 = vector.shape_cast %261 : vector<1x2x32xbf16> to vector<2x32xbf16>
    %263 = vector.shape_cast %259 : vector<2x32xbf16> to vector<1x2x32xbf16>
    tpu.vector_store %arg4[%260, %c0_85, %c32_86], %263 {strides = array<i32>} : memref<8x2x64xbf16, #tpu.memory_space<vmem>>, vector<1x2x32xbf16>,
    %c5_i32 = arith.constant 5 : i32
    %c7_i32_87 = arith.constant 7 : i32
    %264 = arith.subi %c7_i32_87, %c5_i32 : i32
    %cst_88 = arith.constant 0.000000e+00 : f32
    %265 = vector.broadcast %cst_88 : f32 to vector<4x32xf32>
    %266 = arith.select %36, %251, %265 : vector<4x32xi1>, vector<4x32xf32>
    %cst_89 = arith.constant 0.000000e+00 : f32
    %267 = vector.broadcast %cst_89 : f32 to vector<4x32xf32>
    %268 = arith.select %36, %267, %251 : vector<4x32xi1>, vector<4x32xf32>
    %269 = tpu.concatenate %266, %268 in 1 : vector<4x32xf32>, vector<4x32xf32> -> vector<4x64xf32>
    %270 = arith.truncf %269 : vector<4x64xf32> to vector<4x64xbf16>
    %cst_90 = arith.constant dense<0.000000e+00> : vector<4x128xf32>
    %271 = tpu.matmul %270, %21, %cst_90 {dimension_numbers = #tpu.dot_dimension_numbers<[1], [0], [0], [1], [0, 0, 1, 1], [], []>} : vector<4x64xbf16>, vector<64x128xbf16>, vector<4x128xf32> -> vector<4x128xf32>
    %272 = arith.index_cast %c5_i32 : i32 to index
    %c0_91 = arith.constant 0 : index
    %c0_92 = arith.constant 0 : index
    %273 = vector.load %arg5[%272, %c0_91, %c0_92] : memref<8x2x128xbf16, #tpu.memory_space<vmem>>, vector<1x2x128xbf16>
    %274 = vector.shape_cast %273 : vector<1x2x128xbf16> to vector<2x128xbf16>
    %275 = arith.index_cast %264 : i32 to index
    %c0_93 = arith.constant 0 : index
    %c0_94 = arith.constant 0 : index
    %276 = vector.load %arg6[%275, %c0_93, %c0_94] : memref<8x2x128xbf16, #tpu.memory_space<vmem>>, vector<1x2x128xbf16>
    %277 = vector.shape_cast %276 : vector<1x2x128xbf16> to vector<2x128xbf16>
    %278 = tpu.concatenate %274, %277 in 0 : vector<2x128xbf16>, vector<2x128xbf16> -> vector<4x128xbf16>
    %279 = arith.extf %278 : vector<4x128xbf16> to vector<4x128xf32>
    %280 = arith.addf %271, %279 : vector<4x128xf32>
    %281 = vector.broadcast %30 : vector<1x128xf32> to vector<4x128xf32>
    %282 = arith.mulf %281, %280 : vector<4x128xf32>
    %283 = math.tanh %282 : vector<4x128xf32>
    %284 = vector.broadcast %30 : vector<1x128xf32> to vector<4x128xf32>
    %285 = arith.mulf %284, %283 : vector<4x128xf32>
    %286 = vector.broadcast %33 : vector<1x128xf32> to vector<4x128xf32>
    %287 = arith.addf %285, %286 : vector<4x128xf32>
    %288 = vector.extract_strided_slice %287 {offsets = [0, 0], sizes = [4, 32], strides = [1, 1]} : vector<4x128xf32> to vector<4x32xf32>
    %289 = vector.extract_strided_slice %287 {offsets = [0, 32], sizes = [4, 32], strides = [1, 1]} : vector<4x128xf32> to vector<4x32xf32>
    %290 = vector.extract_strided_slice %287 {offsets = [0, 64], sizes = [4, 32], strides = [1, 1]} : vector<4x128xf32> to vector<4x32xf32>
    %291 = vector.extract_strided_slice %287 {offsets = [0, 96], sizes = [4, 32], strides = [1, 1]} : vector<4x128xf32> to vector<4x32xf32>
    %292 = arith.mulf %289, %249 : vector<4x32xf32>
    %293 = arith.mulf %288, %290 : vector<4x32xf32>
    %294 = arith.addf %292, %293 : vector<4x32xf32>
    %295 = math.tanh %294 : vector<4x32xf32>
    %296 = arith.mulf %291, %295 : vector<4x32xf32>
    %297 = vector.extract_strided_slice %296 {offsets = [0, 0], sizes = [2, 32], strides = [1, 1]} : vector<4x32xf32> to vector<2x32xf32>
    %298 = arith.truncf %297 : vector<2x32xf32> to vector<2x32xbf16>
    %299 = arith.index_cast %c5_i32 : i32 to index
    %c0_95 = arith.constant 0 : index
    %c0_96 = arith.constant 0 : index
    %300 = vector.load %arg4[%299, %c0_95, %c0_96] : memref<8x2x64xbf16, #tpu.memory_space<vmem>>, vector<1x2x32xbf16>
    %301 = vector.shape_cast %300 : vector<1x2x32xbf16> to vector<2x32xbf16>
    %302 = vector.shape_cast %298 : vector<2x32xbf16> to vector<1x2x32xbf16>
    tpu.vector_store %arg4[%299, %c0_95, %c0_96], %302 {strides = array<i32>} : memref<8x2x64xbf16, #tpu.memory_space<vmem>>, vector<1x2x32xbf16>,
    %303 = vector.extract_strided_slice %296 {offsets = [2, 0], sizes = [2, 32], strides = [1, 1]} : vector<4x32xf32> to vector<2x32xf32>
    %304 = arith.truncf %303 : vector<2x32xf32> to vector<2x32xbf16>
    %305 = arith.index_cast %264 : i32 to index
    %c0_97 = arith.constant 0 : index
    %c32_98 = arith.constant 32 : index
    %306 = vector.load %arg4[%305, %c0_97, %c32_98] : memref<8x2x64xbf16, #tpu.memory_space<vmem>>, vector<1x2x32xbf16>
    %307 = vector.shape_cast %306 : vector<1x2x32xbf16> to vector<2x32xbf16>
    %308 = vector.shape_cast %304 : vector<2x32xbf16> to vector<1x2x32xbf16>
    tpu.vector_store %arg4[%305, %c0_97, %c32_98], %308 {strides = array<i32>} : memref<8x2x64xbf16, #tpu.memory_space<vmem>>, vector<1x2x32xbf16>,
    %c6_i32 = arith.constant 6 : i32
    %c7_i32_99 = arith.constant 7 : i32
    %309 = arith.subi %c7_i32_99, %c6_i32 : i32
    %cst_100 = arith.constant 0.000000e+00 : f32
    %310 = vector.broadcast %cst_100 : f32 to vector<4x32xf32>
    %311 = arith.select %36, %296, %310 : vector<4x32xi1>, vector<4x32xf32>
    %cst_101 = arith.constant 0.000000e+00 : f32
    %312 = vector.broadcast %cst_101 : f32 to vector<4x32xf32>
    %313 = arith.select %36, %312, %296 : vector<4x32xi1>, vector<4x32xf32>
    %314 = tpu.concatenate %311, %313 in 1 : vector<4x32xf32>, vector<4x32xf32> -> vector<4x64xf32>
    %315 = arith.truncf %314 : vector<4x64xf32> to vector<4x64xbf16>
    %cst_102 = arith.constant dense<0.000000e+00> : vector<4x128xf32>
    %316 = tpu.matmul %315, %21, %cst_102 {dimension_numbers = #tpu.dot_dimension_numbers<[1], [0], [0], [1], [0, 0, 1, 1], [], []>} : vector<4x64xbf16>, vector<64x128xbf16>, vector<4x128xf32> -> vector<4x128xf32>
    %317 = arith.index_cast %c6_i32 : i32 to index
    %c0_103 = arith.constant 0 : index
    %c0_104 = arith.constant 0 : index
    %318 = vector.load %arg5[%317, %c0_103, %c0_104] : memref<8x2x128xbf16, #tpu.memory_space<vmem>>, vector<1x2x128xbf16>
    %319 = vector.shape_cast %318 : vector<1x2x128xbf16> to vector<2x128xbf16>
    %320 = arith.index_cast %309 : i32 to index
    %c0_105 = arith.constant 0 : index
    %c0_106 = arith.constant 0 : index
    %321 = vector.load %arg6[%320, %c0_105, %c0_106] : memref<8x2x128xbf16, #tpu.memory_space<vmem>>, vector<1x2x128xbf16>
    %322 = vector.shape_cast %321 : vector<1x2x128xbf16> to vector<2x128xbf16>
    %323 = tpu.concatenate %319, %322 in 0 : vector<2x128xbf16>, vector<2x128xbf16> -> vector<4x128xbf16>
    %324 = arith.extf %323 : vector<4x128xbf16> to vector<4x128xf32>
    %325 = arith.addf %316, %324 : vector<4x128xf32>
    %326 = vector.broadcast %30 : vector<1x128xf32> to vector<4x128xf32>
    %327 = arith.mulf %326, %325 : vector<4x128xf32>
    %328 = math.tanh %327 : vector<4x128xf32>
    %329 = vector.broadcast %30 : vector<1x128xf32> to vector<4x128xf32>
    %330 = arith.mulf %329, %328 : vector<4x128xf32>
    %331 = vector.broadcast %33 : vector<1x128xf32> to vector<4x128xf32>
    %332 = arith.addf %330, %331 : vector<4x128xf32>
    %333 = vector.extract_strided_slice %332 {offsets = [0, 0], sizes = [4, 32], strides = [1, 1]} : vector<4x128xf32> to vector<4x32xf32>
    %334 = vector.extract_strided_slice %332 {offsets = [0, 32], sizes = [4, 32], strides = [1, 1]} : vector<4x128xf32> to vector<4x32xf32>
    %335 = vector.extract_strided_slice %332 {offsets = [0, 64], sizes = [4, 32], strides = [1, 1]} : vector<4x128xf32> to vector<4x32xf32>
    %336 = vector.extract_strided_slice %332 {offsets = [0, 96], sizes = [4, 32], strides = [1, 1]} : vector<4x128xf32> to vector<4x32xf32>
    %337 = arith.mulf %334, %294 : vector<4x32xf32>
    %338 = arith.mulf %333, %335 : vector<4x32xf32>
    %339 = arith.addf %337, %338 : vector<4x32xf32>
    %340 = math.tanh %339 : vector<4x32xf32>
    %341 = arith.mulf %336, %340 : vector<4x32xf32>
    %342 = vector.extract_strided_slice %341 {offsets = [0, 0], sizes = [2, 32], strides = [1, 1]} : vector<4x32xf32> to vector<2x32xf32>
    %343 = arith.truncf %342 : vector<2x32xf32> to vector<2x32xbf16>
    %344 = arith.index_cast %c6_i32 : i32 to index
    %c0_107 = arith.constant 0 : index
    %c0_108 = arith.constant 0 : index
    %345 = vector.load %arg4[%344, %c0_107, %c0_108] : memref<8x2x64xbf16, #tpu.memory_space<vmem>>, vector<1x2x32xbf16>
    %346 = vector.shape_cast %345 : vector<1x2x32xbf16> to vector<2x32xbf16>
    %347 = vector.shape_cast %343 : vector<2x32xbf16> to vector<1x2x32xbf16>
    tpu.vector_store %arg4[%344, %c0_107, %c0_108], %347 {strides = array<i32>} : memref<8x2x64xbf16, #tpu.memory_space<vmem>>, vector<1x2x32xbf16>,
    %348 = vector.extract_strided_slice %341 {offsets = [2, 0], sizes = [2, 32], strides = [1, 1]} : vector<4x32xf32> to vector<2x32xf32>
    %349 = arith.truncf %348 : vector<2x32xf32> to vector<2x32xbf16>
    %350 = arith.index_cast %309 : i32 to index
    %c0_109 = arith.constant 0 : index
    %c32_110 = arith.constant 32 : index
    %351 = vector.load %arg4[%350, %c0_109, %c32_110] : memref<8x2x64xbf16, #tpu.memory_space<vmem>>, vector<1x2x32xbf16>
    %352 = vector.shape_cast %351 : vector<1x2x32xbf16> to vector<2x32xbf16>
    %353 = vector.shape_cast %349 : vector<2x32xbf16> to vector<1x2x32xbf16>
    tpu.vector_store %arg4[%350, %c0_109, %c32_110], %353 {strides = array<i32>} : memref<8x2x64xbf16, #tpu.memory_space<vmem>>, vector<1x2x32xbf16>,
    %c7_i32_111 = arith.constant 7 : i32
    %c7_i32_112 = arith.constant 7 : i32
    %354 = arith.subi %c7_i32_112, %c7_i32_111 : i32
    %cst_113 = arith.constant 0.000000e+00 : f32
    %355 = vector.broadcast %cst_113 : f32 to vector<4x32xf32>
    %356 = arith.select %36, %341, %355 : vector<4x32xi1>, vector<4x32xf32>
    %cst_114 = arith.constant 0.000000e+00 : f32
    %357 = vector.broadcast %cst_114 : f32 to vector<4x32xf32>
    %358 = arith.select %36, %357, %341 : vector<4x32xi1>, vector<4x32xf32>
    %359 = tpu.concatenate %356, %358 in 1 : vector<4x32xf32>, vector<4x32xf32> -> vector<4x64xf32>
    %360 = arith.truncf %359 : vector<4x64xf32> to vector<4x64xbf16>
    %cst_115 = arith.constant dense<0.000000e+00> : vector<4x128xf32>
    %361 = tpu.matmul %360, %21, %cst_115 {dimension_numbers = #tpu.dot_dimension_numbers<[1], [0], [0], [1], [0, 0, 1, 1], [], []>} : vector<4x64xbf16>, vector<64x128xbf16>, vector<4x128xf32> -> vector<4x128xf32>
    %362 = arith.index_cast %c7_i32_111 : i32 to index
    %c0_116 = arith.constant 0 : index
    %c0_117 = arith.constant 0 : index
    %363 = vector.load %arg5[%362, %c0_116, %c0_117] : memref<8x2x128xbf16, #tpu.memory_space<vmem>>, vector<1x2x128xbf16>
    %364 = vector.shape_cast %363 : vector<1x2x128xbf16> to vector<2x128xbf16>
    %365 = arith.index_cast %354 : i32 to index
    %c0_118 = arith.constant 0 : index
    %c0_119 = arith.constant 0 : index
    %366 = vector.load %arg6[%365, %c0_118, %c0_119] : memref<8x2x128xbf16, #tpu.memory_space<vmem>>, vector<1x2x128xbf16>
    %367 = vector.shape_cast %366 : vector<1x2x128xbf16> to vector<2x128xbf16>
    %368 = tpu.concatenate %364, %367 in 0 : vector<2x128xbf16>, vector<2x128xbf16> -> vector<4x128xbf16>
    %369 = arith.extf %368 : vector<4x128xbf16> to vector<4x128xf32>
    %370 = arith.addf %361, %369 : vector<4x128xf32>
    %371 = vector.broadcast %30 : vector<1x128xf32> to vector<4x128xf32>
    %372 = arith.mulf %371, %370 : vector<4x128xf32>
    %373 = math.tanh %372 : vector<4x128xf32>
    %374 = vector.broadcast %30 : vector<1x128xf32> to vector<4x128xf32>
    %375 = arith.mulf %374, %373 : vector<4x128xf32>
    %376 = vector.broadcast %33 : vector<1x128xf32> to vector<4x128xf32>
    %377 = arith.addf %375, %376 : vector<4x128xf32>
    %378 = vector.extract_strided_slice %377 {offsets = [0, 0], sizes = [4, 32], strides = [1, 1]} : vector<4x128xf32> to vector<4x32xf32>
    %379 = vector.extract_strided_slice %377 {offsets = [0, 32], sizes = [4, 32], strides = [1, 1]} : vector<4x128xf32> to vector<4x32xf32>
    %380 = vector.extract_strided_slice %377 {offsets = [0, 64], sizes = [4, 32], strides = [1, 1]} : vector<4x128xf32> to vector<4x32xf32>
    %381 = vector.extract_strided_slice %377 {offsets = [0, 96], sizes = [4, 32], strides = [1, 1]} : vector<4x128xf32> to vector<4x32xf32>
    %382 = arith.mulf %379, %339 : vector<4x32xf32>
    %383 = arith.mulf %378, %380 : vector<4x32xf32>
    %384 = arith.addf %382, %383 : vector<4x32xf32>
    %385 = math.tanh %384 : vector<4x32xf32>
    %386 = arith.mulf %381, %385 : vector<4x32xf32>
    %387 = vector.extract_strided_slice %386 {offsets = [0, 0], sizes = [2, 32], strides = [1, 1]} : vector<4x32xf32> to vector<2x32xf32>
    %388 = arith.truncf %387 : vector<2x32xf32> to vector<2x32xbf16>
    %389 = arith.index_cast %c7_i32_111 : i32 to index
    %c0_120 = arith.constant 0 : index
    %c0_121 = arith.constant 0 : index
    %390 = vector.load %arg4[%389, %c0_120, %c0_121] : memref<8x2x64xbf16, #tpu.memory_space<vmem>>, vector<1x2x32xbf16>
    %391 = vector.shape_cast %390 : vector<1x2x32xbf16> to vector<2x32xbf16>
    %392 = vector.shape_cast %388 : vector<2x32xbf16> to vector<1x2x32xbf16>
    tpu.vector_store %arg4[%389, %c0_120, %c0_121], %392 {strides = array<i32>} : memref<8x2x64xbf16, #tpu.memory_space<vmem>>, vector<1x2x32xbf16>,
    %393 = vector.extract_strided_slice %386 {offsets = [2, 0], sizes = [2, 32], strides = [1, 1]} : vector<4x32xf32> to vector<2x32xf32>
    %394 = arith.truncf %393 : vector<2x32xf32> to vector<2x32xbf16>
    %395 = arith.index_cast %354 : i32 to index
    %c0_122 = arith.constant 0 : index
    %c32_123 = arith.constant 32 : index
    %396 = vector.load %arg4[%395, %c0_122, %c32_123] : memref<8x2x64xbf16, #tpu.memory_space<vmem>>, vector<1x2x32xbf16>
    %397 = vector.shape_cast %396 : vector<1x2x32xbf16> to vector<2x32xbf16>
    %398 = vector.shape_cast %394 : vector<2x32xbf16> to vector<1x2x32xbf16>
    tpu.vector_store %arg4[%395, %c0_122, %c32_123], %398 {strides = array<i32>} : memref<8x2x64xbf16, #tpu.memory_space<vmem>>, vector<1x2x32xbf16>,
    %c8_i32 = arith.constant 8 : i32
    return
  }
}

module attributes {stable_mosaic.version = 11 : i64} {
  func.func @_concat_linear_kernel(%arg0: i32, %arg1: memref<16x64xbf16, #tpu.memory_space<vmem>>, %arg2: memref<16x64xbf16, #tpu.memory_space<vmem>>, %arg3: memref<64x5xbf16, #tpu.memory_space<vmem>>, %arg4: memref<64x5xbf16, #tpu.memory_space<vmem>>, %arg5: memref<1x5xf32, #tpu.memory_space<vmem>>, %arg6: memref<16x5xf32, #tpu.memory_space<vmem>>) attributes {dimension_semantics = [#tpu.dimension_semantics<parallel>], iteration_bounds = array<i64: 1>, scalar_prefetch = 0 : i64, scratch_operands = 0 : i64, tpu.core_type = #tpu.core_type<tc>, window_params = [{transform_indices = @transform_0, window_bounds = array<i64: 16, 64>}, {transform_indices = @transform_1, window_bounds = array<i64: 16, 64>}, {pipeline_mode = #tpu.pipeline_mode<synchronous>, transform_indices = @transform_2, window_bounds = array<i64: 64, 5>}, {pipeline_mode = #tpu.pipeline_mode<synchronous>, transform_indices = @transform_3, window_bounds = array<i64: 64, 5>}, {pipeline_mode = #tpu.pipeline_mode<synchronous>, transform_indices = @transform_4, window_bounds = array<i64: 1, 5>}, {transform_indices = @transform_5, window_bounds = array<i64: 16, 5>}]} {
    %c0 = arith.constant 0 : index
    %c0_0 = arith.constant 0 : index
    %0 = vector.load %arg1[%c0, %c0_0] : memref<16x64xbf16, #tpu.memory_space<vmem>>, vector<16x64xbf16>
    %c0_1 = arith.constant 0 : index
    %c0_2 = arith.constant 0 : index
    %1 = vector.load %arg3[%c0_1, %c0_2] : memref<64x5xbf16, #tpu.memory_space<vmem>>, vector<64x5xbf16>
    %cst = arith.constant dense<0.000000e+00> : vector<16x5xf32>
    %2 = tpu.matmul %0, %1, %cst {dimension_numbers = #tpu.dot_dimension_numbers<[1], [0], [0], [1], [0, 0, 1, 1], [], []>} : vector<16x64xbf16>, vector<64x5xbf16>, vector<16x5xf32> -> vector<16x5xf32>
    %c0_3 = arith.constant 0 : index
    %c0_4 = arith.constant 0 : index
    %3 = vector.load %arg2[%c0_3, %c0_4] : memref<16x64xbf16, #tpu.memory_space<vmem>>, vector<16x64xbf16>
    %c0_5 = arith.constant 0 : index
    %c0_6 = arith.constant 0 : index
    %4 = vector.load %arg4[%c0_5, %c0_6] : memref<64x5xbf16, #tpu.memory_space<vmem>>, vector<64x5xbf16>
    %cst_7 = arith.constant dense<0.000000e+00> : vector<16x5xf32>
    %5 = tpu.matmul %3, %4, %cst_7 {dimension_numbers = #tpu.dot_dimension_numbers<[1], [0], [0], [1], [0, 0, 1, 1], [], []>} : vector<16x64xbf16>, vector<64x5xbf16>, vector<16x5xf32> -> vector<16x5xf32>
    %6 = arith.addf %2, %5 : vector<16x5xf32>
    %c0_8 = arith.constant 0 : index
    %c0_9 = arith.constant 0 : index
    %7 = vector.load %arg5[%c0_8, %c0_9] : memref<1x5xf32, #tpu.memory_space<vmem>>, vector<1x5xf32>
    %8 = vector.broadcast %7 : vector<1x5xf32> to vector<16x5xf32>
    %9 = arith.addf %6, %8 : vector<16x5xf32>
    %c0_10 = arith.constant 0 : index
    %c0_11 = arith.constant 0 : index
    %10 = vector.load %arg6[%c0_10, %c0_11] : memref<16x5xf32, #tpu.memory_space<vmem>>, vector<16x5xf32>
    tpu.vector_store %arg6[%c0_10, %c0_11], %9 {strides = array<i32>} : memref<16x5xf32, #tpu.memory_space<vmem>>, vector<16x5xf32>,
    return
  }
  func.func @transform_0(%arg0: i32) -> (i32, i32) {
    %c0_i32 = arith.constant 0 : i32
    %c0_i32_0 = arith.constant 0 : i32
    return %arg0, %c0_i32 : i32, i32
  }
  func.func @transform_1(%arg0: i32) -> (i32, i32) {
    %c0_i32 = arith.constant 0 : i32
    %c0_i32_0 = arith.constant 0 : i32
    return %arg0, %c0_i32 : i32, i32
  }
  func.func @transform_2(%arg0: i32) -> (i32, i32) {
    %c0_i32 = arith.constant 0 : i32
    %c0_i32_0 = arith.constant 0 : i32
    %c0_i32_1 = arith.constant 0 : i32
    return %c0_i32, %c0_i32_0 : i32, i32
  }
  func.func @transform_3(%arg0: i32) -> (i32, i32) {
    %c0_i32 = arith.constant 0 : i32
    %c0_i32_0 = arith.constant 0 : i32
    %c0_i32_1 = arith.constant 0 : i32
    return %c0_i32, %c0_i32_0 : i32, i32
  }
  func.func @transform_4(%arg0: i32) -> (i32, i32) {
    %c0_i32 = arith.constant 0 : i32
    %c0_i32_0 = arith.constant 0 : i32
    %c0_i32_1 = arith.constant 0 : i32
    return %c0_i32, %c0_i32_0 : i32, i32
  }
  func.func @transform_5(%arg0: i32) -> (i32, i32) {
    %c0_i32 = arith.constant 0 : i32
    %c0_i32_0 = arith.constant 0 : i32
    return %arg0, %c0_i32 : i32, i32
  }
}

</mosaic_0001>

<bundles_post_ra>
// kernel: lstm_net_forward.8
= control target key start
LH: loop header
LB: loop body
LE: loop exit
PB: predicated region body
PF: predicated region fallthrough
CT: control target
= control target key end

     0   :  { %v965_v0 = vmov 0.0   ;;  %v966_v2 = vmov 0   ;;  %vm967_vm0 = vmmov 0   ;;  %vm21_vm1 = vcmask 1041408   ;;  %s1176_s1 = inlined_call_operand.vmem [shape: bf16[5,128,128], index: 1, kind: input, shape index: {}]   ;;  %s1177_s0 = inlined_call_operand.vmem [shape: bf16[16,128], index: 0, kind: input, shape index: {}]   ;;  %s1178_s2 = inlined_call_operand.vmem [shape: f32[1,128], index: 2, kind: input, shape index: {}]   ;;  %s1179_s3 = inlined_call_operand.vmem [shape: bf16[16,128], index: 3, kind: output, shape index: {}]  }
   0x1   :  { %815 = vmatprep.subr.bf16.mxu0 %v965_v0  ;;  %835 = vmatprep.subr.bf16.mxu1 %v965_v0  ;;  %v918_v1 = vld [vmem:[%s1176_s1 + $0x78] sm:$0xff]   ;;  %15 = vst [vmem:[#allocation2] sm:$0x3] %v966_v2  ;;  %16 = vst [vmem:[#allocation2 + $0x8] sm:$0xc] %v966_v2  ;;  %v920_v4 = vld [vmem:[%s1176_s1 + $0x70] sm:$0xff]  }
   0x2   :  { %v919_v3 = vld [vmem:[%s1176_s1 + $0x38] sm:$0xff]   ;;  %831 = vmatprep.mubr.msk.bf16.mxu0 %vm967_vm0, %v965_v0  ;;  %851 = vmatprep.mubr.msk.bf16.mxu1 %vm967_vm0, %v965_v0  ;;  %v921_v5 = vld [vmem:[%s1176_s1 + $0x30] sm:$0xff]   ;;  %v922_v6 = vld [vmem:[%s1176_s1 + $0x68] sm:$0xff]   ;;  %vm22_vm2 = vcmask 1045508   ;;  %vm81_vm4 = vcmask 1046528   ;;  %vm416_vm5 = vcmask 1044480  }
   0x3   :  { %816 = vmatpush3.bf16.msra.mxu0 %v918_v1  ;;  %836 = vmatpush3.bf16.msra.mxu1 %v919_v3  ;;  %v923_v7 = vld [vmem:[%s1176_s1 + $0x28] sm:$0xff]   ;;  %v924_v8 = vld [vmem:[%s1176_s1 + $0x60] sm:$0xff]   ;;  %v926_v10 = vld [vmem:[%s1176_s1 + $0x58] sm:$0xff]   ;;  %vm295_vm6 = vcmask 1045504  }
   0x4   :  { %817 = vmatprep.subr.bf16.mxu0 %v965_v0  ;;  %837 = vmatprep.subr.bf16.mxu1 %v965_v0  ;;  %v925_v9 = vld [vmem:[%s1176_s1 + $0x20] sm:$0xff]   ;;  %v927_v11 = vld [vmem:[%s1176_s1 + $0x18] sm:$0xff]   ;;  %v928_v12 = vld [vmem:[%s1176_s1 + $0x50] sm:$0xff]  }
   0x5   :  { %v17_v13 = vld [vmem:[%s1177_s0] sm:$0xf]  ;;  %v18_v14 = vld [vmem:[%s1177_s0 + $0x4] sm:$0xf]  ;;  %vm23_vm3 = vmor %vm21_vm1, %vm22_vm2 }
   0x6   :  { %v24_v15 = vrot.slane %v17_v13, 6  ;;  %v26_v16 = vrot.slane %v18_v14, 6  ;;  %v929_v17 = vld [vmem:[%s1176_s1 + $0x10] sm:$0xff]   ;;  %v930_v21 = vld [vmem:[%s1176_s1 + $0x48] sm:$0xff]   ;;  %v932_v23 = vld [vmem:[%s1176_s1 + $0x40] sm:$0xff]  }
   0x7   :  { %818 = vmatpush3.bf16.msra.mxu0 %v920_v4  ;;  %838 = vmatpush3.bf16.msra.mxu1 %v921_v5  ;;  %v931_v22 = vld [vmem:[%s1176_s1 + $0x8] sm:$0xff]   ;;  %v933_v24 = vld [vmem:[%s1176_s1] sm:$0xff]   ;;  %v938_v28 = vld [vmem:[%s1176_s1 + $0xf8] sm:$0xff]  }
   0x8   :  { %819 = vmatprep.subr.bf16.mxu0 %v965_v0  ;;  %839 = vmatprep.subr.bf16.mxu1 %v965_v0  ;;  %v25_v18 = vrot.slane %v24_v15, 4  ;;  %v28_v19 = vrot.slane %v26_v16, 4  ;;  %32 = vst [vmem:[#allocation2] sm:$0xc] %v24_v15  ;;  %v937_v33 = vld [vmem:[%s1176_s1 + $0xb8] sm:$0xff]   ;;  %v940_v35 = vld [vmem:[%s1176_s1 + $0xf0] sm:$0xff]  }
   0x9   :  { %v939_v36 = vld [vmem:[%s1176_s1 + $0xb0] sm:$0xff]   ;;  %v942_v37 = vld [vmem:[%s1176_s1 + $0xe8] sm:$0xff]   ;;  %v944_v39 = vld [vmem:[%s1176_s1 + $0xe0] sm:$0xff]  }
   0xa   :  { %v27_v20 = vsel %vm23_vm3, %v25_v18, %v26_v16  ;;  %34 = vst [vmem:[#allocation2 + $0x8] sm:$0x3] %v28_v19  ;;  %v941_v38 = vld [vmem:[%s1176_s1 + $0xa8] sm:$0xff]   ;;  %v943_v40 = vld [vmem:[%s1176_s1 + $0xa0] sm:$0xff]   ;;  %v946_v41 = vld [vmem:[%s1176_s1 + $0xd8] sm:$0xff]  }
   0xb   :  { %820 = vmatpush3.bf16.msra.mxu0 %v922_v6  ;;  %840 = vmatpush3.bf16.msra.mxu1 %v923_v7  ;;  %33 = vst [vmem:[#allocation2 + $0x4] sm:$0xf] %v27_v20  ;;  %v945_v42 = vld [vmem:[%s1176_s1 + $0x98] sm:$0xff]   ;;  %v948_v43 = vld [vmem:[%s1176_s1 + $0xd0] sm:$0xff]   ;;  %v950_v47 = vld [vmem:[%s1176_s1 + $0xc8] sm:$0xff]  }
   0xc   :  { %821 = vmatprep.subr.bf16.mxu0 %v965_v0  ;;  %841 = vmatprep.subr.bf16.mxu1 %v965_v0  ;;  %v947_v44 = vld [vmem:[%s1176_s1 + $0x90] sm:$0xff]   ;;  %v949_v50 = vld [vmem:[%s1176_s1 + $0x88] sm:$0xff]   ;;  %v952_v53 = vld [vmem:[%s1176_s1 + $0xc0] sm:$0xff]  }
   0xd   :  { %v951_v56 = vld [vmem:[%s1176_s1 + $0x80] sm:$0xff]   ;;  %v955_v61 = vld [vmem:[%s1176_s1 + $0x138] sm:$0xff]   ;;  %v958_v62 = vld [vmem:[%s1176_s1 + $0x130] sm:$0xff]  }
   0xe   :  { %v959_v63 = vld [vmem:[%s1176_s1 + $0x128] sm:$0xff]   ;;  %v960_v1 = vld [vmem:[%s1176_s1 + $0x120] sm:$0xff]   ;;  %v961_v2 = vld [vmem:[%s1176_s1 + $0x118] sm:$0xff]  }
   0xf   :  { %822 = vmatpush3.bf16.msra.mxu0 %v924_v8  ;;  %842 = vmatpush3.bf16.msra.mxu1 %v925_v9  ;;  %v53_v25 = vld [vmem:[#allocation2] sm:$0xe]  ;;  %v962_v3 = vld [vmem:[%s1176_s1 + $0x110] sm:$0xff]   ;;  %v963_v4 = vld [vmem:[%s1176_s1 + $0x108] sm:$0xff]  }
  0x10   :  { %823 = vmatprep.subr.bf16.mxu0 %v965_v0  ;;  %843 = vmatprep.subr.bf16.mxu1 %v965_v0  ;;  %v391_v45 = vld [vmem:[#allocation2] sm:$0x8] }
  0x11   :  { %v935_v26 = vld [vmem:[#allocation2 + $0x8] ss:$0 sps:$4 sm:$0x11]   ;;  %v270_v46 = vld [vmem:[#allocation2] sm:$0xc] }
  0x12   :  { %v1062_v27 = vld [vmem:[#allocation2 + $0x4] sm:$0xf]  ;;  %v83_v30 = vrot.slane %v935_v26, 1  ;;  %v957_v49 = vld [vmem:[#allocation2 + $0x8] ss:$0 sps:$4 sm:$0x77]  }
  0x13   :  { %824 = vmatpush3.bf16.msra.mxu0 %v926_v10  ;;  %844 = vmatpush3.bf16.msra.mxu1 %v927_v11  ;;  %v664_v29 = vcombine.low %v53_v25, %v1062_v27  ;;  %v936_v31 = vld [vmem:[#allocation2] sm:$0xff]   ;;  %v725_v48 = vcombine.low %v391_v45, %v1062_v27  ;;  %v699_v51 = vcombine.low %v270_v46, %v1062_v27  ;;  %v954_v52 = vld [vmem:[#allocation2 + $0x8] ss:$0 sps:$4 sm:$0x33]   ;;  %v418_v55 = vrot.slane %v957_v49, 3 }
  0x14   :  { %825 = vmatprep.subr.bf16.mxu0 %v965_v0  ;;  %845 = vmatprep.subr.bf16.mxu1 %v965_v0  ;;  %v297_v58 = vrot.slane %v954_v52, 2  ;;  %v964_v5 = vld [vmem:[%s1176_s1 + $0x100] sm:$0xff]   ;;  %v512_v6 = vld [vmem:[#allocation2 + $0x8] sm:$0xf] }
  0x15   :  { %v82_v32 = vrot.slane %v664_v29, 1  ;;  %v417_v54 = vrot.slane %v725_v48, 3  ;;  %v296_v57 = vrot.slane %v699_v51, 2  ;;  %v751_v7 = vcombine.low %v1062_v27, %v512_v6 }
  0x17   :  { %826 = vmatpush3.bf16.msra.mxu0 %v928_v12  ;;  %846 = vmatpush3.bf16.msra.mxu1 %v929_v17  ;;  %v84_v34 = vsel %vm81_vm4, %v82_v32, %v83_v30  ;;  %v419_v59 = vsel %vm416_vm5, %v417_v54, %v418_v55  ;;  %v298_v60 = vsel %vm295_vm6, %v296_v57, %v297_v58  ;;  %v760_v32 = vld [vmem:[%s1178_s2] ss:$0 sm:$0xff] }
  0x18   :  { %827 = vmatprep.subr.bf16.mxu0 %v965_v0  ;;  %847 = vmatprep.subr.bf16.mxu1 %v965_v0 }
  0x1b   :  { %828 = vmatpush3.bf16.msra.mxu0 %v930_v21  ;;  %848 = vmatpush3.bf16.msra.mxu1 %v931_v22 }
  0x1c   :  { %829 = vmatprep.subr.bf16.mxu0 %v965_v0  ;;  %849 = vmatprep.subr.bf16.mxu1 %v965_v0 }
  0x1f   :  { %830 = vmatpush3.bf16.msra.mxu0 %v932_v23  ;;  %850 = vmatpush3.bf16.msra.mxu1 %v933_v24 }
  0x20   :  { %855 = vmatprep.subr.bf16.mxu0 %v965_v0  ;;  %875 = vmatprep.subr.bf16.mxu1 %v965_v0 }
  0x22   :  { %852 = vmatmul.mubr.bf16.vlgmr.msra.gmra.mxu1 %v936_v31  ;;  %832 = vmatmul.mubr.bf16.vlgmr.msra.gmra.mxu0 %v84_v34 }
  0x23   :  { %876 = vmatpush3.bf16.msra.mxu1 %v938_v28  ;;  %856 = vmatpush3.bf16.msra.mxu0 %v937_v33 }
  0x24   :  { %877 = vmatprep.subr.bf16.mxu1 %v965_v0  ;;  %857 = vmatprep.subr.bf16.mxu0 %v965_v0 }
  0x25   :  { %871 = vmatprep.mubr.msk.bf16.mxu0 %vm967_vm0, %v965_v0  ;;  %891 = vmatprep.mubr.msk.bf16.mxu1 %vm967_vm0, %v965_v0 }
  0x27   :  { %878 = vmatpush3.bf16.msra.mxu1 %v940_v35  ;;  %858 = vmatpush3.bf16.msra.mxu0 %v939_v36 }
  0x28   :  { %879 = vmatprep.subr.bf16.mxu1 %v965_v0  ;;  %859 = vmatprep.subr.bf16.mxu0 %v965_v0 }
  0x2b   :  { %880 = vmatpush3.bf16.msra.mxu1 %v942_v37  ;;  %860 = vmatpush3.bf16.msra.mxu0 %v941_v38 }
  0x2c   :  { %881 = vmatprep.subr.bf16.mxu1 %v965_v0  ;;  %861 = vmatprep.subr.bf16.mxu0 %v965_v0 }
  0x2f   :  { %882 = vmatpush3.bf16.msra.mxu1 %v944_v39  ;;  %862 = vmatpush3.bf16.msra.mxu0 %v943_v40 }
  0x30   :  { %883 = vmatprep.subr.bf16.mxu1 %v965_v0  ;;  %863 = vmatprep.subr.bf16.mxu0 %v965_v0 }
  0x33   :  { %884 = vmatpush3.bf16.msra.mxu1 %v946_v41  ;;  %864 = vmatpush3.bf16.msra.mxu0 %v945_v42 }
  0x34   :  { %885 = vmatprep.subr.bf16.mxu1 %v965_v0  ;;  %865 = vmatprep.subr.bf16.mxu0 %v965_v0 }
  0x37   :  { %886 = vmatpush3.bf16.msra.mxu1 %v948_v43  ;;  %866 = vmatpush3.bf16.msra.mxu0 %v947_v44 }
  0x38   :  { %887 = vmatprep.subr.bf16.mxu1 %v965_v0  ;;  %867 = vmatprep.subr.bf16.mxu0 %v965_v0 }
  0x3b   :  { %888 = vmatpush3.bf16.msra.mxu1 %v950_v47  ;;  %868 = vmatpush3.bf16.msra.mxu0 %v949_v50 }
  0x3c   :  { %889 = vmatprep.subr.bf16.mxu1 %v965_v0  ;;  %869 = vmatprep.subr.bf16.mxu0 %v965_v0 }
  0x3f   :  { %890 = vmatpush3.bf16.msra.mxu1 %v952_v53  ;;  %870 = vmatpush3.bf16.msra.mxu0 %v951_v56 }
  0x40   :  { %895 = vmatprep.subr.bf16.mxu0 %v965_v0 }
  0x42   :  { %892 = vmatmul.mubr.bf16.vlgmr.msra.gmra.mxu1 %v419_v59  ;;  %872 = vmatmul.mubr.bf16.vlgmr.msra.gmra.mxu0 %v298_v60 }
  0x43   :  { %896 = vmatpush3.bf16.msra.mxu0 %v955_v61  ;;  %911 = vmatprep.mubr.msk.bf16.mxu0 %vm967_vm0, %v965_v0 }
  0x44   :  { %897 = vmatprep.subr.bf16.mxu0 %v965_v0 }
  0x47   :  { %898 = vmatpush3.bf16.msra.mxu0 %v958_v62 }
  0x48   :  { %899 = vmatprep.subr.bf16.mxu0 %v965_v0 }
  0x4b   :  { %900 = vmatpush3.bf16.msra.mxu0 %v959_v63 }
  0x4c   :  { %901 = vmatprep.subr.bf16.mxu0 %v965_v0 }
  0x4f   :  { %902 = vmatpush3.bf16.msra.mxu0 %v960_v1 }
  0x50   :  { %903 = vmatprep.subr.bf16.mxu0 %v965_v0 }
  0x53   :  { %904 = vmatpush3.bf16.msra.mxu0 %v961_v2 }
  0x54   :  { %905 = vmatprep.subr.bf16.mxu0 %v965_v0 }
  0x57   :  { %906 = vmatpush3.bf16.msra.mxu0 %v962_v3 }
  0x58   :  { %907 = vmatprep.subr.bf16.mxu0 %v965_v0 }
  0x5b   :  { %908 = vmatpush3.bf16.msra.mxu0 %v963_v4 }
  0x5c   :  { %909 = vmatprep.subr.bf16.mxu0 %v965_v0 }
  0x5f   :  { %910 = vmatpush3.bf16.msra.mxu0 %v964_v5 }
  0x62   :  { %912 = vmatmul.mubr.bf16.vlgmr.msra.gmra.mxu0 %v751_v7 }
  0xe2   :  { %v263_v8 = vpop.f32.mrf.mxu1  ;;  %v168_v9 = vpop.f32.mrf.mxu0 }
  0xe3   :  { %v264_v23 = vadd.f32 %v263_v8, %v168_v9 }
  0xe4   :  { %v853_v10 = vpop.f32.mrf.mxu1  ;;  %v833_v11 = vpop.f32.mrf.mxu0 }
  0xe6   :  { %v266_v12 = vpop.f32.mrf.mxu1  ;;  %v171_v13 = vpop.f32.mrf.mxu0 }
  0xe7   :  { %v267_v24 = vadd.f32 %v266_v12, %v171_v13 }
  0xe8   :  { %v854_v14 = vpop.f32.mrf.mxu1  ;;  %v834_v15 = vpop.f32.mrf.mxu0 }
 0x102   :  { %v503_v16 = vpop.f32.mrf.mxu1  ;;  %v382_v17 = vpop.f32.mrf.mxu0 }
 0x103   :  { %v389_v25 = vadd.f32 %v382_v17, %v264_v23 }
 0x104   :  { %v893_v18 = vpop.f32.mrf.mxu1  ;;  %v873_v19 = vpop.f32.mrf.mxu0 }
 0x105   :  { %v510_v28 = vadd.f32 %v503_v16, %v389_v25 }
 0x106   :  { %v506_v20 = vpop.f32.mrf.mxu1  ;;  %v385_v21 = vpop.f32.mrf.mxu0 }
 0x107   :  { %v390_v26 = vadd.f32 %v385_v21, %v267_v24 }
 0x108   :  { %v894_v22 = vpop.f32.mrf.mxu1  ;;  %v874_v0 = vpop.f32.mrf.mxu0 }
 0x109   :  { %v511_v30 = vadd.f32 %v506_v20, %v390_v26 }
 0x122   :  { %v616_v27 = vpop.f32.mrf.mxu0 }
 0x123   :  { %v623_v31 = vadd.f32 %v616_v27, %v510_v28 }
 0x124   :  { %v913_v29 = vpop.f32.mrf.mxu0 }
 0x125   :  { %v632_v36 = vadd.f32 %v760_v32, %v623_v31 }
 0x126   :  { %v619_v33 = vpop.f32.mrf.mxu0 }
 0x127   :  { %v624_v34 = vadd.f32 %v619_v33, %v511_v30 }
 0x128   :  { %v914_v35 = vpop.f32.mrf.mxu0 }
 0x129   :  { %v633_v37 = vadd.f32 %v760_v32, %v624_v34 }
 0x12b   :  { %v768_v38 = vpack.c.bf16 %v633_v37, %v632_v36 }
 0x12d   :  { %769 = vst [vmem:[%s1179_s3] sm:$0xff] %v768_v38  }

// kernel: lstm_net_forward.7
= control target key start
LH: loop header
LB: loop body
LE: loop exit
PB: predicated region body
PF: predicated region fallthrough
CT: control target
= control target key end

     0   :  { %9 = vsyncpa [#allocation5], 0  ;;  %s2315_s0 = inlined_call_operand.vmem [shape: bf16[8,2,64], index: 0, kind: input, shape index: {}]   ;;  %s2316_s1 = inlined_call_operand.hbm [shape: bf16[2,64,128], index: 1, kind: input, shape index: {}]   ;;  %s2317_s2 = inlined_call_operand.hbm [shape: bf16[64,128], index: 2, kind: input, shape index: {}]   ;;  %s2318_s3 = inlined_call_operand.vmem [shape: f32[2,1,128], index: 3, kind: input, shape index: {}]   ;;  %s2319_s4 = inlined_call_operand.vmem [shape: bf16[8,2,64], index: 4, kind: output, shape index: {}]  }
   0x1   :  { %10 = vsyncpa [#allocation7], 0  ;;  %s1840_s15 = smov [#allocation4]  }
   0x2   :  { %s18_s16 = sshll.u32 %s1840_s15, 4  ;;  %s19_s16 = int_to_ptr.vmem [resolvable:$true] %s18_s16 }
   0x3   :  { %s1804_s17 = scalar_lea.vmem %s19_s16, 1024  ;;  %p1809_p1 = scmp.lt.s32.totalorder %s19_s16, %s19_s16 }
   0x4   :  { %p1805_p0 = scmp.ne.s32.totalorder %s19_s16, %s1804_s17  ;;  %p1810_p2 = scmp.lt.s32.totalorder %s1804_s17, %s1804_s17 }
   0x6   :  { %p1811_p3 = por %p1810_p2, %p1809_p1 }
   0x8   :  { %p1812_p4 = pnand %p1811_p3, %p1805_p0 }
   0xa   :  { %1815 = shalt.err (!%p1812_p4)
}
   0xb   :  { %s1841_s18 = smov 64   ;;  %s1842_s19 = smov 4  }
   0xc   :  { %24 = dma.hbm_to_vmem [thread:$0]  %s2316_s1, 1024, %s19_s16, [#allocation5], %s1841_s18, %s1841_s18, %s1842_s19  }
   0xd   :  { %s1843_s22 = smov [#allocation6]  }
   0xe   :  { %s30_s23 = sshll.u32 %s1843_s22, 4  ;;  %s31_s23 = int_to_ptr.vmem [resolvable:$true] %s30_s23 }
   0xf   :  { %s1824_s24 = scalar_lea.vmem %s31_s23, 512  ;;  %p1829_p6 = scmp.lt.s32.totalorder %s31_s23, %s31_s23 }
  0x10   :  { %p1825_p5 = scmp.ne.s32.totalorder %s31_s23, %s1824_s24  ;;  %p1830_p7 = scmp.lt.s32.totalorder %s1824_s24, %s1824_s24 }
  0x12   :  { %p1831_p8 = por %p1830_p7, %p1829_p6 }
  0x14   :  { %p1832_p9 = pnand %p1831_p8, %p1825_p5 }
  0x16   :  { %1835 = shalt.err (!%p1832_p9)
}
  0x17   :  { %36 = dma.hbm_to_vmem [thread:$0]  %s2317_s2, 512, %s31_s23, [#allocation7], %s1841_s18, %s1841_s18, %s1842_s19  }
  0x18   :  { %1836 = dma.done.wait [#allocation5], 1024  }
  0x19   :  { %1837 = vsyncadd [#allocation5], 4294966272 }
  0x1a   :  { %1838 = dma.done.wait [#allocation7], 512  }
  0x1b   :  { %1839 = vsyncadd [#allocation7], 4294966784  ;;  %v1844_v0 = vmov 0.0   ;;  %vm1845_vm0 = vmmov 0   ;;  %v1846_v1 = vmov 1966171168   ;;  %v83_v3 = vlaneseq }
  0x1c   :  { %1613 = vmatprep.subr.bf16.mxu0 %v1844_v0  ;;  %1625 = vmatprep.subr.bf16.mxu1 %v1844_v0  ;;  %v81_v2 = vunpack.c.l.s4 %v1846_v1  ;;  %v1744_v4 = vld [vmem:[#allocation4 + $0x18] sm:$0xff]   ;;  %v1746_v6 = vld [vmem:[#allocation4 + $0x10] sm:$0xff]   ;;  %v1748_v10 = vld [vmem:[#allocation4 + $0x8] sm:$0xff]   ;;  %vm159_vm1 = vcmask 523264   ;;  %v1847_v40 = vmov 0.0|0.0   ;;  %vm453_vm5 = vcmask 1040384  }
  0x1d   :  { %1621 = vmatprep.mubr.msk.bf16.mxu0 %vm1845_vm0, %v1844_v0  ;;  %1633 = vmatprep.mubr.msk.bf16.mxu1 %vm1845_vm0, %v1844_v0  ;;  %v1745_v5 = vld [vmem:[#allocation4 + $0x38] sm:$0xff]   ;;  %v1747_v7 = vld [vmem:[#allocation4 + $0x30] sm:$0xff]   ;;  %v1894_v9 = vshrl.u32 %v83_v3, 7  ;;  %v1749_v11 = vld [vmem:[#allocation4 + $0x28] sm:$0xff]   ;;  %v1848_v41 = vmov 1983009808  }
  0x1e   :  { %1614 = vmatpush3.bf16.msra.mxu0 %v1744_v4  ;;  %1626 = vmatpush3.bf16.msra.mxu1 %v1745_v5  ;;  %v82_v8 = vunpack.c.0.s8 %v81_v2  ;;  %v1750_v13 = vld [vmem:[#allocation4] sm:$0xff]   ;;  %v46_v14 = vld [vmem:[%s2315_s0] sm:$0x1]  ;;  %v47_v15 = vld [vmem:[%s2315_s0 + $0x1] sm:$0x1]  ;;  %v151_v42 = vunpack.c.l.s4 %v1848_v41  ;;  %vm592_vm7 = vcmask 261120  }
  0x1f   :  { %1615 = vmatprep.subr.bf16.mxu0 %v1844_v0  ;;  %1627 = vmatprep.subr.bf16.mxu1 %v1844_v0  ;;  %v48_v16 = vld [vmem:[%s2315_s0 + $0x2] sm:$0x1]  ;;  %v49_v17 = vld [vmem:[%s2315_s0 + $0x3] sm:$0x1]  ;;  %v50_v18 = vld [vmem:[%s2315_s0 + $0x4] sm:$0x1]  ;;  %v76_v20 = vcombine.low %v46_v14, %v47_v15 }
  0x20   :  { %v1899_v12 = vsub.s32 %v82_v8, %v1894_v9  ;;  %v51_v19 = vld [vmem:[%s2315_s0 + $0x5] sm:$0x1]  ;;  %v52_v21 = vld [vmem:[%s2315_s0 + $0x6] sm:$0x1]  ;;  %v53_v22 = vld [vmem:[%s2315_s0 + $0x7] sm:$0x1]  ;;  %v77_v23 = vcombine.low %v48_v16, %v49_v17  ;;  %v152_v43 = vunpack.c.0.s8 %v151_v42 }
  0x21   :  { %v78_v24 = vcombine.low %v50_v18, %v51_v19  ;;  %v1751_v25 = vld [vmem:[#allocation4 + $0x20] sm:$0xff]   ;;  %v79_v26 = vcombine.low %v52_v21, %v53_v22  ;;  %v1936_v35 = vld [vmem:[#allocation6 + $0x18] sm:$0xff]   ;;  %v1941_v37 = vld [vmem:[#allocation6 + $0x10] sm:$0xff]   ;;  %vm432_vm6 = vcmp.lt.s32.totalorder %v1894_v9, 2  ;;  %vm566_vm8 = vcmask 253952  }
  0x22   :  { %1616 = vmatpush3.bf16.msra.mxu0 %v1746_v6  ;;  %1628 = vmatpush3.bf16.msra.mxu1 %v1747_v7  ;;  %v86_v27 = vrot.slane %v76_v20, %v1899_v12  ;;  %v93_v28 = vrot.slane %v77_v23, %v1899_v12  ;;  %v1951_v38 = vld [vmem:[#allocation6 + $0x8] sm:$0xff]   ;;  %v1957_v39 = vld [vmem:[#allocation6] sm:$0xff]   ;;  %v1525_v44 = vld [vmem:[%s2318_s3] ss:$0 sm:$0xff]  ;;  %v155_v47 = vsub.s32 %v152_v43, %v1894_v9  ;;  %vm580_vm9 = vcmask 516352  }
  0x23   :  { %1617 = vmatprep.subr.bf16.mxu0 %v1844_v0  ;;  %1629 = vmatprep.subr.bf16.mxu1 %v1844_v0  ;;  %v100_v29 = vrot.slane %v78_v24, %v1899_v12  ;;  %v107_v30 = vrot.slane %v79_v26, %v1899_v12  ;;  %v1532_v45 = vld [vmem:[%s2318_s3 + $0x1] ss:$0 sm:$0xff]  ;;  %v149_v46 = vcombine.low %v1525_v44, %v1525_v44  ;;  %s1850_s3 = smov 32  }
  0x24   :  { %v108_v31 = vcombine.low %v86_v27, %v93_v28  ;;  %v304_v48 = vcombine.low %v1532_v45, %v1532_v45 }
  0x25   :  { %v109_v32 = vcombine.low %v100_v29, %v107_v30  ;;  %v156_v49 = vrot.slane %v149_v46, %v155_v47 }
  0x26   :  { %1618 = vmatpush3.bf16.msra.mxu0 %v1748_v10  ;;  %1630 = vmatpush3.bf16.msra.mxu1 %v1749_v11  ;;  %v116_v33 = vrot.slane %v108_v31, %v1899_v12  ;;  %v311_v50 = vrot.slane %v304_v48, %v155_v47  ;;  %v424_v48 = vand.u32 127, %v83_v3 }
  0x27   :  { %1619 = vmatprep.subr.bf16.mxu0 %v1844_v0  ;;  %1631 = vmatprep.subr.bf16.mxu1 %v1844_v0  ;;  %v123_v34 = vrot.slane %v109_v32, %v1899_v12  ;;  %v157_v51 = vcombine.low %v156_v49, %v156_v49 }
  0x28   :  { %v312_v52 = vcombine.low %v311_v50, %v311_v50  ;;  %vm425_vm2 = vcmp.ge.s32.totalorder %v424_v48, 64  ;;  %vm426_vm3 = vcmp.lt.s32.totalorder %v424_v48, 96 }
  0x29   :  { %v124_v36 = vcombine.low %v116_v33, %v123_v34  ;;  %vm427_vm4 = vmand %vm425_vm2, %vm426_vm3 }
  0x2a   :  { %1620 = vmatpush3.bf16.msra.mxu0 %v1750_v13  ;;  %1632 = vmatpush3.bf16.msra.mxu1 %v1751_v25 }
  0x2b   :  { %1637 = vmatprep.subr.bf16.mxu0 %v1844_v0  ;;  %1649 = vmatprep.subr.bf16.mxu1 %v1844_v0 }
  0x2d   :  { %1622 = vmatmul.mubr.msk.bf16.vlgmr.msra.gmra.mxu0 %vm159_vm1, %v124_v36  ;;  %1634 = vmatmul.mubr.msk.bf16.vlgmr.msra.gmra.mxu1 %vm159_vm1, %v124_v36 }
  0x2e   :  { %1638 = vmatpush3.bf16.msra.mxu0 %v1936_v35  ;;  %1645 = vmatprep.mubr.msk.bf16.mxu0 %vm1845_vm0, %v1844_v0 }
  0x2f   :  { %1639 = vmatprep.subr.bf16.mxu0 %v1844_v0  ;;  %1650 = vmatpush3.bf16.msra.mxu1 %v1936_v35 }
  0x30   :  { %1651 = vmatprep.subr.bf16.mxu1 %v1844_v0  ;;  %1657 = vmatprep.mubr.msk.bf16.mxu1 %vm1845_vm0, %v1844_v0 }
  0x32   :  { %1640 = vmatpush3.bf16.msra.mxu0 %v1941_v37 }
  0x33   :  { %1641 = vmatprep.subr.bf16.mxu0 %v1844_v0  ;;  %1652 = vmatpush3.bf16.msra.mxu1 %v1941_v37 }
  0x34   :  { %1653 = vmatprep.subr.bf16.mxu1 %v1844_v0 }
  0x36   :  { %1642 = vmatpush3.bf16.msra.mxu0 %v1951_v38 }
  0x37   :  { %1643 = vmatprep.subr.bf16.mxu0 %v1844_v0  ;;  %1654 = vmatpush3.bf16.msra.mxu1 %v1951_v38 }
  0x38   :  { %1655 = vmatprep.subr.bf16.mxu1 %v1844_v0 }
  0x3a   :  { %1644 = vmatpush3.bf16.msra.mxu0 %v1957_v39 }
  0x3b   :  { %1656 = vmatpush3.bf16.msra.mxu1 %v1957_v39  ;;  %1661 = vmatprep.subr.bf16.mxu0 %v1844_v0 }
  0x3c   :  { %1673 = vmatprep.subr.bf16.mxu1 %v1844_v0 }
  0x3d   :  { %1646 = vmatmul.mubr.bf16.vlgmr.msra.gmra.mxu0 %v1847_v40 }
  0x3e   :  { %1662 = vmatpush3.bf16.msra.mxu0 %v1936_v35  ;;  %1669 = vmatprep.mubr.msk.bf16.mxu0 %vm1845_vm0, %v1844_v0 }
  0x3f   :  { %1663 = vmatprep.subr.bf16.mxu0 %v1844_v0 }
  0x42   :  { %1664 = vmatpush3.bf16.msra.mxu0 %v1941_v37 }
  0x43   :  { %1665 = vmatprep.subr.bf16.mxu0 %v1844_v0 }
  0x46   :  { %1666 = vmatpush3.bf16.msra.mxu0 %v1951_v38 }
  0x47   :  { %1667 = vmatprep.subr.bf16.mxu0 %v1844_v0 }
  0x4a   :  { %1668 = vmatpush3.bf16.msra.mxu0 %v1957_v39 }
  0x4b   :  { %1685 = vmatprep.subr.bf16.mxu0 %v1844_v0 }
  0xed   :  { %v197_v53 = vpop.f32.mrf.mxu0  ;;  %v348_v54 = vpop.f32.mrf.mxu1 }
  0xee   :  { %v198_v55 = vadd.f32 %v197_v53, %v157_v51  ;;  %v349_v56 = vadd.f32 %v348_v54, %v312_v52 }
  0xef   :  { %v1623_v57 = vpop.f32.mrf.mxu0  ;;  %v1635_v58 = vpop.f32.mrf.mxu1 }
  0xf0   :  { %v206_v59 = vcombine.high %v198_v55, %v198_v55  ;;  %v213_v60 = vrot.slane %v198_v55, %v155_v47  ;;  %v357_v61 = vcombine.high %v349_v56, %v349_v56  ;;  %v364_v62 = vrot.slane %v349_v56, %v155_v47 }
  0xf1   :  { %v200_v63 = vpop.f32.mrf.mxu0  ;;  %v351_v1 = vpop.f32.mrf.mxu1  ;;  %v1849_v56 = vmov 0.5  }
  0xf2   :  { %v220_v2 = vrot.slane %v206_v59, %v155_v47  ;;  %v221_v4 = vcombine.high %v213_v60, %v213_v60  ;;  %v248_v5 = vpack.c.bf16 %v213_v60, %v213_v60  ;;  %v371_v6 = vrot.slane %v357_v61, %v155_v47 }
  0xf3   :  { %v372_v7 = vcombine.high %v364_v62, %v364_v62  ;;  %v399_v8 = vpack.c.bf16 %v364_v62, %v364_v62  ;;  %v201_v10 = vadd.f32 %v200_v63, %v157_v51  ;;  %v352_v11 = vadd.f32 %v351_v1, %v312_v52  ;;  %v1636_v13 = vpop.f32.mrf.mxu1  ;;  %v1624_v14 = vpop.f32.mrf.mxu0 }
  0xf4   :  { %v222_v15 = vcombine.high %v220_v2, %v220_v2  ;;  %v249_v16 = vpack.c.bf16 %v221_v4, %v221_v4  ;;  %v250_v17 = vpack.c.bf16 %v220_v2, %v220_v2  ;;  %256 = vst [vmem:[#allocation2] sm:$0x1] %v248_v5  ;;  %v373_v18 = vcombine.high %v371_v6, %v371_v6 }
  0xf5   :  { %v400_v19 = vpack.c.bf16 %v372_v7, %v372_v7  ;;  %v401_v20 = vpack.c.bf16 %v371_v6, %v371_v6  ;;  %407 = vst [vmem:[#allocation3] sm:$0x1] %v399_v8  ;;  %v223_v21 = vcombine.high %v201_v10, %v201_v10  ;;  %v230_v22 = vrot.slane %v201_v10, %v155_v47 }
  0xf6   :  { %v251_v23 = vpack.c.bf16 %v222_v15, %v222_v15  ;;  %257 = vst [vmem:[#allocation2 + $0x1] sm:$0x1] %v249_v16  ;;  %258 = vst [vmem:[#allocation2 + $0x2] sm:$0x1] %v250_v17  ;;  %v402_v24 = vpack.c.bf16 %v373_v18, %v373_v18  ;;  %v374_v25 = vcombine.high %v352_v11, %v352_v11  ;;  %v1987_v57 = vsel %vm427_vm4, 1.0, %v1849_v56 }
  0xf7   :  { %v381_v26 = vrot.slane %v352_v11, %v155_v47  ;;  %408 = vst [vmem:[#allocation3 + $0x1] sm:$0x1] %v400_v19  ;;  %409 = vst [vmem:[#allocation3 + $0x2] sm:$0x1] %v401_v20  ;;  %v237_v27 = vrot.slane %v223_v21, %v155_v47  ;;  %v238_v28 = vcombine.high %v230_v22, %v230_v22  ;;  %v1990_v60 = vsel %vm427_vm4, 0.0, %v1849_v56 }
  0xf8   :  { %v252_v29 = vpack.c.bf16 %v230_v22, %v230_v22  ;;  %259 = vst [vmem:[#allocation2 + $0x3] sm:$0x1] %v251_v23  ;;  %410 = vst [vmem:[#allocation3 + $0x3] sm:$0x1] %v402_v24  ;;  %v388_v30 = vrot.slane %v374_v25, %v155_v47 }
  0xf9   :  { %v389_v31 = vcombine.high %v381_v26, %v381_v26  ;;  %v403_v32 = vpack.c.bf16 %v381_v26, %v381_v26  ;;  %v239_v33 = vcombine.high %v237_v27, %v237_v27  ;;  %v253_v34 = vpack.c.bf16 %v238_v28, %v238_v28 }
  0xfa   :  { %v254_v36 = vpack.c.bf16 %v237_v27, %v237_v27  ;;  %260 = vst [vmem:[#allocation2 + $0x4] sm:$0x1] %v252_v29  ;;  %v390_v40 = vcombine.high %v388_v30, %v388_v30  ;;  %v405_v42 = vpack.c.bf16 %v388_v30, %v388_v30 }
  0xfb   :  { %v404_v41 = vpack.c.bf16 %v389_v31, %v389_v31  ;;  %411 = vst [vmem:[#allocation3 + $0x4] sm:$0x1] %v403_v32  ;;  %v255_v43 = vpack.c.bf16 %v239_v33, %v239_v33  ;;  %261 = vst [vmem:[#allocation2 + $0x5] sm:$0x1] %v253_v34  ;;  %v434_v52 = vld [vmem:[#allocation2] sm:$0x1] }
  0xfc   :  { %262 = vst [vmem:[#allocation2 + $0x6] sm:$0x1] %v254_v36  ;;  %v406_v44 = vpack.c.bf16 %v390_v40, %v390_v40  ;;  %413 = vst [vmem:[#allocation3 + $0x6] sm:$0x1] %v405_v42 }
  0xfd   :  { %412 = vst [vmem:[#allocation3 + $0x5] sm:$0x1] %v404_v41  ;;  %263 = vst [vmem:[#allocation2 + $0x7] sm:$0x1] %v255_v43  ;;  %v520_v45 = vpop.f32.mrf.mxu0  ;;  %v596_v20 = vld [vmem:[#allocation2 + $0x1] sm:$0x1] }
  0xfe   :  { %414 = vst [vmem:[#allocation3 + $0x7] sm:$0x1] %v406_v44 }
  0xff   :  { %v1647_v46 = vpop.f32.mrf.mxu0 }
 0x101   :  { %v523_v47 = vpop.f32.mrf.mxu0 }
 0x103   :  { %v1648_v49 = vpop.f32.mrf.mxu0  ;;  %v1757_v17 = vld [vmem:[#allocation3 + $0x6] ss:$0 sps:$4 sm:$0x11]  }
 0x104   :  { %v607_v18 = vrot.slane %v1757_v17, %v1899_v12 }
 0x105   :  { %v1756_v50 = vld [vmem:[#allocation3 + $0x7] ss:$0 sps:$4 sm:$0x11]  }
 0x106   :  { %v445_v51 = vrot.slane %v1756_v50, %v1899_v12  ;;  %v614_v19 = vrot.slane %v607_v18, %v1899_v12  ;;  %v1758_v50 = vld [vmem:[#allocation3 + $0x5] ss:$0 sps:$4 sm:$0x11]  }
 0x108   :  { %v452_v53 = vrot.slane %v445_v51, %v1899_v12  ;;  %v617_v21 = vsel %vm453_vm5, %v596_v20, %v614_v19  ;;  %v742_v51 = vrot.slane %v1758_v50, %v1899_v12 }
 0x109   :  { %v619_v22 = vunpack.c.l.bf16 %v617_v21  ;;  %v1759_v21 = vld [vmem:[#allocation3 + $0x4] ss:$0 sps:$4 sm:$0x11]  }
 0x10a   :  { %v456_v54 = vsel %vm453_vm5, %v434_v52, %v452_v53  ;;  %v749_v52 = vrot.slane %v742_v51, %v1899_v12  ;;  %v731_v53 = vld [vmem:[#allocation2 + $0x2] sm:$0x1] }
 0x10b   :  { %v458_v55 = vunpack.c.l.bf16 %v456_v54 }
 0x10c   :  { %v752_v54 = vsel %vm453_vm5, %v731_v53, %v749_v52 }
 0x10d   :  { %v521_v58 = vadd.f32 %v520_v45, %v458_v55  ;;  %v754_v55 = vunpack.c.l.bf16 %v752_v54 }
 0x10f   :  { %v526_v3 = vmul.f32 %v521_v58, %v1987_v57 }
 0x111   :  { %1764 = vtanh.f32 %v526_v3 }
 0x11e   :  { %v1765_v59 = vpop.eup %1764 }
 0x11f   :  { %v528_v61 = vmul.f32 %v1765_v59, %v1987_v57 }
 0x121   :  { %v529_v62 = vadd.f32 %v528_v61, %v1990_v60 }
 0x123   :  { %532 = vrot.lane.b32.xlu0 %v529_v62, %s1841_s18  ;;  %v530_v2 = vmul.f32 0.0, %v529_v62 }
 0x195   :  { %v533_v63 = vpop.permute.xlu0 %532 }
 0x196   :  { %v535_v1 = vmul.f32 %v533_v63, %v529_v62 }
 0x198   :  { %537 = vrot.lane.b32.xlu0 %v535_v1, %s1850_s3 }
 0x20a   :  { %v538_v4 = vpop.permute.xlu0 %537 }
 0x20b   :  { %v540_v5 = vadd.f32 %v538_v4, %v530_v2 }
 0x20d   :  { %1766 = vtanh.f32 %v540_v5 }
 0x21a   :  { %v1767_v6 = vpop.eup %1766 }
 0x21b   :  { %543 = vrot.lane.b32.xlu1 %v1767_v6, %s1841_s18 }
 0x28d   :  { %v544_v7 = vpop.permute.xlu1 %543 }
 0x28e   :  { %v1998_v8 = vmul.f32 %v544_v7, %v529_v62 }
 0x290   :  { %v583_v10 = vsel %vm432_vm6, 0.0, %v1998_v8  ;;  %v582_v11 = vsel %vm432_vm6, %v1998_v8, 0.0 }
 0x291   :  { %589 = vrot.lane.b32.xlu0 %v583_v10, %s1841_s18  ;;  %585 = vrot.lane.b32.xlu1 %v582_v11, %s1850_s3 }
 0x303   :  { %v590_v13 = vpop.permute.xlu0 %589  ;;  %v586_v14 = vpop.permute.xlu1 %585 }
 0x304   :  { %v593_v15 = vsel %vm592_vm7, %v586_v14, %v590_v13 }
 0x305   :  { %v594_v16 = vpack.c.bf16 %v593_v15, %v593_v15 }
 0x307   :  { %1658 = vmatmul.mubr.msk.bf16.vlgmr.msra.gmra.mxu1 %vm159_vm1, %v594_v16 }
 0x308   :  { %1674 = vmatpush3.bf16.msra.mxu1 %v1936_v35  ;;  %1681 = vmatprep.mubr.msk.bf16.mxu1 %vm1845_vm0, %v1844_v0 }
 0x309   :  { %1675 = vmatprep.subr.bf16.mxu1 %v1844_v0 }
 0x30c   :  { %1676 = vmatpush3.bf16.msra.mxu1 %v1941_v37 }
 0x30d   :  { %1677 = vmatprep.subr.bf16.mxu1 %v1844_v0 }
 0x310   :  { %1678 = vmatpush3.bf16.msra.mxu1 %v1951_v38 }
 0x311   :  { %1679 = vmatprep.subr.bf16.mxu1 %v1844_v0 }
 0x314   :  { %1680 = vmatpush3.bf16.msra.mxu1 %v1957_v39 }
 0x315   :  { %1697 = vmatprep.subr.bf16.mxu1 %v1844_v0 }
 0x3c7   :  { %v657_v23 = vpop.f32.mrf.mxu1 }
 0x3c8   :  { %v658_v24 = vadd.f32 %v657_v23, %v619_v22  ;;  %v877_v22 = vrot.slane %v1759_v21, %v1899_v12 }
 0x3c9   :  { %v1659_v25 = vpop.f32.mrf.mxu1 }
 0x3ca   :  { %v663_v26 = vmul.f32 %v658_v24, %v1987_v57  ;;  %v884_v23 = vrot.slane %v877_v22, %v1899_v12  ;;  %v866_v24 = vld [vmem:[#allocation2 + $0x3] sm:$0x1] }
 0x3cb   :  { %v660_v27 = vpop.f32.mrf.mxu1 }
 0x3cc   :  { %1768 = vtanh.f32 %v663_v26  ;;  %v887_v25 = vsel %vm453_vm5, %v866_v24, %v884_v23 }
 0x3cd   :  { %v1660_v28 = vpop.f32.mrf.mxu1  ;;  %v889_v26 = vunpack.c.l.bf16 %v887_v25 }
 0x3d9   :  { %v1769_v29 = vpop.eup %1768 }
 0x3da   :  { %v665_v30 = vmul.f32 %v1769_v29, %v1987_v57 }
 0x3dc   :  { %v666_v31 = vadd.f32 %v665_v30, %v1990_v60 }
 0x3de   :  { %669 = vrot.lane.b32.xlu1 %v666_v31, %s1841_s18  ;;  %v667_v34 = vmul.f32 %v666_v31, %v540_v5 }
 0x450   :  { %v670_v32 = vpop.permute.xlu1 %669 }
 0x451   :  { %v672_v33 = vmul.f32 %v670_v32, %v666_v31 }
 0x453   :  { %674 = vrot.lane.b32.xlu0 %v672_v33, %s1850_s3 }
 0x4c5   :  { %v675_v36 = vpop.permute.xlu0 %674 }
 0x4c6   :  { %v677_v40 = vadd.f32 %v675_v36, %v667_v34 }
 0x4c8   :  { %1770 = vtanh.f32 %v677_v40 }
 0x4d5   :  { %v1771_v41 = vpop.eup %1770 }
 0x4d6   :  { %680 = vrot.lane.b32.xlu1 %v1771_v41, %s1841_s18 }
 0x548   :  { %v681_v42 = vpop.permute.xlu1 %680 }
 0x549   :  { %v2029_v43 = vmul.f32 %v681_v42, %v666_v31 }
 0x54b   :  { %v719_v44 = vsel %vm432_vm6, 0.0, %v2029_v43  ;;  %v718_v45 = vsel %vm432_vm6, %v2029_v43, 0.0 }
 0x54c   :  { %725 = vrot.lane.b32.xlu1 %v719_v44, %s1841_s18  ;;  %721 = vrot.lane.b32.xlu0 %v718_v45, %s1850_s3 }
 0x5be   :  { %v726_v46 = vpop.permute.xlu1 %725  ;;  %v722_v47 = vpop.permute.xlu0 %721 }
 0x5bf   :  { %v728_v48 = vsel %vm592_vm7, %v722_v47, %v726_v46 }
 0x5c0   :  { %v729_v49 = vpack.c.bf16 %v728_v48, %v728_v48 }
 0x5c2   :  { %1670 = vmatmul.mubr.msk.bf16.vlgmr.msra.gmra.mxu0 %vm159_vm1, %v729_v49 }
 0x5c3   :  { %1686 = vmatpush3.bf16.msra.mxu0 %v1936_v35  ;;  %1693 = vmatprep.mubr.msk.bf16.mxu0 %vm1845_vm0, %v1844_v0 }
 0x5c4   :  { %1687 = vmatprep.subr.bf16.mxu0 %v1844_v0 }
 0x5c7   :  { %1688 = vmatpush3.bf16.msra.mxu0 %v1941_v37 }
 0x5c8   :  { %1689 = vmatprep.subr.bf16.mxu0 %v1844_v0 }
 0x5cb   :  { %1690 = vmatpush3.bf16.msra.mxu0 %v1951_v38 }
 0x5cc   :  { %1691 = vmatprep.subr.bf16.mxu0 %v1844_v0 }
 0x5cf   :  { %1692 = vmatpush3.bf16.msra.mxu0 %v1957_v39 }
 0x5d0   :  { %1709 = vmatprep.subr.bf16.mxu0 %v1844_v0 }
 0x682   :  { %v792_v56 = vpop.f32.mrf.mxu0 }
 0x683   :  { %v793_v58 = vadd.f32 %v792_v56, %v754_v55  ;;  %v1760_v55 = vld [vmem:[#allocation3 + $0x3] ss:$0 sps:$4 sm:$0x11]  }
 0x684   :  { %v1671_v3 = vpop.f32.mrf.mxu0  ;;  %v1012_v56 = vrot.slane %v1760_v55, %v1899_v12 }
 0x685   :  { %v798_v59 = vmul.f32 %v793_v58, %v1987_v57  ;;  %v1001_v3 = vld [vmem:[#allocation2 + $0x4] sm:$0x1] }
 0x686   :  { %v795_v61 = vpop.f32.mrf.mxu0  ;;  %v1019_v58 = vrot.slane %v1012_v56, %v1899_v12 }
 0x687   :  { %1772 = vtanh.f32 %v798_v59 }
 0x688   :  { %v1672_v62 = vpop.f32.mrf.mxu0  ;;  %v1022_v59 = vsel %vm453_vm5, %v1001_v3, %v1019_v58  ;;  %v1762_v58 = vld [vmem:[#allocation3 + $0x1] ss:$0 sps:$4 sm:$0x11]  }
 0x689   :  { %v1024_v61 = vunpack.c.l.bf16 %v1022_v59  ;;  %v1278_v3 = vrot.slane %v1762_v58, %v1899_v12 }
 0x68b   :  { %v1285_v59 = vrot.slane %v1278_v3, %v1899_v12 }
 0x694   :  { %v1773_v63 = vpop.eup %1772 }
 0x695   :  { %v800_v1 = vmul.f32 %v1773_v63, %v1987_v57 }
 0x697   :  { %v801_v2 = vadd.f32 %v800_v1, %v1990_v60 }
 0x699   :  { %804 = vrot.lane.b32.xlu0 %v801_v2, %s1841_s18  ;;  %v802_v6 = vmul.f32 %v801_v2, %v677_v40 }
 0x70b   :  { %v805_v4 = vpop.permute.xlu0 %804 }
 0x70c   :  { %v807_v5 = vmul.f32 %v805_v4, %v801_v2 }
 0x70e   :  { %809 = vrot.lane.b32.xlu1 %v807_v5, %s1850_s3 }
 0x780   :  { %v810_v7 = vpop.permute.xlu1 %809 }
 0x781   :  { %v812_v10 = vadd.f32 %v810_v7, %v802_v6 }
 0x783   :  { %1774 = vtanh.f32 %v812_v10 }
 0x790   :  { %v1775_v11 = vpop.eup %1774 }
 0x791   :  { %815 = vrot.lane.b32.xlu0 %v1775_v11, %s1841_s18 }
 0x803   :  { %v816_v13 = vpop.permute.xlu0 %815 }
 0x804   :  { %v2060_v14 = vmul.f32 %v816_v13, %v801_v2 }
 0x806   :  { %v854_v15 = vsel %vm432_vm6, 0.0, %v2060_v14  ;;  %v853_v16 = vsel %vm432_vm6, %v2060_v14, 0.0 }
 0x807   :  { %860 = vrot.lane.b32.xlu0 %v854_v15, %s1841_s18  ;;  %856 = vrot.lane.b32.xlu1 %v853_v16, %s1850_s3 }
 0x879   :  { %v861_v17 = vpop.permute.xlu0 %860  ;;  %v857_v18 = vpop.permute.xlu1 %856 }
 0x87a   :  { %v863_v19 = vsel %vm592_vm7, %v857_v18, %v861_v17 }
 0x87b   :  { %v864_v20 = vpack.c.bf16 %v863_v19, %v863_v19 }
 0x87d   :  { %1682 = vmatmul.mubr.msk.bf16.vlgmr.msra.gmra.mxu1 %vm159_vm1, %v864_v20 }
 0x87e   :  { %1698 = vmatpush3.bf16.msra.mxu1 %v1936_v35  ;;  %1705 = vmatprep.mubr.msk.bf16.mxu1 %vm1845_vm0, %v1844_v0 }
 0x87f   :  { %1699 = vmatprep.subr.bf16.mxu1 %v1844_v0 }
 0x882   :  { %1700 = vmatpush3.bf16.msra.mxu1 %v1941_v37 }
 0x883   :  { %1701 = vmatprep.subr.bf16.mxu1 %v1844_v0 }
 0x886   :  { %1702 = vmatpush3.bf16.msra.mxu1 %v1951_v38 }
 0x887   :  { %1703 = vmatprep.subr.bf16.mxu1 %v1844_v0 }
 0x88a   :  { %1704 = vmatpush3.bf16.msra.mxu1 %v1957_v39 }
 0x88b   :  { %1721 = vmatprep.subr.bf16.mxu1 %v1844_v0 }
 0x93d   :  { %v927_v27 = vpop.f32.mrf.mxu1 }
 0x93e   :  { %v928_v28 = vadd.f32 %v927_v27, %v889_v26  ;;  %v1761_v27 = vld [vmem:[#allocation3 + $0x2] ss:$0 sps:$4 sm:$0x11]  }
 0x93f   :  { %v1683_v29 = vpop.f32.mrf.mxu1 }
 0x940   :  { %v933_v30 = vmul.f32 %v928_v28, %v1987_v57  ;;  %v1145_v28 = vrot.slane %v1761_v27, %v1899_v12  ;;  %v1134_v29 = vld [vmem:[#allocation2 + $0x5] sm:$0x1] }
 0x941   :  { %v930_v31 = vpop.f32.mrf.mxu1 }
 0x942   :  { %1776 = vtanh.f32 %v933_v30 }
 0x943   :  { %v1684_v32 = vpop.f32.mrf.mxu1 }
 0x94f   :  { %v1777_v33 = vpop.eup %1776 }
 0x950   :  { %v935_v34 = vmul.f32 %v1777_v33, %v1987_v57 }
 0x952   :  { %v936_v36 = vadd.f32 %v935_v34, %v1990_v60 }
 0x954   :  { %939 = vrot.lane.b32.xlu1 %v936_v36, %s1841_s18  ;;  %v937_v42 = vmul.f32 %v936_v36, %v812_v10 }
 0x9c6   :  { %v940_v40 = vpop.permute.xlu1 %939 }
 0x9c7   :  { %v942_v41 = vmul.f32 %v940_v40, %v936_v36 }
 0x9c9   :  { %944 = vrot.lane.b32.xlu0 %v942_v41, %s1850_s3 }
 0xa3b   :  { %v945_v44 = vpop.permute.xlu0 %944 }
 0xa3c   :  { %v947_v45 = vadd.f32 %v945_v44, %v937_v42 }
 0xa3e   :  { %1778 = vtanh.f32 %v947_v45 }
 0xa4b   :  { %v1779_v46 = vpop.eup %1778 }
 0xa4c   :  { %950 = vrot.lane.b32.xlu1 %v1779_v46, %s1841_s18 }
 0xabe   :  { %v951_v47 = vpop.permute.xlu1 %950 }
 0xabf   :  { %v2091_v48 = vmul.f32 %v951_v47, %v936_v36 }
 0xac1   :  { %v989_v49 = vsel %vm432_vm6, 0.0, %v2091_v48  ;;  %v988_v50 = vsel %vm432_vm6, %v2091_v48, 0.0 }
 0xac2   :  { %995 = vrot.lane.b32.xlu1 %v989_v49, %s1841_s18  ;;  %991 = vrot.lane.b32.xlu0 %v988_v50, %s1850_s3 }
 0xb34   :  { %v996_v51 = vpop.permute.xlu1 %995  ;;  %v992_v52 = vpop.permute.xlu0 %991 }
 0xb35   :  { %v998_v53 = vsel %vm592_vm7, %v992_v52, %v996_v51 }
 0xb36   :  { %v999_v54 = vpack.c.bf16 %v998_v53, %v998_v53 }
 0xb38   :  { %1694 = vmatmul.mubr.msk.bf16.vlgmr.msra.gmra.mxu0 %vm159_vm1, %v999_v54 }
 0xb39   :  { %1710 = vmatpush3.bf16.msra.mxu0 %v1936_v35  ;;  %1717 = vmatprep.mubr.msk.bf16.mxu0 %vm1845_vm0, %v1844_v0 }
 0xb3a   :  { %1711 = vmatprep.subr.bf16.mxu0 %v1844_v0 }
 0xb3d   :  { %1712 = vmatpush3.bf16.msra.mxu0 %v1941_v37 }
 0xb3e   :  { %1713 = vmatprep.subr.bf16.mxu0 %v1844_v0 }
 0xb41   :  { %1714 = vmatpush3.bf16.msra.mxu0 %v1951_v38 }
 0xb42   :  { %1715 = vmatprep.subr.bf16.mxu0 %v1844_v0 }
 0xb45   :  { %1716 = vmatpush3.bf16.msra.mxu0 %v1957_v39 }
 0xbf8   :  { %v1062_v62 = vpop.f32.mrf.mxu0 }
 0xbf9   :  { %v1063_v63 = vadd.f32 %v1062_v62, %v1024_v61  ;;  %v1267_v61 = vld [vmem:[#allocation2 + $0x6] sm:$0x1] }
 0xbfa   :  { %v1695_v1 = vpop.f32.mrf.mxu0  ;;  %v1288_v62 = vsel %vm453_vm5, %v1267_v61, %v1285_v59 }
 0xbfb   :  { %v1068_v2 = vmul.f32 %v1063_v63, %v1987_v57  ;;  %v1290_v63 = vunpack.c.l.bf16 %v1288_v62 }
 0xbfc   :  { %v1065_v4 = vpop.f32.mrf.mxu0 }
 0xbfd   :  { %1780 = vtanh.f32 %v1068_v2 }
 0xbfe   :  { %v1696_v5 = vpop.f32.mrf.mxu0 }
 0xc0a   :  { %v1781_v6 = vpop.eup %1780 }
 0xc0b   :  { %v1070_v7 = vmul.f32 %v1781_v6, %v1987_v57 }
 0xc0d   :  { %v1071_v10 = vadd.f32 %v1070_v7, %v1990_v60 }
 0xc0f   :  { %1074 = vrot.lane.b32.xlu0 %v1071_v10, %s1841_s18  ;;  %v1072_v15 = vmul.f32 %v1071_v10, %v947_v45 }
 0xc81   :  { %v1075_v11 = vpop.permute.xlu0 %1074 }
 0xc82   :  { %v1077_v13 = vmul.f32 %v1075_v11, %v1071_v10 }
 0xc84   :  { %1079 = vrot.lane.b32.xlu1 %v1077_v13, %s1850_s3 }
 0xcf6   :  { %v1080_v16 = vpop.permute.xlu1 %1079 }
 0xcf7   :  { %v1082_v17 = vadd.f32 %v1080_v16, %v1072_v15 }
 0xcf9   :  { %1782 = vtanh.f32 %v1082_v17 }
 0xd06   :  { %v1783_v18 = vpop.eup %1782 }
 0xd07   :  { %1085 = vrot.lane.b32.xlu0 %v1783_v18, %s1841_s18 }
 0xd79   :  { %v1086_v19 = vpop.permute.xlu0 %1085 }
 0xd7a   :  { %v2121_v20 = vmul.f32 %v1086_v19, %v1071_v10 }
 0xd7c   :  { %v1122_v21 = vsel %vm432_vm6, 0.0, %v2121_v20  ;;  %v1121_v22 = vsel %vm432_vm6, %v2121_v20, 0.0 }
 0xd7d   :  { %1128 = vrot.lane.b32.xlu0 %v1122_v21, %s1841_s18  ;;  %1124 = vrot.lane.b32.xlu1 %v1121_v22, %s1850_s3 }
 0xdef   :  { %v1129_v23 = vpop.permute.xlu0 %1128  ;;  %v1125_v24 = vpop.permute.xlu1 %1124 }
 0xdf0   :  { %v1131_v25 = vsel %vm592_vm7, %v1125_v24, %v1129_v23 }
 0xdf1   :  { %v1132_v26 = vpack.c.bf16 %v1131_v25, %v1131_v25 }
 0xdf3   :  { %1706 = vmatmul.mubr.msk.bf16.vlgmr.msra.gmra.mxu1 %vm159_vm1, %v1132_v26 }
 0xdf4   :  { %1722 = vmatpush3.bf16.msra.mxu1 %v1936_v35  ;;  %1729 = vmatprep.mubr.msk.bf16.mxu1 %vm1845_vm0, %v1844_v0  ;;  %v1152_v35 = vrot.slane %v1145_v28, %v1899_v12 }
 0xdf5   :  { %1723 = vmatprep.subr.bf16.mxu1 %v1844_v0 }
 0xdf6   :  { %v1155_v30 = vsel %vm453_vm5, %v1134_v29, %v1152_v35  ;;  %v1763_v29 = vld [vmem:[#allocation3] ss:$0 sps:$4 sm:$0x11]  }
 0xdf7   :  { %v1157_v31 = vunpack.c.l.bf16 %v1155_v30  ;;  %v1410_v30 = vrot.slane %v1763_v29, %v1899_v12 }
 0xdf8   :  { %1724 = vmatpush3.bf16.msra.mxu1 %v1941_v37 }
 0xdf9   :  { %1725 = vmatprep.subr.bf16.mxu1 %v1844_v0 }
 0xdfc   :  { %1726 = vmatpush3.bf16.msra.mxu1 %v1951_v38 }
 0xdfd   :  { %1727 = vmatprep.subr.bf16.mxu1 %v1844_v0 }
 0xe00   :  { %1728 = vmatpush3.bf16.msra.mxu1 %v1957_v39 }
 0xeb3   :  { %v1195_v32 = vpop.f32.mrf.mxu1 }
 0xeb4   :  { %v1196_v33 = vadd.f32 %v1195_v32, %v1157_v31  ;;  %v1400_v31 = vld [vmem:[#allocation2 + $0x7] sm:$0x1]  ;;  %v1417_v32 = vrot.slane %v1410_v30, %v1899_v12 }
 0xeb5   :  { %v1707_v37 = vpop.f32.mrf.mxu1 }
 0xeb6   :  { %v1201_v34 = vmul.f32 %v1196_v33, %v1987_v57  ;;  %v1420_v9 = vsel %vm453_vm5, %v1400_v31, %v1417_v32 }
 0xeb7   :  { %v1198_v36 = vpop.f32.mrf.mxu1  ;;  %v1422_v33 = vunpack.c.l.bf16 %v1420_v9 }
 0xeb8   :  { %1784 = vtanh.f32 %v1201_v34 }
 0xeb9   :  { %v1708_v38 = vpop.f32.mrf.mxu1 }
 0xec5   :  { %v1785_v0 = vpop.eup %1784 }
 0xec6   :  { %v1203_v39 = vmul.f32 %v1785_v0, %v1987_v57 }
 0xec8   :  { %v1204_v40 = vadd.f32 %v1203_v39, %v1990_v60 }
 0xeca   :  { %1207 = vrot.lane.b32.xlu1 %v1204_v40, %s1841_s18  ;;  %v1205_v44 = vmul.f32 %v1204_v40, %v1082_v17 }
 0xf3c   :  { %v1208_v41 = vpop.permute.xlu1 %1207 }
 0xf3d   :  { %v1210_v42 = vmul.f32 %v1208_v41, %v1204_v40 }
 0xf3f   :  { %1212 = vrot.lane.b32.xlu0 %v1210_v42, %s1850_s3 }
 0xfb1   :  { %v1213_v45 = vpop.permute.xlu0 %1212 }
 0xfb2   :  { %v1215_v46 = vadd.f32 %v1213_v45, %v1205_v44  ;;  %v547_v44 = vpack.c.bf16 %v1998_v8, %v1998_v8  ;;  %v954_v8 = vpack.c.bf16 %v2091_v48, %v2091_v48 }
 0xfb4   :  { %1786 = vtanh.f32 %v1215_v46 }
 0xfc1   :  { %v1787_v47 = vpop.eup %1786 }
 0xfc2   :  { %1218 = vrot.lane.b32.xlu1 %v1787_v47, %s1841_s18 }
0x1034   :  { %v1219_v49 = vpop.permute.xlu1 %1218 }
0x1035   :  { %v2151_v50 = vmul.f32 %v1219_v49, %v1204_v40  ;;  %v555_v49 = vrot.slane %v547_v44, %v1899_v12 }
0x1037   :  { %v1255_v51 = vsel %vm432_vm6, 0.0, %v2151_v50  ;;  %v1254_v52 = vsel %vm432_vm6, %v2151_v50, 0.0 }
0x1038   :  { %1261 = vrot.lane.b32.xlu1 %v1255_v51, %s1841_s18  ;;  %1257 = vrot.lane.b32.xlu0 %v1254_v52, %s1850_s3 }
0x10aa   :  { %v1262_v53 = vpop.permute.xlu1 %1261  ;;  %v1258_v54 = vpop.permute.xlu0 %1257 }
0x10ab   :  { %v1264_v55 = vsel %vm592_vm7, %v1258_v54, %v1262_v53  ;;  %v1089_v53 = vpack.c.bf16 %v2121_v20, %v2121_v20  ;;  %v962_v54 = vrot.slane %v954_v8, %v1899_v12 }
0x10ac   :  { %v1265_v56 = vpack.c.bf16 %v1264_v55, %v1264_v55  ;;  %v1222_v55 = vpack.c.bf16 %v2151_v50, %v2151_v50 }
0x10ad   :  { %v969_v48 = vrot.slane %v962_v54, %v1899_v12 }
0x10ae   :  { %1718 = vmatmul.mubr.msk.bf16.vlgmr.msra.gmra.mxu0 %vm159_vm1, %v1265_v56  ;;  %v1097_v56 = vrot.slane %v1089_v53, %v1899_v12  ;;  %v1230_v20 = vrot.slane %v1222_v55, %v1899_v12 }
0x10b0   :  { %v1104_v3 = vrot.slane %v1097_v56, %v1899_v12  ;;  %v1237_v59 = vrot.slane %v1230_v20, %v1899_v12 }
0x116e   :  { %v1328_v1 = vpop.f32.mrf.mxu0 }
0x116f   :  { %v1329_v2 = vadd.f32 %v1328_v1, %v1290_v63 }
0x1170   :  { %v1719_v4 = vpop.f32.mrf.mxu0 }
0x1171   :  { %v1334_v5 = vmul.f32 %v1329_v2, %v1987_v57 }
0x1172   :  { %v1331_v6 = vpop.f32.mrf.mxu0 }
0x1173   :  { %1788 = vtanh.f32 %v1334_v5  ;;  %v568_v6 = vcombine.high %v555_v49, %v555_v49 }
0x1174   :  { %v1720_v7 = vpop.f32.mrf.mxu0 }
0x1180   :  { %v1789_v10 = vpop.eup %1788 }
0x1181   :  { %v1336_v11 = vmul.f32 %v1789_v10, %v1987_v57 }
0x1183   :  { %v1337_v13 = vadd.f32 %v1336_v11, %v1990_v60  ;;  %v575_v11 = vrot.slane %v568_v6, %v1899_v12 }
0x1185   :  { %1340 = vrot.lane.b32.xlu0 %v1337_v13, %s1841_s18  ;;  %v1338_v17 = vmul.f32 %v1337_v13, %v1215_v46  ;;  %v684_v46 = vpack.c.bf16 %v2029_v43, %v2029_v43 }
0x1187   :  { %v692_v51 = vrot.slane %v684_v46, %v1899_v12 }
0x1189   :  { %v699_v43 = vrot.slane %v692_v51, %v1899_v12 }
0x11f7   :  { %v1341_v15 = vpop.permute.xlu0 %1340 }
0x11f8   :  { %v1343_v16 = vmul.f32 %v1341_v15, %v1337_v13 }
0x11fa   :  { %1345 = vrot.lane.b32.xlu1 %v1343_v16, %s1850_s3 }
0x126c   :  { %v1346_v18 = vpop.permute.xlu1 %1345 }
0x126d   :  { %v2171_v19 = vadd.f32 %v1346_v18, %v1338_v17  ;;  %v975_v18 = vcombine.high %v962_v54, %v962_v54 }
0x126f   :  { %1790 = vtanh.f32 %v2171_v19 }
0x127c   :  { %v1791_v21 = vpop.eup %1790 }
0x127d   :  { %1351 = vrot.lane.b32.xlu0 %v1791_v21, %s1841_s18  ;;  %v1109_v21 = vcombine.high %v1097_v56, %v1097_v56 }
0x12ef   :  { %v1352_v22 = vpop.permute.xlu0 %1351 }
0x12f0   :  { %v1354_v23 = vmul.f32 %v1352_v22, %v1337_v13  ;;  %v705_v13 = vcombine.high %v692_v51, %v692_v51  ;;  %v1116_v22 = vrot.slane %v1109_v21, %v1899_v12 }
0x12f2   :  { %v1388_v24 = vsel %vm432_vm6, 0.0, %v1354_v23  ;;  %v1387_v25 = vsel %vm432_vm6, %v1354_v23, 0.0  ;;  %v1355_v58 = vpack.c.bf16 %v1354_v23, %v1354_v23  ;;  %v712_v15 = vrot.slane %v705_v13, %v1899_v12 }
0x12f3   :  { %1394 = vrot.lane.b32.xlu0 %v1388_v24, %s1841_s18  ;;  %1390 = vrot.lane.b32.xlu1 %v1387_v25, %s1850_s3  ;;  %v1242_v23 = vcombine.high %v1230_v20, %v1230_v20 }
0x12f4   :  { %v1363_v61 = vrot.slane %v1355_v58, %v1899_v12 }
0x12f5   :  { %v1249_v24 = vrot.slane %v1242_v23, %v1899_v12 }
0x12f6   :  { %v1370_v50 = vrot.slane %v1363_v61, %v1899_v12  ;;  %v1375_v25 = vcombine.high %v1363_v61, %v1363_v61 }
0x1365   :  { %v1395_v26 = vpop.permute.xlu0 %1394  ;;  %v1391_v27 = vpop.permute.xlu1 %1390 }
0x1366   :  { %v1397_v28 = vsel %vm592_vm7, %v1391_v27, %v1395_v26  ;;  %v1382_v26 = vrot.slane %v1375_v25, %v1899_v12 }
0x1367   :  { %v1398_v35 = vpack.c.bf16 %v1397_v28, %v1397_v28 }
0x1369   :  { %1730 = vmatmul.mubr.msk.bf16.vlgmr.msra.gmra.mxu1 %vm159_vm1, %v1398_v35 }
0x1429   :  { %v1460_v37 = vpop.f32.mrf.mxu1 }
0x142a   :  { %v1461_v34 = vadd.f32 %v1460_v37, %v1422_v33 }
0x142b   :  { %v1731_v36 = vpop.f32.mrf.mxu1 }
0x142c   :  { %v1466_v38 = vmul.f32 %v1461_v34, %v1987_v57 }
0x142d   :  { %v1463_v0 = vpop.f32.mrf.mxu1 }
0x142e   :  { %1792 = vtanh.f32 %v1466_v38 }
0x142f   :  { %v1732_v39 = vpop.f32.mrf.mxu1 }
0x143b   :  { %v1793_v40 = vpop.eup %1792 }
0x143c   :  { %v1468_v41 = vmul.f32 %v1793_v40, %v1987_v57  ;;  %v819_v57 = vpack.c.bf16 %v2060_v14, %v2060_v14 }
0x143e   :  { %v2189_v42 = vadd.f32 %v1468_v41, %v1990_v60  ;;  %v562_v60 = vrot.slane %v555_v49, %v1899_v12  ;;  %v827_v52 = vrot.slane %v819_v57, %v1899_v12 }
0x1440   :  { %1472 = vrot.lane.b32.xlu1 %v2189_v42, %s1841_s18  ;;  %v834_v14 = vrot.slane %v827_v52, %v1899_v12  ;;  %v1470_v62 = vmul.f32 %v2189_v42, %v2171_v19  ;;  %v840_v16 = vcombine.high %v827_v52, %v827_v52  ;;  %v982_v19 = vrot.slane %v975_v18, %v1899_v12 }
0x1442   :  { %v847_v17 = vrot.slane %v840_v16, %v1899_v12 }
0x14b2   :  { %v1473_v45 = vpop.permute.xlu1 %1472 }
0x14b3   :  { %v1475_v47 = vmul.f32 %v1473_v45, %v2189_v42 }
0x14b5   :  { %1477 = vrot.lane.b32.xlu0 %v1475_v47, %s1850_s3 }
0x14b9   :  { %563 = vrot.lane.b32.xlu0 %v562_v60, %s1850_s3 }
0x14bd   :  { %700 = vrot.lane.b32.xlu0 %v699_v43, %s1850_s3 }
0x14c1   :  { %835 = vrot.lane.b32.xlu0 %v834_v14, %s1850_s3 }
0x14c5   :  { %970 = vrot.lane.b32.xlu0 %v969_v48, %s1850_s3 }
0x14c9   :  { %1105 = vrot.lane.b32.xlu0 %v1104_v3, %s1850_s3 }
0x14cd   :  { %1238 = vrot.lane.b32.xlu0 %v1237_v59, %s1850_s3 }
0x14d1   :  { %1371 = vrot.lane.b32.xlu0 %v1370_v50, %s1850_s3 }
0x1527   :  { %v1478_v63 = vpop.permute.xlu0 %1477 }
0x1528   :  { %v1480_v1 = vadd.f32 %v1478_v63, %v1470_v62 }
0x152a   :  { %1794 = vtanh.f32 %v1480_v1 }
0x152b   :  { %v564_v2 = vpop.permute.xlu0 %563 }
0x152c   :  { %567 = vst.msk [vmem:[%s2319_s4] sm:$0x1] %vm566_vm8, %v564_v2 }
0x152f   :  { %v701_v4 = vpop.permute.xlu0 %700 }
0x1530   :  { %1544 = vst.msk [vmem:[%s2319_s4 + $0x1] sm:$0x1] %vm566_vm8, %v701_v4 }
0x1533   :  { %v836_v5 = vpop.permute.xlu0 %835 }
0x1534   :  { %1547 = vst.msk [vmem:[%s2319_s4 + $0x2] sm:$0x1] %vm566_vm8, %v836_v5 }
0x1537   :  { %v1795_v7 = vpop.eup %1794  ;;  %v971_v10 = vpop.permute.xlu0 %970 }
0x1538   :  { %1550 = vst.msk [vmem:[%s2319_s4 + $0x3] sm:$0x1] %vm566_vm8, %v971_v10  ;;  %1483 = vrot.lane.b32.xlu1 %v1795_v7, %s1841_s18 }
0x153b   :  { %v1106_v27 = vpop.permute.xlu0 %1105 }
0x153c   :  { %576 = vrot.lane.b32.xlu1 %v575_v11, %s1841_s18 }
0x153f   :  { %v1239_v29 = vpop.permute.xlu0 %1238 }
0x1540   :  { %713 = vrot.lane.b32.xlu1 %v712_v15, %s1841_s18 }
0x1543   :  { %v1372_v34 = vpop.permute.xlu0 %1371 }
0x1544   :  { %848 = vrot.lane.b32.xlu1 %v847_v17, %s1841_s18 }
0x1548   :  { %983 = vrot.lane.b32.xlu1 %v982_v19, %s1841_s18 }
0x154c   :  { %1117 = vrot.lane.b32.xlu1 %v1116_v22, %s1841_s18 }
0x1550   :  { %1250 = vrot.lane.b32.xlu1 %v1249_v24, %s1841_s18 }
0x1554   :  { %1383 = vrot.lane.b32.xlu1 %v1382_v26, %s1841_s18 }
0x15aa   :  { %v1484_v28 = vpop.permute.xlu1 %1483 }
0x15ab   :  { %v1486_v35 = vmul.f32 %v1484_v28, %v2189_v42 }
0x15ad   :  { %v1487_v30 = vpack.c.bf16 %v1486_v35, %v1486_v35 }
0x15ae   :  { %v577_v31 = vpop.permute.xlu1 %576 }
0x15af   :  { %v1495_v32 = vrot.slane %v1487_v30, %v1899_v12  ;;  %1542 = vst.msk [vmem:[%s2319_s4 + $0x7] sm:$0x1] %vm580_vm9, %v577_v31 }
0x15b1   :  { %v1502_v9 = vrot.slane %v1495_v32, %v1899_v12  ;;  %v1507_v33 = vcombine.high %v1495_v32, %v1495_v32 }
0x15b2   :  { %v714_v37 = vpop.permute.xlu1 %713 }
0x15b3   :  { %1545 = vst.msk [vmem:[%s2319_s4 + $0x6] sm:$0x1] %vm580_vm9, %v714_v37  ;;  %1503 = vrot.lane.b32.xlu0 %v1502_v9, %s1850_s3  ;;  %v1514_v36 = vrot.slane %v1507_v33, %v1899_v12 }
0x15b4   :  { %1559 = vst.msk [vmem:[%s2319_s4 + $0x6] sm:$0x1] %vm566_vm8, %v1372_v34 }
0x15b5   :  { %1515 = vrot.lane.b32.xlu1 %v1514_v36, %s1841_s18 }
0x15b6   :  { %v849_v38 = vpop.permute.xlu1 %848 }
0x15b7   :  { %1548 = vst.msk [vmem:[%s2319_s4 + $0x5] sm:$0x1] %vm580_vm9, %v849_v38 }
0x15b8   :  { %1556 = vst.msk [vmem:[%s2319_s4 + $0x5] sm:$0x1] %vm566_vm8, %v1239_v29 }
0x15ba   :  { %v984_v0 = vpop.permute.xlu1 %983 }
0x15bb   :  { %1551 = vst.msk [vmem:[%s2319_s4 + $0x4] sm:$0x1] %vm580_vm9, %v984_v0 }
0x15bc   :  { %1553 = vst.msk [vmem:[%s2319_s4 + $0x4] sm:$0x1] %vm566_vm8, %v1106_v27 }
0x15be   :  { %v1118_v12 = vpop.permute.xlu1 %1117 }
0x15bf   :  { %1554 = vst.msk [vmem:[%s2319_s4 + $0x3] sm:$0x1] %vm580_vm9, %v1118_v12 }
0x15c2   :  { %v1251_v39 = vpop.permute.xlu1 %1250 }
0x15c3   :  { %1557 = vst.msk [vmem:[%s2319_s4 + $0x2] sm:$0x1] %vm580_vm9, %v1251_v39 }
0x15c6   :  { %v1384_v40 = vpop.permute.xlu1 %1383 }
0x15c7   :  { %1560 = vst.msk [vmem:[%s2319_s4 + $0x1] sm:$0x1] %vm580_vm9, %v1384_v40 }
0x1625   :  { %v1504_v41 = vpop.permute.xlu0 %1503 }
0x1626   :  { %1562 = vst.msk [vmem:[%s2319_s4 + $0x7] sm:$0x1] %vm566_vm8, %v1504_v41 }
0x1627   :  { %v1516_v42 = vpop.permute.xlu1 %1515 }
0x1628   :  { %1518 = vst.msk [vmem:[%s2319_s4] sm:$0x1] %vm580_vm9, %v1516_v42 }
0x1629   :  { %1523 = vsyncpa [#allocation5], 1 }
0x162a   :  { %1524 = vsyncpa [#allocation7], 1 }

// kernel: lstm_net_forward.6
= control target key start
LH: loop header
LB: loop body
LE: loop exit
PB: predicated region body
PF: predicated region fallthrough
CT: control target
= control target key end

     0   :  { %9 = vsyncpa [#allocation5], 0  ;;  %s1918_s15 = smov [#allocation4]   ;;  %s2441_s0 = inlined_call_operand.vmem [shape: bf16[8,2,128], index: 0, kind: input, shape index: {}]   ;;  %s2442_s1 = inlined_call_operand.vmem [shape: bf16[2,128,128], index: 1, kind: input, shape index: {}]   ;;  %s2443_s2 = inlined_call_operand.hbm [shape: bf16[64,128], index: 2, kind: input, shape index: {}]   ;;  %s2444_s3 = inlined_call_operand.vmem [shape: f32[2,1,128], index: 3, kind: input, shape index: {}]   ;;  %s2445_s4 = inlined_call_operand.vmem [shape: bf16[8,2,64], index: 4, kind: output, shape index: {}]  }
   0x1   :  { %s19_s16 = sshll.u32 %s1918_s15, 4  ;;  %s20_s16 = int_to_ptr.vmem [resolvable:$true] %s19_s16 }
   0x2   :  { %s1904_s17 = scalar_lea.vmem %s20_s16, 512  ;;  %p1909_p1 = scmp.lt.s32.totalorder %s20_s16, %s20_s16 }
   0x3   :  { %p1905_p0 = scmp.ne.s32.totalorder %s20_s16, %s1904_s17  ;;  %p1910_p2 = scmp.lt.s32.totalorder %s1904_s17, %s1904_s17 }
   0x5   :  { %p1911_p3 = por %p1910_p2, %p1909_p1 }
   0x7   :  { %p1912_p4 = pnand %p1911_p3, %p1905_p0 }
   0x9   :  { %1915 = shalt.err (!%p1912_p4)
}
   0xa   :  { %s1919_s18 = smov 64   ;;  %s1920_s19 = smov 4  }
   0xb   :  { %25 = dma.hbm_to_vmem [thread:$0]  %s2443_s2, 512, %s20_s16, [#allocation5], %s1919_s18, %s1919_s18, %s1920_s19  }
   0xc   :  { %1916 = dma.done.wait [#allocation5], 512  }
   0xd   :  { %1917 = vsyncadd [#allocation5], 4294966784  ;;  %v1921_v0 = vmov 0.0   ;;  %vm1922_vm0 = vmmov 0   ;;  %v1836_v1 = vld [vmem:[%s2442_s1 + $0x38] sm:$0xff]   ;;  %v1838_v3 = vld [vmem:[%s2442_s1 + $0x30] sm:$0xff]   ;;  %v77_v9 = vlaneseq }
   0xe   :  { %1690 = vmatprep.subr.bf16.mxu0 %v1921_v0  ;;  %1710 = vmatprep.subr.bf16.mxu1 %v1921_v0  ;;  %v1837_v2 = vld [vmem:[%s2442_s1 + $0x78] sm:$0xff]   ;;  %v1839_v4 = vld [vmem:[%s2442_s1 + $0x70] sm:$0xff]   ;;  %v1840_v5 = vld [vmem:[%s2442_s1 + $0x28] sm:$0xff]   ;;  %v1923_v7 = vmov 1966171168   ;;  %v1924_v48 = vmov 0.0|0.0  }
   0xf   :  { %1706 = vmatprep.mubr.msk.bf16.mxu0 %vm1922_vm0, %v1921_v0  ;;  %1726 = vmatprep.mubr.msk.bf16.mxu1 %vm1922_vm0, %v1921_v0  ;;  %v1841_v6 = vld [vmem:[%s2442_s1 + $0x68] sm:$0xff]   ;;  %v75_v8 = vunpack.c.l.s4 %v1923_v7  ;;  %v1842_v10 = vld [vmem:[%s2442_s1 + $0x20] sm:$0xff]   ;;  %v1994_v13 = vshrl.u32 %v77_v9, 7  ;;  %v1844_v14 = vld [vmem:[%s2442_s1 + $0x18] sm:$0xff]   ;;  %v1925_v49 = vmov 1983009808  }
  0x10   :  { %1691 = vmatpush3.bf16.msra.mxu0 %v1836_v1  ;;  %1711 = vmatpush3.bf16.msra.mxu1 %v1837_v2  ;;  %v1843_v11 = vld [vmem:[%s2442_s1 + $0x60] sm:$0xff]   ;;  %v1845_v15 = vld [vmem:[%s2442_s1 + $0x58] sm:$0xff]   ;;  %v1846_v17 = vld [vmem:[%s2442_s1 + $0x10] sm:$0xff]   ;;  %v170_v50 = vunpack.c.l.s4 %v1925_v49  ;;  %vm500_vm4 = vcmask 1040384   ;;  %vm640_vm6 = vcmask 261120   ;;  %vm530_vm7 = vcmask 523264  }
  0x11   :  { %1692 = vmatprep.subr.bf16.mxu0 %v1921_v0  ;;  %1712 = vmatprep.subr.bf16.mxu1 %v1921_v0  ;;  %v76_v12 = vunpack.c.0.s8 %v75_v8  ;;  %v32_v18 = vld [vmem:[%s2441_s0] sm:$0x1]  ;;  %v33_v19 = vld [vmem:[%s2441_s0 + $0x1] sm:$0x1]  ;;  %v34_v20 = vld [vmem:[%s2441_s0 + $0x2] sm:$0x1] }
  0x12   :  { %v35_v21 = vld [vmem:[%s2441_s0 + $0x3] sm:$0x1]  ;;  %v36_v22 = vld [vmem:[%s2441_s0 + $0x4] sm:$0x1]  ;;  %v37_v23 = vld [vmem:[%s2441_s0 + $0x5] sm:$0x1]  ;;  %v70_v24 = vcombine.low %v32_v18, %v33_v19  ;;  %v171_v52 = vunpack.c.0.s8 %v170_v50 }
  0x13   :  { %v2005_v16 = vsub.s32 %v76_v12, %v1994_v13  ;;  %v38_v25 = vld [vmem:[%s2441_s0 + $0x6] sm:$0x1]  ;;  %v39_v26 = vld [vmem:[%s2441_s0 + $0x7] sm:$0x1]  ;;  %v71_v27 = vcombine.low %v34_v20, %v35_v21  ;;  %v72_v28 = vcombine.low %v36_v22, %v37_v23  ;;  %v1847_v29 = vld [vmem:[%s2442_s1 + $0x50] sm:$0xff]   ;;  %vm479_vm5 = vcmp.lt.s32.totalorder %v1994_v13, 2 }
  0x14   :  { %1693 = vmatpush3.bf16.msra.mxu0 %v1838_v3  ;;  %1713 = vmatpush3.bf16.msra.mxu1 %v1839_v4  ;;  %v73_v30 = vcombine.low %v38_v25, %v39_v26  ;;  %v1848_v35 = vld [vmem:[%s2442_s1 + $0x8] sm:$0xff]   ;;  %v1850_v41 = vld [vmem:[%s2442_s1] sm:$0xff]   ;;  %v2077_v46 = vld [vmem:[#allocation4 + $0x8] sm:$0xff]   ;;  %v174_v55 = vsub.s32 %v171_v52, %v1994_v13  ;;  %vm614_vm8 = vcmask 253952   ;;  %vm628_vm9 = vcmask 516352  }
  0x15   :  { %1694 = vmatprep.subr.bf16.mxu0 %v1921_v0  ;;  %1714 = vmatprep.subr.bf16.mxu1 %v1921_v0  ;;  %v80_v31 = vrot.slane %v70_v24, %v2005_v16  ;;  %v87_v32 = vrot.slane %v71_v27, %v2005_v16  ;;  %v94_v33 = vrot.slane %v72_v28, %v2005_v16  ;;  %v1849_v37 = vld [vmem:[%s2442_s1 + $0x48] sm:$0xff]   ;;  %v1851_v42 = vld [vmem:[%s2442_s1 + $0x40] sm:$0xff]   ;;  %v2083_v47 = vld [vmem:[#allocation4] sm:$0xff]  }
  0x16   :  { %v101_v34 = vrot.slane %v73_v30, %v2005_v16  ;;  %v2062_v44 = vld [vmem:[#allocation4 + $0x18] sm:$0xff]   ;;  %v2067_v45 = vld [vmem:[#allocation4 + $0x10] sm:$0xff]  }
  0x17   :  { %v102_v36 = vcombine.low %v80_v31, %v87_v32  ;;  %v1572_v51 = vld [vmem:[%s2444_s3] ss:$0 sm:$0xff]  ;;  %v1598_v53 = vld [vmem:[%s2444_s3 + $0x1] ss:$0 sm:$0xff]  ;;  %s1927_s3 = smov 32  }
  0x18   :  { %1695 = vmatpush3.bf16.msra.mxu0 %v1840_v5  ;;  %1715 = vmatpush3.bf16.msra.mxu1 %v1841_v6  ;;  %v103_v38 = vcombine.low %v94_v33, %v101_v34  ;;  %v168_v54 = vcombine.low %v1572_v51, %v1572_v51  ;;  %v351_v56 = vcombine.low %v1598_v53, %v1598_v53 }
  0x19   :  { %1696 = vmatprep.subr.bf16.mxu0 %v1921_v0  ;;  %1716 = vmatprep.subr.bf16.mxu1 %v1921_v0  ;;  %v110_v39 = vrot.slane %v102_v36, %v2005_v16 }
  0x1a   :  { %v117_v40 = vrot.slane %v103_v38, %v2005_v16  ;;  %v175_v57 = vrot.slane %v168_v54, %v174_v55  ;;  %v358_v58 = vrot.slane %v351_v56, %v174_v55  ;;  %v471_v56 = vand.u32 127, %v77_v9 }
  0x1c   :  { %1697 = vmatpush3.bf16.msra.mxu0 %v1842_v10  ;;  %1717 = vmatpush3.bf16.msra.mxu1 %v1843_v11  ;;  %v118_v43 = vcombine.low %v110_v39, %v117_v40  ;;  %v176_v59 = vcombine.low %v175_v57, %v175_v57  ;;  %v359_v60 = vcombine.low %v358_v58, %v358_v58  ;;  %vm472_vm1 = vcmp.ge.s32.totalorder %v471_v56, 64 }
  0x1d   :  { %1698 = vmatprep.subr.bf16.mxu0 %v1921_v0  ;;  %1718 = vmatprep.subr.bf16.mxu1 %v1921_v0  ;;  %vm473_vm2 = vcmp.lt.s32.totalorder %v471_v56, 96 }
  0x1e   :  { %vm474_vm3 = vmand %vm472_vm1, %vm473_vm2 }
  0x20   :  { %1699 = vmatpush3.bf16.msra.mxu0 %v1844_v14  ;;  %1719 = vmatpush3.bf16.msra.mxu1 %v1845_v15 }
  0x21   :  { %1700 = vmatprep.subr.bf16.mxu0 %v1921_v0  ;;  %1720 = vmatprep.subr.bf16.mxu1 %v1921_v0 }
  0x24   :  { %1701 = vmatpush3.bf16.msra.mxu0 %v1846_v17  ;;  %1721 = vmatpush3.bf16.msra.mxu1 %v1847_v29 }
  0x25   :  { %1702 = vmatprep.subr.bf16.mxu0 %v1921_v0  ;;  %1722 = vmatprep.subr.bf16.mxu1 %v1921_v0 }
  0x28   :  { %1703 = vmatpush3.bf16.msra.mxu0 %v1848_v35  ;;  %1723 = vmatpush3.bf16.msra.mxu1 %v1849_v37 }
  0x29   :  { %1704 = vmatprep.subr.bf16.mxu0 %v1921_v0  ;;  %1724 = vmatprep.subr.bf16.mxu1 %v1921_v0 }
  0x2c   :  { %1705 = vmatpush3.bf16.msra.mxu0 %v1850_v41  ;;  %1725 = vmatpush3.bf16.msra.mxu1 %v1851_v42 }
  0x2d   :  { %1730 = vmatprep.subr.bf16.mxu0 %v1921_v0  ;;  %1742 = vmatprep.subr.bf16.mxu1 %v1921_v0 }
  0x2f   :  { %1707 = vmatmul.mubr.bf16.vlgmr.msra.gmra.mxu0 %v118_v43  ;;  %1727 = vmatmul.mubr.bf16.vlgmr.msra.gmra.mxu1 %v118_v43 }
  0x30   :  { %1731 = vmatpush3.bf16.msra.mxu0 %v2062_v44  ;;  %1738 = vmatprep.mubr.msk.bf16.mxu0 %vm1922_vm0, %v1921_v0 }
  0x31   :  { %1732 = vmatprep.subr.bf16.mxu0 %v1921_v0  ;;  %1743 = vmatpush3.bf16.msra.mxu1 %v2062_v44 }
  0x32   :  { %1750 = vmatprep.mubr.msk.bf16.mxu1 %vm1922_vm0, %v1921_v0  ;;  %1744 = vmatprep.subr.bf16.mxu1 %v1921_v0 }
  0x34   :  { %1733 = vmatpush3.bf16.msra.mxu0 %v2067_v45 }
  0x35   :  { %1734 = vmatprep.subr.bf16.mxu0 %v1921_v0  ;;  %1745 = vmatpush3.bf16.msra.mxu1 %v2067_v45 }
  0x36   :  { %1746 = vmatprep.subr.bf16.mxu1 %v1921_v0 }
  0x38   :  { %1735 = vmatpush3.bf16.msra.mxu0 %v2077_v46 }
  0x39   :  { %1736 = vmatprep.subr.bf16.mxu0 %v1921_v0  ;;  %1747 = vmatpush3.bf16.msra.mxu1 %v2077_v46 }
  0x3a   :  { %1748 = vmatprep.subr.bf16.mxu1 %v1921_v0 }
  0x3c   :  { %1737 = vmatpush3.bf16.msra.mxu0 %v2083_v47 }
  0x3d   :  { %1754 = vmatprep.subr.bf16.mxu0 %v1921_v0  ;;  %1749 = vmatpush3.bf16.msra.mxu1 %v2083_v47 }
  0x3e   :  { %1766 = vmatprep.subr.bf16.mxu1 %v1921_v0 }
  0x3f   :  { %1739 = vmatmul.mubr.bf16.vlgmr.msra.gmra.mxu0 %v1924_v48 }
  0x40   :  { %1755 = vmatpush3.bf16.msra.mxu0 %v2062_v44  ;;  %1762 = vmatprep.mubr.msk.bf16.mxu0 %vm1922_vm0, %v1921_v0 }
  0x41   :  { %1756 = vmatprep.subr.bf16.mxu0 %v1921_v0 }
  0x44   :  { %1757 = vmatpush3.bf16.msra.mxu0 %v2067_v45 }
  0x45   :  { %1758 = vmatprep.subr.bf16.mxu0 %v1921_v0 }
  0x48   :  { %1759 = vmatpush3.bf16.msra.mxu0 %v2077_v46 }
  0x49   :  { %1760 = vmatprep.subr.bf16.mxu0 %v1921_v0 }
  0x4c   :  { %1761 = vmatpush3.bf16.msra.mxu0 %v2083_v47 }
  0x4d   :  { %1778 = vmatprep.subr.bf16.mxu0 %v1921_v0 }
  0xef   :  { %v212_v61 = vpop.f32.mrf.mxu0  ;;  %v395_v63 = vpop.f32.mrf.mxu1 }
  0xf0   :  { %v213_v62 = vadd.f32 %v212_v61, %v176_v59  ;;  %v396_v1 = vadd.f32 %v395_v63, %v359_v60 }
  0xf1   :  { %v1708_v2 = vpop.f32.mrf.mxu0  ;;  %v1728_v5 = vpop.f32.mrf.mxu1 }
  0xf2   :  { %v221_v3 = vcombine.high %v213_v62, %v213_v62  ;;  %v228_v4 = vrot.slane %v213_v62, %v174_v55  ;;  %v404_v6 = vcombine.high %v396_v1, %v396_v1  ;;  %v411_v7 = vrot.slane %v396_v1, %v174_v55 }
  0xf3   :  { %v215_v8 = vpop.f32.mrf.mxu0  ;;  %v398_v15 = vpop.f32.mrf.mxu1  ;;  %v1926_v1 = vmov 0.5  }
  0xf4   :  { %v235_v10 = vrot.slane %v221_v3, %v174_v55  ;;  %v236_v11 = vcombine.high %v228_v4, %v228_v4  ;;  %v263_v12 = vpack.c.bf16 %v228_v4, %v228_v4  ;;  %v216_v14 = vadd.f32 %v215_v8, %v176_v59 }
  0xf5   :  { %v418_v17 = vrot.slane %v404_v6, %v174_v55  ;;  %v419_v18 = vcombine.high %v411_v7, %v411_v7  ;;  %v446_v19 = vpack.c.bf16 %v411_v7, %v411_v7  ;;  %v399_v20 = vadd.f32 %v398_v15, %v359_v60  ;;  %v1709_v21 = vpop.f32.mrf.mxu0  ;;  %v1729_v26 = vpop.f32.mrf.mxu1 }
  0xf6   :  { %v237_v22 = vcombine.high %v235_v10, %v235_v10  ;;  %v264_v23 = vpack.c.bf16 %v236_v11, %v236_v11  ;;  %v265_v24 = vpack.c.bf16 %v235_v10, %v235_v10  ;;  %271 = vst [vmem:[#allocation2] sm:$0x1] %v263_v12  ;;  %v238_v25 = vcombine.high %v216_v14, %v216_v14 }
  0xf7   :  { %v420_v27 = vcombine.high %v418_v17, %v418_v17  ;;  %v447_v28 = vpack.c.bf16 %v419_v18, %v419_v18  ;;  %v448_v29 = vpack.c.bf16 %v418_v17, %v418_v17  ;;  %454 = vst [vmem:[#allocation3] sm:$0x1] %v446_v19  ;;  %v245_v30 = vrot.slane %v216_v14, %v174_v55 }
  0xf8   :  { %v266_v31 = vpack.c.bf16 %v237_v22, %v237_v22  ;;  %272 = vst [vmem:[#allocation2 + $0x1] sm:$0x1] %v264_v23  ;;  %273 = vst [vmem:[#allocation2 + $0x2] sm:$0x1] %v265_v24  ;;  %v252_v32 = vrot.slane %v238_v25, %v174_v55  ;;  %v421_v33 = vcombine.high %v399_v20, %v399_v20  ;;  %v2113_v2 = vsel %vm474_vm3, 1.0, %v1926_v1 }
  0xf9   :  { %v428_v34 = vrot.slane %v399_v20, %v174_v55  ;;  %v449_v35 = vpack.c.bf16 %v420_v27, %v420_v27  ;;  %455 = vst [vmem:[#allocation3 + $0x1] sm:$0x1] %v447_v28  ;;  %456 = vst [vmem:[#allocation3 + $0x2] sm:$0x1] %v448_v29  ;;  %v253_v36 = vcombine.high %v245_v30, %v245_v30  ;;  %v2116_v5 = vsel %vm474_vm3, 0.0, %v1926_v1 }
  0xfa   :  { %v267_v37 = vpack.c.bf16 %v245_v30, %v245_v30  ;;  %274 = vst [vmem:[#allocation2 + $0x3] sm:$0x1] %v266_v31  ;;  %v254_v38 = vcombine.high %v252_v32, %v252_v32  ;;  %v269_v39 = vpack.c.bf16 %v252_v32, %v252_v32  ;;  %v435_v40 = vrot.slane %v421_v33, %v174_v55 }
  0xfb   :  { %v436_v41 = vcombine.high %v428_v34, %v428_v34  ;;  %457 = vst [vmem:[#allocation3 + $0x3] sm:$0x1] %v449_v35  ;;  %v268_v42 = vpack.c.bf16 %v253_v36, %v253_v36  ;;  %v450_v43 = vpack.c.bf16 %v428_v34, %v428_v34 }
  0xfc   :  { %275 = vst [vmem:[#allocation2 + $0x4] sm:$0x1] %v267_v37  ;;  %v270_v48 = vpack.c.bf16 %v254_v38, %v254_v38  ;;  %277 = vst [vmem:[#allocation2 + $0x6] sm:$0x1] %v269_v39  ;;  %v437_v49 = vcombine.high %v435_v40, %v435_v40  ;;  %v452_v51 = vpack.c.bf16 %v435_v40, %v435_v40 }
  0xfd   :  { %v451_v50 = vpack.c.bf16 %v436_v41, %v436_v41  ;;  %276 = vst [vmem:[#allocation2 + $0x5] sm:$0x1] %v268_v42  ;;  %458 = vst [vmem:[#allocation3 + $0x4] sm:$0x1] %v450_v43  ;;  %v481_v60 = vld [vmem:[#allocation2] sm:$0x1] }
  0xfe   :  { %278 = vst [vmem:[#allocation2 + $0x7] sm:$0x1] %v270_v48  ;;  %v453_v52 = vpack.c.bf16 %v437_v49, %v437_v49  ;;  %460 = vst [vmem:[#allocation3 + $0x6] sm:$0x1] %v452_v51 }
  0xff   :  { %459 = vst [vmem:[#allocation3 + $0x5] sm:$0x1] %v451_v50  ;;  %v568_v53 = vpop.f32.mrf.mxu0  ;;  %v644_v28 = vld [vmem:[#allocation2 + $0x1] sm:$0x1] }
 0x100   :  { %461 = vst [vmem:[#allocation3 + $0x7] sm:$0x1] %v453_v52 }
 0x101   :  { %v1740_v54 = vpop.f32.mrf.mxu0 }
 0x103   :  { %v571_v55 = vpop.f32.mrf.mxu0 }
 0x105   :  { %v1741_v57 = vpop.f32.mrf.mxu0  ;;  %v1857_v25 = vld [vmem:[#allocation3 + $0x6] ss:$0 sps:$4 sm:$0x11]  }
 0x106   :  { %v655_v26 = vrot.slane %v1857_v25, %v2005_v16 }
 0x107   :  { %v1856_v58 = vld [vmem:[#allocation3 + $0x7] ss:$0 sps:$4 sm:$0x11]  }
 0x108   :  { %v492_v59 = vrot.slane %v1856_v58, %v2005_v16  ;;  %v662_v27 = vrot.slane %v655_v26, %v2005_v16  ;;  %v1858_v58 = vld [vmem:[#allocation3 + $0x5] ss:$0 sps:$4 sm:$0x11]  }
 0x10a   :  { %v499_v61 = vrot.slane %v492_v59, %v2005_v16  ;;  %v665_v29 = vsel %vm500_vm4, %v644_v28, %v662_v27  ;;  %v790_v59 = vrot.slane %v1858_v58, %v2005_v16 }
 0x10b   :  { %v667_v30 = vunpack.c.l.bf16 %v665_v29  ;;  %v1859_v29 = vld [vmem:[#allocation3 + $0x4] ss:$0 sps:$4 sm:$0x11]  }
 0x10c   :  { %v503_v62 = vsel %vm500_vm4, %v481_v60, %v499_v61  ;;  %v797_v60 = vrot.slane %v790_v59, %v2005_v16  ;;  %v779_v61 = vld [vmem:[#allocation2 + $0x2] sm:$0x1] }
 0x10d   :  { %v505_v63 = vunpack.c.l.bf16 %v503_v62 }
 0x10e   :  { %v800_v62 = vsel %vm500_vm4, %v779_v61, %v797_v60 }
 0x10f   :  { %v569_v3 = vadd.f32 %v568_v53, %v505_v63  ;;  %v802_v63 = vunpack.c.l.bf16 %v800_v62 }
 0x111   :  { %v574_v9 = vmul.f32 %v569_v3, %v2113_v2 }
 0x113   :  { %1864 = vtanh.f32 %v574_v9 }
 0x120   :  { %v1865_v4 = vpop.eup %1864 }
 0x121   :  { %v576_v6 = vmul.f32 %v1865_v4, %v2113_v2 }
 0x123   :  { %v577_v7 = vadd.f32 %v576_v6, %v2116_v5 }
 0x125   :  { %580 = vrot.lane.b32.xlu0 %v577_v7, %s1919_s18  ;;  %v578_v11 = vmul.f32 0.0, %v577_v7 }
 0x197   :  { %v581_v8 = vpop.permute.xlu0 %580 }
 0x198   :  { %v583_v10 = vmul.f32 %v581_v8, %v577_v7 }
 0x19a   :  { %585 = vrot.lane.b32.xlu0 %v583_v10, %s1927_s3 }
 0x20c   :  { %v586_v12 = vpop.permute.xlu0 %585 }
 0x20d   :  { %v588_v14 = vadd.f32 %v586_v12, %v578_v11 }
 0x20f   :  { %1866 = vtanh.f32 %v588_v14 }
 0x21c   :  { %v1867_v15 = vpop.eup %1866 }
 0x21d   :  { %591 = vrot.lane.b32.xlu1 %v1867_v15, %s1919_s18 }
 0x28f   :  { %v592_v17 = vpop.permute.xlu1 %591 }
 0x290   :  { %v2124_v18 = vmul.f32 %v592_v17, %v577_v7 }
 0x292   :  { %v631_v19 = vsel %vm479_vm5, 0.0, %v2124_v18  ;;  %v630_v20 = vsel %vm479_vm5, %v2124_v18, 0.0 }
 0x293   :  { %637 = vrot.lane.b32.xlu0 %v631_v19, %s1919_s18  ;;  %633 = vrot.lane.b32.xlu1 %v630_v20, %s1927_s3 }
 0x305   :  { %v638_v21 = vpop.permute.xlu0 %637  ;;  %v634_v22 = vpop.permute.xlu1 %633 }
 0x306   :  { %v641_v23 = vsel %vm640_vm6, %v634_v22, %v638_v21 }
 0x307   :  { %v642_v24 = vpack.c.bf16 %v641_v23, %v641_v23 }
 0x309   :  { %1751 = vmatmul.mubr.msk.bf16.vlgmr.msra.gmra.mxu1 %vm530_vm7, %v642_v24 }
 0x30a   :  { %1767 = vmatpush3.bf16.msra.mxu1 %v2062_v44  ;;  %1774 = vmatprep.mubr.msk.bf16.mxu1 %vm1922_vm0, %v1921_v0 }
 0x30b   :  { %1768 = vmatprep.subr.bf16.mxu1 %v1921_v0 }
 0x30e   :  { %1769 = vmatpush3.bf16.msra.mxu1 %v2067_v45 }
 0x30f   :  { %1770 = vmatprep.subr.bf16.mxu1 %v1921_v0 }
 0x312   :  { %1771 = vmatpush3.bf16.msra.mxu1 %v2077_v46 }
 0x313   :  { %1772 = vmatprep.subr.bf16.mxu1 %v1921_v0 }
 0x316   :  { %1773 = vmatpush3.bf16.msra.mxu1 %v2083_v47 }
 0x317   :  { %1790 = vmatprep.subr.bf16.mxu1 %v1921_v0 }
 0x3c9   :  { %v705_v31 = vpop.f32.mrf.mxu1 }
 0x3ca   :  { %v706_v32 = vadd.f32 %v705_v31, %v667_v30  ;;  %v925_v30 = vrot.slane %v1859_v29, %v2005_v16 }
 0x3cb   :  { %v1752_v33 = vpop.f32.mrf.mxu1 }
 0x3cc   :  { %v711_v34 = vmul.f32 %v706_v32, %v2113_v2  ;;  %v932_v31 = vrot.slane %v925_v30, %v2005_v16  ;;  %v914_v32 = vld [vmem:[#allocation2 + $0x3] sm:$0x1] }
 0x3cd   :  { %v708_v35 = vpop.f32.mrf.mxu1 }
 0x3ce   :  { %1868 = vtanh.f32 %v711_v34  ;;  %v935_v33 = vsel %vm500_vm4, %v914_v32, %v932_v31 }
 0x3cf   :  { %v1753_v36 = vpop.f32.mrf.mxu1  ;;  %v937_v34 = vunpack.c.l.bf16 %v935_v33 }
 0x3db   :  { %v1869_v37 = vpop.eup %1868 }
 0x3dc   :  { %v713_v38 = vmul.f32 %v1869_v37, %v2113_v2 }
 0x3de   :  { %v714_v39 = vadd.f32 %v713_v38, %v2116_v5 }
 0x3e0   :  { %717 = vrot.lane.b32.xlu1 %v714_v39, %s1919_s18  ;;  %v715_v42 = vmul.f32 %v714_v39, %v588_v14 }
 0x452   :  { %v718_v40 = vpop.permute.xlu1 %717 }
 0x453   :  { %v720_v41 = vmul.f32 %v718_v40, %v714_v39 }
 0x455   :  { %722 = vrot.lane.b32.xlu0 %v720_v41, %s1927_s3 }
 0x4c7   :  { %v723_v43 = vpop.permute.xlu0 %722 }
 0x4c8   :  { %v725_v48 = vadd.f32 %v723_v43, %v715_v42 }
 0x4ca   :  { %1870 = vtanh.f32 %v725_v48 }
 0x4d7   :  { %v1871_v49 = vpop.eup %1870 }
 0x4d8   :  { %728 = vrot.lane.b32.xlu1 %v1871_v49, %s1919_s18 }
 0x54a   :  { %v729_v50 = vpop.permute.xlu1 %728 }
 0x54b   :  { %v2155_v51 = vmul.f32 %v729_v50, %v714_v39 }
 0x54d   :  { %v767_v52 = vsel %vm479_vm5, 0.0, %v2155_v51  ;;  %v766_v53 = vsel %vm479_vm5, %v2155_v51, 0.0 }
 0x54e   :  { %773 = vrot.lane.b32.xlu1 %v767_v52, %s1919_s18  ;;  %769 = vrot.lane.b32.xlu0 %v766_v53, %s1927_s3 }
 0x5c0   :  { %v774_v54 = vpop.permute.xlu1 %773  ;;  %v770_v55 = vpop.permute.xlu0 %769 }
 0x5c1   :  { %v776_v56 = vsel %vm640_vm6, %v770_v55, %v774_v54 }
 0x5c2   :  { %v777_v57 = vpack.c.bf16 %v776_v56, %v776_v56 }
 0x5c4   :  { %1763 = vmatmul.mubr.msk.bf16.vlgmr.msra.gmra.mxu0 %vm530_vm7, %v777_v57 }
 0x5c5   :  { %1779 = vmatpush3.bf16.msra.mxu0 %v2062_v44  ;;  %1786 = vmatprep.mubr.msk.bf16.mxu0 %vm1922_vm0, %v1921_v0 }
 0x5c6   :  { %1780 = vmatprep.subr.bf16.mxu0 %v1921_v0 }
 0x5c9   :  { %1781 = vmatpush3.bf16.msra.mxu0 %v2067_v45 }
 0x5ca   :  { %1782 = vmatprep.subr.bf16.mxu0 %v1921_v0 }
 0x5cd   :  { %1783 = vmatpush3.bf16.msra.mxu0 %v2077_v46 }
 0x5ce   :  { %1784 = vmatprep.subr.bf16.mxu0 %v1921_v0 }
 0x5d1   :  { %1785 = vmatpush3.bf16.msra.mxu0 %v2083_v47 }
 0x5d2   :  { %1802 = vmatprep.subr.bf16.mxu0 %v1921_v0 }
 0x684   :  { %v840_v1 = vpop.f32.mrf.mxu0 }
 0x685   :  { %v841_v3 = vadd.f32 %v840_v1, %v802_v63  ;;  %v1860_v63 = vld [vmem:[#allocation3 + $0x3] ss:$0 sps:$4 sm:$0x11]  }
 0x686   :  { %v1764_v9 = vpop.f32.mrf.mxu0  ;;  %v1060_v1 = vrot.slane %v1860_v63, %v2005_v16 }
 0x687   :  { %v846_v4 = vmul.f32 %v841_v3, %v2113_v2  ;;  %v1049_v9 = vld [vmem:[#allocation2 + $0x4] sm:$0x1] }
 0x688   :  { %v843_v6 = vpop.f32.mrf.mxu0  ;;  %v1067_v3 = vrot.slane %v1060_v1, %v2005_v16 }
 0x689   :  { %1872 = vtanh.f32 %v846_v4 }
 0x68a   :  { %v1765_v7 = vpop.f32.mrf.mxu0  ;;  %v1070_v4 = vsel %vm500_vm4, %v1049_v9, %v1067_v3  ;;  %v1862_v3 = vld [vmem:[#allocation3 + $0x1] ss:$0 sps:$4 sm:$0x11]  }
 0x68b   :  { %v1072_v6 = vunpack.c.l.bf16 %v1070_v4  ;;  %v1326_v9 = vrot.slane %v1862_v3, %v2005_v16 }
 0x68d   :  { %v1333_v4 = vrot.slane %v1326_v9, %v2005_v16 }
 0x696   :  { %v1873_v8 = vpop.eup %1872 }
 0x697   :  { %v848_v10 = vmul.f32 %v1873_v8, %v2113_v2 }
 0x699   :  { %v849_v11 = vadd.f32 %v848_v10, %v2116_v5 }
 0x69b   :  { %852 = vrot.lane.b32.xlu0 %v849_v11, %s1919_s18  ;;  %v850_v15 = vmul.f32 %v849_v11, %v725_v48 }
 0x70d   :  { %v853_v12 = vpop.permute.xlu0 %852 }
 0x70e   :  { %v855_v14 = vmul.f32 %v853_v12, %v849_v11 }
 0x710   :  { %857 = vrot.lane.b32.xlu1 %v855_v14, %s1927_s3 }
 0x782   :  { %v858_v17 = vpop.permute.xlu1 %857 }
 0x783   :  { %v860_v19 = vadd.f32 %v858_v17, %v850_v15 }
 0x785   :  { %1874 = vtanh.f32 %v860_v19 }
 0x792   :  { %v1875_v20 = vpop.eup %1874 }
 0x793   :  { %863 = vrot.lane.b32.xlu0 %v1875_v20, %s1919_s18 }
 0x805   :  { %v864_v21 = vpop.permute.xlu0 %863 }
 0x806   :  { %v2186_v22 = vmul.f32 %v864_v21, %v849_v11 }
 0x808   :  { %v902_v23 = vsel %vm479_vm5, 0.0, %v2186_v22  ;;  %v901_v24 = vsel %vm479_vm5, %v2186_v22, 0.0 }
 0x809   :  { %908 = vrot.lane.b32.xlu0 %v902_v23, %s1919_s18  ;;  %904 = vrot.lane.b32.xlu1 %v901_v24, %s1927_s3 }
 0x87b   :  { %v909_v25 = vpop.permute.xlu0 %908  ;;  %v905_v26 = vpop.permute.xlu1 %904 }
 0x87c   :  { %v911_v27 = vsel %vm640_vm6, %v905_v26, %v909_v25 }
 0x87d   :  { %v912_v28 = vpack.c.bf16 %v911_v27, %v911_v27 }
 0x87f   :  { %1775 = vmatmul.mubr.msk.bf16.vlgmr.msra.gmra.mxu1 %vm530_vm7, %v912_v28 }
 0x880   :  { %1791 = vmatpush3.bf16.msra.mxu1 %v2062_v44  ;;  %1798 = vmatprep.mubr.msk.bf16.mxu1 %vm1922_vm0, %v1921_v0 }
 0x881   :  { %1792 = vmatprep.subr.bf16.mxu1 %v1921_v0 }
 0x884   :  { %1793 = vmatpush3.bf16.msra.mxu1 %v2067_v45 }
 0x885   :  { %1794 = vmatprep.subr.bf16.mxu1 %v1921_v0 }
 0x888   :  { %1795 = vmatpush3.bf16.msra.mxu1 %v2077_v46 }
 0x889   :  { %1796 = vmatprep.subr.bf16.mxu1 %v1921_v0 }
 0x88c   :  { %1797 = vmatpush3.bf16.msra.mxu1 %v2083_v47 }
 0x88d   :  { %1814 = vmatprep.subr.bf16.mxu1 %v1921_v0 }
 0x93f   :  { %v975_v35 = vpop.f32.mrf.mxu1 }
 0x940   :  { %v976_v36 = vadd.f32 %v975_v35, %v937_v34  ;;  %v1861_v35 = vld [vmem:[#allocation3 + $0x2] ss:$0 sps:$4 sm:$0x11]  }
 0x941   :  { %v1776_v37 = vpop.f32.mrf.mxu1 }
 0x942   :  { %v981_v38 = vmul.f32 %v976_v36, %v2113_v2  ;;  %v1193_v36 = vrot.slane %v1861_v35, %v2005_v16  ;;  %v1182_v37 = vld [vmem:[#allocation2 + $0x5] sm:$0x1] }
 0x943   :  { %v978_v39 = vpop.f32.mrf.mxu1 }
 0x944   :  { %1876 = vtanh.f32 %v981_v38 }
 0x945   :  { %v1777_v40 = vpop.f32.mrf.mxu1 }
 0x951   :  { %v1877_v41 = vpop.eup %1876 }
 0x952   :  { %v983_v42 = vmul.f32 %v1877_v41, %v2113_v2 }
 0x954   :  { %v984_v43 = vadd.f32 %v983_v42, %v2116_v5 }
 0x956   :  { %987 = vrot.lane.b32.xlu1 %v984_v43, %s1919_s18  ;;  %v985_v50 = vmul.f32 %v984_v43, %v860_v19 }
 0x9c8   :  { %v988_v48 = vpop.permute.xlu1 %987 }
 0x9c9   :  { %v990_v49 = vmul.f32 %v988_v48, %v984_v43 }
 0x9cb   :  { %992 = vrot.lane.b32.xlu0 %v990_v49, %s1927_s3 }
 0xa3d   :  { %v993_v52 = vpop.permute.xlu0 %992 }
 0xa3e   :  { %v995_v53 = vadd.f32 %v993_v52, %v985_v50 }
 0xa40   :  { %1878 = vtanh.f32 %v995_v53 }
 0xa4d   :  { %v1879_v54 = vpop.eup %1878 }
 0xa4e   :  { %998 = vrot.lane.b32.xlu1 %v1879_v54, %s1919_s18 }
 0xac0   :  { %v999_v55 = vpop.permute.xlu1 %998 }
 0xac1   :  { %v2217_v56 = vmul.f32 %v999_v55, %v984_v43 }
 0xac3   :  { %v1037_v57 = vsel %vm479_vm5, 0.0, %v2217_v56  ;;  %v1036_v58 = vsel %vm479_vm5, %v2217_v56, 0.0 }
 0xac4   :  { %1043 = vrot.lane.b32.xlu1 %v1037_v57, %s1919_s18  ;;  %1039 = vrot.lane.b32.xlu0 %v1036_v58, %s1927_s3 }
 0xb36   :  { %v1044_v59 = vpop.permute.xlu1 %1043  ;;  %v1040_v60 = vpop.permute.xlu0 %1039 }
 0xb37   :  { %v1046_v61 = vsel %vm640_vm6, %v1040_v60, %v1044_v59 }
 0xb38   :  { %v1047_v62 = vpack.c.bf16 %v1046_v61, %v1046_v61 }
 0xb3a   :  { %1787 = vmatmul.mubr.msk.bf16.vlgmr.msra.gmra.mxu0 %vm530_vm7, %v1047_v62 }
 0xb3b   :  { %1803 = vmatpush3.bf16.msra.mxu0 %v2062_v44  ;;  %1810 = vmatprep.mubr.msk.bf16.mxu0 %vm1922_vm0, %v1921_v0 }
 0xb3c   :  { %1804 = vmatprep.subr.bf16.mxu0 %v1921_v0 }
 0xb3f   :  { %1805 = vmatpush3.bf16.msra.mxu0 %v2067_v45 }
 0xb40   :  { %1806 = vmatprep.subr.bf16.mxu0 %v1921_v0 }
 0xb43   :  { %1807 = vmatpush3.bf16.msra.mxu0 %v2077_v46 }
 0xb44   :  { %1808 = vmatprep.subr.bf16.mxu0 %v1921_v0 }
 0xb47   :  { %1809 = vmatpush3.bf16.msra.mxu0 %v2083_v47 }
 0xbfa   :  { %v1110_v7 = vpop.f32.mrf.mxu0 }
 0xbfb   :  { %v1111_v8 = vadd.f32 %v1110_v7, %v1072_v6  ;;  %v1315_v6 = vld [vmem:[#allocation2 + $0x6] sm:$0x1] }
 0xbfc   :  { %v1788_v10 = vpop.f32.mrf.mxu0  ;;  %v1336_v7 = vsel %vm500_vm4, %v1315_v6, %v1333_v4 }
 0xbfd   :  { %v1116_v11 = vmul.f32 %v1111_v8, %v2113_v2  ;;  %v1338_v8 = vunpack.c.l.bf16 %v1336_v7 }
 0xbfe   :  { %v1113_v12 = vpop.f32.mrf.mxu0 }
 0xbff   :  { %1880 = vtanh.f32 %v1116_v11 }
 0xc00   :  { %v1789_v14 = vpop.f32.mrf.mxu0 }
 0xc0c   :  { %v1881_v15 = vpop.eup %1880 }
 0xc0d   :  { %v1118_v17 = vmul.f32 %v1881_v15, %v2113_v2 }
 0xc0f   :  { %v1119_v19 = vadd.f32 %v1118_v17, %v2116_v5 }
 0xc11   :  { %1122 = vrot.lane.b32.xlu0 %v1119_v19, %s1919_s18  ;;  %v1120_v23 = vmul.f32 %v1119_v19, %v995_v53 }
 0xc83   :  { %v1123_v20 = vpop.permute.xlu0 %1122 }
 0xc84   :  { %v1125_v21 = vmul.f32 %v1123_v20, %v1119_v19 }
 0xc86   :  { %1127 = vrot.lane.b32.xlu1 %v1125_v21, %s1927_s3 }
 0xcf8   :  { %v1128_v24 = vpop.permute.xlu1 %1127 }
 0xcf9   :  { %v1130_v25 = vadd.f32 %v1128_v24, %v1120_v23 }
 0xcfb   :  { %1882 = vtanh.f32 %v1130_v25 }
 0xd08   :  { %v1883_v26 = vpop.eup %1882 }
 0xd09   :  { %1133 = vrot.lane.b32.xlu0 %v1883_v26, %s1919_s18 }
 0xd7b   :  { %v1134_v27 = vpop.permute.xlu0 %1133 }
 0xd7c   :  { %v2247_v28 = vmul.f32 %v1134_v27, %v1119_v19 }
 0xd7e   :  { %v1170_v29 = vsel %vm479_vm5, 0.0, %v2247_v28  ;;  %v1169_v30 = vsel %vm479_vm5, %v2247_v28, 0.0 }
 0xd7f   :  { %1176 = vrot.lane.b32.xlu0 %v1170_v29, %s1919_s18  ;;  %1172 = vrot.lane.b32.xlu1 %v1169_v30, %s1927_s3 }
 0xdf1   :  { %v1177_v31 = vpop.permute.xlu0 %1176  ;;  %v1173_v32 = vpop.permute.xlu1 %1172 }
 0xdf2   :  { %v1179_v33 = vsel %vm640_vm6, %v1173_v32, %v1177_v31 }
 0xdf3   :  { %v1180_v34 = vpack.c.bf16 %v1179_v33, %v1179_v33 }
 0xdf5   :  { %1799 = vmatmul.mubr.msk.bf16.vlgmr.msra.gmra.mxu1 %vm530_vm7, %v1180_v34 }
 0xdf6   :  { %1815 = vmatpush3.bf16.msra.mxu1 %v2062_v44  ;;  %1822 = vmatprep.mubr.msk.bf16.mxu1 %vm1922_vm0, %v1921_v0  ;;  %v1200_v44 = vrot.slane %v1193_v36, %v2005_v16 }
 0xdf7   :  { %1816 = vmatprep.subr.bf16.mxu1 %v1921_v0 }
 0xdf8   :  { %v1203_v38 = vsel %vm500_vm4, %v1182_v37, %v1200_v44  ;;  %v1863_v37 = vld [vmem:[#allocation3] ss:$0 sps:$4 sm:$0x11]  }
 0xdf9   :  { %v1205_v39 = vunpack.c.l.bf16 %v1203_v38  ;;  %v1458_v38 = vrot.slane %v1863_v37, %v2005_v16 }
 0xdfa   :  { %1817 = vmatpush3.bf16.msra.mxu1 %v2067_v45 }
 0xdfb   :  { %1818 = vmatprep.subr.bf16.mxu1 %v1921_v0 }
 0xdfe   :  { %1819 = vmatpush3.bf16.msra.mxu1 %v2077_v46 }
 0xdff   :  { %1820 = vmatprep.subr.bf16.mxu1 %v1921_v0 }
 0xe02   :  { %1821 = vmatpush3.bf16.msra.mxu1 %v2083_v47 }
 0xeb5   :  { %v1243_v40 = vpop.f32.mrf.mxu1 }
 0xeb6   :  { %v1244_v41 = vadd.f32 %v1243_v40, %v1205_v39  ;;  %v1448_v39 = vld [vmem:[#allocation2 + $0x7] sm:$0x1]  ;;  %v1465_v40 = vrot.slane %v1458_v38, %v2005_v16 }
 0xeb7   :  { %v1800_v45 = vpop.f32.mrf.mxu1 }
 0xeb8   :  { %v1249_v42 = vmul.f32 %v1244_v41, %v2113_v2  ;;  %v1468_v13 = vsel %vm500_vm4, %v1448_v39, %v1465_v40 }
 0xeb9   :  { %v1246_v43 = vpop.f32.mrf.mxu1  ;;  %v1470_v41 = vunpack.c.l.bf16 %v1468_v13 }
 0xeba   :  { %1884 = vtanh.f32 %v1249_v42 }
 0xebb   :  { %v1801_v46 = vpop.f32.mrf.mxu1 }
 0xec7   :  { %v1885_v0 = vpop.eup %1884 }
 0xec8   :  { %v1251_v47 = vmul.f32 %v1885_v0, %v2113_v2 }
 0xeca   :  { %v1252_v48 = vadd.f32 %v1251_v47, %v2116_v5 }
 0xecc   :  { %1255 = vrot.lane.b32.xlu1 %v1252_v48, %s1919_s18  ;;  %v1253_v52 = vmul.f32 %v1252_v48, %v1130_v25 }
 0xf3e   :  { %v1256_v49 = vpop.permute.xlu1 %1255 }
 0xf3f   :  { %v1258_v50 = vmul.f32 %v1256_v49, %v1252_v48 }
 0xf41   :  { %1260 = vrot.lane.b32.xlu0 %v1258_v50, %s1927_s3 }
 0xfb3   :  { %v1261_v53 = vpop.permute.xlu0 %1260 }
 0xfb4   :  { %v1263_v54 = vadd.f32 %v1261_v53, %v1253_v52  ;;  %v595_v52 = vpack.c.bf16 %v2124_v18, %v2124_v18  ;;  %v1002_v18 = vpack.c.bf16 %v2217_v56, %v2217_v56 }
 0xfb6   :  { %1886 = vtanh.f32 %v1263_v54 }
 0xfc3   :  { %v1887_v55 = vpop.eup %1886 }
 0xfc4   :  { %1266 = vrot.lane.b32.xlu1 %v1887_v55, %s1919_s18 }
0x1036   :  { %v1267_v57 = vpop.permute.xlu1 %1266 }
0x1037   :  { %v2277_v58 = vmul.f32 %v1267_v57, %v1252_v48  ;;  %v603_v57 = vrot.slane %v595_v52, %v2005_v16 }
0x1039   :  { %v1303_v59 = vsel %vm479_vm5, 0.0, %v2277_v58  ;;  %v1302_v60 = vsel %vm479_vm5, %v2277_v58, 0.0 }
0x103a   :  { %1309 = vrot.lane.b32.xlu1 %v1303_v59, %s1919_s18  ;;  %1305 = vrot.lane.b32.xlu0 %v1302_v60, %s1927_s3 }
0x10ac   :  { %v1310_v61 = vpop.permute.xlu1 %1309  ;;  %v1306_v62 = vpop.permute.xlu0 %1305 }
0x10ad   :  { %v1312_v63 = vsel %vm640_vm6, %v1306_v62, %v1310_v61  ;;  %v1137_v61 = vpack.c.bf16 %v2247_v28, %v2247_v28  ;;  %v1010_v62 = vrot.slane %v1002_v18, %v2005_v16 }
0x10ae   :  { %v1313_v1 = vpack.c.bf16 %v1312_v63, %v1312_v63  ;;  %v1270_v63 = vpack.c.bf16 %v2277_v58, %v2277_v58 }
0x10af   :  { %v1017_v56 = vrot.slane %v1010_v62, %v2005_v16 }
0x10b0   :  { %1811 = vmatmul.mubr.msk.bf16.vlgmr.msra.gmra.mxu0 %vm530_vm7, %v1313_v1  ;;  %v1145_v1 = vrot.slane %v1137_v61, %v2005_v16  ;;  %v1278_v28 = vrot.slane %v1270_v63, %v2005_v16 }
0x10b2   :  { %v1152_v9 = vrot.slane %v1145_v1, %v2005_v16  ;;  %v1285_v4 = vrot.slane %v1278_v28, %v2005_v16 }
0x1170   :  { %v1376_v10 = vpop.f32.mrf.mxu0 }
0x1171   :  { %v1377_v11 = vadd.f32 %v1376_v10, %v1338_v8 }
0x1172   :  { %v1812_v12 = vpop.f32.mrf.mxu0 }
0x1173   :  { %v1382_v14 = vmul.f32 %v1377_v11, %v2113_v2 }
0x1174   :  { %v1379_v15 = vpop.f32.mrf.mxu0 }
0x1175   :  { %1888 = vtanh.f32 %v1382_v14  ;;  %v616_v15 = vcombine.high %v603_v57, %v603_v57 }
0x1176   :  { %v1813_v17 = vpop.f32.mrf.mxu0 }
0x1182   :  { %v1889_v19 = vpop.eup %1888 }
0x1183   :  { %v1384_v20 = vmul.f32 %v1889_v19, %v2113_v2 }
0x1185   :  { %v1385_v21 = vadd.f32 %v1384_v20, %v2116_v5  ;;  %v623_v20 = vrot.slane %v616_v15, %v2005_v16 }
0x1187   :  { %1388 = vrot.lane.b32.xlu0 %v1385_v21, %s1919_s18  ;;  %v1386_v25 = vmul.f32 %v1385_v21, %v1263_v54  ;;  %v732_v54 = vpack.c.bf16 %v2155_v51, %v2155_v51 }
0x1189   :  { %v740_v59 = vrot.slane %v732_v54, %v2005_v16 }
0x118b   :  { %v747_v51 = vrot.slane %v740_v59, %v2005_v16 }
0x11f9   :  { %v1389_v23 = vpop.permute.xlu0 %1388 }
0x11fa   :  { %v1391_v24 = vmul.f32 %v1389_v23, %v1385_v21 }
0x11fc   :  { %1393 = vrot.lane.b32.xlu1 %v1391_v24, %s1927_s3 }
0x126e   :  { %v1394_v26 = vpop.permute.xlu1 %1393 }
0x126f   :  { %v2297_v27 = vadd.f32 %v1394_v26, %v1386_v25  ;;  %v1023_v26 = vcombine.high %v1010_v62, %v1010_v62 }
0x1271   :  { %1890 = vtanh.f32 %v2297_v27 }
0x127e   :  { %v1891_v29 = vpop.eup %1890 }
0x127f   :  { %1399 = vrot.lane.b32.xlu0 %v1891_v29, %s1919_s18  ;;  %v1157_v29 = vcombine.high %v1145_v1, %v1145_v1 }
0x12f1   :  { %v1400_v30 = vpop.permute.xlu0 %1399 }
0x12f2   :  { %v1402_v31 = vmul.f32 %v1400_v30, %v1385_v21  ;;  %v753_v21 = vcombine.high %v740_v59, %v740_v59  ;;  %v1164_v30 = vrot.slane %v1157_v29, %v2005_v16 }
0x12f4   :  { %v1436_v32 = vsel %vm479_vm5, 0.0, %v1402_v31  ;;  %v1435_v33 = vsel %vm479_vm5, %v1402_v31, 0.0  ;;  %v1403_v3 = vpack.c.bf16 %v1402_v31, %v1402_v31  ;;  %v760_v23 = vrot.slane %v753_v21, %v2005_v16 }
0x12f5   :  { %1442 = vrot.lane.b32.xlu0 %v1436_v32, %s1919_s18  ;;  %1438 = vrot.lane.b32.xlu1 %v1435_v33, %s1927_s3  ;;  %v1290_v31 = vcombine.high %v1278_v28, %v1278_v28 }
0x12f6   :  { %v1411_v6 = vrot.slane %v1403_v3, %v2005_v16 }
0x12f7   :  { %v1297_v32 = vrot.slane %v1290_v31, %v2005_v16 }
0x12f8   :  { %v1418_v58 = vrot.slane %v1411_v6, %v2005_v16  ;;  %v1423_v33 = vcombine.high %v1411_v6, %v1411_v6 }
0x1367   :  { %v1443_v34 = vpop.permute.xlu0 %1442  ;;  %v1439_v35 = vpop.permute.xlu1 %1438 }
0x1368   :  { %v1445_v36 = vsel %vm640_vm6, %v1439_v35, %v1443_v34  ;;  %v1430_v34 = vrot.slane %v1423_v33, %v2005_v16 }
0x1369   :  { %v1446_v44 = vpack.c.bf16 %v1445_v36, %v1445_v36 }
0x136b   :  { %1823 = vmatmul.mubr.msk.bf16.vlgmr.msra.gmra.mxu1 %vm530_vm7, %v1446_v44 }
0x142b   :  { %v1508_v45 = vpop.f32.mrf.mxu1 }
0x142c   :  { %v1509_v42 = vadd.f32 %v1508_v45, %v1470_v41 }
0x142d   :  { %v1824_v43 = vpop.f32.mrf.mxu1 }
0x142e   :  { %v1514_v46 = vmul.f32 %v1509_v42, %v2113_v2 }
0x142f   :  { %v1511_v0 = vpop.f32.mrf.mxu1 }
0x1430   :  { %1892 = vtanh.f32 %v1514_v46 }
0x1431   :  { %v1825_v47 = vpop.f32.mrf.mxu1 }
0x143d   :  { %v1893_v48 = vpop.eup %1892 }
0x143e   :  { %v1516_v49 = vmul.f32 %v1893_v48, %v2113_v2  ;;  %v867_v2 = vpack.c.bf16 %v2186_v22, %v2186_v22 }
0x1440   :  { %v2315_v50 = vadd.f32 %v1516_v49, %v2116_v5  ;;  %v610_v5 = vrot.slane %v603_v57, %v2005_v16  ;;  %v875_v60 = vrot.slane %v867_v2, %v2005_v16 }
0x1442   :  { %1520 = vrot.lane.b32.xlu1 %v2315_v50, %s1919_s18  ;;  %v882_v22 = vrot.slane %v875_v60, %v2005_v16  ;;  %v1518_v7 = vmul.f32 %v2315_v50, %v2297_v27  ;;  %v888_v24 = vcombine.high %v875_v60, %v875_v60  ;;  %v1030_v27 = vrot.slane %v1023_v26, %v2005_v16 }
0x1444   :  { %v895_v25 = vrot.slane %v888_v24, %v2005_v16 }
0x14b4   :  { %v1521_v53 = vpop.permute.xlu1 %1520 }
0x14b5   :  { %v1523_v55 = vmul.f32 %v1521_v53, %v2315_v50 }
0x14b7   :  { %1525 = vrot.lane.b32.xlu0 %v1523_v55, %s1927_s3 }
0x14bb   :  { %611 = vrot.lane.b32.xlu0 %v610_v5, %s1927_s3 }
0x14bf   :  { %748 = vrot.lane.b32.xlu0 %v747_v51, %s1927_s3 }
0x14c3   :  { %883 = vrot.lane.b32.xlu0 %v882_v22, %s1927_s3 }
0x14c7   :  { %1018 = vrot.lane.b32.xlu0 %v1017_v56, %s1927_s3 }
0x14cb   :  { %1153 = vrot.lane.b32.xlu0 %v1152_v9, %s1927_s3 }
0x14cf   :  { %1286 = vrot.lane.b32.xlu0 %v1285_v4, %s1927_s3 }
0x14d3   :  { %1419 = vrot.lane.b32.xlu0 %v1418_v58, %s1927_s3 }
0x1529   :  { %v1526_v8 = vpop.permute.xlu0 %1525 }
0x152a   :  { %v1528_v10 = vadd.f32 %v1526_v8, %v1518_v7 }
0x152c   :  { %1894 = vtanh.f32 %v1528_v10 }
0x152d   :  { %v612_v11 = vpop.permute.xlu0 %611 }
0x152e   :  { %615 = vst.msk [vmem:[%s2445_s4] sm:$0x1] %vm614_vm8, %v612_v11 }
0x1531   :  { %v749_v12 = vpop.permute.xlu0 %748 }
0x1532   :  { %1613 = vst.msk [vmem:[%s2445_s4 + $0x1] sm:$0x1] %vm614_vm8, %v749_v12 }
0x1535   :  { %v884_v14 = vpop.permute.xlu0 %883 }
0x1536   :  { %1616 = vst.msk [vmem:[%s2445_s4 + $0x2] sm:$0x1] %vm614_vm8, %v884_v14 }
0x1539   :  { %v1895_v17 = vpop.eup %1894  ;;  %v1019_v19 = vpop.permute.xlu0 %1018 }
0x153a   :  { %1619 = vst.msk [vmem:[%s2445_s4 + $0x3] sm:$0x1] %vm614_vm8, %v1019_v19  ;;  %1531 = vrot.lane.b32.xlu1 %v1895_v17, %s1919_s18 }
0x153d   :  { %v1154_v35 = vpop.permute.xlu0 %1153 }
0x153e   :  { %624 = vrot.lane.b32.xlu1 %v623_v20, %s1919_s18 }
0x1541   :  { %v1287_v37 = vpop.permute.xlu0 %1286 }
0x1542   :  { %761 = vrot.lane.b32.xlu1 %v760_v23, %s1919_s18 }
0x1545   :  { %v1420_v42 = vpop.permute.xlu0 %1419 }
0x1546   :  { %896 = vrot.lane.b32.xlu1 %v895_v25, %s1919_s18 }
0x154a   :  { %1031 = vrot.lane.b32.xlu1 %v1030_v27, %s1919_s18 }
0x154e   :  { %1165 = vrot.lane.b32.xlu1 %v1164_v30, %s1919_s18 }
0x1552   :  { %1298 = vrot.lane.b32.xlu1 %v1297_v32, %s1919_s18 }
0x1556   :  { %1431 = vrot.lane.b32.xlu1 %v1430_v34, %s1919_s18 }
0x15ac   :  { %v1532_v36 = vpop.permute.xlu1 %1531 }
0x15ad   :  { %v1534_v44 = vmul.f32 %v1532_v36, %v2315_v50 }
0x15af   :  { %v1535_v38 = vpack.c.bf16 %v1534_v44, %v1534_v44 }
0x15b0   :  { %v625_v39 = vpop.permute.xlu1 %624 }
0x15b1   :  { %v1543_v40 = vrot.slane %v1535_v38, %v2005_v16  ;;  %1611 = vst.msk [vmem:[%s2445_s4 + $0x7] sm:$0x1] %vm628_vm9, %v625_v39 }
0x15b3   :  { %v1550_v13 = vrot.slane %v1543_v40, %v2005_v16  ;;  %v1555_v41 = vcombine.high %v1543_v40, %v1543_v40 }
0x15b4   :  { %v762_v45 = vpop.permute.xlu1 %761 }
0x15b5   :  { %1614 = vst.msk [vmem:[%s2445_s4 + $0x6] sm:$0x1] %vm628_vm9, %v762_v45  ;;  %1551 = vrot.lane.b32.xlu0 %v1550_v13, %s1927_s3  ;;  %v1562_v43 = vrot.slane %v1555_v41, %v2005_v16 }
0x15b6   :  { %1628 = vst.msk [vmem:[%s2445_s4 + $0x6] sm:$0x1] %vm614_vm8, %v1420_v42 }
0x15b7   :  { %1563 = vrot.lane.b32.xlu1 %v1562_v43, %s1919_s18 }
0x15b8   :  { %v897_v46 = vpop.permute.xlu1 %896 }
0x15b9   :  { %1617 = vst.msk [vmem:[%s2445_s4 + $0x5] sm:$0x1] %vm628_vm9, %v897_v46 }
0x15ba   :  { %1625 = vst.msk [vmem:[%s2445_s4 + $0x5] sm:$0x1] %vm614_vm8, %v1287_v37 }
0x15bc   :  { %v1032_v0 = vpop.permute.xlu1 %1031 }
0x15bd   :  { %1620 = vst.msk [vmem:[%s2445_s4 + $0x4] sm:$0x1] %vm628_vm9, %v1032_v0 }
0x15be   :  { %1622 = vst.msk [vmem:[%s2445_s4 + $0x4] sm:$0x1] %vm614_vm8, %v1154_v35 }
0x15c0   :  { %v1166_v16 = vpop.permute.xlu1 %1165 }
0x15c1   :  { %1623 = vst.msk [vmem:[%s2445_s4 + $0x3] sm:$0x1] %vm628_vm9, %v1166_v16 }
0x15c4   :  { %v1299_v47 = vpop.permute.xlu1 %1298 }
0x15c5   :  { %1626 = vst.msk [vmem:[%s2445_s4 + $0x2] sm:$0x1] %vm628_vm9, %v1299_v47 }
0x15c8   :  { %v1432_v48 = vpop.permute.xlu1 %1431 }
0x15c9   :  { %1629 = vst.msk [vmem:[%s2445_s4 + $0x1] sm:$0x1] %vm628_vm9, %v1432_v48 }
0x1627   :  { %v1552_v49 = vpop.permute.xlu0 %1551 }
0x1628   :  { %1631 = vst.msk [vmem:[%s2445_s4 + $0x7] sm:$0x1] %vm614_vm8, %v1552_v49 }
0x1629   :  { %v1564_v50 = vpop.permute.xlu1 %1563 }
0x162a   :  { %1566 = vst.msk [vmem:[%s2445_s4] sm:$0x1] %vm628_vm9, %v1564_v50 }
0x162b   :  { %1571 = vsyncpa [#allocation5], 1 }

// kernel: lstm_net_forward.9
= control target key start
LH: loop header
LB: loop body
LE: loop exit
PB: predicated region body
PF: predicated region fallthrough
CT: control target
= control target key end

     0   :  { %v1879_v0 = vmov 0.0   ;;  %vm1880_vm0 = vmmov 0   ;;  %v1881_v7 = vmov 1966171168   ;;  %v63_v9 = vlaneseq  ;;  %s1886_s20 = smov 32   ;;  %s2407_s1 = inlined_call_operand.vmem [shape: bf16[2,128,128], index: 1, kind: input, shape index: {}]   ;;  %s2408_s0 = inlined_call_operand.vmem [shape: bf16[8,2,128], index: 0, kind: input, shape index: {}]   ;;  %s2409_s2 = inlined_call_operand.vmem [shape: bf16[64,128], index: 2, kind: input, shape index: {}]   ;;  %s2410_s3 = inlined_call_operand.vmem [shape: f32[2,1,128], index: 3, kind: input, shape index: {}]   ;;  %s2411_s4 = inlined_call_operand.vmem [shape: bf16[8,2,64], index: 4, kind: output, shape index: {}]  }
   0x1   :  { %1675 = vmatprep.subr.bf16.mxu0 %v1879_v0  ;;  %1695 = vmatprep.subr.bf16.mxu1 %v1879_v0  ;;  %v1819_v1 = vld [vmem:[%s2407_s1 + $0x38] sm:$0xff]   ;;  %v1821_v3 = vld [vmem:[%s2407_s1 + $0x30] sm:$0xff]   ;;  %v1823_v5 = vld [vmem:[%s2407_s1 + $0x28] sm:$0xff]   ;;  %v61_v8 = vunpack.c.l.s4 %v1881_v7  ;;  %v1882_v48 = vmov 0.0|0.0   ;;  %v1883_v49 = vmov 1983009808  }
   0x2   :  { %v1820_v2 = vld [vmem:[%s2407_s1 + $0x78] sm:$0xff]   ;;  %1691 = vmatprep.mubr.msk.bf16.mxu0 %vm1880_vm0, %v1879_v0  ;;  %1711 = vmatprep.mubr.msk.bf16.mxu1 %vm1880_vm0, %v1879_v0  ;;  %v1822_v4 = vld [vmem:[%s2407_s1 + $0x70] sm:$0xff]   ;;  %v1824_v6 = vld [vmem:[%s2407_s1 + $0x68] sm:$0xff]   ;;  %v1948_v13 = vshrl.u32 %v63_v9, 7  ;;  %v156_v50 = vunpack.c.l.s4 %v1883_v49  ;;  %vm486_vm4 = vcmask 1040384   ;;  %vm626_vm6 = vcmask 261120  }
   0x3   :  { %1676 = vmatpush3.bf16.msra.mxu0 %v1819_v1  ;;  %1696 = vmatpush3.bf16.msra.mxu1 %v1820_v2  ;;  %v1825_v10 = vld [vmem:[%s2407_s1 + $0x20] sm:$0xff]   ;;  %v62_v12 = vunpack.c.0.s8 %v61_v8  ;;  %v1827_v14 = vld [vmem:[%s2407_s1 + $0x18] sm:$0xff]   ;;  %v1829_v17 = vld [vmem:[%s2407_s1 + $0x10] sm:$0xff]   ;;  %vm516_vm7 = vcmask 523264   ;;  %vm600_vm8 = vcmask 253952   ;;  %vm614_vm9 = vcmask 516352  }
   0x4   :  { %1677 = vmatprep.subr.bf16.mxu0 %v1879_v0  ;;  %1697 = vmatprep.subr.bf16.mxu1 %v1879_v0  ;;  %v1826_v11 = vld [vmem:[%s2407_s1 + $0x60] sm:$0xff]   ;;  %v1828_v15 = vld [vmem:[%s2407_s1 + $0x58] sm:$0xff]   ;;  %v1830_v29 = vld [vmem:[%s2407_s1 + $0x50] sm:$0xff]   ;;  %v157_v52 = vunpack.c.0.s8 %v156_v50  ;;  %vm465_vm5 = vcmp.lt.s32.totalorder %v1948_v13, 2 }
   0x5   :  { %v1959_v16 = vsub.s32 %v62_v12, %v1948_v13  ;;  %v18_v18 = vld [vmem:[%s2408_s0] sm:$0x1]  ;;  %v19_v19 = vld [vmem:[%s2408_s0 + $0x1] sm:$0x1]  ;;  %v20_v20 = vld [vmem:[%s2408_s0 + $0x2] sm:$0x1] }
   0x6   :  { %v21_v21 = vld [vmem:[%s2408_s0 + $0x3] sm:$0x1]  ;;  %v22_v22 = vld [vmem:[%s2408_s0 + $0x4] sm:$0x1]  ;;  %v23_v23 = vld [vmem:[%s2408_s0 + $0x5] sm:$0x1]  ;;  %v56_v24 = vcombine.low %v18_v18, %v19_v19  ;;  %v160_v55 = vsub.s32 %v157_v52, %v1948_v13 }
   0x7   :  { %1678 = vmatpush3.bf16.msra.mxu0 %v1821_v3  ;;  %1698 = vmatpush3.bf16.msra.mxu1 %v1822_v4  ;;  %v24_v25 = vld [vmem:[%s2408_s0 + $0x6] sm:$0x1]  ;;  %v25_v26 = vld [vmem:[%s2408_s0 + $0x7] sm:$0x1]  ;;  %v57_v27 = vcombine.low %v20_v20, %v21_v21  ;;  %v58_v28 = vcombine.low %v22_v22, %v23_v23  ;;  %v1831_v35 = vld [vmem:[%s2407_s1 + $0x8] sm:$0xff]  }
   0x8   :  { %1679 = vmatprep.subr.bf16.mxu0 %v1879_v0  ;;  %1699 = vmatprep.subr.bf16.mxu1 %v1879_v0  ;;  %v59_v30 = vcombine.low %v24_v25, %v25_v26  ;;  %v66_v31 = vrot.slane %v56_v24, %v1959_v16  ;;  %v1832_v37 = vld [vmem:[%s2407_s1 + $0x48] sm:$0xff]   ;;  %v1833_v41 = vld [vmem:[%s2407_s1] sm:$0xff]   ;;  %v2019_v44 = vld [vmem:[%s2409_s2 + $0x18] sm:$0xff]  }
   0x9   :  { %v73_v32 = vrot.slane %v57_v27, %v1959_v16  ;;  %v80_v33 = vrot.slane %v58_v28, %v1959_v16  ;;  %v1834_v42 = vld [vmem:[%s2407_s1 + $0x40] sm:$0xff]   ;;  %v2027_v45 = vld [vmem:[%s2409_s2 + $0x10] sm:$0xff]   ;;  %v2040_v46 = vld [vmem:[%s2409_s2 + $0x8] sm:$0xff]  }
   0xa   :  { %v87_v34 = vrot.slane %v59_v30, %v1959_v16  ;;  %v2049_v47 = vld [vmem:[%s2409_s2] sm:$0xff]  }
   0xb   :  { %1680 = vmatpush3.bf16.msra.mxu0 %v1823_v5  ;;  %1700 = vmatpush3.bf16.msra.mxu1 %v1824_v6  ;;  %v88_v36 = vcombine.low %v66_v31, %v73_v32  ;;  %v1557_v51 = vld [vmem:[%s2410_s3] ss:$0 sm:$0xff]  ;;  %v1583_v53 = vld [vmem:[%s2410_s3 + $0x1] ss:$0 sm:$0xff]  ;;  %s1885_s3 = smov 64  }
   0xc   :  { %1681 = vmatprep.subr.bf16.mxu0 %v1879_v0  ;;  %1701 = vmatprep.subr.bf16.mxu1 %v1879_v0  ;;  %v89_v38 = vcombine.low %v80_v33, %v87_v34  ;;  %v154_v54 = vcombine.low %v1557_v51, %v1557_v51  ;;  %v337_v56 = vcombine.low %v1583_v53, %v1583_v53 }
   0xd   :  { %v96_v39 = vrot.slane %v88_v36, %v1959_v16 }
   0xe   :  { %v103_v40 = vrot.slane %v89_v38, %v1959_v16  ;;  %v161_v57 = vrot.slane %v154_v54, %v160_v55  ;;  %v344_v58 = vrot.slane %v337_v56, %v160_v55  ;;  %v457_v56 = vand.u32 127, %v63_v9 }
   0xf   :  { %1682 = vmatpush3.bf16.msra.mxu0 %v1825_v10  ;;  %1702 = vmatpush3.bf16.msra.mxu1 %v1826_v11 }
  0x10   :  { %1683 = vmatprep.subr.bf16.mxu0 %v1879_v0  ;;  %1703 = vmatprep.subr.bf16.mxu1 %v1879_v0  ;;  %v104_v43 = vcombine.low %v96_v39, %v103_v40  ;;  %v162_v59 = vcombine.low %v161_v57, %v161_v57  ;;  %v345_v60 = vcombine.low %v344_v58, %v344_v58  ;;  %vm458_vm1 = vcmp.ge.s32.totalorder %v457_v56, 64 }
  0x11   :  { %vm459_vm2 = vcmp.lt.s32.totalorder %v457_v56, 96 }
  0x12   :  { %vm460_vm3 = vmand %vm458_vm1, %vm459_vm2 }
  0x13   :  { %1684 = vmatpush3.bf16.msra.mxu0 %v1827_v14  ;;  %1704 = vmatpush3.bf16.msra.mxu1 %v1828_v15 }
  0x14   :  { %1685 = vmatprep.subr.bf16.mxu0 %v1879_v0  ;;  %1705 = vmatprep.subr.bf16.mxu1 %v1879_v0 }
  0x17   :  { %1686 = vmatpush3.bf16.msra.mxu0 %v1829_v17  ;;  %1706 = vmatpush3.bf16.msra.mxu1 %v1830_v29 }
  0x18   :  { %1687 = vmatprep.subr.bf16.mxu0 %v1879_v0  ;;  %1707 = vmatprep.subr.bf16.mxu1 %v1879_v0 }
  0x1b   :  { %1688 = vmatpush3.bf16.msra.mxu0 %v1831_v35  ;;  %1708 = vmatpush3.bf16.msra.mxu1 %v1832_v37 }
  0x1c   :  { %1689 = vmatprep.subr.bf16.mxu0 %v1879_v0  ;;  %1709 = vmatprep.subr.bf16.mxu1 %v1879_v0 }
  0x1f   :  { %1690 = vmatpush3.bf16.msra.mxu0 %v1833_v41  ;;  %1710 = vmatpush3.bf16.msra.mxu1 %v1834_v42 }
  0x20   :  { %1715 = vmatprep.subr.bf16.mxu0 %v1879_v0  ;;  %1727 = vmatprep.subr.bf16.mxu1 %v1879_v0 }
  0x22   :  { %1692 = vmatmul.mubr.bf16.vlgmr.msra.gmra.mxu0 %v104_v43  ;;  %1712 = vmatmul.mubr.bf16.vlgmr.msra.gmra.mxu1 %v104_v43 }
  0x23   :  { %1716 = vmatpush3.bf16.msra.mxu0 %v2019_v44  ;;  %1723 = vmatprep.mubr.msk.bf16.mxu0 %vm1880_vm0, %v1879_v0 }
  0x24   :  { %1717 = vmatprep.subr.bf16.mxu0 %v1879_v0  ;;  %1728 = vmatpush3.bf16.msra.mxu1 %v2019_v44 }
  0x25   :  { %1735 = vmatprep.mubr.msk.bf16.mxu1 %vm1880_vm0, %v1879_v0  ;;  %1729 = vmatprep.subr.bf16.mxu1 %v1879_v0 }
  0x27   :  { %1718 = vmatpush3.bf16.msra.mxu0 %v2027_v45 }
  0x28   :  { %1719 = vmatprep.subr.bf16.mxu0 %v1879_v0  ;;  %1730 = vmatpush3.bf16.msra.mxu1 %v2027_v45 }
  0x29   :  { %1731 = vmatprep.subr.bf16.mxu1 %v1879_v0 }
  0x2b   :  { %1720 = vmatpush3.bf16.msra.mxu0 %v2040_v46 }
  0x2c   :  { %1721 = vmatprep.subr.bf16.mxu0 %v1879_v0  ;;  %1732 = vmatpush3.bf16.msra.mxu1 %v2040_v46 }
  0x2d   :  { %1733 = vmatprep.subr.bf16.mxu1 %v1879_v0 }
  0x2f   :  { %1722 = vmatpush3.bf16.msra.mxu0 %v2049_v47 }
  0x30   :  { %1739 = vmatprep.subr.bf16.mxu0 %v1879_v0  ;;  %1734 = vmatpush3.bf16.msra.mxu1 %v2049_v47 }
  0x31   :  { %1751 = vmatprep.subr.bf16.mxu1 %v1879_v0 }
  0x32   :  { %1724 = vmatmul.mubr.bf16.vlgmr.msra.gmra.mxu0 %v1882_v48 }
  0x33   :  { %1740 = vmatpush3.bf16.msra.mxu0 %v2019_v44  ;;  %1747 = vmatprep.mubr.msk.bf16.mxu0 %vm1880_vm0, %v1879_v0 }
  0x34   :  { %1741 = vmatprep.subr.bf16.mxu0 %v1879_v0 }
  0x37   :  { %1742 = vmatpush3.bf16.msra.mxu0 %v2027_v45 }
  0x38   :  { %1743 = vmatprep.subr.bf16.mxu0 %v1879_v0 }
  0x3b   :  { %1744 = vmatpush3.bf16.msra.mxu0 %v2040_v46 }
  0x3c   :  { %1745 = vmatprep.subr.bf16.mxu0 %v1879_v0 }
  0x3f   :  { %1746 = vmatpush3.bf16.msra.mxu0 %v2049_v47 }
  0x40   :  { %1763 = vmatprep.subr.bf16.mxu0 %v1879_v0 }
  0xe2   :  { %v198_v61 = vpop.f32.mrf.mxu0  ;;  %v381_v63 = vpop.f32.mrf.mxu1 }
  0xe3   :  { %v199_v62 = vadd.f32 %v198_v61, %v162_v59  ;;  %v382_v1 = vadd.f32 %v381_v63, %v345_v60 }
  0xe4   :  { %v1693_v2 = vpop.f32.mrf.mxu0  ;;  %v1713_v5 = vpop.f32.mrf.mxu1 }
  0xe5   :  { %v207_v3 = vcombine.high %v199_v62, %v199_v62  ;;  %v214_v4 = vrot.slane %v199_v62, %v160_v55  ;;  %v390_v6 = vcombine.high %v382_v1, %v382_v1  ;;  %v397_v7 = vrot.slane %v382_v1, %v160_v55 }
  0xe6   :  { %v201_v8 = vpop.f32.mrf.mxu0  ;;  %v384_v15 = vpop.f32.mrf.mxu1  ;;  %v1884_v1 = vmov 0.5  }
  0xe7   :  { %v221_v10 = vrot.slane %v207_v3, %v160_v55  ;;  %v222_v11 = vcombine.high %v214_v4, %v214_v4  ;;  %v249_v12 = vpack.c.bf16 %v214_v4, %v214_v4  ;;  %v202_v14 = vadd.f32 %v201_v8, %v162_v59 }
  0xe8   :  { %v404_v17 = vrot.slane %v390_v6, %v160_v55  ;;  %v405_v18 = vcombine.high %v397_v7, %v397_v7  ;;  %v432_v19 = vpack.c.bf16 %v397_v7, %v397_v7  ;;  %v385_v20 = vadd.f32 %v384_v15, %v345_v60  ;;  %v1694_v21 = vpop.f32.mrf.mxu0  ;;  %v1714_v26 = vpop.f32.mrf.mxu1 }
  0xe9   :  { %v223_v22 = vcombine.high %v221_v10, %v221_v10  ;;  %v250_v23 = vpack.c.bf16 %v222_v11, %v222_v11  ;;  %v251_v24 = vpack.c.bf16 %v221_v10, %v221_v10  ;;  %257 = vst [vmem:[#allocation2] sm:$0x1] %v249_v12  ;;  %v224_v25 = vcombine.high %v202_v14, %v202_v14 }
  0xea   :  { %v406_v27 = vcombine.high %v404_v17, %v404_v17  ;;  %v433_v28 = vpack.c.bf16 %v405_v18, %v405_v18  ;;  %v434_v29 = vpack.c.bf16 %v404_v17, %v404_v17  ;;  %440 = vst [vmem:[#allocation3] sm:$0x1] %v432_v19  ;;  %v231_v30 = vrot.slane %v202_v14, %v160_v55 }
  0xeb   :  { %v252_v31 = vpack.c.bf16 %v223_v22, %v223_v22  ;;  %258 = vst [vmem:[#allocation2 + $0x1] sm:$0x1] %v250_v23  ;;  %259 = vst [vmem:[#allocation2 + $0x2] sm:$0x1] %v251_v24  ;;  %v238_v32 = vrot.slane %v224_v25, %v160_v55  ;;  %v407_v33 = vcombine.high %v385_v20, %v385_v20  ;;  %v2079_v2 = vsel %vm460_vm3, 1.0, %v1884_v1 }
  0xec   :  { %v414_v34 = vrot.slane %v385_v20, %v160_v55  ;;  %v435_v35 = vpack.c.bf16 %v406_v27, %v406_v27  ;;  %441 = vst [vmem:[#allocation3 + $0x1] sm:$0x1] %v433_v28  ;;  %442 = vst [vmem:[#allocation3 + $0x2] sm:$0x1] %v434_v29  ;;  %v239_v36 = vcombine.high %v231_v30, %v231_v30  ;;  %v2082_v5 = vsel %vm460_vm3, 0.0, %v1884_v1 }
  0xed   :  { %v253_v37 = vpack.c.bf16 %v231_v30, %v231_v30  ;;  %260 = vst [vmem:[#allocation2 + $0x3] sm:$0x1] %v252_v31  ;;  %v240_v38 = vcombine.high %v238_v32, %v238_v32  ;;  %v255_v39 = vpack.c.bf16 %v238_v32, %v238_v32  ;;  %v421_v40 = vrot.slane %v407_v33, %v160_v55 }
  0xee   :  { %v422_v41 = vcombine.high %v414_v34, %v414_v34  ;;  %443 = vst [vmem:[#allocation3 + $0x3] sm:$0x1] %v435_v35  ;;  %v254_v42 = vpack.c.bf16 %v239_v36, %v239_v36  ;;  %v436_v43 = vpack.c.bf16 %v414_v34, %v414_v34 }
  0xef   :  { %261 = vst [vmem:[#allocation2 + $0x4] sm:$0x1] %v253_v37  ;;  %v256_v48 = vpack.c.bf16 %v240_v38, %v240_v38  ;;  %263 = vst [vmem:[#allocation2 + $0x6] sm:$0x1] %v255_v39  ;;  %v423_v49 = vcombine.high %v421_v40, %v421_v40  ;;  %v438_v51 = vpack.c.bf16 %v421_v40, %v421_v40 }
  0xf0   :  { %v437_v50 = vpack.c.bf16 %v422_v41, %v422_v41  ;;  %262 = vst [vmem:[#allocation2 + $0x5] sm:$0x1] %v254_v42  ;;  %444 = vst [vmem:[#allocation3 + $0x4] sm:$0x1] %v436_v43  ;;  %v467_v60 = vld [vmem:[#allocation2] sm:$0x1] }
  0xf1   :  { %264 = vst [vmem:[#allocation2 + $0x7] sm:$0x1] %v256_v48  ;;  %v439_v52 = vpack.c.bf16 %v423_v49, %v423_v49  ;;  %446 = vst [vmem:[#allocation3 + $0x6] sm:$0x1] %v438_v51 }
  0xf2   :  { %445 = vst [vmem:[#allocation3 + $0x5] sm:$0x1] %v437_v50  ;;  %v554_v53 = vpop.f32.mrf.mxu0  ;;  %v630_v28 = vld [vmem:[#allocation2 + $0x1] sm:$0x1] }
  0xf3   :  { %447 = vst [vmem:[#allocation3 + $0x7] sm:$0x1] %v439_v52 }
  0xf4   :  { %v1725_v54 = vpop.f32.mrf.mxu0 }
  0xf6   :  { %v557_v55 = vpop.f32.mrf.mxu0 }
  0xf8   :  { %v1726_v57 = vpop.f32.mrf.mxu0  ;;  %v1840_v25 = vld [vmem:[#allocation3 + $0x6] ss:$0 sps:$4 sm:$0x11]  }
  0xf9   :  { %v641_v26 = vrot.slane %v1840_v25, %v1959_v16 }
  0xfa   :  { %v1839_v58 = vld [vmem:[#allocation3 + $0x7] ss:$0 sps:$4 sm:$0x11]  }
  0xfb   :  { %v478_v59 = vrot.slane %v1839_v58, %v1959_v16  ;;  %v648_v27 = vrot.slane %v641_v26, %v1959_v16  ;;  %v1841_v58 = vld [vmem:[#allocation3 + $0x5] ss:$0 sps:$4 sm:$0x11]  }
  0xfd   :  { %v485_v61 = vrot.slane %v478_v59, %v1959_v16  ;;  %v651_v29 = vsel %vm486_vm4, %v630_v28, %v648_v27  ;;  %v776_v59 = vrot.slane %v1841_v58, %v1959_v16 }
  0xfe   :  { %v653_v30 = vunpack.c.l.bf16 %v651_v29  ;;  %v1842_v29 = vld [vmem:[#allocation3 + $0x4] ss:$0 sps:$4 sm:$0x11]  }
  0xff   :  { %v489_v62 = vsel %vm486_vm4, %v467_v60, %v485_v61  ;;  %v783_v60 = vrot.slane %v776_v59, %v1959_v16  ;;  %v765_v61 = vld [vmem:[#allocation2 + $0x2] sm:$0x1] }
 0x100   :  { %v491_v63 = vunpack.c.l.bf16 %v489_v62 }
 0x101   :  { %v786_v62 = vsel %vm486_vm4, %v765_v61, %v783_v60 }
 0x102   :  { %v555_v3 = vadd.f32 %v554_v53, %v491_v63  ;;  %v788_v63 = vunpack.c.l.bf16 %v786_v62 }
 0x104   :  { %v560_v9 = vmul.f32 %v555_v3, %v2079_v2 }
 0x106   :  { %1847 = vtanh.f32 %v560_v9 }
 0x113   :  { %v1848_v4 = vpop.eup %1847 }
 0x114   :  { %v562_v6 = vmul.f32 %v1848_v4, %v2079_v2 }
 0x116   :  { %v563_v7 = vadd.f32 %v562_v6, %v2082_v5 }
 0x118   :  { %566 = vrot.lane.b32.xlu0 %v563_v7, %s1885_s3  ;;  %v564_v11 = vmul.f32 0.0, %v563_v7 }
 0x18a   :  { %v567_v8 = vpop.permute.xlu0 %566 }
 0x18b   :  { %v569_v10 = vmul.f32 %v567_v8, %v563_v7 }
 0x18d   :  { %571 = vrot.lane.b32.xlu0 %v569_v10, %s1886_s20 }
 0x1ff   :  { %v572_v12 = vpop.permute.xlu0 %571 }
 0x200   :  { %v574_v14 = vadd.f32 %v572_v12, %v564_v11 }
 0x202   :  { %1849 = vtanh.f32 %v574_v14 }
 0x20f   :  { %v1850_v15 = vpop.eup %1849 }
 0x210   :  { %577 = vrot.lane.b32.xlu1 %v1850_v15, %s1885_s3 }
 0x282   :  { %v578_v17 = vpop.permute.xlu1 %577 }
 0x283   :  { %v2090_v18 = vmul.f32 %v578_v17, %v563_v7 }
 0x285   :  { %v617_v19 = vsel %vm465_vm5, 0.0, %v2090_v18  ;;  %v616_v20 = vsel %vm465_vm5, %v2090_v18, 0.0 }
 0x286   :  { %623 = vrot.lane.b32.xlu0 %v617_v19, %s1885_s3  ;;  %619 = vrot.lane.b32.xlu1 %v616_v20, %s1886_s20 }
 0x2f8   :  { %v624_v21 = vpop.permute.xlu0 %623  ;;  %v620_v22 = vpop.permute.xlu1 %619 }
 0x2f9   :  { %v627_v23 = vsel %vm626_vm6, %v620_v22, %v624_v21 }
 0x2fa   :  { %v628_v24 = vpack.c.bf16 %v627_v23, %v627_v23 }
 0x2fc   :  { %1736 = vmatmul.mubr.msk.bf16.vlgmr.msra.gmra.mxu1 %vm516_vm7, %v628_v24 }
 0x2fd   :  { %1752 = vmatpush3.bf16.msra.mxu1 %v2019_v44  ;;  %1759 = vmatprep.mubr.msk.bf16.mxu1 %vm1880_vm0, %v1879_v0 }
 0x2fe   :  { %1753 = vmatprep.subr.bf16.mxu1 %v1879_v0 }
 0x301   :  { %1754 = vmatpush3.bf16.msra.mxu1 %v2027_v45 }
 0x302   :  { %1755 = vmatprep.subr.bf16.mxu1 %v1879_v0 }
 0x305   :  { %1756 = vmatpush3.bf16.msra.mxu1 %v2040_v46 }
 0x306   :  { %1757 = vmatprep.subr.bf16.mxu1 %v1879_v0 }
 0x309   :  { %1758 = vmatpush3.bf16.msra.mxu1 %v2049_v47 }
 0x30a   :  { %1775 = vmatprep.subr.bf16.mxu1 %v1879_v0 }
 0x3bc   :  { %v691_v31 = vpop.f32.mrf.mxu1 }
 0x3bd   :  { %v692_v32 = vadd.f32 %v691_v31, %v653_v30  ;;  %v911_v30 = vrot.slane %v1842_v29, %v1959_v16 }
 0x3be   :  { %v1737_v33 = vpop.f32.mrf.mxu1 }
 0x3bf   :  { %v697_v34 = vmul.f32 %v692_v32, %v2079_v2  ;;  %v918_v31 = vrot.slane %v911_v30, %v1959_v16  ;;  %v900_v32 = vld [vmem:[#allocation2 + $0x3] sm:$0x1] }
 0x3c0   :  { %v694_v35 = vpop.f32.mrf.mxu1 }
 0x3c1   :  { %1851 = vtanh.f32 %v697_v34  ;;  %v921_v33 = vsel %vm486_vm4, %v900_v32, %v918_v31 }
 0x3c2   :  { %v1738_v36 = vpop.f32.mrf.mxu1  ;;  %v923_v34 = vunpack.c.l.bf16 %v921_v33 }
 0x3ce   :  { %v1852_v37 = vpop.eup %1851 }
 0x3cf   :  { %v699_v38 = vmul.f32 %v1852_v37, %v2079_v2 }
 0x3d1   :  { %v700_v39 = vadd.f32 %v699_v38, %v2082_v5 }
 0x3d3   :  { %703 = vrot.lane.b32.xlu1 %v700_v39, %s1885_s3  ;;  %v701_v42 = vmul.f32 %v700_v39, %v574_v14 }
 0x445   :  { %v704_v40 = vpop.permute.xlu1 %703 }
 0x446   :  { %v706_v41 = vmul.f32 %v704_v40, %v700_v39 }
 0x448   :  { %708 = vrot.lane.b32.xlu0 %v706_v41, %s1886_s20 }
 0x4ba   :  { %v709_v43 = vpop.permute.xlu0 %708 }
 0x4bb   :  { %v711_v48 = vadd.f32 %v709_v43, %v701_v42 }
 0x4bd   :  { %1853 = vtanh.f32 %v711_v48 }
 0x4ca   :  { %v1854_v49 = vpop.eup %1853 }
 0x4cb   :  { %714 = vrot.lane.b32.xlu1 %v1854_v49, %s1885_s3 }
 0x53d   :  { %v715_v50 = vpop.permute.xlu1 %714 }
 0x53e   :  { %v2121_v51 = vmul.f32 %v715_v50, %v700_v39 }
 0x540   :  { %v753_v52 = vsel %vm465_vm5, 0.0, %v2121_v51  ;;  %v752_v53 = vsel %vm465_vm5, %v2121_v51, 0.0 }
 0x541   :  { %759 = vrot.lane.b32.xlu1 %v753_v52, %s1885_s3  ;;  %755 = vrot.lane.b32.xlu0 %v752_v53, %s1886_s20 }
 0x5b3   :  { %v760_v54 = vpop.permute.xlu1 %759  ;;  %v756_v55 = vpop.permute.xlu0 %755 }
 0x5b4   :  { %v762_v56 = vsel %vm626_vm6, %v756_v55, %v760_v54 }
 0x5b5   :  { %v763_v57 = vpack.c.bf16 %v762_v56, %v762_v56 }
 0x5b7   :  { %1748 = vmatmul.mubr.msk.bf16.vlgmr.msra.gmra.mxu0 %vm516_vm7, %v763_v57 }
 0x5b8   :  { %1764 = vmatpush3.bf16.msra.mxu0 %v2019_v44  ;;  %1771 = vmatprep.mubr.msk.bf16.mxu0 %vm1880_vm0, %v1879_v0 }
 0x5b9   :  { %1765 = vmatprep.subr.bf16.mxu0 %v1879_v0 }
 0x5bc   :  { %1766 = vmatpush3.bf16.msra.mxu0 %v2027_v45 }
 0x5bd   :  { %1767 = vmatprep.subr.bf16.mxu0 %v1879_v0 }
 0x5c0   :  { %1768 = vmatpush3.bf16.msra.mxu0 %v2040_v46 }
 0x5c1   :  { %1769 = vmatprep.subr.bf16.mxu0 %v1879_v0 }
 0x5c4   :  { %1770 = vmatpush3.bf16.msra.mxu0 %v2049_v47 }
 0x5c5   :  { %1787 = vmatprep.subr.bf16.mxu0 %v1879_v0 }
 0x677   :  { %v826_v1 = vpop.f32.mrf.mxu0 }
 0x678   :  { %v827_v3 = vadd.f32 %v826_v1, %v788_v63  ;;  %v1843_v63 = vld [vmem:[#allocation3 + $0x3] ss:$0 sps:$4 sm:$0x11]  }
 0x679   :  { %v1749_v9 = vpop.f32.mrf.mxu0  ;;  %v1046_v1 = vrot.slane %v1843_v63, %v1959_v16 }
 0x67a   :  { %v832_v4 = vmul.f32 %v827_v3, %v2079_v2  ;;  %v1035_v9 = vld [vmem:[#allocation2 + $0x4] sm:$0x1] }
 0x67b   :  { %v829_v6 = vpop.f32.mrf.mxu0  ;;  %v1053_v3 = vrot.slane %v1046_v1, %v1959_v16 }
 0x67c   :  { %1855 = vtanh.f32 %v832_v4 }
 0x67d   :  { %v1750_v7 = vpop.f32.mrf.mxu0  ;;  %v1056_v4 = vsel %vm486_vm4, %v1035_v9, %v1053_v3  ;;  %v1845_v3 = vld [vmem:[#allocation3 + $0x1] ss:$0 sps:$4 sm:$0x11]  }
 0x67e   :  { %v1058_v6 = vunpack.c.l.bf16 %v1056_v4  ;;  %v1312_v9 = vrot.slane %v1845_v3, %v1959_v16 }
 0x680   :  { %v1319_v4 = vrot.slane %v1312_v9, %v1959_v16 }
 0x689   :  { %v1856_v8 = vpop.eup %1855 }
 0x68a   :  { %v834_v10 = vmul.f32 %v1856_v8, %v2079_v2 }
 0x68c   :  { %v835_v11 = vadd.f32 %v834_v10, %v2082_v5 }
 0x68e   :  { %838 = vrot.lane.b32.xlu0 %v835_v11, %s1885_s3  ;;  %v836_v15 = vmul.f32 %v835_v11, %v711_v48 }
 0x700   :  { %v839_v12 = vpop.permute.xlu0 %838 }
 0x701   :  { %v841_v14 = vmul.f32 %v839_v12, %v835_v11 }
 0x703   :  { %843 = vrot.lane.b32.xlu1 %v841_v14, %s1886_s20 }
 0x775   :  { %v844_v17 = vpop.permute.xlu1 %843 }
 0x776   :  { %v846_v19 = vadd.f32 %v844_v17, %v836_v15 }
 0x778   :  { %1857 = vtanh.f32 %v846_v19 }
 0x785   :  { %v1858_v20 = vpop.eup %1857 }
 0x786   :  { %849 = vrot.lane.b32.xlu0 %v1858_v20, %s1885_s3 }
 0x7f8   :  { %v850_v21 = vpop.permute.xlu0 %849 }
 0x7f9   :  { %v2152_v22 = vmul.f32 %v850_v21, %v835_v11 }
 0x7fb   :  { %v888_v23 = vsel %vm465_vm5, 0.0, %v2152_v22  ;;  %v887_v24 = vsel %vm465_vm5, %v2152_v22, 0.0 }
 0x7fc   :  { %894 = vrot.lane.b32.xlu0 %v888_v23, %s1885_s3  ;;  %890 = vrot.lane.b32.xlu1 %v887_v24, %s1886_s20 }
 0x86e   :  { %v895_v25 = vpop.permute.xlu0 %894  ;;  %v891_v26 = vpop.permute.xlu1 %890 }
 0x86f   :  { %v897_v27 = vsel %vm626_vm6, %v891_v26, %v895_v25 }
 0x870   :  { %v898_v28 = vpack.c.bf16 %v897_v27, %v897_v27 }
 0x872   :  { %1760 = vmatmul.mubr.msk.bf16.vlgmr.msra.gmra.mxu1 %vm516_vm7, %v898_v28 }
 0x873   :  { %1776 = vmatpush3.bf16.msra.mxu1 %v2019_v44  ;;  %1783 = vmatprep.mubr.msk.bf16.mxu1 %vm1880_vm0, %v1879_v0 }
 0x874   :  { %1777 = vmatprep.subr.bf16.mxu1 %v1879_v0 }
 0x877   :  { %1778 = vmatpush3.bf16.msra.mxu1 %v2027_v45 }
 0x878   :  { %1779 = vmatprep.subr.bf16.mxu1 %v1879_v0 }
 0x87b   :  { %1780 = vmatpush3.bf16.msra.mxu1 %v2040_v46 }
 0x87c   :  { %1781 = vmatprep.subr.bf16.mxu1 %v1879_v0 }
 0x87f   :  { %1782 = vmatpush3.bf16.msra.mxu1 %v2049_v47 }
 0x880   :  { %1799 = vmatprep.subr.bf16.mxu1 %v1879_v0 }
 0x932   :  { %v961_v35 = vpop.f32.mrf.mxu1 }
 0x933   :  { %v962_v36 = vadd.f32 %v961_v35, %v923_v34  ;;  %v1844_v35 = vld [vmem:[#allocation3 + $0x2] ss:$0 sps:$4 sm:$0x11]  }
 0x934   :  { %v1761_v37 = vpop.f32.mrf.mxu1 }
 0x935   :  { %v967_v38 = vmul.f32 %v962_v36, %v2079_v2  ;;  %v1179_v36 = vrot.slane %v1844_v35, %v1959_v16  ;;  %v1168_v37 = vld [vmem:[#allocation2 + $0x5] sm:$0x1] }
 0x936   :  { %v964_v39 = vpop.f32.mrf.mxu1 }
 0x937   :  { %1859 = vtanh.f32 %v967_v38 }
 0x938   :  { %v1762_v40 = vpop.f32.mrf.mxu1 }
 0x944   :  { %v1860_v41 = vpop.eup %1859 }
 0x945   :  { %v969_v42 = vmul.f32 %v1860_v41, %v2079_v2 }
 0x947   :  { %v970_v43 = vadd.f32 %v969_v42, %v2082_v5 }
 0x949   :  { %973 = vrot.lane.b32.xlu1 %v970_v43, %s1885_s3  ;;  %v971_v50 = vmul.f32 %v970_v43, %v846_v19 }
 0x9bb   :  { %v974_v48 = vpop.permute.xlu1 %973 }
 0x9bc   :  { %v976_v49 = vmul.f32 %v974_v48, %v970_v43 }
 0x9be   :  { %978 = vrot.lane.b32.xlu0 %v976_v49, %s1886_s20 }
 0xa30   :  { %v979_v52 = vpop.permute.xlu0 %978 }
 0xa31   :  { %v981_v53 = vadd.f32 %v979_v52, %v971_v50 }
 0xa33   :  { %1861 = vtanh.f32 %v981_v53 }
 0xa40   :  { %v1862_v54 = vpop.eup %1861 }
 0xa41   :  { %984 = vrot.lane.b32.xlu1 %v1862_v54, %s1885_s3 }
 0xab3   :  { %v985_v55 = vpop.permute.xlu1 %984 }
 0xab4   :  { %v2183_v56 = vmul.f32 %v985_v55, %v970_v43 }
 0xab6   :  { %v1023_v57 = vsel %vm465_vm5, 0.0, %v2183_v56  ;;  %v1022_v58 = vsel %vm465_vm5, %v2183_v56, 0.0 }
 0xab7   :  { %1029 = vrot.lane.b32.xlu1 %v1023_v57, %s1885_s3  ;;  %1025 = vrot.lane.b32.xlu0 %v1022_v58, %s1886_s20 }
 0xb29   :  { %v1030_v59 = vpop.permute.xlu1 %1029  ;;  %v1026_v60 = vpop.permute.xlu0 %1025 }
 0xb2a   :  { %v1032_v61 = vsel %vm626_vm6, %v1026_v60, %v1030_v59 }
 0xb2b   :  { %v1033_v62 = vpack.c.bf16 %v1032_v61, %v1032_v61 }
 0xb2d   :  { %1772 = vmatmul.mubr.msk.bf16.vlgmr.msra.gmra.mxu0 %vm516_vm7, %v1033_v62 }
 0xb2e   :  { %1788 = vmatpush3.bf16.msra.mxu0 %v2019_v44  ;;  %1795 = vmatprep.mubr.msk.bf16.mxu0 %vm1880_vm0, %v1879_v0 }
 0xb2f   :  { %1789 = vmatprep.subr.bf16.mxu0 %v1879_v0 }
 0xb32   :  { %1790 = vmatpush3.bf16.msra.mxu0 %v2027_v45 }
 0xb33   :  { %1791 = vmatprep.subr.bf16.mxu0 %v1879_v0 }
 0xb36   :  { %1792 = vmatpush3.bf16.msra.mxu0 %v2040_v46 }
 0xb37   :  { %1793 = vmatprep.subr.bf16.mxu0 %v1879_v0 }
 0xb3a   :  { %1794 = vmatpush3.bf16.msra.mxu0 %v2049_v47 }
 0xbed   :  { %v1096_v7 = vpop.f32.mrf.mxu0 }
 0xbee   :  { %v1097_v8 = vadd.f32 %v1096_v7, %v1058_v6  ;;  %v1301_v6 = vld [vmem:[#allocation2 + $0x6] sm:$0x1] }
 0xbef   :  { %v1773_v10 = vpop.f32.mrf.mxu0  ;;  %v1322_v7 = vsel %vm486_vm4, %v1301_v6, %v1319_v4 }
 0xbf0   :  { %v1102_v11 = vmul.f32 %v1097_v8, %v2079_v2  ;;  %v1324_v8 = vunpack.c.l.bf16 %v1322_v7 }
 0xbf1   :  { %v1099_v12 = vpop.f32.mrf.mxu0 }
 0xbf2   :  { %1863 = vtanh.f32 %v1102_v11 }
 0xbf3   :  { %v1774_v14 = vpop.f32.mrf.mxu0 }
 0xbff   :  { %v1864_v15 = vpop.eup %1863 }
 0xc00   :  { %v1104_v17 = vmul.f32 %v1864_v15, %v2079_v2 }
 0xc02   :  { %v1105_v19 = vadd.f32 %v1104_v17, %v2082_v5 }
 0xc04   :  { %1108 = vrot.lane.b32.xlu0 %v1105_v19, %s1885_s3  ;;  %v1106_v23 = vmul.f32 %v1105_v19, %v981_v53 }
 0xc76   :  { %v1109_v20 = vpop.permute.xlu0 %1108 }
 0xc77   :  { %v1111_v21 = vmul.f32 %v1109_v20, %v1105_v19 }
 0xc79   :  { %1113 = vrot.lane.b32.xlu1 %v1111_v21, %s1886_s20 }
 0xceb   :  { %v1114_v24 = vpop.permute.xlu1 %1113 }
 0xcec   :  { %v1116_v25 = vadd.f32 %v1114_v24, %v1106_v23 }
 0xcee   :  { %1865 = vtanh.f32 %v1116_v25 }
 0xcfb   :  { %v1866_v26 = vpop.eup %1865 }
 0xcfc   :  { %1119 = vrot.lane.b32.xlu0 %v1866_v26, %s1885_s3 }
 0xd6e   :  { %v1120_v27 = vpop.permute.xlu0 %1119 }
 0xd6f   :  { %v2213_v28 = vmul.f32 %v1120_v27, %v1105_v19 }
 0xd71   :  { %v1156_v29 = vsel %vm465_vm5, 0.0, %v2213_v28  ;;  %v1155_v30 = vsel %vm465_vm5, %v2213_v28, 0.0 }
 0xd72   :  { %1162 = vrot.lane.b32.xlu0 %v1156_v29, %s1885_s3  ;;  %1158 = vrot.lane.b32.xlu1 %v1155_v30, %s1886_s20 }
 0xde4   :  { %v1163_v31 = vpop.permute.xlu0 %1162  ;;  %v1159_v32 = vpop.permute.xlu1 %1158 }
 0xde5   :  { %v1165_v33 = vsel %vm626_vm6, %v1159_v32, %v1163_v31 }
 0xde6   :  { %v1166_v34 = vpack.c.bf16 %v1165_v33, %v1165_v33 }
 0xde8   :  { %1784 = vmatmul.mubr.msk.bf16.vlgmr.msra.gmra.mxu1 %vm516_vm7, %v1166_v34 }
 0xde9   :  { %1800 = vmatpush3.bf16.msra.mxu1 %v2019_v44  ;;  %1807 = vmatprep.mubr.msk.bf16.mxu1 %vm1880_vm0, %v1879_v0  ;;  %v1186_v44 = vrot.slane %v1179_v36, %v1959_v16 }
 0xdea   :  { %1801 = vmatprep.subr.bf16.mxu1 %v1879_v0 }
 0xdeb   :  { %v1189_v38 = vsel %vm486_vm4, %v1168_v37, %v1186_v44  ;;  %v1846_v37 = vld [vmem:[#allocation3] ss:$0 sps:$4 sm:$0x11]  }
 0xdec   :  { %v1191_v39 = vunpack.c.l.bf16 %v1189_v38  ;;  %v1444_v38 = vrot.slane %v1846_v37, %v1959_v16 }
 0xded   :  { %1802 = vmatpush3.bf16.msra.mxu1 %v2027_v45 }
 0xdee   :  { %1803 = vmatprep.subr.bf16.mxu1 %v1879_v0 }
 0xdf1   :  { %1804 = vmatpush3.bf16.msra.mxu1 %v2040_v46 }
 0xdf2   :  { %1805 = vmatprep.subr.bf16.mxu1 %v1879_v0 }
 0xdf5   :  { %1806 = vmatpush3.bf16.msra.mxu1 %v2049_v47 }
 0xea8   :  { %v1229_v40 = vpop.f32.mrf.mxu1 }
 0xea9   :  { %v1230_v41 = vadd.f32 %v1229_v40, %v1191_v39  ;;  %v1434_v39 = vld [vmem:[#allocation2 + $0x7] sm:$0x1]  ;;  %v1451_v40 = vrot.slane %v1444_v38, %v1959_v16 }
 0xeaa   :  { %v1785_v45 = vpop.f32.mrf.mxu1 }
 0xeab   :  { %v1235_v42 = vmul.f32 %v1230_v41, %v2079_v2  ;;  %v1454_v13 = vsel %vm486_vm4, %v1434_v39, %v1451_v40 }
 0xeac   :  { %v1232_v43 = vpop.f32.mrf.mxu1  ;;  %v1456_v41 = vunpack.c.l.bf16 %v1454_v13 }
 0xead   :  { %1867 = vtanh.f32 %v1235_v42 }
 0xeae   :  { %v1786_v46 = vpop.f32.mrf.mxu1 }
 0xeba   :  { %v1868_v0 = vpop.eup %1867 }
 0xebb   :  { %v1237_v47 = vmul.f32 %v1868_v0, %v2079_v2 }
 0xebd   :  { %v1238_v48 = vadd.f32 %v1237_v47, %v2082_v5 }
 0xebf   :  { %1241 = vrot.lane.b32.xlu1 %v1238_v48, %s1885_s3  ;;  %v1239_v52 = vmul.f32 %v1238_v48, %v1116_v25 }
 0xf31   :  { %v1242_v49 = vpop.permute.xlu1 %1241 }
 0xf32   :  { %v1244_v50 = vmul.f32 %v1242_v49, %v1238_v48 }
 0xf34   :  { %1246 = vrot.lane.b32.xlu0 %v1244_v50, %s1886_s20 }
 0xfa6   :  { %v1247_v53 = vpop.permute.xlu0 %1246 }
 0xfa7   :  { %v1249_v54 = vadd.f32 %v1247_v53, %v1239_v52  ;;  %v581_v52 = vpack.c.bf16 %v2090_v18, %v2090_v18  ;;  %v988_v18 = vpack.c.bf16 %v2183_v56, %v2183_v56 }
 0xfa9   :  { %1869 = vtanh.f32 %v1249_v54 }
 0xfb6   :  { %v1870_v55 = vpop.eup %1869 }
 0xfb7   :  { %1252 = vrot.lane.b32.xlu1 %v1870_v55, %s1885_s3 }
0x1029   :  { %v1253_v57 = vpop.permute.xlu1 %1252 }
0x102a   :  { %v2243_v58 = vmul.f32 %v1253_v57, %v1238_v48  ;;  %v589_v57 = vrot.slane %v581_v52, %v1959_v16 }
0x102c   :  { %v1289_v59 = vsel %vm465_vm5, 0.0, %v2243_v58  ;;  %v1288_v60 = vsel %vm465_vm5, %v2243_v58, 0.0 }
0x102d   :  { %1295 = vrot.lane.b32.xlu1 %v1289_v59, %s1885_s3  ;;  %1291 = vrot.lane.b32.xlu0 %v1288_v60, %s1886_s20 }
0x109f   :  { %v1296_v61 = vpop.permute.xlu1 %1295  ;;  %v1292_v62 = vpop.permute.xlu0 %1291 }
0x10a0   :  { %v1298_v63 = vsel %vm626_vm6, %v1292_v62, %v1296_v61  ;;  %v1123_v61 = vpack.c.bf16 %v2213_v28, %v2213_v28  ;;  %v996_v62 = vrot.slane %v988_v18, %v1959_v16 }
0x10a1   :  { %v1299_v1 = vpack.c.bf16 %v1298_v63, %v1298_v63  ;;  %v1256_v63 = vpack.c.bf16 %v2243_v58, %v2243_v58 }
0x10a2   :  { %v1003_v56 = vrot.slane %v996_v62, %v1959_v16 }
0x10a3   :  { %1796 = vmatmul.mubr.msk.bf16.vlgmr.msra.gmra.mxu0 %vm516_vm7, %v1299_v1  ;;  %v1131_v1 = vrot.slane %v1123_v61, %v1959_v16  ;;  %v1264_v28 = vrot.slane %v1256_v63, %v1959_v16 }
0x10a5   :  { %v1138_v9 = vrot.slane %v1131_v1, %v1959_v16  ;;  %v1271_v4 = vrot.slane %v1264_v28, %v1959_v16 }
0x1163   :  { %v1362_v10 = vpop.f32.mrf.mxu0 }
0x1164   :  { %v1363_v11 = vadd.f32 %v1362_v10, %v1324_v8 }
0x1165   :  { %v1797_v12 = vpop.f32.mrf.mxu0 }
0x1166   :  { %v1368_v14 = vmul.f32 %v1363_v11, %v2079_v2 }
0x1167   :  { %v1365_v15 = vpop.f32.mrf.mxu0 }
0x1168   :  { %1871 = vtanh.f32 %v1368_v14  ;;  %v602_v15 = vcombine.high %v589_v57, %v589_v57 }
0x1169   :  { %v1798_v17 = vpop.f32.mrf.mxu0 }
0x1175   :  { %v1872_v19 = vpop.eup %1871 }
0x1176   :  { %v1370_v20 = vmul.f32 %v1872_v19, %v2079_v2 }
0x1178   :  { %v1371_v21 = vadd.f32 %v1370_v20, %v2082_v5  ;;  %v609_v20 = vrot.slane %v602_v15, %v1959_v16 }
0x117a   :  { %1374 = vrot.lane.b32.xlu0 %v1371_v21, %s1885_s3  ;;  %v1372_v25 = vmul.f32 %v1371_v21, %v1249_v54  ;;  %v718_v54 = vpack.c.bf16 %v2121_v51, %v2121_v51 }
0x117c   :  { %v726_v59 = vrot.slane %v718_v54, %v1959_v16 }
0x117e   :  { %v733_v51 = vrot.slane %v726_v59, %v1959_v16 }
0x11ec   :  { %v1375_v23 = vpop.permute.xlu0 %1374 }
0x11ed   :  { %v1377_v24 = vmul.f32 %v1375_v23, %v1371_v21 }
0x11ef   :  { %1379 = vrot.lane.b32.xlu1 %v1377_v24, %s1886_s20 }
0x1261   :  { %v1380_v26 = vpop.permute.xlu1 %1379 }
0x1262   :  { %v2263_v27 = vadd.f32 %v1380_v26, %v1372_v25  ;;  %v1009_v26 = vcombine.high %v996_v62, %v996_v62 }
0x1264   :  { %1873 = vtanh.f32 %v2263_v27 }
0x1271   :  { %v1874_v29 = vpop.eup %1873 }
0x1272   :  { %1385 = vrot.lane.b32.xlu0 %v1874_v29, %s1885_s3  ;;  %v1143_v29 = vcombine.high %v1131_v1, %v1131_v1 }
0x12e4   :  { %v1386_v30 = vpop.permute.xlu0 %1385 }
0x12e5   :  { %v1388_v31 = vmul.f32 %v1386_v30, %v1371_v21  ;;  %v739_v21 = vcombine.high %v726_v59, %v726_v59  ;;  %v1150_v30 = vrot.slane %v1143_v29, %v1959_v16 }
0x12e7   :  { %v1422_v32 = vsel %vm465_vm5, 0.0, %v1388_v31  ;;  %v1421_v33 = vsel %vm465_vm5, %v1388_v31, 0.0  ;;  %v1389_v3 = vpack.c.bf16 %v1388_v31, %v1388_v31  ;;  %v746_v23 = vrot.slane %v739_v21, %v1959_v16 }
0x12e8   :  { %1428 = vrot.lane.b32.xlu0 %v1422_v32, %s1885_s3  ;;  %1424 = vrot.lane.b32.xlu1 %v1421_v33, %s1886_s20  ;;  %v1276_v31 = vcombine.high %v1264_v28, %v1264_v28 }
0x12e9   :  { %v1397_v6 = vrot.slane %v1389_v3, %v1959_v16 }
0x12ea   :  { %v1283_v32 = vrot.slane %v1276_v31, %v1959_v16 }
0x12eb   :  { %v1404_v58 = vrot.slane %v1397_v6, %v1959_v16  ;;  %v1409_v33 = vcombine.high %v1397_v6, %v1397_v6 }
0x135a   :  { %v1429_v34 = vpop.permute.xlu0 %1428  ;;  %v1425_v35 = vpop.permute.xlu1 %1424 }
0x135b   :  { %v1431_v36 = vsel %vm626_vm6, %v1425_v35, %v1429_v34  ;;  %v1416_v34 = vrot.slane %v1409_v33, %v1959_v16 }
0x135c   :  { %v1432_v44 = vpack.c.bf16 %v1431_v36, %v1431_v36 }
0x135e   :  { %1808 = vmatmul.mubr.msk.bf16.vlgmr.msra.gmra.mxu1 %vm516_vm7, %v1432_v44 }
0x141e   :  { %v1494_v45 = vpop.f32.mrf.mxu1 }
0x141f   :  { %v1495_v42 = vadd.f32 %v1494_v45, %v1456_v41 }
0x1420   :  { %v1809_v43 = vpop.f32.mrf.mxu1 }
0x1421   :  { %v1500_v46 = vmul.f32 %v1495_v42, %v2079_v2 }
0x1422   :  { %v1497_v0 = vpop.f32.mrf.mxu1 }
0x1423   :  { %1875 = vtanh.f32 %v1500_v46 }
0x1424   :  { %v1810_v47 = vpop.f32.mrf.mxu1 }
0x1430   :  { %v1876_v48 = vpop.eup %1875 }
0x1431   :  { %v1502_v49 = vmul.f32 %v1876_v48, %v2079_v2  ;;  %v853_v2 = vpack.c.bf16 %v2152_v22, %v2152_v22 }
0x1433   :  { %v2281_v50 = vadd.f32 %v1502_v49, %v2082_v5  ;;  %v596_v5 = vrot.slane %v589_v57, %v1959_v16  ;;  %v861_v60 = vrot.slane %v853_v2, %v1959_v16 }
0x1435   :  { %1506 = vrot.lane.b32.xlu1 %v2281_v50, %s1885_s3  ;;  %v868_v22 = vrot.slane %v861_v60, %v1959_v16  ;;  %v1504_v7 = vmul.f32 %v2281_v50, %v2263_v27  ;;  %v874_v24 = vcombine.high %v861_v60, %v861_v60  ;;  %v1016_v27 = vrot.slane %v1009_v26, %v1959_v16 }
0x1437   :  { %v881_v25 = vrot.slane %v874_v24, %v1959_v16 }
0x14a7   :  { %v1507_v53 = vpop.permute.xlu1 %1506 }
0x14a8   :  { %v1509_v55 = vmul.f32 %v1507_v53, %v2281_v50 }
0x14aa   :  { %1511 = vrot.lane.b32.xlu0 %v1509_v55, %s1886_s20 }
0x14ae   :  { %597 = vrot.lane.b32.xlu0 %v596_v5, %s1886_s20 }
0x14b2   :  { %734 = vrot.lane.b32.xlu0 %v733_v51, %s1886_s20 }
0x14b6   :  { %869 = vrot.lane.b32.xlu0 %v868_v22, %s1886_s20 }
0x14ba   :  { %1004 = vrot.lane.b32.xlu0 %v1003_v56, %s1886_s20 }
0x14be   :  { %1139 = vrot.lane.b32.xlu0 %v1138_v9, %s1886_s20 }
0x14c2   :  { %1272 = vrot.lane.b32.xlu0 %v1271_v4, %s1886_s20 }
0x14c6   :  { %1405 = vrot.lane.b32.xlu0 %v1404_v58, %s1886_s20 }
0x151c   :  { %v1512_v8 = vpop.permute.xlu0 %1511 }
0x151d   :  { %v1514_v10 = vadd.f32 %v1512_v8, %v1504_v7 }
0x151f   :  { %1877 = vtanh.f32 %v1514_v10 }
0x1520   :  { %v598_v11 = vpop.permute.xlu0 %597 }
0x1521   :  { %601 = vst.msk [vmem:[%s2411_s4] sm:$0x1] %vm600_vm8, %v598_v11 }
0x1524   :  { %v735_v12 = vpop.permute.xlu0 %734 }
0x1525   :  { %1598 = vst.msk [vmem:[%s2411_s4 + $0x1] sm:$0x1] %vm600_vm8, %v735_v12 }
0x1528   :  { %v870_v14 = vpop.permute.xlu0 %869 }
0x1529   :  { %1601 = vst.msk [vmem:[%s2411_s4 + $0x2] sm:$0x1] %vm600_vm8, %v870_v14 }
0x152c   :  { %v1878_v17 = vpop.eup %1877  ;;  %v1005_v19 = vpop.permute.xlu0 %1004 }
0x152d   :  { %1604 = vst.msk [vmem:[%s2411_s4 + $0x3] sm:$0x1] %vm600_vm8, %v1005_v19  ;;  %1517 = vrot.lane.b32.xlu1 %v1878_v17, %s1885_s3 }
0x1530   :  { %v1140_v35 = vpop.permute.xlu0 %1139 }
0x1531   :  { %610 = vrot.lane.b32.xlu1 %v609_v20, %s1885_s3 }
0x1534   :  { %v1273_v37 = vpop.permute.xlu0 %1272 }
0x1535   :  { %747 = vrot.lane.b32.xlu1 %v746_v23, %s1885_s3 }
0x1538   :  { %v1406_v42 = vpop.permute.xlu0 %1405 }
0x1539   :  { %882 = vrot.lane.b32.xlu1 %v881_v25, %s1885_s3 }
0x153d   :  { %1017 = vrot.lane.b32.xlu1 %v1016_v27, %s1885_s3 }
0x1541   :  { %1151 = vrot.lane.b32.xlu1 %v1150_v30, %s1885_s3 }
0x1545   :  { %1284 = vrot.lane.b32.xlu1 %v1283_v32, %s1885_s3 }
0x1549   :  { %1417 = vrot.lane.b32.xlu1 %v1416_v34, %s1885_s3 }
0x159f   :  { %v1518_v36 = vpop.permute.xlu1 %1517 }
0x15a0   :  { %v1520_v44 = vmul.f32 %v1518_v36, %v2281_v50 }
0x15a2   :  { %v1521_v38 = vpack.c.bf16 %v1520_v44, %v1520_v44 }
0x15a3   :  { %v611_v39 = vpop.permute.xlu1 %610 }
0x15a4   :  { %v1529_v40 = vrot.slane %v1521_v38, %v1959_v16  ;;  %1596 = vst.msk [vmem:[%s2411_s4 + $0x7] sm:$0x1] %vm614_vm9, %v611_v39 }
0x15a6   :  { %v1541_v13 = vcombine.high %v1529_v40, %v1529_v40  ;;  %v1536_v41 = vrot.slane %v1529_v40, %v1959_v16 }
0x15a7   :  { %v748_v45 = vpop.permute.xlu1 %747 }
0x15a8   :  { %1599 = vst.msk [vmem:[%s2411_s4 + $0x6] sm:$0x1] %vm614_vm9, %v748_v45  ;;  %1537 = vrot.lane.b32.xlu0 %v1536_v41, %s1886_s20  ;;  %v1548_v43 = vrot.slane %v1541_v13, %v1959_v16 }
0x15a9   :  { %1613 = vst.msk [vmem:[%s2411_s4 + $0x6] sm:$0x1] %vm600_vm8, %v1406_v42 }
0x15aa   :  { %1549 = vrot.lane.b32.xlu1 %v1548_v43, %s1885_s3 }
0x15ab   :  { %v883_v46 = vpop.permute.xlu1 %882 }
0x15ac   :  { %1602 = vst.msk [vmem:[%s2411_s4 + $0x5] sm:$0x1] %vm614_vm9, %v883_v46 }
0x15ad   :  { %1610 = vst.msk [vmem:[%s2411_s4 + $0x5] sm:$0x1] %vm600_vm8, %v1273_v37 }
0x15af   :  { %v1018_v0 = vpop.permute.xlu1 %1017 }
0x15b0   :  { %1605 = vst.msk [vmem:[%s2411_s4 + $0x4] sm:$0x1] %vm614_vm9, %v1018_v0 }
0x15b1   :  { %1607 = vst.msk [vmem:[%s2411_s4 + $0x4] sm:$0x1] %vm600_vm8, %v1140_v35 }
0x15b3   :  { %v1152_v16 = vpop.permute.xlu1 %1151 }
0x15b4   :  { %1608 = vst.msk [vmem:[%s2411_s4 + $0x3] sm:$0x1] %vm614_vm9, %v1152_v16 }
0x15b7   :  { %v1285_v47 = vpop.permute.xlu1 %1284 }
0x15b8   :  { %1611 = vst.msk [vmem:[%s2411_s4 + $0x2] sm:$0x1] %vm614_vm9, %v1285_v47 }
0x15bb   :  { %v1418_v48 = vpop.permute.xlu1 %1417 }
0x15bc   :  { %1614 = vst.msk [vmem:[%s2411_s4 + $0x1] sm:$0x1] %vm614_vm9, %v1418_v48 }
0x161a   :  { %v1538_v49 = vpop.permute.xlu0 %1537 }
0x161b   :  { %1616 = vst.msk [vmem:[%s2411_s4 + $0x7] sm:$0x1] %vm600_vm8, %v1538_v49 }
0x161c   :  { %v1550_v50 = vpop.permute.xlu1 %1549 }
0x161d   :  { %1552 = vst.msk [vmem:[%s2411_s4] sm:$0x1] %vm614_vm9, %v1550_v50 }

// kernel: lstm_net_forward.11
= control target key start
LH: loop header
LB: loop body
LE: loop exit
PB: predicated region body
PF: predicated region fallthrough
CT: control target
= control target key end

     0   :  { %v263_v0 = vmov 0.0   ;;  %vm264_vm0 = vmmov 0   ;;  %vm70_vm1 = vcmask 523264   ;;  %vm197_vm2 = vcmask 39936   ;;  %s334_s3 = inlined_call_operand.vmem [shape: bf16[64,5], index: 3, kind: input, shape index: {}]   ;;  %s335_s2 = inlined_call_operand.vmem [shape: bf16[64,5], index: 2, kind: input, shape index: {}]   ;;  %s336_s1 = inlined_call_operand.vmem [shape: bf16[16,64], index: 1, kind: input, shape index: {}]   ;;  %s337_s0 = inlined_call_operand.vmem [shape: bf16[16,64], index: 0, kind: input, shape index: {}]   ;;  %s338_s4 = inlined_call_operand.vmem [shape: f32[1,5], index: 4, kind: input, shape index: {}]   ;;  %s339_s5 = inlined_call_operand.vmem [shape: f32[16,5], index: 5, kind: output, shape index: {}]  }
   0x1   :  { %227 = vmatprep.subr.bf16.mxu0 %v263_v0  ;;  %239 = vmatprep.subr.bf16.mxu1 %v263_v0  ;;  %v253_v1 = vld [vmem:[%s334_s3 + $0x18] sm:$0xff]   ;;  %v255_v3 = vld [vmem:[%s334_s3 + $0x10] sm:$0xff]   ;;  %v257_v5 = vld [vmem:[%s334_s3 + $0x8] sm:$0xff]  }
   0x2   :  { %v254_v2 = vld [vmem:[%s335_s2 + $0x18] sm:$0xff]   ;;  %235 = vmatprep.mubr.msk.bf16.mxu0 %vm264_vm0, %v263_v0  ;;  %247 = vmatprep.mubr.msk.bf16.mxu1 %vm264_vm0, %v263_v0  ;;  %v256_v4 = vld [vmem:[%s335_s2 + $0x10] sm:$0xff]   ;;  %v258_v6 = vld [vmem:[%s335_s2 + $0x8] sm:$0xff]  }
   0x3   :  { %228 = vmatpush3.bf16.msra.mxu0 %v253_v1  ;;  %240 = vmatpush3.bf16.msra.mxu1 %v254_v2  ;;  %v259_v7 = vld [vmem:[%s334_s3] sm:$0xff]  }
   0x4   :  { %229 = vmatprep.subr.bf16.mxu0 %v263_v0  ;;  %241 = vmatprep.subr.bf16.mxu1 %v263_v0  ;;  %v260_v8 = vld [vmem:[%s335_s2] sm:$0xff]  }
   0x5   :  { %v261_v9 = vld [vmem:[%s336_s1] sm:$0xff]  }
   0x6   :  { %v262_v10 = vld [vmem:[%s337_s0] sm:$0xff]  }
   0x7   :  { %230 = vmatpush3.bf16.msra.mxu0 %v255_v3  ;;  %242 = vmatpush3.bf16.msra.mxu1 %v256_v4  ;;  %v216_v13 = vld [vmem:[%s338_s4] ss:$0 sm:$0xff] }
   0x8   :  { %231 = vmatprep.subr.bf16.mxu0 %v263_v0  ;;  %243 = vmatprep.subr.bf16.mxu1 %v263_v0 }
   0xb   :  { %232 = vmatpush3.bf16.msra.mxu0 %v257_v5  ;;  %244 = vmatpush3.bf16.msra.mxu1 %v258_v6 }
   0xc   :  { %233 = vmatprep.subr.bf16.mxu0 %v263_v0  ;;  %245 = vmatprep.subr.bf16.mxu1 %v263_v0 }
   0xf   :  { %234 = vmatpush3.bf16.msra.mxu0 %v259_v7  ;;  %246 = vmatpush3.bf16.msra.mxu1 %v260_v8 }
  0x12   :  { %236 = vmatmul.mubr.msk.bf16.vlgmr.msra.gmra.mxu0 %vm70_vm1, %v261_v9  ;;  %248 = vmatmul.mubr.msk.bf16.vlgmr.msra.gmra.mxu1 %vm70_vm1, %v262_v10 }
  0xd2   :  { %v108_v11 = vpop.f32.mrf.mxu0  ;;  %v181_v12 = vpop.f32.mrf.mxu1 }
  0xd3   :  { %v182_v14 = vadd.f32 %v181_v12, %v108_v11 }
  0xd4   :  { %v237_v15 = vpop.f32.mrf.mxu0  ;;  %v249_v16 = vpop.f32.mrf.mxu1 }
  0xd5   :  { %v195_v17 = vadd.f32 %v216_v13, %v182_v14 }
  0xd6   :  { %v111_v18 = vpop.f32.mrf.mxu0  ;;  %v184_v19 = vpop.f32.mrf.mxu1 }
  0xd7   :  { %198 = vst.msk [vmem:[%s339_s5] sm:$0xff] %vm197_vm2, %v195_v17  ;;  %v185_v20 = vadd.f32 %v184_v19, %v111_v18 }
  0xd8   :  { %v238_v21 = vpop.f32.mrf.mxu0  ;;  %v250_v22 = vpop.f32.mrf.mxu1 }
  0xd9   :  { %v196_v23 = vadd.f32 %v216_v13, %v185_v20 }
  0xdb   :  { %199 = vst.msk [vmem:[%s339_s5 + $0x8] sm:$0xff] %vm197_vm2, %v196_v23 }

// kernel: lstm_net_forward.10
= control target key start
LH: loop header
LB: loop body
LE: loop exit
PB: predicated region body
PF: predicated region fallthrough
CT: control target
= control target key end

     0   :  { %v55_v0 = vlaneseq  ;;  %v1771_v1 = vmov 0.0   ;;  %v1772_v3 = vmov 1966171168   ;;  %vm1773_vm0 = vmmov 0   ;;  %s1778_s30 = smov 32   ;;  %s2269_s1 = inlined_call_operand.vmem [shape: bf16[2,64,128], index: 1, kind: input, shape index: {}]   ;;  %s2270_s0 = inlined_call_operand.vmem [shape: bf16[8,2,64], index: 0, kind: input, shape index: {}]   ;;  %s2271_s2 = inlined_call_operand.vmem [shape: bf16[64,128], index: 2, kind: input, shape index: {}]   ;;  %s2272_s3 = inlined_call_operand.vmem [shape: f32[2,1,128], index: 3, kind: input, shape index: {}]   ;;  %s2273_s4 = inlined_call_operand.vmem [shape: bf16[8,2,64], index: 4, kind: output, shape index: {}]  }
   0x1   :  { %1591 = vmatprep.subr.bf16.mxu0 %v1771_v1  ;;  %1603 = vmatprep.subr.bf16.mxu1 %v1771_v1  ;;  %v1719_v2 = vld [vmem:[%s2269_s1 + $0x18] sm:$0xff]   ;;  %v53_v4 = vunpack.c.l.s4 %v1772_v3  ;;  %v1721_v6 = vld [vmem:[%s2269_s1 + $0x10] sm:$0xff]   ;;  %v1723_v10 = vld [vmem:[%s2269_s1 + $0x8] sm:$0xff]   ;;  %vm131_vm1 = vcmask 523264   ;;  %v1774_v40 = vmov 0.0|0.0   ;;  %vm425_vm5 = vcmask 1040384  }
   0x2   :  { %v1720_v5 = vld [vmem:[%s2269_s1 + $0x38] sm:$0xff]   ;;  %1599 = vmatprep.mubr.msk.bf16.mxu0 %vm1773_vm0, %v1771_v1  ;;  %1611 = vmatprep.mubr.msk.bf16.mxu1 %vm1773_vm0, %v1771_v1  ;;  %v1722_v7 = vld [vmem:[%s2269_s1 + $0x30] sm:$0xff]   ;;  %v1824_v9 = vshrl.u32 %v55_v0, 7  ;;  %v1724_v11 = vld [vmem:[%s2269_s1 + $0x28] sm:$0xff]   ;;  %v1775_v41 = vmov 1983009808  }
   0x3   :  { %1592 = vmatpush3.bf16.msra.mxu0 %v1719_v2  ;;  %1604 = vmatpush3.bf16.msra.mxu1 %v1720_v5  ;;  %v54_v8 = vunpack.c.0.s8 %v53_v4  ;;  %v1725_v13 = vld [vmem:[%s2269_s1] sm:$0xff]   ;;  %v1881_v35 = vld [vmem:[%s2271_s2 + $0x18] sm:$0xff]   ;;  %v1889_v37 = vld [vmem:[%s2271_s2 + $0x10] sm:$0xff]   ;;  %v123_v42 = vunpack.c.l.s4 %v1775_v41  ;;  %vm564_vm7 = vcmask 261120   ;;  %vm538_vm8 = vcmask 253952  }
   0x4   :  { %1593 = vmatprep.subr.bf16.mxu0 %v1771_v1  ;;  %1605 = vmatprep.subr.bf16.mxu1 %v1771_v1  ;;  %v18_v14 = vld [vmem:[%s2270_s0] sm:$0x1]  ;;  %v19_v15 = vld [vmem:[%s2270_s0 + $0x1] sm:$0x1]  ;;  %v20_v16 = vld [vmem:[%s2270_s0 + $0x2] sm:$0x1] }
   0x5   :  { %v1835_v12 = vsub.s32 %v54_v8, %v1824_v9  ;;  %v21_v17 = vld [vmem:[%s2270_s0 + $0x3] sm:$0x1]  ;;  %v22_v18 = vld [vmem:[%s2270_s0 + $0x4] sm:$0x1]  ;;  %v23_v19 = vld [vmem:[%s2270_s0 + $0x5] sm:$0x1]  ;;  %v48_v20 = vcombine.low %v18_v14, %v19_v15  ;;  %v124_v43 = vunpack.c.0.s8 %v123_v42 }
   0x6   :  { %v24_v21 = vld [vmem:[%s2270_s0 + $0x6] sm:$0x1]  ;;  %v25_v22 = vld [vmem:[%s2270_s0 + $0x7] sm:$0x1]  ;;  %v49_v23 = vcombine.low %v20_v16, %v21_v17  ;;  %v50_v24 = vcombine.low %v22_v18, %v23_v19  ;;  %v1902_v38 = vld [vmem:[%s2271_s2 + $0x8] sm:$0xff]   ;;  %vm404_vm6 = vcmp.lt.s32.totalorder %v1824_v9, 2 }
   0x7   :  { %1594 = vmatpush3.bf16.msra.mxu0 %v1721_v6  ;;  %1606 = vmatpush3.bf16.msra.mxu1 %v1722_v7  ;;  %v1726_v25 = vld [vmem:[%s2269_s1 + $0x20] sm:$0xff]   ;;  %v51_v26 = vcombine.low %v24_v21, %v25_v22  ;;  %v58_v27 = vrot.slane %v48_v20, %v1835_v12  ;;  %v127_v47 = vsub.s32 %v124_v43, %v1824_v9  ;;  %vm552_vm9 = vcmask 516352  }
   0x8   :  { %1595 = vmatprep.subr.bf16.mxu0 %v1771_v1  ;;  %1607 = vmatprep.subr.bf16.mxu1 %v1771_v1  ;;  %v65_v28 = vrot.slane %v49_v23, %v1835_v12  ;;  %v72_v29 = vrot.slane %v50_v24, %v1835_v12  ;;  %v1911_v39 = vld [vmem:[%s2271_s2] sm:$0xff]  }
   0x9   :  { %v79_v30 = vrot.slane %v51_v26, %v1835_v12  ;;  %v1495_v44 = vld [vmem:[%s2272_s3] ss:$0 sm:$0xff]  ;;  %v1510_v45 = vld [vmem:[%s2272_s3 + $0x1] ss:$0 sm:$0xff]  ;;  %s1777_s3 = smov 64  }
   0xa   :  { %v80_v31 = vcombine.low %v58_v27, %v65_v28  ;;  %v121_v46 = vcombine.low %v1495_v44, %v1495_v44  ;;  %v276_v48 = vcombine.low %v1510_v45, %v1510_v45 }
   0xb   :  { %1596 = vmatpush3.bf16.msra.mxu0 %v1723_v10  ;;  %1608 = vmatpush3.bf16.msra.mxu1 %v1724_v11  ;;  %v81_v32 = vcombine.low %v72_v29, %v79_v30 }
   0xc   :  { %1597 = vmatprep.subr.bf16.mxu0 %v1771_v1  ;;  %1609 = vmatprep.subr.bf16.mxu1 %v1771_v1  ;;  %v88_v33 = vrot.slane %v80_v31, %v1835_v12  ;;  %v128_v49 = vrot.slane %v121_v46, %v127_v47  ;;  %v283_v50 = vrot.slane %v276_v48, %v127_v47  ;;  %v396_v48 = vand.u32 127, %v55_v0 }
   0xd   :  { %v95_v34 = vrot.slane %v81_v32, %v1835_v12 }
   0xe   :  { %v129_v51 = vcombine.low %v128_v49, %v128_v49  ;;  %v284_v52 = vcombine.low %v283_v50, %v283_v50  ;;  %vm397_vm2 = vcmp.ge.s32.totalorder %v396_v48, 64  ;;  %vm398_vm3 = vcmp.lt.s32.totalorder %v396_v48, 96 }
   0xf   :  { %1598 = vmatpush3.bf16.msra.mxu0 %v1725_v13  ;;  %1610 = vmatpush3.bf16.msra.mxu1 %v1726_v25  ;;  %v96_v36 = vcombine.low %v88_v33, %v95_v34  ;;  %vm399_vm4 = vmand %vm397_vm2, %vm398_vm3 }
  0x10   :  { %1615 = vmatprep.subr.bf16.mxu0 %v1771_v1  ;;  %1627 = vmatprep.subr.bf16.mxu1 %v1771_v1 }
  0x12   :  { %1600 = vmatmul.mubr.msk.bf16.vlgmr.msra.gmra.mxu0 %vm131_vm1, %v96_v36  ;;  %1612 = vmatmul.mubr.msk.bf16.vlgmr.msra.gmra.mxu1 %vm131_vm1, %v96_v36 }
  0x13   :  { %1616 = vmatpush3.bf16.msra.mxu0 %v1881_v35  ;;  %1623 = vmatprep.mubr.msk.bf16.mxu0 %vm1773_vm0, %v1771_v1 }
  0x14   :  { %1617 = vmatprep.subr.bf16.mxu0 %v1771_v1  ;;  %1628 = vmatpush3.bf16.msra.mxu1 %v1881_v35 }
  0x15   :  { %1629 = vmatprep.subr.bf16.mxu1 %v1771_v1  ;;  %1635 = vmatprep.mubr.msk.bf16.mxu1 %vm1773_vm0, %v1771_v1 }
  0x17   :  { %1618 = vmatpush3.bf16.msra.mxu0 %v1889_v37 }
  0x18   :  { %1619 = vmatprep.subr.bf16.mxu0 %v1771_v1  ;;  %1630 = vmatpush3.bf16.msra.mxu1 %v1889_v37 }
  0x19   :  { %1631 = vmatprep.subr.bf16.mxu1 %v1771_v1 }
  0x1b   :  { %1620 = vmatpush3.bf16.msra.mxu0 %v1902_v38 }
  0x1c   :  { %1621 = vmatprep.subr.bf16.mxu0 %v1771_v1  ;;  %1632 = vmatpush3.bf16.msra.mxu1 %v1902_v38 }
  0x1d   :  { %1633 = vmatprep.subr.bf16.mxu1 %v1771_v1 }
  0x1f   :  { %1622 = vmatpush3.bf16.msra.mxu0 %v1911_v39 }
  0x20   :  { %1634 = vmatpush3.bf16.msra.mxu1 %v1911_v39  ;;  %1639 = vmatprep.subr.bf16.mxu0 %v1771_v1 }
  0x21   :  { %1651 = vmatprep.subr.bf16.mxu1 %v1771_v1 }
  0x22   :  { %1624 = vmatmul.mubr.bf16.vlgmr.msra.gmra.mxu0 %v1774_v40 }
  0x23   :  { %1640 = vmatpush3.bf16.msra.mxu0 %v1881_v35  ;;  %1647 = vmatprep.mubr.msk.bf16.mxu0 %vm1773_vm0, %v1771_v1 }
  0x24   :  { %1641 = vmatprep.subr.bf16.mxu0 %v1771_v1 }
  0x27   :  { %1642 = vmatpush3.bf16.msra.mxu0 %v1889_v37 }
  0x28   :  { %1643 = vmatprep.subr.bf16.mxu0 %v1771_v1 }
  0x2b   :  { %1644 = vmatpush3.bf16.msra.mxu0 %v1902_v38 }
  0x2c   :  { %1645 = vmatprep.subr.bf16.mxu0 %v1771_v1 }
  0x2f   :  { %1646 = vmatpush3.bf16.msra.mxu0 %v1911_v39 }
  0x30   :  { %1663 = vmatprep.subr.bf16.mxu0 %v1771_v1 }
  0xd2   :  { %v169_v53 = vpop.f32.mrf.mxu0  ;;  %v320_v54 = vpop.f32.mrf.mxu1 }
  0xd3   :  { %v170_v55 = vadd.f32 %v169_v53, %v129_v51  ;;  %v321_v56 = vadd.f32 %v320_v54, %v284_v52 }
  0xd4   :  { %v1601_v57 = vpop.f32.mrf.mxu0  ;;  %v1613_v58 = vpop.f32.mrf.mxu1 }
  0xd5   :  { %v178_v59 = vcombine.high %v170_v55, %v170_v55  ;;  %v185_v60 = vrot.slane %v170_v55, %v127_v47  ;;  %v329_v61 = vcombine.high %v321_v56, %v321_v56  ;;  %v336_v62 = vrot.slane %v321_v56, %v127_v47 }
  0xd6   :  { %v172_v63 = vpop.f32.mrf.mxu0  ;;  %v323_v2 = vpop.f32.mrf.mxu1  ;;  %v1776_v56 = vmov 0.5  }
  0xd7   :  { %v192_v3 = vrot.slane %v178_v59, %v127_v47  ;;  %v193_v4 = vcombine.high %v185_v60, %v185_v60  ;;  %v220_v5 = vpack.c.bf16 %v185_v60, %v185_v60  ;;  %v343_v6 = vrot.slane %v329_v61, %v127_v47 }
  0xd8   :  { %v344_v7 = vcombine.high %v336_v62, %v336_v62  ;;  %v371_v8 = vpack.c.bf16 %v336_v62, %v336_v62  ;;  %v173_v10 = vadd.f32 %v172_v63, %v129_v51  ;;  %v324_v11 = vadd.f32 %v323_v2, %v284_v52  ;;  %v1614_v13 = vpop.f32.mrf.mxu1  ;;  %v1602_v14 = vpop.f32.mrf.mxu0 }
  0xd9   :  { %v194_v15 = vcombine.high %v192_v3, %v192_v3  ;;  %v221_v16 = vpack.c.bf16 %v193_v4, %v193_v4  ;;  %v222_v17 = vpack.c.bf16 %v192_v3, %v192_v3  ;;  %228 = vst [vmem:[#allocation2] sm:$0x1] %v220_v5  ;;  %v345_v18 = vcombine.high %v343_v6, %v343_v6 }
  0xda   :  { %v372_v19 = vpack.c.bf16 %v344_v7, %v344_v7  ;;  %v373_v20 = vpack.c.bf16 %v343_v6, %v343_v6  ;;  %379 = vst [vmem:[#allocation3] sm:$0x1] %v371_v8  ;;  %v195_v21 = vcombine.high %v173_v10, %v173_v10  ;;  %v202_v22 = vrot.slane %v173_v10, %v127_v47 }
  0xdb   :  { %v223_v23 = vpack.c.bf16 %v194_v15, %v194_v15  ;;  %229 = vst [vmem:[#allocation2 + $0x1] sm:$0x1] %v221_v16  ;;  %230 = vst [vmem:[#allocation2 + $0x2] sm:$0x1] %v222_v17  ;;  %v374_v24 = vpack.c.bf16 %v345_v18, %v345_v18  ;;  %v346_v25 = vcombine.high %v324_v11, %v324_v11  ;;  %v1941_v57 = vsel %vm399_vm4, 1.0, %v1776_v56 }
  0xdc   :  { %v353_v26 = vrot.slane %v324_v11, %v127_v47  ;;  %380 = vst [vmem:[#allocation3 + $0x1] sm:$0x1] %v372_v19  ;;  %381 = vst [vmem:[#allocation3 + $0x2] sm:$0x1] %v373_v20  ;;  %v209_v27 = vrot.slane %v195_v21, %v127_v47  ;;  %v210_v28 = vcombine.high %v202_v22, %v202_v22  ;;  %v1944_v60 = vsel %vm399_vm4, 0.0, %v1776_v56 }
  0xdd   :  { %v224_v29 = vpack.c.bf16 %v202_v22, %v202_v22  ;;  %231 = vst [vmem:[#allocation2 + $0x3] sm:$0x1] %v223_v23  ;;  %382 = vst [vmem:[#allocation3 + $0x3] sm:$0x1] %v374_v24  ;;  %v360_v30 = vrot.slane %v346_v25, %v127_v47 }
  0xde   :  { %v361_v31 = vcombine.high %v353_v26, %v353_v26  ;;  %v375_v32 = vpack.c.bf16 %v353_v26, %v353_v26  ;;  %v211_v33 = vcombine.high %v209_v27, %v209_v27  ;;  %v225_v34 = vpack.c.bf16 %v210_v28, %v210_v28 }
  0xdf   :  { %v226_v36 = vpack.c.bf16 %v209_v27, %v209_v27  ;;  %232 = vst [vmem:[#allocation2 + $0x4] sm:$0x1] %v224_v29  ;;  %v362_v40 = vcombine.high %v360_v30, %v360_v30  ;;  %v377_v42 = vpack.c.bf16 %v360_v30, %v360_v30 }
  0xe0   :  { %v376_v41 = vpack.c.bf16 %v361_v31, %v361_v31  ;;  %383 = vst [vmem:[#allocation3 + $0x4] sm:$0x1] %v375_v32  ;;  %v227_v43 = vpack.c.bf16 %v211_v33, %v211_v33  ;;  %233 = vst [vmem:[#allocation2 + $0x5] sm:$0x1] %v225_v34  ;;  %v406_v52 = vld [vmem:[#allocation2] sm:$0x1] }
  0xe1   :  { %234 = vst [vmem:[#allocation2 + $0x6] sm:$0x1] %v226_v36  ;;  %v378_v44 = vpack.c.bf16 %v362_v40, %v362_v40  ;;  %385 = vst [vmem:[#allocation3 + $0x6] sm:$0x1] %v377_v42 }
  0xe2   :  { %384 = vst [vmem:[#allocation3 + $0x5] sm:$0x1] %v376_v41  ;;  %235 = vst [vmem:[#allocation2 + $0x7] sm:$0x1] %v227_v43  ;;  %v492_v45 = vpop.f32.mrf.mxu0  ;;  %v568_v20 = vld [vmem:[#allocation2 + $0x1] sm:$0x1] }
  0xe3   :  { %386 = vst [vmem:[#allocation3 + $0x7] sm:$0x1] %v378_v44 }
  0xe4   :  { %v1625_v46 = vpop.f32.mrf.mxu0 }
  0xe6   :  { %v495_v47 = vpop.f32.mrf.mxu0 }
  0xe8   :  { %v1626_v49 = vpop.f32.mrf.mxu0  ;;  %v1732_v17 = vld [vmem:[#allocation3 + $0x6] ss:$0 sps:$4 sm:$0x11]  }
  0xe9   :  { %v579_v18 = vrot.slane %v1732_v17, %v1835_v12 }
  0xea   :  { %v1731_v50 = vld [vmem:[#allocation3 + $0x7] ss:$0 sps:$4 sm:$0x11]  }
  0xeb   :  { %v417_v51 = vrot.slane %v1731_v50, %v1835_v12  ;;  %v586_v19 = vrot.slane %v579_v18, %v1835_v12  ;;  %v1733_v50 = vld [vmem:[#allocation3 + $0x5] ss:$0 sps:$4 sm:$0x11]  }
  0xed   :  { %v424_v53 = vrot.slane %v417_v51, %v1835_v12  ;;  %v589_v21 = vsel %vm425_vm5, %v568_v20, %v586_v19  ;;  %v714_v51 = vrot.slane %v1733_v50, %v1835_v12 }
  0xee   :  { %v591_v22 = vunpack.c.l.bf16 %v589_v21  ;;  %v1734_v21 = vld [vmem:[#allocation3 + $0x4] ss:$0 sps:$4 sm:$0x11]  }
  0xef   :  { %v428_v54 = vsel %vm425_vm5, %v406_v52, %v424_v53  ;;  %v721_v52 = vrot.slane %v714_v51, %v1835_v12  ;;  %v703_v53 = vld [vmem:[#allocation2 + $0x2] sm:$0x1] }
  0xf0   :  { %v430_v55 = vunpack.c.l.bf16 %v428_v54 }
  0xf1   :  { %v724_v54 = vsel %vm425_vm5, %v703_v53, %v721_v52 }
  0xf2   :  { %v493_v58 = vadd.f32 %v492_v45, %v430_v55  ;;  %v726_v55 = vunpack.c.l.bf16 %v724_v54 }
  0xf4   :  { %v498_v0 = vmul.f32 %v493_v58, %v1941_v57 }
  0xf6   :  { %1739 = vtanh.f32 %v498_v0 }
 0x103   :  { %v1740_v59 = vpop.eup %1739 }
 0x104   :  { %v500_v61 = vmul.f32 %v1740_v59, %v1941_v57 }
 0x106   :  { %v501_v62 = vadd.f32 %v500_v61, %v1944_v60 }
 0x108   :  { %504 = vrot.lane.b32.xlu0 %v501_v62, %s1777_s3  ;;  %v502_v3 = vmul.f32 0.0, %v501_v62 }
 0x17a   :  { %v505_v63 = vpop.permute.xlu0 %504 }
 0x17b   :  { %v507_v2 = vmul.f32 %v505_v63, %v501_v62 }
 0x17d   :  { %509 = vrot.lane.b32.xlu0 %v507_v2, %s1778_s30 }
 0x1ef   :  { %v510_v4 = vpop.permute.xlu0 %509 }
 0x1f0   :  { %v512_v5 = vadd.f32 %v510_v4, %v502_v3 }
 0x1f2   :  { %1741 = vtanh.f32 %v512_v5 }
 0x1ff   :  { %v1742_v6 = vpop.eup %1741 }
 0x200   :  { %515 = vrot.lane.b32.xlu1 %v1742_v6, %s1777_s3 }
 0x272   :  { %v516_v7 = vpop.permute.xlu1 %515 }
 0x273   :  { %v1952_v8 = vmul.f32 %v516_v7, %v501_v62 }
 0x275   :  { %v555_v10 = vsel %vm404_vm6, 0.0, %v1952_v8  ;;  %v554_v11 = vsel %vm404_vm6, %v1952_v8, 0.0 }
 0x276   :  { %561 = vrot.lane.b32.xlu0 %v555_v10, %s1777_s3  ;;  %557 = vrot.lane.b32.xlu1 %v554_v11, %s1778_s30 }
 0x2e8   :  { %v562_v13 = vpop.permute.xlu0 %561  ;;  %v558_v14 = vpop.permute.xlu1 %557 }
 0x2e9   :  { %v565_v15 = vsel %vm564_vm7, %v558_v14, %v562_v13 }
 0x2ea   :  { %v566_v16 = vpack.c.bf16 %v565_v15, %v565_v15 }
 0x2ec   :  { %1636 = vmatmul.mubr.msk.bf16.vlgmr.msra.gmra.mxu1 %vm131_vm1, %v566_v16 }
 0x2ed   :  { %1652 = vmatpush3.bf16.msra.mxu1 %v1881_v35  ;;  %1659 = vmatprep.mubr.msk.bf16.mxu1 %vm1773_vm0, %v1771_v1 }
 0x2ee   :  { %1653 = vmatprep.subr.bf16.mxu1 %v1771_v1 }
 0x2f1   :  { %1654 = vmatpush3.bf16.msra.mxu1 %v1889_v37 }
 0x2f2   :  { %1655 = vmatprep.subr.bf16.mxu1 %v1771_v1 }
 0x2f5   :  { %1656 = vmatpush3.bf16.msra.mxu1 %v1902_v38 }
 0x2f6   :  { %1657 = vmatprep.subr.bf16.mxu1 %v1771_v1 }
 0x2f9   :  { %1658 = vmatpush3.bf16.msra.mxu1 %v1911_v39 }
 0x2fa   :  { %1675 = vmatprep.subr.bf16.mxu1 %v1771_v1 }
 0x3ac   :  { %v629_v23 = vpop.f32.mrf.mxu1 }
 0x3ad   :  { %v630_v24 = vadd.f32 %v629_v23, %v591_v22  ;;  %v849_v22 = vrot.slane %v1734_v21, %v1835_v12 }
 0x3ae   :  { %v1637_v25 = vpop.f32.mrf.mxu1 }
 0x3af   :  { %v635_v26 = vmul.f32 %v630_v24, %v1941_v57  ;;  %v856_v23 = vrot.slane %v849_v22, %v1835_v12  ;;  %v838_v24 = vld [vmem:[#allocation2 + $0x3] sm:$0x1] }
 0x3b0   :  { %v632_v27 = vpop.f32.mrf.mxu1 }
 0x3b1   :  { %1743 = vtanh.f32 %v635_v26  ;;  %v859_v25 = vsel %vm425_vm5, %v838_v24, %v856_v23 }
 0x3b2   :  { %v1638_v28 = vpop.f32.mrf.mxu1  ;;  %v861_v26 = vunpack.c.l.bf16 %v859_v25 }
 0x3be   :  { %v1744_v29 = vpop.eup %1743 }
 0x3bf   :  { %v637_v30 = vmul.f32 %v1744_v29, %v1941_v57 }
 0x3c1   :  { %v638_v31 = vadd.f32 %v637_v30, %v1944_v60 }
 0x3c3   :  { %641 = vrot.lane.b32.xlu1 %v638_v31, %s1777_s3  ;;  %v639_v34 = vmul.f32 %v638_v31, %v512_v5 }
 0x435   :  { %v642_v32 = vpop.permute.xlu1 %641 }
 0x436   :  { %v644_v33 = vmul.f32 %v642_v32, %v638_v31 }
 0x438   :  { %646 = vrot.lane.b32.xlu0 %v644_v33, %s1778_s30 }
 0x4aa   :  { %v647_v36 = vpop.permute.xlu0 %646 }
 0x4ab   :  { %v649_v40 = vadd.f32 %v647_v36, %v639_v34 }
 0x4ad   :  { %1745 = vtanh.f32 %v649_v40 }
 0x4ba   :  { %v1746_v41 = vpop.eup %1745 }
 0x4bb   :  { %652 = vrot.lane.b32.xlu1 %v1746_v41, %s1777_s3 }
 0x52d   :  { %v653_v42 = vpop.permute.xlu1 %652 }
 0x52e   :  { %v1983_v43 = vmul.f32 %v653_v42, %v638_v31 }
 0x530   :  { %v691_v44 = vsel %vm404_vm6, 0.0, %v1983_v43  ;;  %v690_v45 = vsel %vm404_vm6, %v1983_v43, 0.0 }
 0x531   :  { %697 = vrot.lane.b32.xlu1 %v691_v44, %s1777_s3  ;;  %693 = vrot.lane.b32.xlu0 %v690_v45, %s1778_s30 }
 0x5a3   :  { %v698_v46 = vpop.permute.xlu1 %697  ;;  %v694_v47 = vpop.permute.xlu0 %693 }
 0x5a4   :  { %v700_v48 = vsel %vm564_vm7, %v694_v47, %v698_v46 }
 0x5a5   :  { %v701_v49 = vpack.c.bf16 %v700_v48, %v700_v48 }
 0x5a7   :  { %1648 = vmatmul.mubr.msk.bf16.vlgmr.msra.gmra.mxu0 %vm131_vm1, %v701_v49 }
 0x5a8   :  { %1664 = vmatpush3.bf16.msra.mxu0 %v1881_v35  ;;  %1671 = vmatprep.mubr.msk.bf16.mxu0 %vm1773_vm0, %v1771_v1 }
 0x5a9   :  { %1665 = vmatprep.subr.bf16.mxu0 %v1771_v1 }
 0x5ac   :  { %1666 = vmatpush3.bf16.msra.mxu0 %v1889_v37 }
 0x5ad   :  { %1667 = vmatprep.subr.bf16.mxu0 %v1771_v1 }
 0x5b0   :  { %1668 = vmatpush3.bf16.msra.mxu0 %v1902_v38 }
 0x5b1   :  { %1669 = vmatprep.subr.bf16.mxu0 %v1771_v1 }
 0x5b4   :  { %1670 = vmatpush3.bf16.msra.mxu0 %v1911_v39 }
 0x5b5   :  { %1687 = vmatprep.subr.bf16.mxu0 %v1771_v1 }
 0x667   :  { %v764_v56 = vpop.f32.mrf.mxu0 }
 0x668   :  { %v765_v58 = vadd.f32 %v764_v56, %v726_v55  ;;  %v1735_v55 = vld [vmem:[#allocation3 + $0x3] ss:$0 sps:$4 sm:$0x11]  }
 0x669   :  { %v1649_v0 = vpop.f32.mrf.mxu0  ;;  %v984_v56 = vrot.slane %v1735_v55, %v1835_v12 }
 0x66a   :  { %v770_v59 = vmul.f32 %v765_v58, %v1941_v57  ;;  %v973_v0 = vld [vmem:[#allocation2 + $0x4] sm:$0x1] }
 0x66b   :  { %v767_v61 = vpop.f32.mrf.mxu0  ;;  %v991_v58 = vrot.slane %v984_v56, %v1835_v12 }
 0x66c   :  { %1747 = vtanh.f32 %v770_v59 }
 0x66d   :  { %v1650_v62 = vpop.f32.mrf.mxu0  ;;  %v994_v59 = vsel %vm425_vm5, %v973_v0, %v991_v58  ;;  %v1737_v58 = vld [vmem:[#allocation3 + $0x1] ss:$0 sps:$4 sm:$0x11]  }
 0x66e   :  { %v996_v61 = vunpack.c.l.bf16 %v994_v59  ;;  %v1250_v0 = vrot.slane %v1737_v58, %v1835_v12 }
 0x670   :  { %v1257_v59 = vrot.slane %v1250_v0, %v1835_v12 }
 0x679   :  { %v1748_v63 = vpop.eup %1747 }
 0x67a   :  { %v772_v2 = vmul.f32 %v1748_v63, %v1941_v57 }
 0x67c   :  { %v773_v3 = vadd.f32 %v772_v2, %v1944_v60 }
 0x67e   :  { %776 = vrot.lane.b32.xlu0 %v773_v3, %s1777_s3  ;;  %v774_v6 = vmul.f32 %v773_v3, %v649_v40 }
 0x6f0   :  { %v777_v4 = vpop.permute.xlu0 %776 }
 0x6f1   :  { %v779_v5 = vmul.f32 %v777_v4, %v773_v3 }
 0x6f3   :  { %781 = vrot.lane.b32.xlu1 %v779_v5, %s1778_s30 }
 0x765   :  { %v782_v7 = vpop.permute.xlu1 %781 }
 0x766   :  { %v784_v10 = vadd.f32 %v782_v7, %v774_v6 }
 0x768   :  { %1749 = vtanh.f32 %v784_v10 }
 0x775   :  { %v1750_v11 = vpop.eup %1749 }
 0x776   :  { %787 = vrot.lane.b32.xlu0 %v1750_v11, %s1777_s3 }
 0x7e8   :  { %v788_v13 = vpop.permute.xlu0 %787 }
 0x7e9   :  { %v2014_v14 = vmul.f32 %v788_v13, %v773_v3 }
 0x7eb   :  { %v826_v15 = vsel %vm404_vm6, 0.0, %v2014_v14  ;;  %v825_v16 = vsel %vm404_vm6, %v2014_v14, 0.0 }
 0x7ec   :  { %832 = vrot.lane.b32.xlu0 %v826_v15, %s1777_s3  ;;  %828 = vrot.lane.b32.xlu1 %v825_v16, %s1778_s30 }
 0x85e   :  { %v833_v17 = vpop.permute.xlu0 %832  ;;  %v829_v18 = vpop.permute.xlu1 %828 }
 0x85f   :  { %v835_v19 = vsel %vm564_vm7, %v829_v18, %v833_v17 }
 0x860   :  { %v836_v20 = vpack.c.bf16 %v835_v19, %v835_v19 }
 0x862   :  { %1660 = vmatmul.mubr.msk.bf16.vlgmr.msra.gmra.mxu1 %vm131_vm1, %v836_v20 }
 0x863   :  { %1676 = vmatpush3.bf16.msra.mxu1 %v1881_v35  ;;  %1683 = vmatprep.mubr.msk.bf16.mxu1 %vm1773_vm0, %v1771_v1 }
 0x864   :  { %1677 = vmatprep.subr.bf16.mxu1 %v1771_v1 }
 0x867   :  { %1678 = vmatpush3.bf16.msra.mxu1 %v1889_v37 }
 0x868   :  { %1679 = vmatprep.subr.bf16.mxu1 %v1771_v1 }
 0x86b   :  { %1680 = vmatpush3.bf16.msra.mxu1 %v1902_v38 }
 0x86c   :  { %1681 = vmatprep.subr.bf16.mxu1 %v1771_v1 }
 0x86f   :  { %1682 = vmatpush3.bf16.msra.mxu1 %v1911_v39 }
 0x870   :  { %1699 = vmatprep.subr.bf16.mxu1 %v1771_v1 }
 0x922   :  { %v899_v27 = vpop.f32.mrf.mxu1 }
 0x923   :  { %v900_v28 = vadd.f32 %v899_v27, %v861_v26  ;;  %v1736_v27 = vld [vmem:[#allocation3 + $0x2] ss:$0 sps:$4 sm:$0x11]  }
 0x924   :  { %v1661_v29 = vpop.f32.mrf.mxu1 }
 0x925   :  { %v905_v30 = vmul.f32 %v900_v28, %v1941_v57  ;;  %v1117_v28 = vrot.slane %v1736_v27, %v1835_v12  ;;  %v1106_v29 = vld [vmem:[#allocation2 + $0x5] sm:$0x1] }
 0x926   :  { %v902_v31 = vpop.f32.mrf.mxu1 }
 0x927   :  { %1751 = vtanh.f32 %v905_v30 }
 0x928   :  { %v1662_v32 = vpop.f32.mrf.mxu1 }
 0x934   :  { %v1752_v33 = vpop.eup %1751 }
 0x935   :  { %v907_v34 = vmul.f32 %v1752_v33, %v1941_v57 }
 0x937   :  { %v908_v36 = vadd.f32 %v907_v34, %v1944_v60 }
 0x939   :  { %911 = vrot.lane.b32.xlu1 %v908_v36, %s1777_s3  ;;  %v909_v42 = vmul.f32 %v908_v36, %v784_v10 }
 0x9ab   :  { %v912_v40 = vpop.permute.xlu1 %911 }
 0x9ac   :  { %v914_v41 = vmul.f32 %v912_v40, %v908_v36 }
 0x9ae   :  { %916 = vrot.lane.b32.xlu0 %v914_v41, %s1778_s30 }
 0xa20   :  { %v917_v44 = vpop.permute.xlu0 %916 }
 0xa21   :  { %v919_v45 = vadd.f32 %v917_v44, %v909_v42 }
 0xa23   :  { %1753 = vtanh.f32 %v919_v45 }
 0xa30   :  { %v1754_v46 = vpop.eup %1753 }
 0xa31   :  { %922 = vrot.lane.b32.xlu1 %v1754_v46, %s1777_s3 }
 0xaa3   :  { %v923_v47 = vpop.permute.xlu1 %922 }
 0xaa4   :  { %v2045_v48 = vmul.f32 %v923_v47, %v908_v36 }
 0xaa6   :  { %v961_v49 = vsel %vm404_vm6, 0.0, %v2045_v48  ;;  %v960_v50 = vsel %vm404_vm6, %v2045_v48, 0.0 }
 0xaa7   :  { %967 = vrot.lane.b32.xlu1 %v961_v49, %s1777_s3  ;;  %963 = vrot.lane.b32.xlu0 %v960_v50, %s1778_s30 }
 0xb19   :  { %v968_v51 = vpop.permute.xlu1 %967  ;;  %v964_v52 = vpop.permute.xlu0 %963 }
 0xb1a   :  { %v970_v53 = vsel %vm564_vm7, %v964_v52, %v968_v51 }
 0xb1b   :  { %v971_v54 = vpack.c.bf16 %v970_v53, %v970_v53 }
 0xb1d   :  { %1672 = vmatmul.mubr.msk.bf16.vlgmr.msra.gmra.mxu0 %vm131_vm1, %v971_v54 }
 0xb1e   :  { %1688 = vmatpush3.bf16.msra.mxu0 %v1881_v35  ;;  %1695 = vmatprep.mubr.msk.bf16.mxu0 %vm1773_vm0, %v1771_v1 }
 0xb1f   :  { %1689 = vmatprep.subr.bf16.mxu0 %v1771_v1 }
 0xb22   :  { %1690 = vmatpush3.bf16.msra.mxu0 %v1889_v37 }
 0xb23   :  { %1691 = vmatprep.subr.bf16.mxu0 %v1771_v1 }
 0xb26   :  { %1692 = vmatpush3.bf16.msra.mxu0 %v1902_v38 }
 0xb27   :  { %1693 = vmatprep.subr.bf16.mxu0 %v1771_v1 }
 0xb2a   :  { %1694 = vmatpush3.bf16.msra.mxu0 %v1911_v39 }
 0xbdd   :  { %v1034_v62 = vpop.f32.mrf.mxu0 }
 0xbde   :  { %v1035_v63 = vadd.f32 %v1034_v62, %v996_v61  ;;  %v1239_v61 = vld [vmem:[#allocation2 + $0x6] sm:$0x1] }
 0xbdf   :  { %v1673_v2 = vpop.f32.mrf.mxu0  ;;  %v1260_v62 = vsel %vm425_vm5, %v1239_v61, %v1257_v59 }
 0xbe0   :  { %v1040_v3 = vmul.f32 %v1035_v63, %v1941_v57  ;;  %v1262_v63 = vunpack.c.l.bf16 %v1260_v62 }
 0xbe1   :  { %v1037_v4 = vpop.f32.mrf.mxu0 }
 0xbe2   :  { %1755 = vtanh.f32 %v1040_v3 }
 0xbe3   :  { %v1674_v5 = vpop.f32.mrf.mxu0 }
 0xbef   :  { %v1756_v6 = vpop.eup %1755 }
 0xbf0   :  { %v1042_v7 = vmul.f32 %v1756_v6, %v1941_v57 }
 0xbf2   :  { %v1043_v10 = vadd.f32 %v1042_v7, %v1944_v60 }
 0xbf4   :  { %1046 = vrot.lane.b32.xlu0 %v1043_v10, %s1777_s3  ;;  %v1044_v15 = vmul.f32 %v1043_v10, %v919_v45 }
 0xc66   :  { %v1047_v11 = vpop.permute.xlu0 %1046 }
 0xc67   :  { %v1049_v13 = vmul.f32 %v1047_v11, %v1043_v10 }
 0xc69   :  { %1051 = vrot.lane.b32.xlu1 %v1049_v13, %s1778_s30 }
 0xcdb   :  { %v1052_v16 = vpop.permute.xlu1 %1051 }
 0xcdc   :  { %v1054_v17 = vadd.f32 %v1052_v16, %v1044_v15 }
 0xcde   :  { %1757 = vtanh.f32 %v1054_v17 }
 0xceb   :  { %v1758_v18 = vpop.eup %1757 }
 0xcec   :  { %1057 = vrot.lane.b32.xlu0 %v1758_v18, %s1777_s3 }
 0xd5e   :  { %v1058_v19 = vpop.permute.xlu0 %1057 }
 0xd5f   :  { %v2075_v20 = vmul.f32 %v1058_v19, %v1043_v10 }
 0xd61   :  { %v1094_v21 = vsel %vm404_vm6, 0.0, %v2075_v20  ;;  %v1093_v22 = vsel %vm404_vm6, %v2075_v20, 0.0 }
 0xd62   :  { %1100 = vrot.lane.b32.xlu0 %v1094_v21, %s1777_s3  ;;  %1096 = vrot.lane.b32.xlu1 %v1093_v22, %s1778_s30 }
 0xdd4   :  { %v1101_v23 = vpop.permute.xlu0 %1100  ;;  %v1097_v24 = vpop.permute.xlu1 %1096 }
 0xdd5   :  { %v1103_v25 = vsel %vm564_vm7, %v1097_v24, %v1101_v23 }
 0xdd6   :  { %v1104_v26 = vpack.c.bf16 %v1103_v25, %v1103_v25 }
 0xdd8   :  { %1684 = vmatmul.mubr.msk.bf16.vlgmr.msra.gmra.mxu1 %vm131_vm1, %v1104_v26 }
 0xdd9   :  { %1700 = vmatpush3.bf16.msra.mxu1 %v1881_v35  ;;  %1707 = vmatprep.mubr.msk.bf16.mxu1 %vm1773_vm0, %v1771_v1  ;;  %v1124_v35 = vrot.slane %v1117_v28, %v1835_v12 }
 0xdda   :  { %1701 = vmatprep.subr.bf16.mxu1 %v1771_v1 }
 0xddb   :  { %v1127_v30 = vsel %vm425_vm5, %v1106_v29, %v1124_v35  ;;  %v1738_v29 = vld [vmem:[#allocation3] ss:$0 sps:$4 sm:$0x11]  }
 0xddc   :  { %v1129_v31 = vunpack.c.l.bf16 %v1127_v30  ;;  %v1382_v30 = vrot.slane %v1738_v29, %v1835_v12 }
 0xddd   :  { %1702 = vmatpush3.bf16.msra.mxu1 %v1889_v37 }
 0xdde   :  { %1703 = vmatprep.subr.bf16.mxu1 %v1771_v1 }
 0xde1   :  { %1704 = vmatpush3.bf16.msra.mxu1 %v1902_v38 }
 0xde2   :  { %1705 = vmatprep.subr.bf16.mxu1 %v1771_v1 }
 0xde5   :  { %1706 = vmatpush3.bf16.msra.mxu1 %v1911_v39 }
 0xe98   :  { %v1167_v32 = vpop.f32.mrf.mxu1 }
 0xe99   :  { %v1168_v33 = vadd.f32 %v1167_v32, %v1129_v31  ;;  %v1372_v31 = vld [vmem:[#allocation2 + $0x7] sm:$0x1]  ;;  %v1389_v32 = vrot.slane %v1382_v30, %v1835_v12 }
 0xe9a   :  { %v1685_v37 = vpop.f32.mrf.mxu1 }
 0xe9b   :  { %v1173_v34 = vmul.f32 %v1168_v33, %v1941_v57  ;;  %v1392_v9 = vsel %vm425_vm5, %v1372_v31, %v1389_v32 }
 0xe9c   :  { %v1170_v36 = vpop.f32.mrf.mxu1  ;;  %v1394_v33 = vunpack.c.l.bf16 %v1392_v9 }
 0xe9d   :  { %1759 = vtanh.f32 %v1173_v34 }
 0xe9e   :  { %v1686_v38 = vpop.f32.mrf.mxu1 }
 0xeaa   :  { %v1760_v1 = vpop.eup %1759 }
 0xeab   :  { %v1175_v39 = vmul.f32 %v1760_v1, %v1941_v57 }
 0xead   :  { %v1176_v40 = vadd.f32 %v1175_v39, %v1944_v60 }
 0xeaf   :  { %1179 = vrot.lane.b32.xlu1 %v1176_v40, %s1777_s3  ;;  %v1177_v44 = vmul.f32 %v1176_v40, %v1054_v17 }
 0xf21   :  { %v1180_v41 = vpop.permute.xlu1 %1179 }
 0xf22   :  { %v1182_v42 = vmul.f32 %v1180_v41, %v1176_v40 }
 0xf24   :  { %1184 = vrot.lane.b32.xlu0 %v1182_v42, %s1778_s30 }
 0xf96   :  { %v1185_v45 = vpop.permute.xlu0 %1184 }
 0xf97   :  { %v1187_v46 = vadd.f32 %v1185_v45, %v1177_v44  ;;  %v519_v44 = vpack.c.bf16 %v1952_v8, %v1952_v8  ;;  %v926_v8 = vpack.c.bf16 %v2045_v48, %v2045_v48 }
 0xf99   :  { %1761 = vtanh.f32 %v1187_v46 }
 0xfa6   :  { %v1762_v47 = vpop.eup %1761 }
 0xfa7   :  { %1190 = vrot.lane.b32.xlu1 %v1762_v47, %s1777_s3 }
0x1019   :  { %v1191_v49 = vpop.permute.xlu1 %1190 }
0x101a   :  { %v2105_v50 = vmul.f32 %v1191_v49, %v1176_v40  ;;  %v527_v49 = vrot.slane %v519_v44, %v1835_v12 }
0x101c   :  { %v1227_v51 = vsel %vm404_vm6, 0.0, %v2105_v50  ;;  %v1226_v52 = vsel %vm404_vm6, %v2105_v50, 0.0 }
0x101d   :  { %1233 = vrot.lane.b32.xlu1 %v1227_v51, %s1777_s3  ;;  %1229 = vrot.lane.b32.xlu0 %v1226_v52, %s1778_s30 }
0x108f   :  { %v1234_v53 = vpop.permute.xlu1 %1233  ;;  %v1230_v54 = vpop.permute.xlu0 %1229 }
0x1090   :  { %v1236_v55 = vsel %vm564_vm7, %v1230_v54, %v1234_v53  ;;  %v1061_v53 = vpack.c.bf16 %v2075_v20, %v2075_v20  ;;  %v934_v54 = vrot.slane %v926_v8, %v1835_v12 }
0x1091   :  { %v1237_v56 = vpack.c.bf16 %v1236_v55, %v1236_v55  ;;  %v1194_v55 = vpack.c.bf16 %v2105_v50, %v2105_v50 }
0x1092   :  { %v941_v48 = vrot.slane %v934_v54, %v1835_v12 }
0x1093   :  { %1696 = vmatmul.mubr.msk.bf16.vlgmr.msra.gmra.mxu0 %vm131_vm1, %v1237_v56  ;;  %v1069_v56 = vrot.slane %v1061_v53, %v1835_v12  ;;  %v1202_v20 = vrot.slane %v1194_v55, %v1835_v12 }
0x1095   :  { %v1076_v0 = vrot.slane %v1069_v56, %v1835_v12  ;;  %v1209_v59 = vrot.slane %v1202_v20, %v1835_v12 }
0x1153   :  { %v1300_v2 = vpop.f32.mrf.mxu0 }
0x1154   :  { %v1301_v3 = vadd.f32 %v1300_v2, %v1262_v63 }
0x1155   :  { %v1697_v4 = vpop.f32.mrf.mxu0 }
0x1156   :  { %v1306_v5 = vmul.f32 %v1301_v3, %v1941_v57 }
0x1157   :  { %v1303_v6 = vpop.f32.mrf.mxu0 }
0x1158   :  { %1763 = vtanh.f32 %v1306_v5  ;;  %v540_v6 = vcombine.high %v527_v49, %v527_v49 }
0x1159   :  { %v1698_v7 = vpop.f32.mrf.mxu0 }
0x1165   :  { %v1764_v10 = vpop.eup %1763 }
0x1166   :  { %v1308_v11 = vmul.f32 %v1764_v10, %v1941_v57 }
0x1168   :  { %v1309_v13 = vadd.f32 %v1308_v11, %v1944_v60  ;;  %v547_v11 = vrot.slane %v540_v6, %v1835_v12 }
0x116a   :  { %1312 = vrot.lane.b32.xlu0 %v1309_v13, %s1777_s3  ;;  %v1310_v17 = vmul.f32 %v1309_v13, %v1187_v46  ;;  %v656_v46 = vpack.c.bf16 %v1983_v43, %v1983_v43 }
0x116c   :  { %v664_v51 = vrot.slane %v656_v46, %v1835_v12 }
0x116e   :  { %v671_v43 = vrot.slane %v664_v51, %v1835_v12 }
0x11dc   :  { %v1313_v15 = vpop.permute.xlu0 %1312 }
0x11dd   :  { %v1315_v16 = vmul.f32 %v1313_v15, %v1309_v13 }
0x11df   :  { %1317 = vrot.lane.b32.xlu1 %v1315_v16, %s1778_s30 }
0x1251   :  { %v1318_v18 = vpop.permute.xlu1 %1317 }
0x1252   :  { %v2125_v19 = vadd.f32 %v1318_v18, %v1310_v17  ;;  %v947_v18 = vcombine.high %v934_v54, %v934_v54 }
0x1254   :  { %1765 = vtanh.f32 %v2125_v19 }
0x1261   :  { %v1766_v21 = vpop.eup %1765 }
0x1262   :  { %1323 = vrot.lane.b32.xlu0 %v1766_v21, %s1777_s3  ;;  %v1081_v21 = vcombine.high %v1069_v56, %v1069_v56 }
0x12d4   :  { %v1324_v22 = vpop.permute.xlu0 %1323 }
0x12d5   :  { %v1326_v23 = vmul.f32 %v1324_v22, %v1309_v13  ;;  %v677_v13 = vcombine.high %v664_v51, %v664_v51  ;;  %v1088_v22 = vrot.slane %v1081_v21, %v1835_v12 }
0x12d7   :  { %v1360_v24 = vsel %vm404_vm6, 0.0, %v1326_v23  ;;  %v1359_v25 = vsel %vm404_vm6, %v1326_v23, 0.0  ;;  %v1327_v58 = vpack.c.bf16 %v1326_v23, %v1326_v23  ;;  %v684_v15 = vrot.slane %v677_v13, %v1835_v12 }
0x12d8   :  { %1366 = vrot.lane.b32.xlu0 %v1360_v24, %s1777_s3  ;;  %1362 = vrot.lane.b32.xlu1 %v1359_v25, %s1778_s30  ;;  %v1214_v23 = vcombine.high %v1202_v20, %v1202_v20 }
0x12d9   :  { %v1335_v61 = vrot.slane %v1327_v58, %v1835_v12 }
0x12da   :  { %v1221_v24 = vrot.slane %v1214_v23, %v1835_v12 }
0x12db   :  { %v1342_v50 = vrot.slane %v1335_v61, %v1835_v12  ;;  %v1347_v25 = vcombine.high %v1335_v61, %v1335_v61 }
0x134a   :  { %v1367_v26 = vpop.permute.xlu0 %1366  ;;  %v1363_v27 = vpop.permute.xlu1 %1362 }
0x134b   :  { %v1369_v28 = vsel %vm564_vm7, %v1363_v27, %v1367_v26  ;;  %v1354_v26 = vrot.slane %v1347_v25, %v1835_v12 }
0x134c   :  { %v1370_v35 = vpack.c.bf16 %v1369_v28, %v1369_v28 }
0x134e   :  { %1708 = vmatmul.mubr.msk.bf16.vlgmr.msra.gmra.mxu1 %vm131_vm1, %v1370_v35 }
0x140e   :  { %v1432_v37 = vpop.f32.mrf.mxu1 }
0x140f   :  { %v1433_v34 = vadd.f32 %v1432_v37, %v1394_v33 }
0x1410   :  { %v1709_v36 = vpop.f32.mrf.mxu1 }
0x1411   :  { %v1438_v38 = vmul.f32 %v1433_v34, %v1941_v57 }
0x1412   :  { %v1435_v1 = vpop.f32.mrf.mxu1 }
0x1413   :  { %1767 = vtanh.f32 %v1438_v38 }
0x1414   :  { %v1710_v39 = vpop.f32.mrf.mxu1 }
0x1420   :  { %v1768_v40 = vpop.eup %1767 }
0x1421   :  { %v1440_v41 = vmul.f32 %v1768_v40, %v1941_v57  ;;  %v791_v57 = vpack.c.bf16 %v2014_v14, %v2014_v14 }
0x1423   :  { %v2143_v42 = vadd.f32 %v1440_v41, %v1944_v60  ;;  %v534_v60 = vrot.slane %v527_v49, %v1835_v12  ;;  %v799_v52 = vrot.slane %v791_v57, %v1835_v12 }
0x1425   :  { %1444 = vrot.lane.b32.xlu1 %v2143_v42, %s1777_s3  ;;  %v806_v14 = vrot.slane %v799_v52, %v1835_v12  ;;  %v1442_v62 = vmul.f32 %v2143_v42, %v2125_v19  ;;  %v812_v16 = vcombine.high %v799_v52, %v799_v52  ;;  %v954_v19 = vrot.slane %v947_v18, %v1835_v12 }
0x1427   :  { %v819_v17 = vrot.slane %v812_v16, %v1835_v12 }
0x1497   :  { %v1445_v45 = vpop.permute.xlu1 %1444 }
0x1498   :  { %v1447_v47 = vmul.f32 %v1445_v45, %v2143_v42 }
0x149a   :  { %1449 = vrot.lane.b32.xlu0 %v1447_v47, %s1778_s30 }
0x149e   :  { %535 = vrot.lane.b32.xlu0 %v534_v60, %s1778_s30 }
0x14a2   :  { %672 = vrot.lane.b32.xlu0 %v671_v43, %s1778_s30 }
0x14a6   :  { %807 = vrot.lane.b32.xlu0 %v806_v14, %s1778_s30 }
0x14aa   :  { %942 = vrot.lane.b32.xlu0 %v941_v48, %s1778_s30 }
0x14ae   :  { %1077 = vrot.lane.b32.xlu0 %v1076_v0, %s1778_s30 }
0x14b2   :  { %1210 = vrot.lane.b32.xlu0 %v1209_v59, %s1778_s30 }
0x14b6   :  { %1343 = vrot.lane.b32.xlu0 %v1342_v50, %s1778_s30 }
0x150c   :  { %v1450_v63 = vpop.permute.xlu0 %1449 }
0x150d   :  { %v1452_v2 = vadd.f32 %v1450_v63, %v1442_v62 }
0x150f   :  { %1769 = vtanh.f32 %v1452_v2 }
0x1510   :  { %v536_v3 = vpop.permute.xlu0 %535 }
0x1511   :  { %539 = vst.msk [vmem:[%s2273_s4] sm:$0x1] %vm538_vm8, %v536_v3 }
0x1514   :  { %v673_v4 = vpop.permute.xlu0 %672 }
0x1515   :  { %1522 = vst.msk [vmem:[%s2273_s4 + $0x1] sm:$0x1] %vm538_vm8, %v673_v4 }
0x1518   :  { %v808_v5 = vpop.permute.xlu0 %807 }
0x1519   :  { %1525 = vst.msk [vmem:[%s2273_s4 + $0x2] sm:$0x1] %vm538_vm8, %v808_v5 }
0x151c   :  { %v1770_v7 = vpop.eup %1769  ;;  %v943_v10 = vpop.permute.xlu0 %942 }
0x151d   :  { %1528 = vst.msk [vmem:[%s2273_s4 + $0x3] sm:$0x1] %vm538_vm8, %v943_v10  ;;  %1455 = vrot.lane.b32.xlu1 %v1770_v7, %s1777_s3 }
0x1520   :  { %v1078_v27 = vpop.permute.xlu0 %1077 }
0x1521   :  { %548 = vrot.lane.b32.xlu1 %v547_v11, %s1777_s3 }
0x1524   :  { %v1211_v29 = vpop.permute.xlu0 %1210 }
0x1525   :  { %685 = vrot.lane.b32.xlu1 %v684_v15, %s1777_s3 }
0x1528   :  { %v1344_v34 = vpop.permute.xlu0 %1343 }
0x1529   :  { %820 = vrot.lane.b32.xlu1 %v819_v17, %s1777_s3 }
0x152d   :  { %955 = vrot.lane.b32.xlu1 %v954_v19, %s1777_s3 }
0x1531   :  { %1089 = vrot.lane.b32.xlu1 %v1088_v22, %s1777_s3 }
0x1535   :  { %1222 = vrot.lane.b32.xlu1 %v1221_v24, %s1777_s3 }
0x1539   :  { %1355 = vrot.lane.b32.xlu1 %v1354_v26, %s1777_s3 }
0x158f   :  { %v1456_v28 = vpop.permute.xlu1 %1455 }
0x1590   :  { %v1458_v35 = vmul.f32 %v1456_v28, %v2143_v42 }
0x1592   :  { %v1459_v30 = vpack.c.bf16 %v1458_v35, %v1458_v35 }
0x1593   :  { %v549_v31 = vpop.permute.xlu1 %548 }
0x1594   :  { %v1467_v32 = vrot.slane %v1459_v30, %v1835_v12  ;;  %1520 = vst.msk [vmem:[%s2273_s4 + $0x7] sm:$0x1] %vm552_vm9, %v549_v31 }
0x1596   :  { %v1479_v9 = vcombine.high %v1467_v32, %v1467_v32  ;;  %v1474_v33 = vrot.slane %v1467_v32, %v1835_v12 }
0x1597   :  { %v686_v37 = vpop.permute.xlu1 %685 }
0x1598   :  { %1523 = vst.msk [vmem:[%s2273_s4 + $0x6] sm:$0x1] %vm552_vm9, %v686_v37  ;;  %1475 = vrot.lane.b32.xlu0 %v1474_v33, %s1778_s30  ;;  %v1486_v36 = vrot.slane %v1479_v9, %v1835_v12 }
0x1599   :  { %1537 = vst.msk [vmem:[%s2273_s4 + $0x6] sm:$0x1] %vm538_vm8, %v1344_v34 }
0x159a   :  { %1487 = vrot.lane.b32.xlu1 %v1486_v36, %s1777_s3 }
0x159b   :  { %v821_v38 = vpop.permute.xlu1 %820 }
0x159c   :  { %1526 = vst.msk [vmem:[%s2273_s4 + $0x5] sm:$0x1] %vm552_vm9, %v821_v38 }
0x159d   :  { %1534 = vst.msk [vmem:[%s2273_s4 + $0x5] sm:$0x1] %vm538_vm8, %v1211_v29 }
0x159f   :  { %v956_v1 = vpop.permute.xlu1 %955 }
0x15a0   :  { %1529 = vst.msk [vmem:[%s2273_s4 + $0x4] sm:$0x1] %vm552_vm9, %v956_v1 }
0x15a1   :  { %1531 = vst.msk [vmem:[%s2273_s4 + $0x4] sm:$0x1] %vm538_vm8, %v1078_v27 }
0x15a3   :  { %v1090_v12 = vpop.permute.xlu1 %1089 }
0x15a4   :  { %1532 = vst.msk [vmem:[%s2273_s4 + $0x3] sm:$0x1] %vm552_vm9, %v1090_v12 }
0x15a7   :  { %v1223_v39 = vpop.permute.xlu1 %1222 }
0x15a8   :  { %1535 = vst.msk [vmem:[%s2273_s4 + $0x2] sm:$0x1] %vm552_vm9, %v1223_v39 }
0x15ab   :  { %v1356_v40 = vpop.permute.xlu1 %1355 }
0x15ac   :  { %1538 = vst.msk [vmem:[%s2273_s4 + $0x1] sm:$0x1] %vm552_vm9, %v1356_v40 }
0x160a   :  { %v1476_v41 = vpop.permute.xlu0 %1475 }
0x160b   :  { %1540 = vst.msk [vmem:[%s2273_s4 + $0x7] sm:$0x1] %vm538_vm8, %v1476_v41 }
0x160c   :  { %v1488_v42 = vpop.permute.xlu1 %1487 }
0x160d   :  { %1490 = vst.msk [vmem:[%s2273_s4] sm:$0x1] %vm552_vm9, %v1488_v42 }

</bundles_post_ra>
